<compile_context>
chip_gen: v6e
topology: v6e:2x2x1
jax: 0.10.0
libtpu: 0.0.40
codegen_flags: <defaults>
</compile_context>

<pallas_src>
import functools

import jax
import jax.numpy as jnp
from jax import lax
from jax.experimental import pallas as pl
from jax.experimental.pallas import tpu as pltpu

EMB_DIM = 256               # nn.Embedding(vocab_size, 256)
MAX_B_BLK = 128             # fill MXU rows; multiple of 16 keeps bf16 stores full-tile
SPIKE_DTYPE = jnp.bfloat16  # spikes are exactly {0,1} -> lossless, halves HBM writeback


def _round_up(x, m):
    return (x + m - 1) // m * m


def snn_dialogue_kernel(x_ref, w1_ref, b1_ref, w2_ref, b2_ref, scal_ref,
                        spk_ref, mem1_ref, syn2_ref, mem2_ref,
                        *, seq_len, b_blk, time_steps):
    h_pad = w1_ref.shape[1]
    v_pad = w2_ref.shape[1]

    # --- scalars decoded once (snntorch clamps learnable decays to [0, 1]) ---
    beta1 = jnp.clip(scal_ref[0], 0.0, 1.0)
    alpha2 = jnp.clip(scal_ref[1], 0.0, 1.0)
    beta2 = jnp.clip(scal_ref[2], 0.0, 1.0)
    thr1 = scal_ref[3]
    thr2 = scal_ref[4]

    # Hoisted broadcasts: JAX does not CSE broadcast_in_dim inside unrolled loops, so
    # materialize each scalar (and the b2 bias row) as a full vreg tile exactly once.
    beta1_b = jnp.broadcast_to(beta1, (b_blk, h_pad))
    thr1_b = jnp.broadcast_to(thr1, (b_blk, h_pad))
    alpha2_b = jnp.broadcast_to(alpha2, (b_blk, v_pad))
    beta2_b = jnp.broadcast_to(beta2, (b_blk, v_pad))
    thr2_b = jnp.broadcast_to(thr2, (b_blk, v_pad))
    b2_b = jnp.broadcast_to(b2_ref[...].astype(jnp.float32), (b_blk, v_pad))

    # --- fc1 hoisted out of the recurrence: one batched MXU matmul ---
    # x_ref rows are token-major within the block: row = t * b_blk + b_local.
    cur1_all = jnp.dot(x_ref[...], w1_ref[...],
                       preferred_element_type=jnp.float32
                       ) + b1_ref[...].astype(jnp.float32)          # (S*Bblk, Hp) f32

    # --- state init (lif1.init_leaky / lif2.init_synaptic -> zeros) ---
    mem1 = jnp.zeros((b_blk, h_pad), jnp.float32)
    syn2 = jnp.zeros((b_blk, v_pad), jnp.float32)
    mem2 = jnp.zeros((b_blk, v_pad), jnp.float32)
    # spk carries double as the reset terms: spk_{k-1} == H(mem_{k-1} - thr) == reset_k.
    # Zero init is exact because mem starts at 0 and thr1, thr2 > 0.
    spk1 = jnp.zeros((b_blk, h_pad), jnp.float32)
    spk2 = jnp.zeros((b_blk, v_pad), jnp.float32)

    unroll = time_steps if time_steps <= 8 else 4   # cap unroll for large T (spill guard)

    # Static token loop (seq_len small in this harness); state carries across tokens.
    for t in range(seq_len):
        cur1 = cur1_all[t * b_blk:(t + 1) * b_blk, :]   # static slice: free vreg pick

        def step(_, carry, cur1=cur1):
            m1, s2, m2, sp1, sp2 = carry
            # snn.Leaky (threshold=0.8, subtract reset); sp1 is last step's spike == reset.
            m1 = beta1_b * m1 + cur1 - sp1 * thr1_b
            sp1 = (m1 - thr1_b > 0).astype(jnp.float32)
            # fc2 on spikes — MXU matmul (Bblk, Hp) x (Hp, Vp); zero-padded K is exact.
            cur2 = jnp.dot(sp1.astype(w2_ref.dtype), w2_ref[...],
                           preferred_element_type=jnp.float32) + b2_b
            # snn.Synaptic (threshold=1.0, subtract reset); sp2 is last step's spike.
            s2 = alpha2_b * s2 + cur2
            m2 = beta2_b * m2 + s2 - sp2 * thr2_b
            sp2 = (m2 - thr2_b > 0).astype(jnp.float32)
            return m1, s2, m2, sp1, sp2

        mem1, syn2, mem2, spk1, spk2 = lax.fori_loop(
            0, time_steps, step, (mem1, syn2, mem2, spk1, spk2), unroll=unroll)

        # Full-tile, lane-dense, unmasked store (b_blk is a multiple of 16 for bf16).
        spk_ref[t * b_blk:(t + 1) * b_blk, :] = spk2.astype(spk_ref.dtype)

    mem1_ref[...] = mem1
    syn2_ref[...] = syn2
    mem2_ref[...] = mem2


def spike_dialogue_forward(x, params, *, time_steps, matmul_dtype=jnp.float32):
    """x: int32 (B, S).  Returns (spikes (B, S, V) f32, [], (mem1, (syn2, mem2)))."""
    B, S = x.shape
    H = params["w1"].shape[1]
    V = params["w2"].shape[1]
    Hp = _round_up(H, 128)
    Vp = _round_up(V, 128)
    b_blk = min(MAX_B_BLK, _round_up(B, 16))
    Bp = _round_up(B, b_blk)
    NB = Bp // b_blk

    # Glue (plain JAX): embedding gather, zero-padding to lane/sublane tiles,
    # and token-major flattening of each batch block.
    x_e = params["embed"][x].astype(jnp.float32)                      # (B, S, 256)
    x_e = jnp.pad(x_e, ((0, Bp - B), (0, 0), (0, 0)))
    x_e = jnp.transpose(x_e.reshape(NB, b_blk, S, EMB_DIM), (0, 2, 1, 3))
    x_e = x_e.reshape(NB * S * b_blk, EMB_DIM).astype(matmul_dtype)   # row = (blk, t, b)

    w1 = jnp.pad(params["w1"].astype(jnp.float32),
                 ((0, 0), (0, Hp - H))).astype(matmul_dtype)
    b1 = jnp.pad(params["b1"].astype(jnp.float32), (0, Hp - H)).reshape(1, Hp)
    w2 = jnp.pad(params["w2"].astype(jnp.float32),
                 ((0, Hp - H), (0, Vp - V))).astype(matmul_dtype)
    b2 = jnp.pad(params["b2"].astype(jnp.float32), (0, Vp - V)).reshape(1, Vp)
    scal = jnp.array([params["beta1"], params["alpha2"], params["beta2"],
                      params["thr1"], params["thr2"]], dtype=jnp.float32)

    kernel = functools.partial(snn_dialogue_kernel,
                               seq_len=S, b_blk=b_blk, time_steps=time_steps)

    spk, mem1, syn2, mem2 = pl.pallas_call(
        kernel,
        out_shape=(jax.ShapeDtypeStruct((NB * S * b_blk, Vp), SPIKE_DTYPE),  # spikes, flat
                   jax.ShapeDtypeStruct((Bp, Hp), jnp.float32),              # final mem1
                   jax.ShapeDtypeStruct((Bp, Vp), jnp.float32),              # final syn2
                   jax.ShapeDtypeStruct((Bp, Vp), jnp.float32)),             # final mem2
        grid_spec=pltpu.PrefetchScalarGridSpec(
            num_scalar_prefetch=0,
            grid=(NB,),                                                # batch blocks only
            in_specs=[
                pl.BlockSpec((S * b_blk, EMB_DIM), lambda b: (b, 0)),  # x_emb block slab
                pl.BlockSpec((EMB_DIM, Hp), lambda b: (0, 0)),         # W1 (padded)
                pl.BlockSpec((1, Hp), lambda b: (0, 0)),               # b1
                pl.BlockSpec((Hp, Vp), lambda b: (0, 0)),              # W2 (padded)
                pl.BlockSpec((1, Vp), lambda b: (0, 0)),               # b2
                pl.BlockSpec(memory_space=pltpu.MemorySpace.SMEM),     # scalars
            ],
            out_specs=[
                pl.BlockSpec((S * b_blk, Vp), lambda b: (b, 0)),       # spikes (flat)
                pl.BlockSpec((b_blk, Hp), lambda b: (b, 0)),           # mem1
                pl.BlockSpec((b_blk, Vp), lambda b: (b, 0)),           # syn2
                pl.BlockSpec((b_blk, Vp), lambda b: (b, 0)),           # mem2
            ],
        ),
        compiler_params=pltpu.CompilerParams(
            dimension_semantics=("parallel",)),   # independent batch shards (2 TCs on v7x)
    )(x_e, w1, b1, w2, b2, scal)

    # Un-flatten spikes: row = blk*S*b_blk + t*b_blk + b_local  ->  (B, S, V).
    spikes = spk.reshape(NB, S, b_blk, Vp).transpose(0, 2, 1, 3).reshape(Bp, S, Vp)
    spikes = spikes[:B, :, :V].astype(jnp.float32)
    stdp_traces = []                              # use_stdp=False / eval mode
    return spikes, stdp_traces, (mem1[:B, :H], (syn2[:B, :V], mem2[:B, :V]))


def reference_forward(x, params, *, time_steps):
    """Pure-JAX reference of the PyTorch forward (explicit-state snntorch math)."""
    B, S = x.shape
    H = params["w1"].shape[1]
    V = params["w2"].shape[1]
    hi = jax.lax.Precision.HIGHEST   # true-f32 dots so the comparison is not bf16-noisy
    beta1 = min(max(params["beta1"], 0.0), 1.0)
    alpha2 = min(max(params["alpha2"], 0.0), 1.0)
    beta2 = min(max(params["beta2"], 0.0), 1.0)
    thr1, thr2 = params["thr1"], params["thr2"]
    mem1 = jnp.zeros((B, H), jnp.float32)
    syn2 = jnp.zeros((B, V), jnp.float32)
    mem2 = jnp.zeros((B, V), jnp.float32)
    outs = []
    for t in range(S):
        xe = params["embed"][x[:, t]]
        cur1 = jnp.dot(xe, params["w1"], precision=hi) + params["b1"]
        spk2 = jnp.zeros((B, V), jnp.float32)
        for _ in range(time_steps):
            reset1 = (mem1 - thr1 > 0).astype(jnp.float32)
            mem1 = beta1 * mem1 + cur1 - reset1 * thr1
            spk1 = (mem1 - thr1 > 0).astype(jnp.float32)
            cur2 = jnp.dot(spk1, params["w2"], precision=hi) + params["b2"]
            reset2 = (mem2 - thr2 > 0).astype(jnp.float32)
            syn2 = alpha2 * syn2 + cur2
            mem2 = beta2 * mem2 + syn2 - reset2 * thr2
            spk2 = (mem2 - thr2 > 0).astype(jnp.float32)
        outs.append(spk2)
    spikes = jnp.transpose(jnp.stack(outs), (1, 0, 2))
    return spikes, (mem1, (syn2, mem2))


if __name__ == "__main__":
    # Small shapes consistent with the module's forward.
    B, S = 2, 8             # batch, seq_len
    VOCAB, HIDDEN = 64, 32  # vocab_size, hidden_size
    TIME_STEPS = 5

    key = jax.random.PRNGKey(0)
    k_emb, k_w1, k_b1, k_w2, k_b2, k_x = jax.random.split(key, 6)

    lim1 = 1.0 / (EMB_DIM ** 0.5)
    lim2 = 1.0 / (HIDDEN ** 0.5)
    params = dict(
        embed=jax.random.normal(k_emb, (VOCAB, EMB_DIM), jnp.float32),             # nn.Embedding
        w1=jax.random.uniform(k_w1, (EMB_DIM, HIDDEN), jnp.float32, -lim1, lim1),  # fc1 (in-major)
        b1=jax.random.uniform(k_b1, (HIDDEN,), jnp.float32, -lim1, lim1),
        w2=jax.random.uniform(k_w2, (HIDDEN, VOCAB), jnp.float32, -lim2, lim2),    # fc2 (in-major)
        b2=jax.random.uniform(k_b2, (VOCAB,), jnp.float32, -lim2, lim2),
        beta1=0.85, alpha2=0.9, beta2=0.8, thr1=0.8, thr2=1.0,
    )
    x = jax.random.randint(k_x, (B, S), 0, VOCAB, jnp.int32)

    # f32 matmuls: spikes must match the f32 reference exactly.
    spikes, stdp_traces, (mem1, (syn2, mem2)) = jax.block_until_ready(
        spike_dialogue_forward(x, params, time_steps=TIME_STEPS))

    ref_spikes, (r_mem1, (r_syn2, r_mem2)) = reference_forward(
        x, params, time_steps=TIME_STEPS)
    assert spikes.shape == (B, S, VOCAB)
    assert jnp.allclose(spikes, ref_spikes, atol=1e-5)
    assert jnp.allclose(mem1, r_mem1, atol=1e-4)
    assert jnp.allclose(syn2, r_syn2, atol=1e-4)
    assert jnp.allclose(mem2, r_mem2, atol=1e-4)

    # Production config: bf16 matmul operands (spk1 operand is lossless {0,1}); run once
    # to validate compile/lowering.  Borderline spikes may legitimately differ from f32,
    # so only shape is asserted here.
    spikes_bf16, _, _ = jax.block_until_ready(
        spike_dialogue_forward(x, params, time_steps=TIME_STEPS,
                               matmul_dtype=jnp.bfloat16))
    assert spikes_bf16.shape == (B, S, VOCAB)

    # TODO(synk): surrogate-gradient (fast_sigmoid/atan) backward and STDP trace
    # bookkeeping are training-only / Python-side and are not part of this forward kernel.
    print("KERNEL_OK")
</pallas_src>

<mosaic_0001>
module attributes {stable_mosaic.version = 11 : i64} {
  func.func @snn_dialogue_kernel(%arg0: i32, %arg1: memref<128x256xf32, #tpu.memory_space<vmem>>, %arg2: memref<256x128xf32, #tpu.memory_space<vmem>>, %arg3: memref<1x128xf32, #tpu.memory_space<vmem>>, %arg4: memref<128x128xf32, #tpu.memory_space<vmem>>, %arg5: memref<1x128xf32, #tpu.memory_space<vmem>>, %arg6: memref<5xf32, #tpu.memory_space<smem>>, %arg7: memref<128x128xbf16, #tpu.memory_space<vmem>>, %arg8: memref<16x128xf32, #tpu.memory_space<vmem>>, %arg9: memref<16x128xf32, #tpu.memory_space<vmem>>, %arg10: memref<16x128xf32, #tpu.memory_space<vmem>>) attributes {dimension_semantics = [#tpu.dimension_semantics<parallel>], iteration_bounds = array<i64: 1>, scalar_prefetch = 0 : i64, scratch_operands = 0 : i64, tpu.core_type = #tpu.core_type<tc>, window_params = [{transform_indices = @transform_0, window_bounds = array<i64: 128, 256>}, {pipeline_mode = #tpu.pipeline_mode<synchronous>, transform_indices = @transform_1, window_bounds = array<i64: 256, 128>}, {pipeline_mode = #tpu.pipeline_mode<synchronous>, transform_indices = @transform_2, window_bounds = array<i64: 1, 128>}, {pipeline_mode = #tpu.pipeline_mode<synchronous>, transform_indices = @transform_3, window_bounds = array<i64: 128, 128>}, {pipeline_mode = #tpu.pipeline_mode<synchronous>, transform_indices = @transform_4, window_bounds = array<i64: 1, 128>}, {transform_indices = @transform_5, window_bounds = array<i64: 5>}, {transform_indices = @transform_6, window_bounds = array<i64: 128, 128>}, {transform_indices = @transform_7, window_bounds = array<i64: 16, 128>}, {transform_indices = @transform_8, window_bounds = array<i64: 16, 128>}, {transform_indices = @transform_9, window_bounds = array<i64: 16, 128>}]} {
    %c0 = arith.constant 0 : index
    %0 = memref.load %arg6[%c0] : memref<5xf32, #tpu.memory_space<smem>>
    %cst = arith.constant 0.000000e+00 : f32
    %cst_0 = arith.constant 1.000000e+00 : f32
    %1 = arith.maximumf %cst, %0 : f32
    %2 = arith.minimumf %cst_0, %1 : f32
    %c1 = arith.constant 1 : index
    %3 = memref.load %arg6[%c1] : memref<5xf32, #tpu.memory_space<smem>>
    %cst_1 = arith.constant 0.000000e+00 : f32
    %cst_2 = arith.constant 1.000000e+00 : f32
    %4 = arith.maximumf %cst_1, %3 : f32
    %5 = arith.minimumf %cst_2, %4 : f32
    %c2 = arith.constant 2 : index
    %6 = memref.load %arg6[%c2] : memref<5xf32, #tpu.memory_space<smem>>
    %cst_3 = arith.constant 0.000000e+00 : f32
    %cst_4 = arith.constant 1.000000e+00 : f32
    %7 = arith.maximumf %cst_3, %6 : f32
    %8 = arith.minimumf %cst_4, %7 : f32
    %c3 = arith.constant 3 : index
    %9 = memref.load %arg6[%c3] : memref<5xf32, #tpu.memory_space<smem>>
    %c4 = arith.constant 4 : index
    %10 = memref.load %arg6[%c4] : memref<5xf32, #tpu.memory_space<smem>>
    %11 = vector.broadcast %2 : f32 to vector<16x128xf32>
    %12 = vector.broadcast %9 : f32 to vector<16x128xf32>
    %13 = vector.broadcast %5 : f32 to vector<16x128xf32>
    %14 = vector.broadcast %8 : f32 to vector<16x128xf32>
    %15 = vector.broadcast %10 : f32 to vector<16x128xf32>
    %c0_5 = arith.constant 0 : index
    %c0_6 = arith.constant 0 : index
    %16 = vector.load %arg5[%c0_5, %c0_6] : memref<1x128xf32, #tpu.memory_space<vmem>>, vector<1x128xf32>
    %17 = vector.shape_cast %16 : vector<1x128xf32> to vector<1x128xf32>
    %18 = vector.broadcast %17 : vector<1x128xf32> to vector<16x128xf32>
    %c0_7 = arith.constant 0 : index
    %c0_8 = arith.constant 0 : index
    %19 = vector.load %arg1[%c0_7, %c0_8] : memref<128x256xf32, #tpu.memory_space<vmem>>, vector<128x256xf32>
    %c0_9 = arith.constant 0 : index
    %c0_10 = arith.constant 0 : index
    %20 = vector.load %arg2[%c0_9, %c0_10] : memref<256x128xf32, #tpu.memory_space<vmem>>, vector<256x128xf32>
    %cst_11 = arith.constant dense<0.000000e+00> : vector<128x128xf32>
    %21 = tpu.matmul %19, %20, %cst_11 {dimension_numbers = #tpu.dot_dimension_numbers<[1], [0], [0], [1], [0, 0, 1, 1], [], []>} : vector<128x256xf32>, vector<256x128xf32>, vector<128x128xf32> -> vector<128x128xf32>
    %c0_12 = arith.constant 0 : index
    %c0_13 = arith.constant 0 : index
    %22 = vector.load %arg3[%c0_12, %c0_13] : memref<1x128xf32, #tpu.memory_space<vmem>>, vector<1x128xf32>
    %23 = vector.broadcast %22 : vector<1x128xf32> to vector<128x128xf32>
    %24 = arith.addf %21, %23 : vector<128x128xf32>
    %cst_14 = arith.constant 0.000000e+00 : f32
    %25 = vector.broadcast %cst_14 : f32 to vector<16x128xf32>
    %cst_15 = arith.constant 0.000000e+00 : f32
    %26 = vector.broadcast %cst_15 : f32 to vector<16x128xf32>
    %cst_16 = arith.constant 0.000000e+00 : f32
    %27 = vector.broadcast %cst_16 : f32 to vector<16x128xf32>
    %cst_17 = arith.constant 0.000000e+00 : f32
    %28 = vector.broadcast %cst_17 : f32 to vector<16x128xf32>
    %cst_18 = arith.constant 0.000000e+00 : f32
    %29 = vector.broadcast %cst_18 : f32 to vector<16x128xf32>
    %30 = vector.extract_strided_slice %24 {offsets = [0, 0], sizes = [16, 128], strides = [1, 1]} : vector<128x128xf32> to vector<16x128xf32>
    %c0_i32 = arith.constant 0 : i32
    %31 = arith.mulf %11, %25 : vector<16x128xf32>
    %32 = arith.addf %31, %30 : vector<16x128xf32>
    %33 = arith.mulf %28, %12 : vector<16x128xf32>
    %34 = arith.subf %32, %33 : vector<16x128xf32>
    %35 = arith.subf %34, %12 : vector<16x128xf32>
    %cst_19 = arith.constant 0.000000e+00 : f32
    %36 = vector.broadcast %cst_19 : f32 to vector<16x128xf32>
    %37 = arith.cmpf ogt, %35, %36 : vector<16x128xf32>
    %38 = arith.extui %37 : vector<16x128xi1> to vector<16x128xi32>
    %39 = arith.sitofp %38 : vector<16x128xi32> to vector<16x128xf32>
    %c0_20 = arith.constant 0 : index
    %c0_21 = arith.constant 0 : index
    %40 = vector.load %arg4[%c0_20, %c0_21] : memref<128x128xf32, #tpu.memory_space<vmem>>, vector<128x128xf32>
    %cst_22 = arith.constant dense<0.000000e+00> : vector<16x128xf32>
    %41 = tpu.matmul %39, %40, %cst_22 {dimension_numbers = #tpu.dot_dimension_numbers<[1], [0], [0], [1], [0, 0, 1, 1], [], []>} : vector<16x128xf32>, vector<128x128xf32>, vector<16x128xf32> -> vector<16x128xf32>
    %42 = arith.addf %41, %18 : vector<16x128xf32>
    %43 = arith.mulf %13, %26 : vector<16x128xf32>
    %44 = arith.addf %43, %42 : vector<16x128xf32>
    %45 = arith.mulf %14, %27 : vector<16x128xf32>
    %46 = arith.addf %45, %44 : vector<16x128xf32>
    %47 = arith.mulf %29, %15 : vector<16x128xf32>
    %48 = arith.subf %46, %47 : vector<16x128xf32>
    %49 = arith.subf %48, %15 : vector<16x128xf32>
    %cst_23 = arith.constant 0.000000e+00 : f32
    %50 = vector.broadcast %cst_23 : f32 to vector<16x128xf32>
    %51 = arith.cmpf ogt, %49, %50 : vector<16x128xf32>
    %52 = arith.extui %51 : vector<16x128xi1> to vector<16x128xi32>
    %53 = arith.sitofp %52 : vector<16x128xi32> to vector<16x128xf32>
    %c1_i32 = arith.constant 1 : i32
    %54 = arith.mulf %11, %34 : vector<16x128xf32>
    %55 = arith.addf %54, %30 : vector<16x128xf32>
    %56 = arith.mulf %39, %12 : vector<16x128xf32>
    %57 = arith.subf %55, %56 : vector<16x128xf32>
    %58 = arith.subf %57, %12 : vector<16x128xf32>
    %cst_24 = arith.constant 0.000000e+00 : f32
    %59 = vector.broadcast %cst_24 : f32 to vector<16x128xf32>
    %60 = arith.cmpf ogt, %58, %59 : vector<16x128xf32>
    %61 = arith.extui %60 : vector<16x128xi1> to vector<16x128xi32>
    %62 = arith.sitofp %61 : vector<16x128xi32> to vector<16x128xf32>
    %c0_25 = arith.constant 0 : index
    %c0_26 = arith.constant 0 : index
    %63 = vector.load %arg4[%c0_25, %c0_26] : memref<128x128xf32, #tpu.memory_space<vmem>>, vector<128x128xf32>
    %cst_27 = arith.constant dense<0.000000e+00> : vector<16x128xf32>
    %64 = tpu.matmul %62, %63, %cst_27 {dimension_numbers = #tpu.dot_dimension_numbers<[1], [0], [0], [1], [0, 0, 1, 1], [], []>} : vector<16x128xf32>, vector<128x128xf32>, vector<16x128xf32> -> vector<16x128xf32>
    %65 = arith.addf %64, %18 : vector<16x128xf32>
    %66 = arith.mulf %13, %44 : vector<16x128xf32>
    %67 = arith.addf %66, %65 : vector<16x128xf32>
    %68 = arith.mulf %14, %48 : vector<16x128xf32>
    %69 = arith.addf %68, %67 : vector<16x128xf32>
    %70 = arith.mulf %53, %15 : vector<16x128xf32>
    %71 = arith.subf %69, %70 : vector<16x128xf32>
    %72 = arith.subf %71, %15 : vector<16x128xf32>
    %cst_28 = arith.constant 0.000000e+00 : f32
    %73 = vector.broadcast %cst_28 : f32 to vector<16x128xf32>
    %74 = arith.cmpf ogt, %72, %73 : vector<16x128xf32>
    %75 = arith.extui %74 : vector<16x128xi1> to vector<16x128xi32>
    %76 = arith.sitofp %75 : vector<16x128xi32> to vector<16x128xf32>
    %c2_i32 = arith.constant 2 : i32
    %77 = arith.mulf %11, %57 : vector<16x128xf32>
    %78 = arith.addf %77, %30 : vector<16x128xf32>
    %79 = arith.mulf %62, %12 : vector<16x128xf32>
    %80 = arith.subf %78, %79 : vector<16x128xf32>
    %81 = arith.subf %80, %12 : vector<16x128xf32>
    %cst_29 = arith.constant 0.000000e+00 : f32
    %82 = vector.broadcast %cst_29 : f32 to vector<16x128xf32>
    %83 = arith.cmpf ogt, %81, %82 : vector<16x128xf32>
    %84 = arith.extui %83 : vector<16x128xi1> to vector<16x128xi32>
    %85 = arith.sitofp %84 : vector<16x128xi32> to vector<16x128xf32>
    %c0_30 = arith.constant 0 : index
    %c0_31 = arith.constant 0 : index
    %86 = vector.load %arg4[%c0_30, %c0_31] : memref<128x128xf32, #tpu.memory_space<vmem>>, vector<128x128xf32>
    %cst_32 = arith.constant dense<0.000000e+00> : vector<16x128xf32>
    %87 = tpu.matmul %85, %86, %cst_32 {dimension_numbers = #tpu.dot_dimension_numbers<[1], [0], [0], [1], [0, 0, 1, 1], [], []>} : vector<16x128xf32>, vector<128x128xf32>, vector<16x128xf32> -> vector<16x128xf32>
    %88 = arith.addf %87, %18 : vector<16x128xf32>
    %89 = arith.mulf %13, %67 : vector<16x128xf32>
    %90 = arith.addf %89, %88 : vector<16x128xf32>
    %91 = arith.mulf %14, %71 : vector<16x128xf32>
    %92 = arith.addf %91, %90 : vector<16x128xf32>
    %93 = arith.mulf %76, %15 : vector<16x128xf32>
    %94 = arith.subf %92, %93 : vector<16x128xf32>
    %95 = arith.subf %94, %15 : vector<16x128xf32>
    %cst_33 = arith.constant 0.000000e+00 : f32
    %96 = vector.broadcast %cst_33 : f32 to vector<16x128xf32>
    %97 = arith.cmpf ogt, %95, %96 : vector<16x128xf32>
    %98 = arith.extui %97 : vector<16x128xi1> to vector<16x128xi32>
    %99 = arith.sitofp %98 : vector<16x128xi32> to vector<16x128xf32>
    %c3_i32 = arith.constant 3 : i32
    %100 = arith.mulf %11, %80 : vector<16x128xf32>
    %101 = arith.addf %100, %30 : vector<16x128xf32>
    %102 = arith.mulf %85, %12 : vector<16x128xf32>
    %103 = arith.subf %101, %102 : vector<16x128xf32>
    %104 = arith.subf %103, %12 : vector<16x128xf32>
    %cst_34 = arith.constant 0.000000e+00 : f32
    %105 = vector.broadcast %cst_34 : f32 to vector<16x128xf32>
    %106 = arith.cmpf ogt, %104, %105 : vector<16x128xf32>
    %107 = arith.extui %106 : vector<16x128xi1> to vector<16x128xi32>
    %108 = arith.sitofp %107 : vector<16x128xi32> to vector<16x128xf32>
    %c0_35 = arith.constant 0 : index
    %c0_36 = arith.constant 0 : index
    %109 = vector.load %arg4[%c0_35, %c0_36] : memref<128x128xf32, #tpu.memory_space<vmem>>, vector<128x128xf32>
    %cst_37 = arith.constant dense<0.000000e+00> : vector<16x128xf32>
    %110 = tpu.matmul %108, %109, %cst_37 {dimension_numbers = #tpu.dot_dimension_numbers<[1], [0], [0], [1], [0, 0, 1, 1], [], []>} : vector<16x128xf32>, vector<128x128xf32>, vector<16x128xf32> -> vector<16x128xf32>
    %111 = arith.addf %110, %18 : vector<16x128xf32>
    %112 = arith.mulf %13, %90 : vector<16x128xf32>
    %113 = arith.addf %112, %111 : vector<16x128xf32>
    %114 = arith.mulf %14, %94 : vector<16x128xf32>
    %115 = arith.addf %114, %113 : vector<16x128xf32>
    %116 = arith.mulf %99, %15 : vector<16x128xf32>
    %117 = arith.subf %115, %116 : vector<16x128xf32>
    %118 = arith.subf %117, %15 : vector<16x128xf32>
    %cst_38 = arith.constant 0.000000e+00 : f32
    %119 = vector.broadcast %cst_38 : f32 to vector<16x128xf32>
    %120 = arith.cmpf ogt, %118, %119 : vector<16x128xf32>
    %121 = arith.extui %120 : vector<16x128xi1> to vector<16x128xi32>
    %122 = arith.sitofp %121 : vector<16x128xi32> to vector<16x128xf32>
    %c4_i32 = arith.constant 4 : i32
    %123 = arith.mulf %11, %103 : vector<16x128xf32>
    %124 = arith.addf %123, %30 : vector<16x128xf32>
    %125 = arith.mulf %108, %12 : vector<16x128xf32>
    %126 = arith.subf %124, %125 : vector<16x128xf32>
    %127 = arith.subf %126, %12 : vector<16x128xf32>
    %cst_39 = arith.constant 0.000000e+00 : f32
    %128 = vector.broadcast %cst_39 : f32 to vector<16x128xf32>
    %129 = arith.cmpf ogt, %127, %128 : vector<16x128xf32>
    %130 = arith.extui %129 : vector<16x128xi1> to vector<16x128xi32>
    %131 = arith.sitofp %130 : vector<16x128xi32> to vector<16x128xf32>
    %c0_40 = arith.constant 0 : index
    %c0_41 = arith.constant 0 : index
    %132 = vector.load %arg4[%c0_40, %c0_41] : memref<128x128xf32, #tpu.memory_space<vmem>>, vector<128x128xf32>
    %cst_42 = arith.constant dense<0.000000e+00> : vector<16x128xf32>
    %133 = tpu.matmul %131, %132, %cst_42 {dimension_numbers = #tpu.dot_dimension_numbers<[1], [0], [0], [1], [0, 0, 1, 1], [], []>} : vector<16x128xf32>, vector<128x128xf32>, vector<16x128xf32> -> vector<16x128xf32>
    %134 = arith.addf %133, %18 : vector<16x128xf32>
    %135 = arith.mulf %13, %113 : vector<16x128xf32>
    %136 = arith.addf %135, %134 : vector<16x128xf32>
    %137 = arith.mulf %14, %117 : vector<16x128xf32>
    %138 = arith.addf %137, %136 : vector<16x128xf32>
    %139 = arith.mulf %122, %15 : vector<16x128xf32>
    %140 = arith.subf %138, %139 : vector<16x128xf32>
    %141 = arith.subf %140, %15 : vector<16x128xf32>
    %cst_43 = arith.constant 0.000000e+00 : f32
    %142 = vector.broadcast %cst_43 : f32 to vector<16x128xf32>
    %143 = arith.cmpf ogt, %141, %142 : vector<16x128xf32>
    %144 = arith.extui %143 : vector<16x128xi1> to vector<16x128xi32>
    %145 = arith.sitofp %144 : vector<16x128xi32> to vector<16x128xf32>
    %146 = arith.truncf %145 : vector<16x128xf32> to vector<16x128xbf16>
    %c0_44 = arith.constant 0 : index
    %c0_45 = arith.constant 0 : index
    %147 = vector.load %arg7[%c0_44, %c0_45] : memref<128x128xbf16, #tpu.memory_space<vmem>>, vector<16x128xbf16>
    tpu.vector_store %arg7[%c0_44, %c0_45], %146 {strides = array<i32>} : memref<128x128xbf16, #tpu.memory_space<vmem>>, vector<16x128xbf16>,
    %148 = vector.extract_strided_slice %24 {offsets = [16, 0], sizes = [16, 128], strides = [1, 1]} : vector<128x128xf32> to vector<16x128xf32>
    %c0_i32_46 = arith.constant 0 : i32
    %149 = arith.mulf %11, %126 : vector<16x128xf32>
    %150 = arith.addf %149, %148 : vector<16x128xf32>
    %151 = arith.mulf %131, %12 : vector<16x128xf32>
    %152 = arith.subf %150, %151 : vector<16x128xf32>
    %153 = arith.subf %152, %12 : vector<16x128xf32>
    %cst_47 = arith.constant 0.000000e+00 : f32
    %154 = vector.broadcast %cst_47 : f32 to vector<16x128xf32>
    %155 = arith.cmpf ogt, %153, %154 : vector<16x128xf32>
    %156 = arith.extui %155 : vector<16x128xi1> to vector<16x128xi32>
    %157 = arith.sitofp %156 : vector<16x128xi32> to vector<16x128xf32>
    %c0_48 = arith.constant 0 : index
    %c0_49 = arith.constant 0 : index
    %158 = vector.load %arg4[%c0_48, %c0_49] : memref<128x128xf32, #tpu.memory_space<vmem>>, vector<128x128xf32>
    %cst_50 = arith.constant dense<0.000000e+00> : vector<16x128xf32>
    %159 = tpu.matmul %157, %158, %cst_50 {dimension_numbers = #tpu.dot_dimension_numbers<[1], [0], [0], [1], [0, 0, 1, 1], [], []>} : vector<16x128xf32>, vector<128x128xf32>, vector<16x128xf32> -> vector<16x128xf32>
    %160 = arith.addf %159, %18 : vector<16x128xf32>
    %161 = arith.mulf %13, %136 : vector<16x128xf32>
    %162 = arith.addf %161, %160 : vector<16x128xf32>
    %163 = arith.mulf %14, %140 : vector<16x128xf32>
    %164 = arith.addf %163, %162 : vector<16x128xf32>
    %165 = arith.mulf %145, %15 : vector<16x128xf32>
    %166 = arith.subf %164, %165 : vector<16x128xf32>
    %167 = arith.subf %166, %15 : vector<16x128xf32>
    %cst_51 = arith.constant 0.000000e+00 : f32
    %168 = vector.broadcast %cst_51 : f32 to vector<16x128xf32>
    %169 = arith.cmpf ogt, %167, %168 : vector<16x128xf32>
    %170 = arith.extui %169 : vector<16x128xi1> to vector<16x128xi32>
    %171 = arith.sitofp %170 : vector<16x128xi32> to vector<16x128xf32>
    %c1_i32_52 = arith.constant 1 : i32
    %172 = arith.mulf %11, %152 : vector<16x128xf32>
    %173 = arith.addf %172, %148 : vector<16x128xf32>
    %174 = arith.mulf %157, %12 : vector<16x128xf32>
    %175 = arith.subf %173, %174 : vector<16x128xf32>
    %176 = arith.subf %175, %12 : vector<16x128xf32>
    %cst_53 = arith.constant 0.000000e+00 : f32
    %177 = vector.broadcast %cst_53 : f32 to vector<16x128xf32>
    %178 = arith.cmpf ogt, %176, %177 : vector<16x128xf32>
    %179 = arith.extui %178 : vector<16x128xi1> to vector<16x128xi32>
    %180 = arith.sitofp %179 : vector<16x128xi32> to vector<16x128xf32>
    %c0_54 = arith.constant 0 : index
    %c0_55 = arith.constant 0 : index
    %181 = vector.load %arg4[%c0_54, %c0_55] : memref<128x128xf32, #tpu.memory_space<vmem>>, vector<128x128xf32>
    %cst_56 = arith.constant dense<0.000000e+00> : vector<16x128xf32>
    %182 = tpu.matmul %180, %181, %cst_56 {dimension_numbers = #tpu.dot_dimension_numbers<[1], [0], [0], [1], [0, 0, 1, 1], [], []>} : vector<16x128xf32>, vector<128x128xf32>, vector<16x128xf32> -> vector<16x128xf32>
    %183 = arith.addf %182, %18 : vector<16x128xf32>
    %184 = arith.mulf %13, %162 : vector<16x128xf32>
    %185 = arith.addf %184, %183 : vector<16x128xf32>
    %186 = arith.mulf %14, %166 : vector<16x128xf32>
    %187 = arith.addf %186, %185 : vector<16x128xf32>
    %188 = arith.mulf %171, %15 : vector<16x128xf32>
    %189 = arith.subf %187, %188 : vector<16x128xf32>
    %190 = arith.subf %189, %15 : vector<16x128xf32>
    %cst_57 = arith.constant 0.000000e+00 : f32
    %191 = vector.broadcast %cst_57 : f32 to vector<16x128xf32>
    %192 = arith.cmpf ogt, %190, %191 : vector<16x128xf32>
    %193 = arith.extui %192 : vector<16x128xi1> to vector<16x128xi32>
    %194 = arith.sitofp %193 : vector<16x128xi32> to vector<16x128xf32>
    %c2_i32_58 = arith.constant 2 : i32
    %195 = arith.mulf %11, %175 : vector<16x128xf32>
    %196 = arith.addf %195, %148 : vector<16x128xf32>
    %197 = arith.mulf %180, %12 : vector<16x128xf32>
    %198 = arith.subf %196, %197 : vector<16x128xf32>
    %199 = arith.subf %198, %12 : vector<16x128xf32>
    %cst_59 = arith.constant 0.000000e+00 : f32
    %200 = vector.broadcast %cst_59 : f32 to vector<16x128xf32>
    %201 = arith.cmpf ogt, %199, %200 : vector<16x128xf32>
    %202 = arith.extui %201 : vector<16x128xi1> to vector<16x128xi32>
    %203 = arith.sitofp %202 : vector<16x128xi32> to vector<16x128xf32>
    %c0_60 = arith.constant 0 : index
    %c0_61 = arith.constant 0 : index
    %204 = vector.load %arg4[%c0_60, %c0_61] : memref<128x128xf32, #tpu.memory_space<vmem>>, vector<128x128xf32>
    %cst_62 = arith.constant dense<0.000000e+00> : vector<16x128xf32>
    %205 = tpu.matmul %203, %204, %cst_62 {dimension_numbers = #tpu.dot_dimension_numbers<[1], [0], [0], [1], [0, 0, 1, 1], [], []>} : vector<16x128xf32>, vector<128x128xf32>, vector<16x128xf32> -> vector<16x128xf32>
    %206 = arith.addf %205, %18 : vector<16x128xf32>
    %207 = arith.mulf %13, %185 : vector<16x128xf32>
    %208 = arith.addf %207, %206 : vector<16x128xf32>
    %209 = arith.mulf %14, %189 : vector<16x128xf32>
    %210 = arith.addf %209, %208 : vector<16x128xf32>
    %211 = arith.mulf %194, %15 : vector<16x128xf32>
    %212 = arith.subf %210, %211 : vector<16x128xf32>
    %213 = arith.subf %212, %15 : vector<16x128xf32>
    %cst_63 = arith.constant 0.000000e+00 : f32
    %214 = vector.broadcast %cst_63 : f32 to vector<16x128xf32>
    %215 = arith.cmpf ogt, %213, %214 : vector<16x128xf32>
    %216 = arith.extui %215 : vector<16x128xi1> to vector<16x128xi32>
    %217 = arith.sitofp %216 : vector<16x128xi32> to vector<16x128xf32>
    %c3_i32_64 = arith.constant 3 : i32
    %218 = arith.mulf %11, %198 : vector<16x128xf32>
    %219 = arith.addf %218, %148 : vector<16x128xf32>
    %220 = arith.mulf %203, %12 : vector<16x128xf32>
    %221 = arith.subf %219, %220 : vector<16x128xf32>
    %222 = arith.subf %221, %12 : vector<16x128xf32>
    %cst_65 = arith.constant 0.000000e+00 : f32
    %223 = vector.broadcast %cst_65 : f32 to vector<16x128xf32>
    %224 = arith.cmpf ogt, %222, %223 : vector<16x128xf32>
    %225 = arith.extui %224 : vector<16x128xi1> to vector<16x128xi32>
    %226 = arith.sitofp %225 : vector<16x128xi32> to vector<16x128xf32>
    %c0_66 = arith.constant 0 : index
    %c0_67 = arith.constant 0 : index
    %227 = vector.load %arg4[%c0_66, %c0_67] : memref<128x128xf32, #tpu.memory_space<vmem>>, vector<128x128xf32>
    %cst_68 = arith.constant dense<0.000000e+00> : vector<16x128xf32>
    %228 = tpu.matmul %226, %227, %cst_68 {dimension_numbers = #tpu.dot_dimension_numbers<[1], [0], [0], [1], [0, 0, 1, 1], [], []>} : vector<16x128xf32>, vector<128x128xf32>, vector<16x128xf32> -> vector<16x128xf32>
    %229 = arith.addf %228, %18 : vector<16x128xf32>
    %230 = arith.mulf %13, %208 : vector<16x128xf32>
    %231 = arith.addf %230, %229 : vector<16x128xf32>
    %232 = arith.mulf %14, %212 : vector<16x128xf32>
    %233 = arith.addf %232, %231 : vector<16x128xf32>
    %234 = arith.mulf %217, %15 : vector<16x128xf32>
    %235 = arith.subf %233, %234 : vector<16x128xf32>
    %236 = arith.subf %235, %15 : vector<16x128xf32>
    %cst_69 = arith.constant 0.000000e+00 : f32
    %237 = vector.broadcast %cst_69 : f32 to vector<16x128xf32>
    %238 = arith.cmpf ogt, %236, %237 : vector<16x128xf32>
    %239 = arith.extui %238 : vector<16x128xi1> to vector<16x128xi32>
    %240 = arith.sitofp %239 : vector<16x128xi32> to vector<16x128xf32>
    %c4_i32_70 = arith.constant 4 : i32
    %241 = arith.mulf %11, %221 : vector<16x128xf32>
    %242 = arith.addf %241, %148 : vector<16x128xf32>
    %243 = arith.mulf %226, %12 : vector<16x128xf32>
    %244 = arith.subf %242, %243 : vector<16x128xf32>
    %245 = arith.subf %244, %12 : vector<16x128xf32>
    %cst_71 = arith.constant 0.000000e+00 : f32
    %246 = vector.broadcast %cst_71 : f32 to vector<16x128xf32>
    %247 = arith.cmpf ogt, %245, %246 : vector<16x128xf32>
    %248 = arith.extui %247 : vector<16x128xi1> to vector<16x128xi32>
    %249 = arith.sitofp %248 : vector<16x128xi32> to vector<16x128xf32>
    %c0_72 = arith.constant 0 : index
    %c0_73 = arith.constant 0 : index
    %250 = vector.load %arg4[%c0_72, %c0_73] : memref<128x128xf32, #tpu.memory_space<vmem>>, vector<128x128xf32>
    %cst_74 = arith.constant dense<0.000000e+00> : vector<16x128xf32>
    %251 = tpu.matmul %249, %250, %cst_74 {dimension_numbers = #tpu.dot_dimension_numbers<[1], [0], [0], [1], [0, 0, 1, 1], [], []>} : vector<16x128xf32>, vector<128x128xf32>, vector<16x128xf32> -> vector<16x128xf32>
    %252 = arith.addf %251, %18 : vector<16x128xf32>
    %253 = arith.mulf %13, %231 : vector<16x128xf32>
    %254 = arith.addf %253, %252 : vector<16x128xf32>
    %255 = arith.mulf %14, %235 : vector<16x128xf32>
    %256 = arith.addf %255, %254 : vector<16x128xf32>
    %257 = arith.mulf %240, %15 : vector<16x128xf32>
    %258 = arith.subf %256, %257 : vector<16x128xf32>
    %259 = arith.subf %258, %15 : vector<16x128xf32>
    %cst_75 = arith.constant 0.000000e+00 : f32
    %260 = vector.broadcast %cst_75 : f32 to vector<16x128xf32>
    %261 = arith.cmpf ogt, %259, %260 : vector<16x128xf32>
    %262 = arith.extui %261 : vector<16x128xi1> to vector<16x128xi32>
    %263 = arith.sitofp %262 : vector<16x128xi32> to vector<16x128xf32>
    %264 = arith.truncf %263 : vector<16x128xf32> to vector<16x128xbf16>
    %c16 = arith.constant 16 : index
    %c0_76 = arith.constant 0 : index
    %265 = vector.load %arg7[%c16, %c0_76] : memref<128x128xbf16, #tpu.memory_space<vmem>>, vector<16x128xbf16>
    tpu.vector_store %arg7[%c16, %c0_76], %264 {strides = array<i32>} : memref<128x128xbf16, #tpu.memory_space<vmem>>, vector<16x128xbf16>,
    %266 = vector.extract_strided_slice %24 {offsets = [32, 0], sizes = [16, 128], strides = [1, 1]} : vector<128x128xf32> to vector<16x128xf32>
    %c0_i32_77 = arith.constant 0 : i32
    %267 = arith.mulf %11, %244 : vector<16x128xf32>
    %268 = arith.addf %267, %266 : vector<16x128xf32>
    %269 = arith.mulf %249, %12 : vector<16x128xf32>
    %270 = arith.subf %268, %269 : vector<16x128xf32>
    %271 = arith.subf %270, %12 : vector<16x128xf32>
    %cst_78 = arith.constant 0.000000e+00 : f32
    %272 = vector.broadcast %cst_78 : f32 to vector<16x128xf32>
    %273 = arith.cmpf ogt, %271, %272 : vector<16x128xf32>
    %274 = arith.extui %273 : vector<16x128xi1> to vector<16x128xi32>
    %275 = arith.sitofp %274 : vector<16x128xi32> to vector<16x128xf32>
    %c0_79 = arith.constant 0 : index
    %c0_80 = arith.constant 0 : index
    %276 = vector.load %arg4[%c0_79, %c0_80] : memref<128x128xf32, #tpu.memory_space<vmem>>, vector<128x128xf32>
    %cst_81 = arith.constant dense<0.000000e+00> : vector<16x128xf32>
    %277 = tpu.matmul %275, %276, %cst_81 {dimension_numbers = #tpu.dot_dimension_numbers<[1], [0], [0], [1], [0, 0, 1, 1], [], []>} : vector<16x128xf32>, vector<128x128xf32>, vector<16x128xf32> -> vector<16x128xf32>
    %278 = arith.addf %277, %18 : vector<16x128xf32>
    %279 = arith.mulf %13, %254 : vector<16x128xf32>
    %280 = arith.addf %279, %278 : vector<16x128xf32>
    %281 = arith.mulf %14, %258 : vector<16x128xf32>
    %282 = arith.addf %281, %280 : vector<16x128xf32>
    %283 = arith.mulf %263, %15 : vector<16x128xf32>
    %284 = arith.subf %282, %283 : vector<16x128xf32>
    %285 = arith.subf %284, %15 : vector<16x128xf32>
    %cst_82 = arith.constant 0.000000e+00 : f32
    %286 = vector.broadcast %cst_82 : f32 to vector<16x128xf32>
    %287 = arith.cmpf ogt, %285, %286 : vector<16x128xf32>
    %288 = arith.extui %287 : vector<16x128xi1> to vector<16x128xi32>
    %289 = arith.sitofp %288 : vector<16x128xi32> to vector<16x128xf32>
    %c1_i32_83 = arith.constant 1 : i32
    %290 = arith.mulf %11, %270 : vector<16x128xf32>
    %291 = arith.addf %290, %266 : vector<16x128xf32>
    %292 = arith.mulf %275, %12 : vector<16x128xf32>
    %293 = arith.subf %291, %292 : vector<16x128xf32>
    %294 = arith.subf %293, %12 : vector<16x128xf32>
    %cst_84 = arith.constant 0.000000e+00 : f32
    %295 = vector.broadcast %cst_84 : f32 to vector<16x128xf32>
    %296 = arith.cmpf ogt, %294, %295 : vector<16x128xf32>
    %297 = arith.extui %296 : vector<16x128xi1> to vector<16x128xi32>
    %298 = arith.sitofp %297 : vector<16x128xi32> to vector<16x128xf32>
    %c0_85 = arith.constant 0 : index
    %c0_86 = arith.constant 0 : index
    %299 = vector.load %arg4[%c0_85, %c0_86] : memref<128x128xf32, #tpu.memory_space<vmem>>, vector<128x128xf32>
    %cst_87 = arith.constant dense<0.000000e+00> : vector<16x128xf32>
    %300 = tpu.matmul %298, %299, %cst_87 {dimension_numbers = #tpu.dot_dimension_numbers<[1], [0], [0], [1], [0, 0, 1, 1], [], []>} : vector<16x128xf32>, vector<128x128xf32>, vector<16x128xf32> -> vector<16x128xf32>
    %301 = arith.addf %300, %18 : vector<16x128xf32>
    %302 = arith.mulf %13, %280 : vector<16x128xf32>
    %303 = arith.addf %302, %301 : vector<16x128xf32>
    %304 = arith.mulf %14, %284 : vector<16x128xf32>
    %305 = arith.addf %304, %303 : vector<16x128xf32>
    %306 = arith.mulf %289, %15 : vector<16x128xf32>
    %307 = arith.subf %305, %306 : vector<16x128xf32>
    %308 = arith.subf %307, %15 : vector<16x128xf32>
    %cst_88 = arith.constant 0.000000e+00 : f32
    %309 = vector.broadcast %cst_88 : f32 to vector<16x128xf32>
    %310 = arith.cmpf ogt, %308, %309 : vector<16x128xf32>
    %311 = arith.extui %310 : vector<16x128xi1> to vector<16x128xi32>
    %312 = arith.sitofp %311 : vector<16x128xi32> to vector<16x128xf32>
    %c2_i32_89 = arith.constant 2 : i32
    %313 = arith.mulf %11, %293 : vector<16x128xf32>
    %314 = arith.addf %313, %266 : vector<16x128xf32>
    %315 = arith.mulf %298, %12 : vector<16x128xf32>
    %316 = arith.subf %314, %315 : vector<16x128xf32>
    %317 = arith.subf %316, %12 : vector<16x128xf32>
    %cst_90 = arith.constant 0.000000e+00 : f32
    %318 = vector.broadcast %cst_90 : f32 to vector<16x128xf32>
    %319 = arith.cmpf ogt, %317, %318 : vector<16x128xf32>
    %320 = arith.extui %319 : vector<16x128xi1> to vector<16x128xi32>
    %321 = arith.sitofp %320 : vector<16x128xi32> to vector<16x128xf32>
    %c0_91 = arith.constant 0 : index
    %c0_92 = arith.constant 0 : index
    %322 = vector.load %arg4[%c0_91, %c0_92] : memref<128x128xf32, #tpu.memory_space<vmem>>, vector<128x128xf32>
    %cst_93 = arith.constant dense<0.000000e+00> : vector<16x128xf32>
    %323 = tpu.matmul %321, %322, %cst_93 {dimension_numbers = #tpu.dot_dimension_numbers<[1], [0], [0], [1], [0, 0, 1, 1], [], []>} : vector<16x128xf32>, vector<128x128xf32>, vector<16x128xf32> -> vector<16x128xf32>
    %324 = arith.addf %323, %18 : vector<16x128xf32>
    %325 = arith.mulf %13, %303 : vector<16x128xf32>
    %326 = arith.addf %325, %324 : vector<16x128xf32>
    %327 = arith.mulf %14, %307 : vector<16x128xf32>
    %328 = arith.addf %327, %326 : vector<16x128xf32>
    %329 = arith.mulf %312, %15 : vector<16x128xf32>
    %330 = arith.subf %328, %329 : vector<16x128xf32>
    %331 = arith.subf %330, %15 : vector<16x128xf32>
    %cst_94 = arith.constant 0.000000e+00 : f32
    %332 = vector.broadcast %cst_94 : f32 to vector<16x128xf32>
    %333 = arith.cmpf ogt, %331, %332 : vector<16x128xf32>
    %334 = arith.extui %333 : vector<16x128xi1> to vector<16x128xi32>
    %335 = arith.sitofp %334 : vector<16x128xi32> to vector<16x128xf32>
    %c3_i32_95 = arith.constant 3 : i32
    %336 = arith.mulf %11, %316 : vector<16x128xf32>
    %337 = arith.addf %336, %266 : vector<16x128xf32>
    %338 = arith.mulf %321, %12 : vector<16x128xf32>
    %339 = arith.subf %337, %338 : vector<16x128xf32>
    %340 = arith.subf %339, %12 : vector<16x128xf32>
    %cst_96 = arith.constant 0.000000e+00 : f32
    %341 = vector.broadcast %cst_96 : f32 to vector<16x128xf32>
    %342 = arith.cmpf ogt, %340, %341 : vector<16x128xf32>
    %343 = arith.extui %342 : vector<16x128xi1> to vector<16x128xi32>
    %344 = arith.sitofp %343 : vector<16x128xi32> to vector<16x128xf32>
    %c0_97 = arith.constant 0 : index
    %c0_98 = arith.constant 0 : index
    %345 = vector.load %arg4[%c0_97, %c0_98] : memref<128x128xf32, #tpu.memory_space<vmem>>, vector<128x128xf32>
    %cst_99 = arith.constant dense<0.000000e+00> : vector<16x128xf32>
    %346 = tpu.matmul %344, %345, %cst_99 {dimension_numbers = #tpu.dot_dimension_numbers<[1], [0], [0], [1], [0, 0, 1, 1], [], []>} : vector<16x128xf32>, vector<128x128xf32>, vector<16x128xf32> -> vector<16x128xf32>
    %347 = arith.addf %346, %18 : vector<16x128xf32>
    %348 = arith.mulf %13, %326 : vector<16x128xf32>
    %349 = arith.addf %348, %347 : vector<16x128xf32>
    %350 = arith.mulf %14, %330 : vector<16x128xf32>
    %351 = arith.addf %350, %349 : vector<16x128xf32>
    %352 = arith.mulf %335, %15 : vector<16x128xf32>
    %353 = arith.subf %351, %352 : vector<16x128xf32>
    %354 = arith.subf %353, %15 : vector<16x128xf32>
    %cst_100 = arith.constant 0.000000e+00 : f32
    %355 = vector.broadcast %cst_100 : f32 to vector<16x128xf32>
    %356 = arith.cmpf ogt, %354, %355 : vector<16x128xf32>
    %357 = arith.extui %356 : vector<16x128xi1> to vector<16x128xi32>
    %358 = arith.sitofp %357 : vector<16x128xi32> to vector<16x128xf32>
    %c4_i32_101 = arith.constant 4 : i32
    %359 = arith.mulf %11, %339 : vector<16x128xf32>
    %360 = arith.addf %359, %266 : vector<16x128xf32>
    %361 = arith.mulf %344, %12 : vector<16x128xf32>
    %362 = arith.subf %360, %361 : vector<16x128xf32>
    %363 = arith.subf %362, %12 : vector<16x128xf32>
    %cst_102 = arith.constant 0.000000e+00 : f32
    %364 = vector.broadcast %cst_102 : f32 to vector<16x128xf32>
    %365 = arith.cmpf ogt, %363, %364 : vector<16x128xf32>
    %366 = arith.extui %365 : vector<16x128xi1> to vector<16x128xi32>
    %367 = arith.sitofp %366 : vector<16x128xi32> to vector<16x128xf32>
    %c0_103 = arith.constant 0 : index
    %c0_104 = arith.constant 0 : index
    %368 = vector.load %arg4[%c0_103, %c0_104] : memref<128x128xf32, #tpu.memory_space<vmem>>, vector<128x128xf32>
    %cst_105 = arith.constant dense<0.000000e+00> : vector<16x128xf32>
    %369 = tpu.matmul %367, %368, %cst_105 {dimension_numbers = #tpu.dot_dimension_numbers<[1], [0], [0], [1], [0, 0, 1, 1], [], []>} : vector<16x128xf32>, vector<128x128xf32>, vector<16x128xf32> -> vector<16x128xf32>
    %370 = arith.addf %369, %18 : vector<16x128xf32>
    %371 = arith.mulf %13, %349 : vector<16x128xf32>
    %372 = arith.addf %371, %370 : vector<16x128xf32>
    %373 = arith.mulf %14, %353 : vector<16x128xf32>
    %374 = arith.addf %373, %372 : vector<16x128xf32>
    %375 = arith.mulf %358, %15 : vector<16x128xf32>
    %376 = arith.subf %374, %375 : vector<16x128xf32>
    %377 = arith.subf %376, %15 : vector<16x128xf32>
    %cst_106 = arith.constant 0.000000e+00 : f32
    %378 = vector.broadcast %cst_106 : f32 to vector<16x128xf32>
    %379 = arith.cmpf ogt, %377, %378 : vector<16x128xf32>
    %380 = arith.extui %379 : vector<16x128xi1> to vector<16x128xi32>
    %381 = arith.sitofp %380 : vector<16x128xi32> to vector<16x128xf32>
    %382 = arith.truncf %381 : vector<16x128xf32> to vector<16x128xbf16>
    %c32 = arith.constant 32 : index
    %c0_107 = arith.constant 0 : index
    %383 = vector.load %arg7[%c32, %c0_107] : memref<128x128xbf16, #tpu.memory_space<vmem>>, vector<16x128xbf16>
    tpu.vector_store %arg7[%c32, %c0_107], %382 {strides = array<i32>} : memref<128x128xbf16, #tpu.memory_space<vmem>>, vector<16x128xbf16>,
    %384 = vector.extract_strided_slice %24 {offsets = [48, 0], sizes = [16, 128], strides = [1, 1]} : vector<128x128xf32> to vector<16x128xf32>
    %c0_i32_108 = arith.constant 0 : i32
    %385 = arith.mulf %11, %362 : vector<16x128xf32>
    %386 = arith.addf %385, %384 : vector<16x128xf32>
    %387 = arith.mulf %367, %12 : vector<16x128xf32>
    %388 = arith.subf %386, %387 : vector<16x128xf32>
    %389 = arith.subf %388, %12 : vector<16x128xf32>
    %cst_109 = arith.constant 0.000000e+00 : f32
    %390 = vector.broadcast %cst_109 : f32 to vector<16x128xf32>
    %391 = arith.cmpf ogt, %389, %390 : vector<16x128xf32>
    %392 = arith.extui %391 : vector<16x128xi1> to vector<16x128xi32>
    %393 = arith.sitofp %392 : vector<16x128xi32> to vector<16x128xf32>
    %c0_110 = arith.constant 0 : index
    %c0_111 = arith.constant 0 : index
    %394 = vector.load %arg4[%c0_110, %c0_111] : memref<128x128xf32, #tpu.memory_space<vmem>>, vector<128x128xf32>
    %cst_112 = arith.constant dense<0.000000e+00> : vector<16x128xf32>
    %395 = tpu.matmul %393, %394, %cst_112 {dimension_numbers = #tpu.dot_dimension_numbers<[1], [0], [0], [1], [0, 0, 1, 1], [], []>} : vector<16x128xf32>, vector<128x128xf32>, vector<16x128xf32> -> vector<16x128xf32>
    %396 = arith.addf %395, %18 : vector<16x128xf32>
    %397 = arith.mulf %13, %372 : vector<16x128xf32>
    %398 = arith.addf %397, %396 : vector<16x128xf32>
    %399 = arith.mulf %14, %376 : vector<16x128xf32>
    %400 = arith.addf %399, %398 : vector<16x128xf32>
    %401 = arith.mulf %381, %15 : vector<16x128xf32>
    %402 = arith.subf %400, %401 : vector<16x128xf32>
    %403 = arith.subf %402, %15 : vector<16x128xf32>
    %cst_113 = arith.constant 0.000000e+00 : f32
    %404 = vector.broadcast %cst_113 : f32 to vector<16x128xf32>
    %405 = arith.cmpf ogt, %403, %404 : vector<16x128xf32>
    %406 = arith.extui %405 : vector<16x128xi1> to vector<16x128xi32>
    %407 = arith.sitofp %406 : vector<16x128xi32> to vector<16x128xf32>
    %c1_i32_114 = arith.constant 1 : i32
    %408 = arith.mulf %11, %388 : vector<16x128xf32>
    %409 = arith.addf %408, %384 : vector<16x128xf32>
    %410 = arith.mulf %393, %12 : vector<16x128xf32>
    %411 = arith.subf %409, %410 : vector<16x128xf32>
    %412 = arith.subf %411, %12 : vector<16x128xf32>
    %cst_115 = arith.constant 0.000000e+00 : f32
    %413 = vector.broadcast %cst_115 : f32 to vector<16x128xf32>
    %414 = arith.cmpf ogt, %412, %413 : vector<16x128xf32>
    %415 = arith.extui %414 : vector<16x128xi1> to vector<16x128xi32>
    %416 = arith.sitofp %415 : vector<16x128xi32> to vector<16x128xf32>
    %c0_116 = arith.constant 0 : index
    %c0_117 = arith.constant 0 : index
    %417 = vector.load %arg4[%c0_116, %c0_117] : memref<128x128xf32, #tpu.memory_space<vmem>>, vector<128x128xf32>
    %cst_118 = arith.constant dense<0.000000e+00> : vector<16x128xf32>
    %418 = tpu.matmul %416, %417, %cst_118 {dimension_numbers = #tpu.dot_dimension_numbers<[1], [0], [0], [1], [0, 0, 1, 1], [], []>} : vector<16x128xf32>, vector<128x128xf32>, vector<16x128xf32> -> vector<16x128xf32>
    %419 = arith.addf %418, %18 : vector<16x128xf32>
    %420 = arith.mulf %13, %398 : vector<16x128xf32>
    %421 = arith.addf %420, %419 : vector<16x128xf32>
    %422 = arith.mulf %14, %402 : vector<16x128xf32>
    %423 = arith.addf %422, %421 : vector<16x128xf32>
    %424 = arith.mulf %407, %15 : vector<16x128xf32>
    %425 = arith.subf %423, %424 : vector<16x128xf32>
    %426 = arith.subf %425, %15 : vector<16x128xf32>
    %cst_119 = arith.constant 0.000000e+00 : f32
    %427 = vector.broadcast %cst_119 : f32 to vector<16x128xf32>
    %428 = arith.cmpf ogt, %426, %427 : vector<16x128xf32>
    %429 = arith.extui %428 : vector<16x128xi1> to vector<16x128xi32>
    %430 = arith.sitofp %429 : vector<16x128xi32> to vector<16x128xf32>
    %c2_i32_120 = arith.constant 2 : i32
    %431 = arith.mulf %11, %411 : vector<16x128xf32>
    %432 = arith.addf %431, %384 : vector<16x128xf32>
    %433 = arith.mulf %416, %12 : vector<16x128xf32>
    %434 = arith.subf %432, %433 : vector<16x128xf32>
    %435 = arith.subf %434, %12 : vector<16x128xf32>
    %cst_121 = arith.constant 0.000000e+00 : f32
    %436 = vector.broadcast %cst_121 : f32 to vector<16x128xf32>
    %437 = arith.cmpf ogt, %435, %436 : vector<16x128xf32>
    %438 = arith.extui %437 : vector<16x128xi1> to vector<16x128xi32>
    %439 = arith.sitofp %438 : vector<16x128xi32> to vector<16x128xf32>
    %c0_122 = arith.constant 0 : index
    %c0_123 = arith.constant 0 : index
    %440 = vector.load %arg4[%c0_122, %c0_123] : memref<128x128xf32, #tpu.memory_space<vmem>>, vector<128x128xf32>
    %cst_124 = arith.constant dense<0.000000e+00> : vector<16x128xf32>
    %441 = tpu.matmul %439, %440, %cst_124 {dimension_numbers = #tpu.dot_dimension_numbers<[1], [0], [0], [1], [0, 0, 1, 1], [], []>} : vector<16x128xf32>, vector<128x128xf32>, vector<16x128xf32> -> vector<16x128xf32>
    %442 = arith.addf %441, %18 : vector<16x128xf32>
    %443 = arith.mulf %13, %421 : vector<16x128xf32>
    %444 = arith.addf %443, %442 : vector<16x128xf32>
    %445 = arith.mulf %14, %425 : vector<16x128xf32>
    %446 = arith.addf %445, %444 : vector<16x128xf32>
    %447 = arith.mulf %430, %15 : vector<16x128xf32>
    %448 = arith.subf %446, %447 : vector<16x128xf32>
    %449 = arith.subf %448, %15 : vector<16x128xf32>
    %cst_125 = arith.constant 0.000000e+00 : f32
    %450 = vector.broadcast %cst_125 : f32 to vector<16x128xf32>
    %451 = arith.cmpf ogt, %449, %450 : vector<16x128xf32>
    %452 = arith.extui %451 : vector<16x128xi1> to vector<16x128xi32>
    %453 = arith.sitofp %452 : vector<16x128xi32> to vector<16x128xf32>
    %c3_i32_126 = arith.constant 3 : i32
    %454 = arith.mulf %11, %434 : vector<16x128xf32>
    %455 = arith.addf %454, %384 : vector<16x128xf32>
    %456 = arith.mulf %439, %12 : vector<16x128xf32>
    %457 = arith.subf %455, %456 : vector<16x128xf32>
    %458 = arith.subf %457, %12 : vector<16x128xf32>
    %cst_127 = arith.constant 0.000000e+00 : f32
    %459 = vector.broadcast %cst_127 : f32 to vector<16x128xf32>
    %460 = arith.cmpf ogt, %458, %459 : vector<16x128xf32>
    %461 = arith.extui %460 : vector<16x128xi1> to vector<16x128xi32>
    %462 = arith.sitofp %461 : vector<16x128xi32> to vector<16x128xf32>
    %c0_128 = arith.constant 0 : index
    %c0_129 = arith.constant 0 : index
    %463 = vector.load %arg4[%c0_128, %c0_129] : memref<128x128xf32, #tpu.memory_space<vmem>>, vector<128x128xf32>
    %cst_130 = arith.constant dense<0.000000e+00> : vector<16x128xf32>
    %464 = tpu.matmul %462, %463, %cst_130 {dimension_numbers = #tpu.dot_dimension_numbers<[1], [0], [0], [1], [0, 0, 1, 1], [], []>} : vector<16x128xf32>, vector<128x128xf32>, vector<16x128xf32> -> vector<16x128xf32>
    %465 = arith.addf %464, %18 : vector<16x128xf32>
    %466 = arith.mulf %13, %444 : vector<16x128xf32>
    %467 = arith.addf %466, %465 : vector<16x128xf32>
    %468 = arith.mulf %14, %448 : vector<16x128xf32>
    %469 = arith.addf %468, %467 : vector<16x128xf32>
    %470 = arith.mulf %453, %15 : vector<16x128xf32>
    %471 = arith.subf %469, %470 : vector<16x128xf32>
    %472 = arith.subf %471, %15 : vector<16x128xf32>
    %cst_131 = arith.constant 0.000000e+00 : f32
    %473 = vector.broadcast %cst_131 : f32 to vector<16x128xf32>
    %474 = arith.cmpf ogt, %472, %473 : vector<16x128xf32>
    %475 = arith.extui %474 : vector<16x128xi1> to vector<16x128xi32>
    %476 = arith.sitofp %475 : vector<16x128xi32> to vector<16x128xf32>
    %c4_i32_132 = arith.constant 4 : i32
    %477 = arith.mulf %11, %457 : vector<16x128xf32>
    %478 = arith.addf %477, %384 : vector<16x128xf32>
    %479 = arith.mulf %462, %12 : vector<16x128xf32>
    %480 = arith.subf %478, %479 : vector<16x128xf32>
    %481 = arith.subf %480, %12 : vector<16x128xf32>
    %cst_133 = arith.constant 0.000000e+00 : f32
    %482 = vector.broadcast %cst_133 : f32 to vector<16x128xf32>
    %483 = arith.cmpf ogt, %481, %482 : vector<16x128xf32>
    %484 = arith.extui %483 : vector<16x128xi1> to vector<16x128xi32>
    %485 = arith.sitofp %484 : vector<16x128xi32> to vector<16x128xf32>
    %c0_134 = arith.constant 0 : index
    %c0_135 = arith.constant 0 : index
    %486 = vector.load %arg4[%c0_134, %c0_135] : memref<128x128xf32, #tpu.memory_space<vmem>>, vector<128x128xf32>
    %cst_136 = arith.constant dense<0.000000e+00> : vector<16x128xf32>
    %487 = tpu.matmul %485, %486, %cst_136 {dimension_numbers = #tpu.dot_dimension_numbers<[1], [0], [0], [1], [0, 0, 1, 1], [], []>} : vector<16x128xf32>, vector<128x128xf32>, vector<16x128xf32> -> vector<16x128xf32>
    %488 = arith.addf %487, %18 : vector<16x128xf32>
    %489 = arith.mulf %13, %467 : vector<16x128xf32>
    %490 = arith.addf %489, %488 : vector<16x128xf32>
    %491 = arith.mulf %14, %471 : vector<16x128xf32>
    %492 = arith.addf %491, %490 : vector<16x128xf32>
    %493 = arith.mulf %476, %15 : vector<16x128xf32>
    %494 = arith.subf %492, %493 : vector<16x128xf32>
    %495 = arith.subf %494, %15 : vector<16x128xf32>
    %cst_137 = arith.constant 0.000000e+00 : f32
    %496 = vector.broadcast %cst_137 : f32 to vector<16x128xf32>
    %497 = arith.cmpf ogt, %495, %496 : vector<16x128xf32>
    %498 = arith.extui %497 : vector<16x128xi1> to vector<16x128xi32>
    %499 = arith.sitofp %498 : vector<16x128xi32> to vector<16x128xf32>
    %500 = arith.truncf %499 : vector<16x128xf32> to vector<16x128xbf16>
    %c48 = arith.constant 48 : index
    %c0_138 = arith.constant 0 : index
    %501 = vector.load %arg7[%c48, %c0_138] : memref<128x128xbf16, #tpu.memory_space<vmem>>, vector<16x128xbf16>
    tpu.vector_store %arg7[%c48, %c0_138], %500 {strides = array<i32>} : memref<128x128xbf16, #tpu.memory_space<vmem>>, vector<16x128xbf16>,
    %502 = vector.extract_strided_slice %24 {offsets = [64, 0], sizes = [16, 128], strides = [1, 1]} : vector<128x128xf32> to vector<16x128xf32>
    %c0_i32_139 = arith.constant 0 : i32
    %503 = arith.mulf %11, %480 : vector<16x128xf32>
    %504 = arith.addf %503, %502 : vector<16x128xf32>
    %505 = arith.mulf %485, %12 : vector<16x128xf32>
    %506 = arith.subf %504, %505 : vector<16x128xf32>
    %507 = arith.subf %506, %12 : vector<16x128xf32>
    %cst_140 = arith.constant 0.000000e+00 : f32
    %508 = vector.broadcast %cst_140 : f32 to vector<16x128xf32>
    %509 = arith.cmpf ogt, %507, %508 : vector<16x128xf32>
    %510 = arith.extui %509 : vector<16x128xi1> to vector<16x128xi32>
    %511 = arith.sitofp %510 : vector<16x128xi32> to vector<16x128xf32>
    %c0_141 = arith.constant 0 : index
    %c0_142 = arith.constant 0 : index
    %512 = vector.load %arg4[%c0_141, %c0_142] : memref<128x128xf32, #tpu.memory_space<vmem>>, vector<128x128xf32>
    %cst_143 = arith.constant dense<0.000000e+00> : vector<16x128xf32>
    %513 = tpu.matmul %511, %512, %cst_143 {dimension_numbers = #tpu.dot_dimension_numbers<[1], [0], [0], [1], [0, 0, 1, 1], [], []>} : vector<16x128xf32>, vector<128x128xf32>, vector<16x128xf32> -> vector<16x128xf32>
    %514 = arith.addf %513, %18 : vector<16x128xf32>
    %515 = arith.mulf %13, %490 : vector<16x128xf32>
    %516 = arith.addf %515, %514 : vector<16x128xf32>
    %517 = arith.mulf %14, %494 : vector<16x128xf32>
    %518 = arith.addf %517, %516 : vector<16x128xf32>
    %519 = arith.mulf %499, %15 : vector<16x128xf32>
    %520 = arith.subf %518, %519 : vector<16x128xf32>
    %521 = arith.subf %520, %15 : vector<16x128xf32>
    %cst_144 = arith.constant 0.000000e+00 : f32
    %522 = vector.broadcast %cst_144 : f32 to vector<16x128xf32>
    %523 = arith.cmpf ogt, %521, %522 : vector<16x128xf32>
    %524 = arith.extui %523 : vector<16x128xi1> to vector<16x128xi32>
    %525 = arith.sitofp %524 : vector<16x128xi32> to vector<16x128xf32>
    %c1_i32_145 = arith.constant 1 : i32
    %526 = arith.mulf %11, %506 : vector<16x128xf32>
    %527 = arith.addf %526, %502 : vector<16x128xf32>
    %528 = arith.mulf %511, %12 : vector<16x128xf32>
    %529 = arith.subf %527, %528 : vector<16x128xf32>
    %530 = arith.subf %529, %12 : vector<16x128xf32>
    %cst_146 = arith.constant 0.000000e+00 : f32
    %531 = vector.broadcast %cst_146 : f32 to vector<16x128xf32>
    %532 = arith.cmpf ogt, %530, %531 : vector<16x128xf32>
    %533 = arith.extui %532 : vector<16x128xi1> to vector<16x128xi32>
    %534 = arith.sitofp %533 : vector<16x128xi32> to vector<16x128xf32>
    %c0_147 = arith.constant 0 : index
    %c0_148 = arith.constant 0 : index
    %535 = vector.load %arg4[%c0_147, %c0_148] : memref<128x128xf32, #tpu.memory_space<vmem>>, vector<128x128xf32>
    %cst_149 = arith.constant dense<0.000000e+00> : vector<16x128xf32>
    %536 = tpu.matmul %534, %535, %cst_149 {dimension_numbers = #tpu.dot_dimension_numbers<[1], [0], [0], [1], [0, 0, 1, 1], [], []>} : vector<16x128xf32>, vector<128x128xf32>, vector<16x128xf32> -> vector<16x128xf32>
    %537 = arith.addf %536, %18 : vector<16x128xf32>
    %538 = arith.mulf %13, %516 : vector<16x128xf32>
    %539 = arith.addf %538, %537 : vector<16x128xf32>
    %540 = arith.mulf %14, %520 : vector<16x128xf32>
    %541 = arith.addf %540, %539 : vector<16x128xf32>
    %542 = arith.mulf %525, %15 : vector<16x128xf32>
    %543 = arith.subf %541, %542 : vector<16x128xf32>
    %544 = arith.subf %543, %15 : vector<16x128xf32>
    %cst_150 = arith.constant 0.000000e+00 : f32
    %545 = vector.broadcast %cst_150 : f32 to vector<16x128xf32>
    %546 = arith.cmpf ogt, %544, %545 : vector<16x128xf32>
    %547 = arith.extui %546 : vector<16x128xi1> to vector<16x128xi32>
    %548 = arith.sitofp %547 : vector<16x128xi32> to vector<16x128xf32>
    %c2_i32_151 = arith.constant 2 : i32
    %549 = arith.mulf %11, %529 : vector<16x128xf32>
    %550 = arith.addf %549, %502 : vector<16x128xf32>
    %551 = arith.mulf %534, %12 : vector<16x128xf32>
    %552 = arith.subf %550, %551 : vector<16x128xf32>
    %553 = arith.subf %552, %12 : vector<16x128xf32>
    %cst_152 = arith.constant 0.000000e+00 : f32
    %554 = vector.broadcast %cst_152 : f32 to vector<16x128xf32>
    %555 = arith.cmpf ogt, %553, %554 : vector<16x128xf32>
    %556 = arith.extui %555 : vector<16x128xi1> to vector<16x128xi32>
    %557 = arith.sitofp %556 : vector<16x128xi32> to vector<16x128xf32>
    %c0_153 = arith.constant 0 : index
    %c0_154 = arith.constant 0 : index
    %558 = vector.load %arg4[%c0_153, %c0_154] : memref<128x128xf32, #tpu.memory_space<vmem>>, vector<128x128xf32>
    %cst_155 = arith.constant dense<0.000000e+00> : vector<16x128xf32>
    %559 = tpu.matmul %557, %558, %cst_155 {dimension_numbers = #tpu.dot_dimension_numbers<[1], [0], [0], [1], [0, 0, 1, 1], [], []>} : vector<16x128xf32>, vector<128x128xf32>, vector<16x128xf32> -> vector<16x128xf32>
    %560 = arith.addf %559, %18 : vector<16x128xf32>
    %561 = arith.mulf %13, %539 : vector<16x128xf32>
    %562 = arith.addf %561, %560 : vector<16x128xf32>
    %563 = arith.mulf %14, %543 : vector<16x128xf32>
    %564 = arith.addf %563, %562 : vector<16x128xf32>
    %565 = arith.mulf %548, %15 : vector<16x128xf32>
    %566 = arith.subf %564, %565 : vector<16x128xf32>
    %567 = arith.subf %566, %15 : vector<16x128xf32>
    %cst_156 = arith.constant 0.000000e+00 : f32
    %568 = vector.broadcast %cst_156 : f32 to vector<16x128xf32>
    %569 = arith.cmpf ogt, %567, %568 : vector<16x128xf32>
    %570 = arith.extui %569 : vector<16x128xi1> to vector<16x128xi32>
    %571 = arith.sitofp %570 : vector<16x128xi32> to vector<16x128xf32>
    %c3_i32_157 = arith.constant 3 : i32
    %572 = arith.mulf %11, %552 : vector<16x128xf32>
    %573 = arith.addf %572, %502 : vector<16x128xf32>
    %574 = arith.mulf %557, %12 : vector<16x128xf32>
    %575 = arith.subf %573, %574 : vector<16x128xf32>
    %576 = arith.subf %575, %12 : vector<16x128xf32>
    %cst_158 = arith.constant 0.000000e+00 : f32
    %577 = vector.broadcast %cst_158 : f32 to vector<16x128xf32>
    %578 = arith.cmpf ogt, %576, %577 : vector<16x128xf32>
    %579 = arith.extui %578 : vector<16x128xi1> to vector<16x128xi32>
    %580 = arith.sitofp %579 : vector<16x128xi32> to vector<16x128xf32>
    %c0_159 = arith.constant 0 : index
    %c0_160 = arith.constant 0 : index
    %581 = vector.load %arg4[%c0_159, %c0_160] : memref<128x128xf32, #tpu.memory_space<vmem>>, vector<128x128xf32>
    %cst_161 = arith.constant dense<0.000000e+00> : vector<16x128xf32>
    %582 = tpu.matmul %580, %581, %cst_161 {dimension_numbers = #tpu.dot_dimension_numbers<[1], [0], [0], [1], [0, 0, 1, 1], [], []>} : vector<16x128xf32>, vector<128x128xf32>, vector<16x128xf32> -> vector<16x128xf32>
    %583 = arith.addf %582, %18 : vector<16x128xf32>
    %584 = arith.mulf %13, %562 : vector<16x128xf32>
    %585 = arith.addf %584, %583 : vector<16x128xf32>
    %586 = arith.mulf %14, %566 : vector<16x128xf32>
    %587 = arith.addf %586, %585 : vector<16x128xf32>
    %588 = arith.mulf %571, %15 : vector<16x128xf32>
    %589 = arith.subf %587, %588 : vector<16x128xf32>
    %590 = arith.subf %589, %15 : vector<16x128xf32>
    %cst_162 = arith.constant 0.000000e+00 : f32
    %591 = vector.broadcast %cst_162 : f32 to vector<16x128xf32>
    %592 = arith.cmpf ogt, %590, %591 : vector<16x128xf32>
    %593 = arith.extui %592 : vector<16x128xi1> to vector<16x128xi32>
    %594 = arith.sitofp %593 : vector<16x128xi32> to vector<16x128xf32>
    %c4_i32_163 = arith.constant 4 : i32
    %595 = arith.mulf %11, %575 : vector<16x128xf32>
    %596 = arith.addf %595, %502 : vector<16x128xf32>
    %597 = arith.mulf %580, %12 : vector<16x128xf32>
    %598 = arith.subf %596, %597 : vector<16x128xf32>
    %599 = arith.subf %598, %12 : vector<16x128xf32>
    %cst_164 = arith.constant 0.000000e+00 : f32
    %600 = vector.broadcast %cst_164 : f32 to vector<16x128xf32>
    %601 = arith.cmpf ogt, %599, %600 : vector<16x128xf32>
    %602 = arith.extui %601 : vector<16x128xi1> to vector<16x128xi32>
    %603 = arith.sitofp %602 : vector<16x128xi32> to vector<16x128xf32>
    %c0_165 = arith.constant 0 : index
    %c0_166 = arith.constant 0 : index
    %604 = vector.load %arg4[%c0_165, %c0_166] : memref<128x128xf32, #tpu.memory_space<vmem>>, vector<128x128xf32>
    %cst_167 = arith.constant dense<0.000000e+00> : vector<16x128xf32>
    %605 = tpu.matmul %603, %604, %cst_167 {dimension_numbers = #tpu.dot_dimension_numbers<[1], [0], [0], [1], [0, 0, 1, 1], [], []>} : vector<16x128xf32>, vector<128x128xf32>, vector<16x128xf32> -> vector<16x128xf32>
    %606 = arith.addf %605, %18 : vector<16x128xf32>
    %607 = arith.mulf %13, %585 : vector<16x128xf32>
    %608 = arith.addf %607, %606 : vector<16x128xf32>
    %609 = arith.mulf %14, %589 : vector<16x128xf32>
    %610 = arith.addf %609, %608 : vector<16x128xf32>
    %611 = arith.mulf %594, %15 : vector<16x128xf32>
    %612 = arith.subf %610, %611 : vector<16x128xf32>
    %613 = arith.subf %612, %15 : vector<16x128xf32>
    %cst_168 = arith.constant 0.000000e+00 : f32
    %614 = vector.broadcast %cst_168 : f32 to vector<16x128xf32>
    %615 = arith.cmpf ogt, %613, %614 : vector<16x128xf32>
    %616 = arith.extui %615 : vector<16x128xi1> to vector<16x128xi32>
    %617 = arith.sitofp %616 : vector<16x128xi32> to vector<16x128xf32>
    %618 = arith.truncf %617 : vector<16x128xf32> to vector<16x128xbf16>
    %c64 = arith.constant 64 : index
    %c0_169 = arith.constant 0 : index
    %619 = vector.load %arg7[%c64, %c0_169] : memref<128x128xbf16, #tpu.memory_space<vmem>>, vector<16x128xbf16>
    tpu.vector_store %arg7[%c64, %c0_169], %618 {strides = array<i32>} : memref<128x128xbf16, #tpu.memory_space<vmem>>, vector<16x128xbf16>,
    %620 = vector.extract_strided_slice %24 {offsets = [80, 0], sizes = [16, 128], strides = [1, 1]} : vector<128x128xf32> to vector<16x128xf32>
    %c0_i32_170 = arith.constant 0 : i32
    %621 = arith.mulf %11, %598 : vector<16x128xf32>
    %622 = arith.addf %621, %620 : vector<16x128xf32>
    %623 = arith.mulf %603, %12 : vector<16x128xf32>
    %624 = arith.subf %622, %623 : vector<16x128xf32>
    %625 = arith.subf %624, %12 : vector<16x128xf32>
    %cst_171 = arith.constant 0.000000e+00 : f32
    %626 = vector.broadcast %cst_171 : f32 to vector<16x128xf32>
    %627 = arith.cmpf ogt, %625, %626 : vector<16x128xf32>
    %628 = arith.extui %627 : vector<16x128xi1> to vector<16x128xi32>
    %629 = arith.sitofp %628 : vector<16x128xi32> to vector<16x128xf32>
    %c0_172 = arith.constant 0 : index
    %c0_173 = arith.constant 0 : index
    %630 = vector.load %arg4[%c0_172, %c0_173] : memref<128x128xf32, #tpu.memory_space<vmem>>, vector<128x128xf32>
    %cst_174 = arith.constant dense<0.000000e+00> : vector<16x128xf32>
    %631 = tpu.matmul %629, %630, %cst_174 {dimension_numbers = #tpu.dot_dimension_numbers<[1], [0], [0], [1], [0, 0, 1, 1], [], []>} : vector<16x128xf32>, vector<128x128xf32>, vector<16x128xf32> -> vector<16x128xf32>
    %632 = arith.addf %631, %18 : vector<16x128xf32>
    %633 = arith.mulf %13, %608 : vector<16x128xf32>
    %634 = arith.addf %633, %632 : vector<16x128xf32>
    %635 = arith.mulf %14, %612 : vector<16x128xf32>
    %636 = arith.addf %635, %634 : vector<16x128xf32>
    %637 = arith.mulf %617, %15 : vector<16x128xf32>
    %638 = arith.subf %636, %637 : vector<16x128xf32>
    %639 = arith.subf %638, %15 : vector<16x128xf32>
    %cst_175 = arith.constant 0.000000e+00 : f32
    %640 = vector.broadcast %cst_175 : f32 to vector<16x128xf32>
    %641 = arith.cmpf ogt, %639, %640 : vector<16x128xf32>
    %642 = arith.extui %641 : vector<16x128xi1> to vector<16x128xi32>
    %643 = arith.sitofp %642 : vector<16x128xi32> to vector<16x128xf32>
    %c1_i32_176 = arith.constant 1 : i32
    %644 = arith.mulf %11, %624 : vector<16x128xf32>
    %645 = arith.addf %644, %620 : vector<16x128xf32>
    %646 = arith.mulf %629, %12 : vector<16x128xf32>
    %647 = arith.subf %645, %646 : vector<16x128xf32>
    %648 = arith.subf %647, %12 : vector<16x128xf32>
    %cst_177 = arith.constant 0.000000e+00 : f32
    %649 = vector.broadcast %cst_177 : f32 to vector<16x128xf32>
    %650 = arith.cmpf ogt, %648, %649 : vector<16x128xf32>
    %651 = arith.extui %650 : vector<16x128xi1> to vector<16x128xi32>
    %652 = arith.sitofp %651 : vector<16x128xi32> to vector<16x128xf32>
    %c0_178 = arith.constant 0 : index
    %c0_179 = arith.constant 0 : index
    %653 = vector.load %arg4[%c0_178, %c0_179] : memref<128x128xf32, #tpu.memory_space<vmem>>, vector<128x128xf32>
    %cst_180 = arith.constant dense<0.000000e+00> : vector<16x128xf32>
    %654 = tpu.matmul %652, %653, %cst_180 {dimension_numbers = #tpu.dot_dimension_numbers<[1], [0], [0], [1], [0, 0, 1, 1], [], []>} : vector<16x128xf32>, vector<128x128xf32>, vector<16x128xf32> -> vector<16x128xf32>
    %655 = arith.addf %654, %18 : vector<16x128xf32>
    %656 = arith.mulf %13, %634 : vector<16x128xf32>
    %657 = arith.addf %656, %655 : vector<16x128xf32>
    %658 = arith.mulf %14, %638 : vector<16x128xf32>
    %659 = arith.addf %658, %657 : vector<16x128xf32>
    %660 = arith.mulf %643, %15 : vector<16x128xf32>
    %661 = arith.subf %659, %660 : vector<16x128xf32>
    %662 = arith.subf %661, %15 : vector<16x128xf32>
    %cst_181 = arith.constant 0.000000e+00 : f32
    %663 = vector.broadcast %cst_181 : f32 to vector<16x128xf32>
    %664 = arith.cmpf ogt, %662, %663 : vector<16x128xf32>
    %665 = arith.extui %664 : vector<16x128xi1> to vector<16x128xi32>
    %666 = arith.sitofp %665 : vector<16x128xi32> to vector<16x128xf32>
    %c2_i32_182 = arith.constant 2 : i32
    %667 = arith.mulf %11, %647 : vector<16x128xf32>
    %668 = arith.addf %667, %620 : vector<16x128xf32>
    %669 = arith.mulf %652, %12 : vector<16x128xf32>
    %670 = arith.subf %668, %669 : vector<16x128xf32>
    %671 = arith.subf %670, %12 : vector<16x128xf32>
    %cst_183 = arith.constant 0.000000e+00 : f32
    %672 = vector.broadcast %cst_183 : f32 to vector<16x128xf32>
    %673 = arith.cmpf ogt, %671, %672 : vector<16x128xf32>
    %674 = arith.extui %673 : vector<16x128xi1> to vector<16x128xi32>
    %675 = arith.sitofp %674 : vector<16x128xi32> to vector<16x128xf32>
    %c0_184 = arith.constant 0 : index
    %c0_185 = arith.constant 0 : index
    %676 = vector.load %arg4[%c0_184, %c0_185] : memref<128x128xf32, #tpu.memory_space<vmem>>, vector<128x128xf32>
    %cst_186 = arith.constant dense<0.000000e+00> : vector<16x128xf32>
    %677 = tpu.matmul %675, %676, %cst_186 {dimension_numbers = #tpu.dot_dimension_numbers<[1], [0], [0], [1], [0, 0, 1, 1], [], []>} : vector<16x128xf32>, vector<128x128xf32>, vector<16x128xf32> -> vector<16x128xf32>
    %678 = arith.addf %677, %18 : vector<16x128xf32>
    %679 = arith.mulf %13, %657 : vector<16x128xf32>
    %680 = arith.addf %679, %678 : vector<16x128xf32>
    %681 = arith.mulf %14, %661 : vector<16x128xf32>
    %682 = arith.addf %681, %680 : vector<16x128xf32>
    %683 = arith.mulf %666, %15 : vector<16x128xf32>
    %684 = arith.subf %682, %683 : vector<16x128xf32>
    %685 = arith.subf %684, %15 : vector<16x128xf32>
    %cst_187 = arith.constant 0.000000e+00 : f32
    %686 = vector.broadcast %cst_187 : f32 to vector<16x128xf32>
    %687 = arith.cmpf ogt, %685, %686 : vector<16x128xf32>
    %688 = arith.extui %687 : vector<16x128xi1> to vector<16x128xi32>
    %689 = arith.sitofp %688 : vector<16x128xi32> to vector<16x128xf32>
    %c3_i32_188 = arith.constant 3 : i32
    %690 = arith.mulf %11, %670 : vector<16x128xf32>
    %691 = arith.addf %690, %620 : vector<16x128xf32>
    %692 = arith.mulf %675, %12 : vector<16x128xf32>
    %693 = arith.subf %691, %692 : vector<16x128xf32>
    %694 = arith.subf %693, %12 : vector<16x128xf32>
    %cst_189 = arith.constant 0.000000e+00 : f32
    %695 = vector.broadcast %cst_189 : f32 to vector<16x128xf32>
    %696 = arith.cmpf ogt, %694, %695 : vector<16x128xf32>
    %697 = arith.extui %696 : vector<16x128xi1> to vector<16x128xi32>
    %698 = arith.sitofp %697 : vector<16x128xi32> to vector<16x128xf32>
    %c0_190 = arith.constant 0 : index
    %c0_191 = arith.constant 0 : index
    %699 = vector.load %arg4[%c0_190, %c0_191] : memref<128x128xf32, #tpu.memory_space<vmem>>, vector<128x128xf32>
    %cst_192 = arith.constant dense<0.000000e+00> : vector<16x128xf32>
    %700 = tpu.matmul %698, %699, %cst_192 {dimension_numbers = #tpu.dot_dimension_numbers<[1], [0], [0], [1], [0, 0, 1, 1], [], []>} : vector<16x128xf32>, vector<128x128xf32>, vector<16x128xf32> -> vector<16x128xf32>
    %701 = arith.addf %700, %18 : vector<16x128xf32>
    %702 = arith.mulf %13, %680 : vector<16x128xf32>
    %703 = arith.addf %702, %701 : vector<16x128xf32>
    %704 = arith.mulf %14, %684 : vector<16x128xf32>
    %705 = arith.addf %704, %703 : vector<16x128xf32>
    %706 = arith.mulf %689, %15 : vector<16x128xf32>
    %707 = arith.subf %705, %706 : vector<16x128xf32>
    %708 = arith.subf %707, %15 : vector<16x128xf32>
    %cst_193 = arith.constant 0.000000e+00 : f32
    %709 = vector.broadcast %cst_193 : f32 to vector<16x128xf32>
    %710 = arith.cmpf ogt, %708, %709 : vector<16x128xf32>
    %711 = arith.extui %710 : vector<16x128xi1> to vector<16x128xi32>
    %712 = arith.sitofp %711 : vector<16x128xi32> to vector<16x128xf32>
    %c4_i32_194 = arith.constant 4 : i32
    %713 = arith.mulf %11, %693 : vector<16x128xf32>
    %714 = arith.addf %713, %620 : vector<16x128xf32>
    %715 = arith.mulf %698, %12 : vector<16x128xf32>
    %716 = arith.subf %714, %715 : vector<16x128xf32>
    %717 = arith.subf %716, %12 : vector<16x128xf32>
    %cst_195 = arith.constant 0.000000e+00 : f32
    %718 = vector.broadcast %cst_195 : f32 to vector<16x128xf32>
    %719 = arith.cmpf ogt, %717, %718 : vector<16x128xf32>
    %720 = arith.extui %719 : vector<16x128xi1> to vector<16x128xi32>
    %721 = arith.sitofp %720 : vector<16x128xi32> to vector<16x128xf32>
    %c0_196 = arith.constant 0 : index
    %c0_197 = arith.constant 0 : index
    %722 = vector.load %arg4[%c0_196, %c0_197] : memref<128x128xf32, #tpu.memory_space<vmem>>, vector<128x128xf32>
    %cst_198 = arith.constant dense<0.000000e+00> : vector<16x128xf32>
    %723 = tpu.matmul %721, %722, %cst_198 {dimension_numbers = #tpu.dot_dimension_numbers<[1], [0], [0], [1], [0, 0, 1, 1], [], []>} : vector<16x128xf32>, vector<128x128xf32>, vector<16x128xf32> -> vector<16x128xf32>
    %724 = arith.addf %723, %18 : vector<16x128xf32>
    %725 = arith.mulf %13, %703 : vector<16x128xf32>
    %726 = arith.addf %725, %724 : vector<16x128xf32>
    %727 = arith.mulf %14, %707 : vector<16x128xf32>
    %728 = arith.addf %727, %726 : vector<16x128xf32>
    %729 = arith.mulf %712, %15 : vector<16x128xf32>
    %730 = arith.subf %728, %729 : vector<16x128xf32>
    %731 = arith.subf %730, %15 : vector<16x128xf32>
    %cst_199 = arith.constant 0.000000e+00 : f32
    %732 = vector.broadcast %cst_199 : f32 to vector<16x128xf32>
    %733 = arith.cmpf ogt, %731, %732 : vector<16x128xf32>
    %734 = arith.extui %733 : vector<16x128xi1> to vector<16x128xi32>
    %735 = arith.sitofp %734 : vector<16x128xi32> to vector<16x128xf32>
    %736 = arith.truncf %735 : vector<16x128xf32> to vector<16x128xbf16>
    %c80 = arith.constant 80 : index
    %c0_200 = arith.constant 0 : index
    %737 = vector.load %arg7[%c80, %c0_200] : memref<128x128xbf16, #tpu.memory_space<vmem>>, vector<16x128xbf16>
    tpu.vector_store %arg7[%c80, %c0_200], %736 {strides = array<i32>} : memref<128x128xbf16, #tpu.memory_space<vmem>>, vector<16x128xbf16>,
    %738 = vector.extract_strided_slice %24 {offsets = [96, 0], sizes = [16, 128], strides = [1, 1]} : vector<128x128xf32> to vector<16x128xf32>
    %c0_i32_201 = arith.constant 0 : i32
    %739 = arith.mulf %11, %716 : vector<16x128xf32>
    %740 = arith.addf %739, %738 : vector<16x128xf32>
    %741 = arith.mulf %721, %12 : vector<16x128xf32>
    %742 = arith.subf %740, %741 : vector<16x128xf32>
    %743 = arith.subf %742, %12 : vector<16x128xf32>
    %cst_202 = arith.constant 0.000000e+00 : f32
    %744 = vector.broadcast %cst_202 : f32 to vector<16x128xf32>
    %745 = arith.cmpf ogt, %743, %744 : vector<16x128xf32>
    %746 = arith.extui %745 : vector<16x128xi1> to vector<16x128xi32>
    %747 = arith.sitofp %746 : vector<16x128xi32> to vector<16x128xf32>
    %c0_203 = arith.constant 0 : index
    %c0_204 = arith.constant 0 : index
    %748 = vector.load %arg4[%c0_203, %c0_204] : memref<128x128xf32, #tpu.memory_space<vmem>>, vector<128x128xf32>
    %cst_205 = arith.constant dense<0.000000e+00> : vector<16x128xf32>
    %749 = tpu.matmul %747, %748, %cst_205 {dimension_numbers = #tpu.dot_dimension_numbers<[1], [0], [0], [1], [0, 0, 1, 1], [], []>} : vector<16x128xf32>, vector<128x128xf32>, vector<16x128xf32> -> vector<16x128xf32>
    %750 = arith.addf %749, %18 : vector<16x128xf32>
    %751 = arith.mulf %13, %726 : vector<16x128xf32>
    %752 = arith.addf %751, %750 : vector<16x128xf32>
    %753 = arith.mulf %14, %730 : vector<16x128xf32>
    %754 = arith.addf %753, %752 : vector<16x128xf32>
    %755 = arith.mulf %735, %15 : vector<16x128xf32>
    %756 = arith.subf %754, %755 : vector<16x128xf32>
    %757 = arith.subf %756, %15 : vector<16x128xf32>
    %cst_206 = arith.constant 0.000000e+00 : f32
    %758 = vector.broadcast %cst_206 : f32 to vector<16x128xf32>
    %759 = arith.cmpf ogt, %757, %758 : vector<16x128xf32>
    %760 = arith.extui %759 : vector<16x128xi1> to vector<16x128xi32>
    %761 = arith.sitofp %760 : vector<16x128xi32> to vector<16x128xf32>
    %c1_i32_207 = arith.constant 1 : i32
    %762 = arith.mulf %11, %742 : vector<16x128xf32>
    %763 = arith.addf %762, %738 : vector<16x128xf32>
    %764 = arith.mulf %747, %12 : vector<16x128xf32>
    %765 = arith.subf %763, %764 : vector<16x128xf32>
    %766 = arith.subf %765, %12 : vector<16x128xf32>
    %cst_208 = arith.constant 0.000000e+00 : f32
    %767 = vector.broadcast %cst_208 : f32 to vector<16x128xf32>
    %768 = arith.cmpf ogt, %766, %767 : vector<16x128xf32>
    %769 = arith.extui %768 : vector<16x128xi1> to vector<16x128xi32>
    %770 = arith.sitofp %769 : vector<16x128xi32> to vector<16x128xf32>
    %c0_209 = arith.constant 0 : index
    %c0_210 = arith.constant 0 : index
    %771 = vector.load %arg4[%c0_209, %c0_210] : memref<128x128xf32, #tpu.memory_space<vmem>>, vector<128x128xf32>
    %cst_211 = arith.constant dense<0.000000e+00> : vector<16x128xf32>
    %772 = tpu.matmul %770, %771, %cst_211 {dimension_numbers = #tpu.dot_dimension_numbers<[1], [0], [0], [1], [0, 0, 1, 1], [], []>} : vector<16x128xf32>, vector<128x128xf32>, vector<16x128xf32> -> vector<16x128xf32>
    %773 = arith.addf %772, %18 : vector<16x128xf32>
    %774 = arith.mulf %13, %752 : vector<16x128xf32>
    %775 = arith.addf %774, %773 : vector<16x128xf32>
    %776 = arith.mulf %14, %756 : vector<16x128xf32>
    %777 = arith.addf %776, %775 : vector<16x128xf32>
    %778 = arith.mulf %761, %15 : vector<16x128xf32>
    %779 = arith.subf %777, %778 : vector<16x128xf32>
    %780 = arith.subf %779, %15 : vector<16x128xf32>
    %cst_212 = arith.constant 0.000000e+00 : f32
    %781 = vector.broadcast %cst_212 : f32 to vector<16x128xf32>
    %782 = arith.cmpf ogt, %780, %781 : vector<16x128xf32>
    %783 = arith.extui %782 : vector<16x128xi1> to vector<16x128xi32>
    %784 = arith.sitofp %783 : vector<16x128xi32> to vector<16x128xf32>
    %c2_i32_213 = arith.constant 2 : i32
    %785 = arith.mulf %11, %765 : vector<16x128xf32>
    %786 = arith.addf %785, %738 : vector<16x128xf32>
    %787 = arith.mulf %770, %12 : vector<16x128xf32>
    %788 = arith.subf %786, %787 : vector<16x128xf32>
    %789 = arith.subf %788, %12 : vector<16x128xf32>
    %cst_214 = arith.constant 0.000000e+00 : f32
    %790 = vector.broadcast %cst_214 : f32 to vector<16x128xf32>
    %791 = arith.cmpf ogt, %789, %790 : vector<16x128xf32>
    %792 = arith.extui %791 : vector<16x128xi1> to vector<16x128xi32>
    %793 = arith.sitofp %792 : vector<16x128xi32> to vector<16x128xf32>
    %c0_215 = arith.constant 0 : index
    %c0_216 = arith.constant 0 : index
    %794 = vector.load %arg4[%c0_215, %c0_216] : memref<128x128xf32, #tpu.memory_space<vmem>>, vector<128x128xf32>
    %cst_217 = arith.constant dense<0.000000e+00> : vector<16x128xf32>
    %795 = tpu.matmul %793, %794, %cst_217 {dimension_numbers = #tpu.dot_dimension_numbers<[1], [0], [0], [1], [0, 0, 1, 1], [], []>} : vector<16x128xf32>, vector<128x128xf32>, vector<16x128xf32> -> vector<16x128xf32>
    %796 = arith.addf %795, %18 : vector<16x128xf32>
    %797 = arith.mulf %13, %775 : vector<16x128xf32>
    %798 = arith.addf %797, %796 : vector<16x128xf32>
    %799 = arith.mulf %14, %779 : vector<16x128xf32>
    %800 = arith.addf %799, %798 : vector<16x128xf32>
    %801 = arith.mulf %784, %15 : vector<16x128xf32>
    %802 = arith.subf %800, %801 : vector<16x128xf32>
    %803 = arith.subf %802, %15 : vector<16x128xf32>
    %cst_218 = arith.constant 0.000000e+00 : f32
    %804 = vector.broadcast %cst_218 : f32 to vector<16x128xf32>
    %805 = arith.cmpf ogt, %803, %804 : vector<16x128xf32>
    %806 = arith.extui %805 : vector<16x128xi1> to vector<16x128xi32>
    %807 = arith.sitofp %806 : vector<16x128xi32> to vector<16x128xf32>
    %c3_i32_219 = arith.constant 3 : i32
    %808 = arith.mulf %11, %788 : vector<16x128xf32>
    %809 = arith.addf %808, %738 : vector<16x128xf32>
    %810 = arith.mulf %793, %12 : vector<16x128xf32>
    %811 = arith.subf %809, %810 : vector<16x128xf32>
    %812 = arith.subf %811, %12 : vector<16x128xf32>
    %cst_220 = arith.constant 0.000000e+00 : f32
    %813 = vector.broadcast %cst_220 : f32 to vector<16x128xf32>
    %814 = arith.cmpf ogt, %812, %813 : vector<16x128xf32>
    %815 = arith.extui %814 : vector<16x128xi1> to vector<16x128xi32>
    %816 = arith.sitofp %815 : vector<16x128xi32> to vector<16x128xf32>
    %c0_221 = arith.constant 0 : index
    %c0_222 = arith.constant 0 : index
    %817 = vector.load %arg4[%c0_221, %c0_222] : memref<128x128xf32, #tpu.memory_space<vmem>>, vector<128x128xf32>
    %cst_223 = arith.constant dense<0.000000e+00> : vector<16x128xf32>
    %818 = tpu.matmul %816, %817, %cst_223 {dimension_numbers = #tpu.dot_dimension_numbers<[1], [0], [0], [1], [0, 0, 1, 1], [], []>} : vector<16x128xf32>, vector<128x128xf32>, vector<16x128xf32> -> vector<16x128xf32>
    %819 = arith.addf %818, %18 : vector<16x128xf32>
    %820 = arith.mulf %13, %798 : vector<16x128xf32>
    %821 = arith.addf %820, %819 : vector<16x128xf32>
    %822 = arith.mulf %14, %802 : vector<16x128xf32>
    %823 = arith.addf %822, %821 : vector<16x128xf32>
    %824 = arith.mulf %807, %15 : vector<16x128xf32>
    %825 = arith.subf %823, %824 : vector<16x128xf32>
    %826 = arith.subf %825, %15 : vector<16x128xf32>
    %cst_224 = arith.constant 0.000000e+00 : f32
    %827 = vector.broadcast %cst_224 : f32 to vector<16x128xf32>
    %828 = arith.cmpf ogt, %826, %827 : vector<16x128xf32>
    %829 = arith.extui %828 : vector<16x128xi1> to vector<16x128xi32>
    %830 = arith.sitofp %829 : vector<16x128xi32> to vector<16x128xf32>
    %c4_i32_225 = arith.constant 4 : i32
    %831 = arith.mulf %11, %811 : vector<16x128xf32>
    %832 = arith.addf %831, %738 : vector<16x128xf32>
    %833 = arith.mulf %816, %12 : vector<16x128xf32>
    %834 = arith.subf %832, %833 : vector<16x128xf32>
    %835 = arith.subf %834, %12 : vector<16x128xf32>
    %cst_226 = arith.constant 0.000000e+00 : f32
    %836 = vector.broadcast %cst_226 : f32 to vector<16x128xf32>
    %837 = arith.cmpf ogt, %835, %836 : vector<16x128xf32>
    %838 = arith.extui %837 : vector<16x128xi1> to vector<16x128xi32>
    %839 = arith.sitofp %838 : vector<16x128xi32> to vector<16x128xf32>
    %c0_227 = arith.constant 0 : index
    %c0_228 = arith.constant 0 : index
    %840 = vector.load %arg4[%c0_227, %c0_228] : memref<128x128xf32, #tpu.memory_space<vmem>>, vector<128x128xf32>
    %cst_229 = arith.constant dense<0.000000e+00> : vector<16x128xf32>
    %841 = tpu.matmul %839, %840, %cst_229 {dimension_numbers = #tpu.dot_dimension_numbers<[1], [0], [0], [1], [0, 0, 1, 1], [], []>} : vector<16x128xf32>, vector<128x128xf32>, vector<16x128xf32> -> vector<16x128xf32>
    %842 = arith.addf %841, %18 : vector<16x128xf32>
    %843 = arith.mulf %13, %821 : vector<16x128xf32>
    %844 = arith.addf %843, %842 : vector<16x128xf32>
    %845 = arith.mulf %14, %825 : vector<16x128xf32>
    %846 = arith.addf %845, %844 : vector<16x128xf32>
    %847 = arith.mulf %830, %15 : vector<16x128xf32>
    %848 = arith.subf %846, %847 : vector<16x128xf32>
    %849 = arith.subf %848, %15 : vector<16x128xf32>
    %cst_230 = arith.constant 0.000000e+00 : f32
    %850 = vector.broadcast %cst_230 : f32 to vector<16x128xf32>
    %851 = arith.cmpf ogt, %849, %850 : vector<16x128xf32>
    %852 = arith.extui %851 : vector<16x128xi1> to vector<16x128xi32>
    %853 = arith.sitofp %852 : vector<16x128xi32> to vector<16x128xf32>
    %854 = arith.truncf %853 : vector<16x128xf32> to vector<16x128xbf16>
    %c96 = arith.constant 96 : index
    %c0_231 = arith.constant 0 : index
    %855 = vector.load %arg7[%c96, %c0_231] : memref<128x128xbf16, #tpu.memory_space<vmem>>, vector<16x128xbf16>
    tpu.vector_store %arg7[%c96, %c0_231], %854 {strides = array<i32>} : memref<128x128xbf16, #tpu.memory_space<vmem>>, vector<16x128xbf16>,
    %856 = vector.extract_strided_slice %24 {offsets = [112, 0], sizes = [16, 128], strides = [1, 1]} : vector<128x128xf32> to vector<16x128xf32>
    %c0_i32_232 = arith.constant 0 : i32
    %857 = arith.mulf %11, %834 : vector<16x128xf32>
    %858 = arith.addf %857, %856 : vector<16x128xf32>
    %859 = arith.mulf %839, %12 : vector<16x128xf32>
    %860 = arith.subf %858, %859 : vector<16x128xf32>
    %861 = arith.subf %860, %12 : vector<16x128xf32>
    %cst_233 = arith.constant 0.000000e+00 : f32
    %862 = vector.broadcast %cst_233 : f32 to vector<16x128xf32>
    %863 = arith.cmpf ogt, %861, %862 : vector<16x128xf32>
    %864 = arith.extui %863 : vector<16x128xi1> to vector<16x128xi32>
    %865 = arith.sitofp %864 : vector<16x128xi32> to vector<16x128xf32>
    %c0_234 = arith.constant 0 : index
    %c0_235 = arith.constant 0 : index
    %866 = vector.load %arg4[%c0_234, %c0_235] : memref<128x128xf32, #tpu.memory_space<vmem>>, vector<128x128xf32>
    %cst_236 = arith.constant dense<0.000000e+00> : vector<16x128xf32>
    %867 = tpu.matmul %865, %866, %cst_236 {dimension_numbers = #tpu.dot_dimension_numbers<[1], [0], [0], [1], [0, 0, 1, 1], [], []>} : vector<16x128xf32>, vector<128x128xf32>, vector<16x128xf32> -> vector<16x128xf32>
    %868 = arith.addf %867, %18 : vector<16x128xf32>
    %869 = arith.mulf %13, %844 : vector<16x128xf32>
    %870 = arith.addf %869, %868 : vector<16x128xf32>
    %871 = arith.mulf %14, %848 : vector<16x128xf32>
    %872 = arith.addf %871, %870 : vector<16x128xf32>
    %873 = arith.mulf %853, %15 : vector<16x128xf32>
    %874 = arith.subf %872, %873 : vector<16x128xf32>
    %875 = arith.subf %874, %15 : vector<16x128xf32>
    %cst_237 = arith.constant 0.000000e+00 : f32
    %876 = vector.broadcast %cst_237 : f32 to vector<16x128xf32>
    %877 = arith.cmpf ogt, %875, %876 : vector<16x128xf32>
    %878 = arith.extui %877 : vector<16x128xi1> to vector<16x128xi32>
    %879 = arith.sitofp %878 : vector<16x128xi32> to vector<16x128xf32>
    %c1_i32_238 = arith.constant 1 : i32
    %880 = arith.mulf %11, %860 : vector<16x128xf32>
    %881 = arith.addf %880, %856 : vector<16x128xf32>
    %882 = arith.mulf %865, %12 : vector<16x128xf32>
    %883 = arith.subf %881, %882 : vector<16x128xf32>
    %884 = arith.subf %883, %12 : vector<16x128xf32>
    %cst_239 = arith.constant 0.000000e+00 : f32
    %885 = vector.broadcast %cst_239 : f32 to vector<16x128xf32>
    %886 = arith.cmpf ogt, %884, %885 : vector<16x128xf32>
    %887 = arith.extui %886 : vector<16x128xi1> to vector<16x128xi32>
    %888 = arith.sitofp %887 : vector<16x128xi32> to vector<16x128xf32>
    %c0_240 = arith.constant 0 : index
    %c0_241 = arith.constant 0 : index
    %889 = vector.load %arg4[%c0_240, %c0_241] : memref<128x128xf32, #tpu.memory_space<vmem>>, vector<128x128xf32>
    %cst_242 = arith.constant dense<0.000000e+00> : vector<16x128xf32>
    %890 = tpu.matmul %888, %889, %cst_242 {dimension_numbers = #tpu.dot_dimension_numbers<[1], [0], [0], [1], [0, 0, 1, 1], [], []>} : vector<16x128xf32>, vector<128x128xf32>, vector<16x128xf32> -> vector<16x128xf32>
    %891 = arith.addf %890, %18 : vector<16x128xf32>
    %892 = arith.mulf %13, %870 : vector<16x128xf32>
    %893 = arith.addf %892, %891 : vector<16x128xf32>
    %894 = arith.mulf %14, %874 : vector<16x128xf32>
    %895 = arith.addf %894, %893 : vector<16x128xf32>
    %896 = arith.mulf %879, %15 : vector<16x128xf32>
    %897 = arith.subf %895, %896 : vector<16x128xf32>
    %898 = arith.subf %897, %15 : vector<16x128xf32>
    %cst_243 = arith.constant 0.000000e+00 : f32
    %899 = vector.broadcast %cst_243 : f32 to vector<16x128xf32>
    %900 = arith.cmpf ogt, %898, %899 : vector<16x128xf32>
    %901 = arith.extui %900 : vector<16x128xi1> to vector<16x128xi32>
    %902 = arith.sitofp %901 : vector<16x128xi32> to vector<16x128xf32>
    %c2_i32_244 = arith.constant 2 : i32
    %903 = arith.mulf %11, %883 : vector<16x128xf32>
    %904 = arith.addf %903, %856 : vector<16x128xf32>
    %905 = arith.mulf %888, %12 : vector<16x128xf32>
    %906 = arith.subf %904, %905 : vector<16x128xf32>
    %907 = arith.subf %906, %12 : vector<16x128xf32>
    %cst_245 = arith.constant 0.000000e+00 : f32
    %908 = vector.broadcast %cst_245 : f32 to vector<16x128xf32>
    %909 = arith.cmpf ogt, %907, %908 : vector<16x128xf32>
    %910 = arith.extui %909 : vector<16x128xi1> to vector<16x128xi32>
    %911 = arith.sitofp %910 : vector<16x128xi32> to vector<16x128xf32>
    %c0_246 = arith.constant 0 : index
    %c0_247 = arith.constant 0 : index
    %912 = vector.load %arg4[%c0_246, %c0_247] : memref<128x128xf32, #tpu.memory_space<vmem>>, vector<128x128xf32>
    %cst_248 = arith.constant dense<0.000000e+00> : vector<16x128xf32>
    %913 = tpu.matmul %911, %912, %cst_248 {dimension_numbers = #tpu.dot_dimension_numbers<[1], [0], [0], [1], [0, 0, 1, 1], [], []>} : vector<16x128xf32>, vector<128x128xf32>, vector<16x128xf32> -> vector<16x128xf32>
    %914 = arith.addf %913, %18 : vector<16x128xf32>
    %915 = arith.mulf %13, %893 : vector<16x128xf32>
    %916 = arith.addf %915, %914 : vector<16x128xf32>
    %917 = arith.mulf %14, %897 : vector<16x128xf32>
    %918 = arith.addf %917, %916 : vector<16x128xf32>
    %919 = arith.mulf %902, %15 : vector<16x128xf32>
    %920 = arith.subf %918, %919 : vector<16x128xf32>
    %921 = arith.subf %920, %15 : vector<16x128xf32>
    %cst_249 = arith.constant 0.000000e+00 : f32
    %922 = vector.broadcast %cst_249 : f32 to vector<16x128xf32>
    %923 = arith.cmpf ogt, %921, %922 : vector<16x128xf32>
    %924 = arith.extui %923 : vector<16x128xi1> to vector<16x128xi32>
    %925 = arith.sitofp %924 : vector<16x128xi32> to vector<16x128xf32>
    %c3_i32_250 = arith.constant 3 : i32
    %926 = arith.mulf %11, %906 : vector<16x128xf32>
    %927 = arith.addf %926, %856 : vector<16x128xf32>
    %928 = arith.mulf %911, %12 : vector<16x128xf32>
    %929 = arith.subf %927, %928 : vector<16x128xf32>
    %930 = arith.subf %929, %12 : vector<16x128xf32>
    %cst_251 = arith.constant 0.000000e+00 : f32
    %931 = vector.broadcast %cst_251 : f32 to vector<16x128xf32>
    %932 = arith.cmpf ogt, %930, %931 : vector<16x128xf32>
    %933 = arith.extui %932 : vector<16x128xi1> to vector<16x128xi32>
    %934 = arith.sitofp %933 : vector<16x128xi32> to vector<16x128xf32>
    %c0_252 = arith.constant 0 : index
    %c0_253 = arith.constant 0 : index
    %935 = vector.load %arg4[%c0_252, %c0_253] : memref<128x128xf32, #tpu.memory_space<vmem>>, vector<128x128xf32>
    %cst_254 = arith.constant dense<0.000000e+00> : vector<16x128xf32>
    %936 = tpu.matmul %934, %935, %cst_254 {dimension_numbers = #tpu.dot_dimension_numbers<[1], [0], [0], [1], [0, 0, 1, 1], [], []>} : vector<16x128xf32>, vector<128x128xf32>, vector<16x128xf32> -> vector<16x128xf32>
    %937 = arith.addf %936, %18 : vector<16x128xf32>
    %938 = arith.mulf %13, %916 : vector<16x128xf32>
    %939 = arith.addf %938, %937 : vector<16x128xf32>
    %940 = arith.mulf %14, %920 : vector<16x128xf32>
    %941 = arith.addf %940, %939 : vector<16x128xf32>
    %942 = arith.mulf %925, %15 : vector<16x128xf32>
    %943 = arith.subf %941, %942 : vector<16x128xf32>
    %944 = arith.subf %943, %15 : vector<16x128xf32>
    %cst_255 = arith.constant 0.000000e+00 : f32
    %945 = vector.broadcast %cst_255 : f32 to vector<16x128xf32>
    %946 = arith.cmpf ogt, %944, %945 : vector<16x128xf32>
    %947 = arith.extui %946 : vector<16x128xi1> to vector<16x128xi32>
    %948 = arith.sitofp %947 : vector<16x128xi32> to vector<16x128xf32>
    %c4_i32_256 = arith.constant 4 : i32
    %949 = arith.mulf %11, %929 : vector<16x128xf32>
    %950 = arith.addf %949, %856 : vector<16x128xf32>
    %951 = arith.mulf %934, %12 : vector<16x128xf32>
    %952 = arith.subf %950, %951 : vector<16x128xf32>
    %953 = arith.subf %952, %12 : vector<16x128xf32>
    %cst_257 = arith.constant 0.000000e+00 : f32
    %954 = vector.broadcast %cst_257 : f32 to vector<16x128xf32>
    %955 = arith.cmpf ogt, %953, %954 : vector<16x128xf32>
    %956 = arith.extui %955 : vector<16x128xi1> to vector<16x128xi32>
    %957 = arith.sitofp %956 : vector<16x128xi32> to vector<16x128xf32>
    %c0_258 = arith.constant 0 : index
    %c0_259 = arith.constant 0 : index
    %958 = vector.load %arg4[%c0_258, %c0_259] : memref<128x128xf32, #tpu.memory_space<vmem>>, vector<128x128xf32>
    %cst_260 = arith.constant dense<0.000000e+00> : vector<16x128xf32>
    %959 = tpu.matmul %957, %958, %cst_260 {dimension_numbers = #tpu.dot_dimension_numbers<[1], [0], [0], [1], [0, 0, 1, 1], [], []>} : vector<16x128xf32>, vector<128x128xf32>, vector<16x128xf32> -> vector<16x128xf32>
    %960 = arith.addf %959, %18 : vector<16x128xf32>
    %961 = arith.mulf %13, %939 : vector<16x128xf32>
    %962 = arith.addf %961, %960 : vector<16x128xf32>
    %963 = arith.mulf %14, %943 : vector<16x128xf32>
    %964 = arith.addf %963, %962 : vector<16x128xf32>
    %965 = arith.mulf %948, %15 : vector<16x128xf32>
    %966 = arith.subf %964, %965 : vector<16x128xf32>
    %967 = arith.subf %966, %15 : vector<16x128xf32>
    %cst_261 = arith.constant 0.000000e+00 : f32
    %968 = vector.broadcast %cst_261 : f32 to vector<16x128xf32>
    %969 = arith.cmpf ogt, %967, %968 : vector<16x128xf32>
    %970 = arith.extui %969 : vector<16x128xi1> to vector<16x128xi32>
    %971 = arith.sitofp %970 : vector<16x128xi32> to vector<16x128xf32>
    %972 = arith.truncf %971 : vector<16x128xf32> to vector<16x128xbf16>
    %c112 = arith.constant 112 : index
    %c0_262 = arith.constant 0 : index
    %973 = vector.load %arg7[%c112, %c0_262] : memref<128x128xbf16, #tpu.memory_space<vmem>>, vector<16x128xbf16>
    tpu.vector_store %arg7[%c112, %c0_262], %972 {strides = array<i32>} : memref<128x128xbf16, #tpu.memory_space<vmem>>, vector<16x128xbf16>,
    %c0_263 = arith.constant 0 : index
    %c0_264 = arith.constant 0 : index
    %974 = vector.load %arg8[%c0_263, %c0_264] : memref<16x128xf32, #tpu.memory_space<vmem>>, vector<16x128xf32>
    tpu.vector_store %arg8[%c0_263, %c0_264], %952 {strides = array<i32>} : memref<16x128xf32, #tpu.memory_space<vmem>>, vector<16x128xf32>,
    %c0_265 = arith.constant 0 : index
    %c0_266 = arith.constant 0 : index
    %975 = vector.load %arg9[%c0_265, %c0_266] : memref<16x128xf32, #tpu.memory_space<vmem>>, vector<16x128xf32>
    tpu.vector_store %arg9[%c0_265, %c0_266], %962 {strides = array<i32>} : memref<16x128xf32, #tpu.memory_space<vmem>>, vector<16x128xf32>,
    %c0_267 = arith.constant 0 : index
    %c0_268 = arith.constant 0 : index
    %976 = vector.load %arg10[%c0_267, %c0_268] : memref<16x128xf32, #tpu.memory_space<vmem>>, vector<16x128xf32>
    tpu.vector_store %arg10[%c0_267, %c0_268], %966 {strides = array<i32>} : memref<16x128xf32, #tpu.memory_space<vmem>>, vector<16x128xf32>,
    return
  }
  func.func @transform_0(%arg0: i32) -> (i32, i32) {
    %c0_i32 = arith.constant 0 : i32
    %c0_i32_0 = arith.constant 0 : i32
    return %arg0, %c0_i32 : i32, i32
  }
  func.func @transform_1(%arg0: i32) -> (i32, i32) {
    %c0_i32 = arith.constant 0 : i32
    %c0_i32_0 = arith.constant 0 : i32
    %c0_i32_1 = arith.constant 0 : i32
    return %c0_i32, %c0_i32_0 : i32, i32
  }
  func.func @transform_2(%arg0: i32) -> (i32, i32) {
    %c0_i32 = arith.constant 0 : i32
    %c0_i32_0 = arith.constant 0 : i32
    %c0_i32_1 = arith.constant 0 : i32
    return %c0_i32, %c0_i32_0 : i32, i32
  }
  func.func @transform_3(%arg0: i32) -> (i32, i32) {
    %c0_i32 = arith.constant 0 : i32
    %c0_i32_0 = arith.constant 0 : i32
    %c0_i32_1 = arith.constant 0 : i32
    return %c0_i32, %c0_i32_0 : i32, i32
  }
  func.func @transform_4(%arg0: i32) -> (i32, i32) {
    %c0_i32 = arith.constant 0 : i32
    %c0_i32_0 = arith.constant 0 : i32
    %c0_i32_1 = arith.constant 0 : i32
    return %c0_i32, %c0_i32_0 : i32, i32
  }
  func.func @transform_5(%arg0: i32) -> i32 {
    %c0_i32 = arith.constant 0 : i32
    %c0_i32_0 = arith.constant 0 : i32
    return %c0_i32 : i32
  }
  func.func @transform_6(%arg0: i32) -> (i32, i32) {
    %c0_i32 = arith.constant 0 : i32
    %c0_i32_0 = arith.constant 0 : i32
    return %arg0, %c0_i32 : i32, i32
  }
  func.func @transform_7(%arg0: i32) -> (i32, i32) {
    %c0_i32 = arith.constant 0 : i32
    %c0_i32_0 = arith.constant 0 : i32
    return %arg0, %c0_i32 : i32, i32
  }
  func.func @transform_8(%arg0: i32) -> (i32, i32) {
    %c0_i32 = arith.constant 0 : i32
    %c0_i32_0 = arith.constant 0 : i32
    return %arg0, %c0_i32 : i32, i32
  }
  func.func @transform_9(%arg0: i32) -> (i32, i32) {
    %c0_i32 = arith.constant 0 : i32
    %c0_i32_0 = arith.constant 0 : i32
    return %arg0, %c0_i32 : i32, i32
  }
}

</mosaic_0001>

<bundles_post_ra>
// kernel: tpu_custom_call.1
= control target key start
LH: loop header
LB: loop body
LE: loop exit
PB: predicated region body
PF: predicated region fallthrough
CT: control target
= control target key end

     0   :  { %15 = vsyncpa [#allocation3], 0  ;;  %s11232_s0 = inlined_call_operand.hbm [shape: f32[128,256], index: 0, kind: input, shape index: {}]   ;;  %s11233_s1 = inlined_call_operand.hbm [shape: f32[256,128], index: 1, kind: input, shape index: {}]   ;;  %s11234_s2 = inlined_call_operand.vmem [shape: f32[1,128], index: 2, kind: input, shape index: {}]   ;;  %s11235_s3 = inlined_call_operand.hbm [shape: f32[128,128], index: 3, kind: input, shape index: {}]   ;;  %s11236_s4 = inlined_call_operand.vmem [shape: f32[1,128], index: 4, kind: input, shape index: {}]   ;;  %s11237_s5 = inlined_call_operand.vmem [shape: f32[5], index: 5, kind: input, shape index: {}]   ;;  %s11238_s6 = inlined_call_operand.hbm [shape: bf16[128,128], index: 6, kind: output, shape index: {0}]   ;;  %s11239_s7 = inlined_call_operand.hbm [shape: f32[16,128], index: 7, kind: output, shape index: {1}]   ;;  %s11240_s8 = inlined_call_operand.hbm [shape: f32[16,128], index: 8, kind: output, shape index: {2}]   ;;  %s11241_s9 = inlined_call_operand.hbm [shape: f32[16,128], index: 9, kind: output, shape index: {3}]  }
   0x1   :  { %16 = vsyncpa [#allocation7], 0 }
   0x2   :  { %17 = vsyncpa [#allocation5], 0 }
   0x3   :  { %18 = vsyncpa [#allocation4], 0 }
   0x4   :  { %19 = vsyncpa [#allocation12], 0 }
   0x5   :  { %20 = vsyncpa [#allocation15], 0  ;;  %s7800_s30 = smov [#allocation6]  }
   0x6   :  { %s38_s10 = sshll.u32 %s7800_s30, 4  ;;  %s39_s10 = int_to_ptr.vmem [resolvable:$true] %s38_s10 }
   0x7   :  { %s7644_s11 = scalar_lea.vmem %s39_s10, 4096  ;;  %p7649_p1 = scmp.lt.s32.totalorder %s39_s10, %s39_s10 }
   0x8   :  { %p7645_p0 = scmp.ne.s32.totalorder %s39_s10, %s7644_s11  ;;  %p7650_p2 = scmp.lt.s32.totalorder %s7644_s11, %s7644_s11 }
   0xa   :  { %p7651_p3 = por %p7650_p2, %p7649_p1 }
   0xc   :  { %p7652_p4 = pnand %p7651_p3, %p7645_p0 }
   0xe   :  { %7655 = shalt.err (!%p7652_p4)
}
   0xf   :  { %s7801_s12 = smov 128   ;;  %s7802_s13 = smov 8  }
  0x10   :  { %44 = dma.hbm_to_vmem [thread:$0]  %s11233_s1, 4096, %s39_s10, [#allocation7], %s7801_s12, %s7801_s12, %s7802_s13  }
  0x11   :  { %s7803_s16 = smov [#allocation2]  }
  0x12   :  { %s26_s17 = sshll.u32 %s7803_s16, 4  ;;  %s27_s17 = int_to_ptr.vmem [resolvable:$true] %s26_s17 }
  0x13   :  { %s7664_s18 = scalar_lea.vmem %s27_s17, 4096  ;;  %p7669_p6 = scmp.lt.s32.totalorder %s27_s17, %s27_s17 }
  0x14   :  { %p7665_p5 = scmp.ne.s32.totalorder %s27_s17, %s7664_s18  ;;  %p7670_p7 = scmp.lt.s32.totalorder %s7664_s18, %s7664_s18 }
  0x16   :  { %p7671_p8 = por %p7670_p7, %p7669_p6 }
  0x18   :  { %p7672_p9 = pnand %p7671_p8, %p7665_p5 }
  0x1a   :  { %7675 = shalt.err (!%p7672_p9)
}
  0x1b   :  { %s7804_s19 = smov 256   ;;  %s7805_s20 = smov 16  }
  0x1c   :  { %32 = dma.hbm_to_vmem [thread:$0]  %s11232_s0, 4096, %s27_s17, [#allocation3], %s7804_s19, %s7804_s19, %s7805_s20  }
  0x1d   :  { %s67_s1 = sshll.u32 %s11237_s5, 4  ;;  %s7806_s25 = smov [#allocation8]   ;;  %s68_s1 = int_to_ptr.vmem [resolvable:$true] %s67_s1 }
  0x1e   :  { %s52_s26 = sshll.u32 %s7806_s25, 4  ;;  %s53_s26 = int_to_ptr.vmem [resolvable:$true] %s52_s26 }
  0x1f   :  { %s7684_s27 = scalar_lea.vmem %s53_s26, 2048  ;;  %p7689_p11 = scmp.lt.s32.totalorder %s53_s26, %s53_s26 }
  0x20   :  { %p7685_p10 = scmp.ne.s32.totalorder %s53_s26, %s7684_s27  ;;  %p7690_p12 = scmp.lt.s32.totalorder %s7684_s27, %s7684_s27 }
  0x22   :  { %p7691_p13 = por %p7690_p12, %p7689_p11 }
  0x24   :  { %p7692_p0 = pnand %p7691_p13, %p7685_p10 }
  0x26   :  { %7695 = shalt.err (!%p7692_p0)
}
  0x27   :  { %58 = dma.hbm_to_vmem [thread:$0]  %s11235_s3, 2048, %s53_s26, [#allocation7], %s7801_s12, %s7801_s12, %s7802_s13  }
  0x28   :  { %s7696_s29 = scalar_lea.vmem %s68_s1, 16  ;;  %p7701_p2 = scmp.lt.s32.totalorder %s68_s1, %s68_s1 }
  0x29   :  { %p7697_p1 = scmp.ne.s32.totalorder %s68_s1, %s7696_s29  ;;  %p7702_p3 = scmp.lt.s32.totalorder %s7696_s29, %s7696_s29 }
  0x2b   :  { %p7703_p4 = por %p7702_p3, %p7701_p2 }
  0x2d   :  { %p7704_p5 = pnand %p7703_p4, %p7697_p1 }
  0x2f   :  { %7707 = shalt.err (!%p7704_p5)
}
  0x30   :  { %s7807_s5 = smov [#allocation9]  }
  0x31   :  { %70 = dma.vmem_to_smem %s68_s1, 16, %s7807_s5, [#allocation5]  }
  0x32   :  { %7788 = dma.done.wait [#allocation3], 4096  }
  0x33   :  { %7789 = vsyncadd [#allocation3], 4294963200 }
  0x34   :  { %7790 = dma.done.wait [#allocation7], 6144  }
  0x35   :  { %7791 = vsyncadd [#allocation7], 4294961152 }
  0x36   :  { %7792 = dma.done.wait [#allocation5], 16  }
  0x37   :  { %7793 = vsyncadd [#allocation5], 4294967280 }
  0x38   :  { %83 = sfence }
  0x39   :  { %v170_v0 = vld [vmem:[#allocation6 + $0xf8] sm:$0xff]  ;;  %v169_v2 = vld [vmem:[#allocation6 + $0xf0] sm:$0xff]  ;;  %v168_v4 = vld [vmem:[#allocation6 + $0xe8] sm:$0xff]  ;;  %s5038_s3 = sld [smem:[#allocation9 + $0x1]]  ;;  %s7808_s10 = smov 0.0  }
  0x3a   :  { %v154_v1 = vld [vmem:[#allocation6 + $0x78] sm:$0xff]  ;;  %5347 = vmatprep.subr.mxu0 %v170_v0  ;;  %v153_v3 = vld [vmem:[#allocation6 + $0x70] sm:$0xff]  ;;  %v152_v5 = vld [vmem:[#allocation6 + $0x68] sm:$0xff]  ;;  %s5039_s30 = sld [smem:[#allocation9 + $0x2]]  ;;  %s7809_s14 = smov 1.0  }
  0x3b   :  { %5348 = vmatpush3.msra.mxu0 %v154_v1  ;;  %v167_v6 = vld [vmem:[#allocation6 + $0xe0] sm:$0xff]  ;;  %v166_v8 = vld [vmem:[#allocation6 + $0xd8] sm:$0xff]  ;;  %v165_v10 = vld [vmem:[#allocation6 + $0xd0] sm:$0xff]  ;;  %s84_s18 = sld [smem:[#allocation9]] }
  0x3c   :  { %5349 = vmatprep.subr.mxu0 %v169_v2  ;;  %v151_v7 = vld [vmem:[#allocation6 + $0x60] sm:$0xff]  ;;  %v150_v9 = vld [vmem:[#allocation6 + $0x58] sm:$0xff]  ;;  %v149_v11 = vld [vmem:[#allocation6 + $0x50] sm:$0xff]  ;;  %s5040_s20 = sld [smem:[#allocation9 + $0x3]] }
  0x3d   :  { %5350 = vmatpush3.msra.mxu0 %v153_v3  ;;  %v164_v12 = vld [vmem:[#allocation6 + $0xc8] sm:$0xff]  ;;  %v163_v15 = vld [vmem:[#allocation6 + $0xc0] sm:$0xff]  ;;  %v162_v17 = vld [vmem:[#allocation6 + $0xb8] sm:$0xff]  ;;  %s9068_s25 = sld [smem:[#allocation9 + $0x4]] }
  0x3e   :  { %5351 = vmatprep.subr.mxu0 %v168_v4  ;;  %v108_v13 = vld [vmem:[#allocation2 + $0x8] sm:$0xff]  ;;  %v147_v16 = vld [vmem:[#allocation6 + $0x40] sm:$0xff]  ;;  %v146_v18 = vld [vmem:[#allocation6 + $0x38] sm:$0xff] }
  0x3f   :  { %5352 = vmatpush3.msra.mxu0 %v152_v5  ;;  %v148_v14 = vld [vmem:[#allocation6 + $0x48] sm:$0xff]  ;;  %242 = vmatprep.mubr.f32.mxu0 %v108_v13  ;;  %v161_v19 = vld [vmem:[#allocation6 + $0xb0] sm:$0xff]  ;;  %v7886_v21 = vld [vmem:[#allocation8 + $0x78] sm:$0xff]  ;;  %s88_s11 = smax.f32 %s7808_s10, %s5038_s3 }
  0x40   :  { %5353 = vmatprep.subr.mxu0 %v167_v6  ;;  %v145_v20 = vld [vmem:[#allocation6 + $0x30] sm:$0xff]  ;;  %v160_v23 = vld [vmem:[#allocation6 + $0xa8] sm:$0xff]  ;;  %6147 = vmatprep.subr.mxu1 %v7886_v21  ;;  %v159_v26 = vld [vmem:[#allocation6 + $0xa0] sm:$0xff]  ;;  %s7978_s15 = smin.f32 %s7809_s14, %s88_s11  ;;  %s91_s16 = smax.f32 %s7808_s10, %s5039_s30 }
  0x41   :  { %5354 = vmatpush3.msra.mxu0 %v151_v7  ;;  %v7888_v22 = vld [vmem:[#allocation8 + $0x70] sm:$0xff]  ;;  %v144_v24 = vld [vmem:[#allocation6 + $0x28] sm:$0xff]  ;;  %6148 = vmatpush3.msra.mxu1 %v7886_v21  ;;  %v143_v27 = vld [vmem:[#allocation6 + $0x20] sm:$0xff]  ;;  %s7983_s17 = smin.f32 %s7809_s14, %s91_s16  ;;  %s85_s19 = smax.f32 %s7808_s10, %s84_s18 }
  0x42   :  { %5355 = vmatprep.subr.mxu0 %v166_v8  ;;  %v7892_v25 = vld [vmem:[#allocation8 + $0x68] sm:$0xff]  ;;  %6149 = vmatprep.subr.mxu1 %v7888_v22  ;;  %v7896_v28 = vld [vmem:[#allocation8 + $0x60] sm:$0xff]  ;;  %v158_v29 = vld [vmem:[#allocation6 + $0x98] sm:$0xff]  ;;  %s86_s21 = smin.f32 %s7809_s14, %s85_s19 }
  0x43   :  { %5356 = vmatpush3.msra.mxu0 %v150_v9  ;;  %6150 = vmatpush3.msra.mxu1 %v7888_v22  ;;  %v142_v30 = vld [vmem:[#allocation6 + $0x18] sm:$0xff]  ;;  %v157_v32 = vld [vmem:[#allocation6 + $0x90] sm:$0xff]  ;;  %v156_v35 = vld [vmem:[#allocation6 + $0x88] sm:$0xff] }
  0x44   :  { %5357 = vmatprep.subr.mxu0 %v165_v10  ;;  %6151 = vmatprep.subr.mxu1 %v7892_v25  ;;  %v7900_v31 = vld [vmem:[#allocation8 + $0x58] sm:$0xff]  ;;  %v141_v33 = vld [vmem:[#allocation6 + $0x10] sm:$0xff]  ;;  %v140_v36 = vld [vmem:[#allocation6 + $0x8] sm:$0xff] }
  0x45   :  { %5358 = vmatpush3.msra.mxu0 %v149_v11  ;;  %6152 = vmatpush3.msra.mxu1 %v7892_v25  ;;  %v7904_v34 = vld [vmem:[#allocation8 + $0x50] sm:$0xff]  ;;  %v7908_v37 = vld [vmem:[#allocation8 + $0x48] sm:$0xff]  ;;  %v155_v38 = vld [vmem:[#allocation6 + $0x80] sm:$0xff] }
  0x46   :  { %5359 = vmatprep.subr.mxu0 %v164_v12  ;;  %6153 = vmatprep.subr.mxu1 %v7896_v28  ;;  %v139_v39 = vld [vmem:[#allocation6] sm:$0xff]  ;;  %v110_v42 = vld [vmem:[#allocation2 + $0x18] sm:$0xff]  ;;  %v109_v43 = vld [vmem:[#allocation2 + $0x10] sm:$0xff] }
  0x47   :  { %5360 = vmatpush3.msra.mxu0 %v148_v14  ;;  %6154 = vmatpush3.msra.mxu1 %v7896_v28  ;;  %v7912_v40 = vld [vmem:[#allocation8 + $0x40] sm:$0xff]  ;;  %v112_v44 = vld [vmem:[#allocation2 + $0x28] sm:$0xff]  ;;  %v114_v46 = vld [vmem:[#allocation2 + $0x38] sm:$0xff] }
  0x48   :  { %5361 = vmatprep.subr.mxu0 %v163_v15  ;;  %6155 = vmatprep.subr.mxu1 %v7900_v31  ;;  %v107_v41 = vld [vmem:[#allocation2] sm:$0xff]  ;;  %v113_v47 = vld [vmem:[#allocation2 + $0x30] sm:$0xff]  ;;  %v116_v48 = vld [vmem:[#allocation2 + $0x48] sm:$0xff] }
  0x49   :  { %5362 = vmatpush3.msra.mxu0 %v147_v16  ;;  %6156 = vmatpush3.msra.mxu1 %v7900_v31  ;;  %v111_v45 = vld [vmem:[#allocation2 + $0x20] sm:$0xff]  ;;  %v118_v50 = vld [vmem:[#allocation2 + $0x58] sm:$0xff]  ;;  %v117_v51 = vld [vmem:[#allocation2 + $0x50] sm:$0xff] }
  0x4a   :  { %5363 = vmatprep.subr.mxu0 %v162_v17  ;;  %6157 = vmatprep.subr.mxu1 %v7904_v34  ;;  %v115_v49 = vld [vmem:[#allocation2 + $0x40] sm:$0xff]  ;;  %v120_v52 = vld [vmem:[#allocation2 + $0x68] sm:$0xff]  ;;  %v122_v54 = vld [vmem:[#allocation2 + $0x78] sm:$0xff]  ;;  %v7994_v17 = vstv %s86_s21 }
  0x4b   :  { %5364 = vmatpush3.msra.mxu0 %v146_v18  ;;  %6158 = vmatpush3.msra.mxu1 %v7904_v34  ;;  %v119_v53 = vld [vmem:[#allocation2 + $0x60] sm:$0xff]  ;;  %v121_v55 = vld [vmem:[#allocation2 + $0x70] sm:$0xff]  ;;  %v124_v56 = vld [vmem:[#allocation2 + $0x88] sm:$0xff] }
  0x4c   :  { %5365 = vmatprep.subr.mxu0 %v161_v19  ;;  %6159 = vmatprep.subr.mxu1 %v7908_v37  ;;  %v123_v57 = vld [vmem:[#allocation2 + $0x80] sm:$0xff]  ;;  %v126_v58 = vld [vmem:[#allocation2 + $0x98] sm:$0xff]  ;;  %v125_v59 = vld [vmem:[#allocation2 + $0x90] sm:$0xff] }
  0x4d   :  { %5366 = vmatpush3.msra.mxu0 %v145_v20  ;;  %6160 = vmatpush3.msra.mxu1 %v7908_v37  ;;  %v7934_v60 = vld [vmem:[#allocation8 + $0x38] sm:$0xff]  ;;  %v7939_v61 = vld [vmem:[#allocation8 + $0x30] sm:$0xff]  ;;  %v128_v62 = vld [vmem:[#allocation2 + $0xa8] sm:$0xff]  ;;  %v8001_v20 = vstv %s5040_s20 }
  0x4e   :  { %5367 = vmatprep.subr.mxu0 %v160_v23  ;;  %6161 = vmatprep.subr.mxu1 %v7912_v40  ;;  %v7945_v63 = vld [vmem:[#allocation8 + $0x28] sm:$0xff]  ;;  %v127_v0 = vld [vmem:[#allocation2 + $0xa0] sm:$0xff]  ;;  %v130_v2 = vld [vmem:[#allocation2 + $0xb8] sm:$0xff] }
  0x4f   :  { %5368 = vmatpush3.msra.mxu0 %v144_v24  ;;  %6162 = vmatpush3.msra.mxu1 %v7912_v40  ;;  %v7950_v1 = vld [vmem:[#allocation8 + $0x20] sm:$0xff]  ;;  %v7955_v3 = vld [vmem:[#allocation8 + $0x18] sm:$0xff]  ;;  %v129_v4 = vld [vmem:[#allocation2 + $0xb0] sm:$0xff]  ;;  %v323_v24 = vmul.f32 0.0, %v7994_v17 }
  0x50   :  { %5369 = vmatprep.subr.mxu0 %v159_v26  ;;  %6163 = vmatprep.subr.mxu1 %v7934_v60  ;;  %v7959_v5 = vld [vmem:[#allocation8 + $0x10] sm:$0xff]  ;;  %v7962_v6 = vld [vmem:[#allocation8 + $0x8] sm:$0xff]  ;;  %v7971_v7 = vld [vmem:[#allocation8] sm:$0xff] }
  0x51   :  { %5370 = vmatpush3.msra.mxu0 %v143_v27  ;;  %6164 = vmatpush3.msra.mxu1 %v7934_v60  ;;  %v132_v8 = vld [vmem:[#allocation2 + $0xc8] sm:$0xff]  ;;  %v131_v9 = vld [vmem:[#allocation2 + $0xc0] sm:$0xff]  ;;  %v134_v10 = vld [vmem:[#allocation2 + $0xd8] sm:$0xff] }
  0x52   :  { %5371 = vmatprep.subr.mxu0 %v158_v29  ;;  %6165 = vmatprep.subr.mxu1 %v7939_v61  ;;  %v133_v11 = vld [vmem:[#allocation2 + $0xd0] sm:$0xff]  ;;  %v136_v12 = vld [vmem:[#allocation2 + $0xe8] sm:$0xff]  ;;  %v135_v13 = vld [vmem:[#allocation2 + $0xe0] sm:$0xff]  ;;  %v326_v29 = vmul.f32 0.0, %v8001_v20 }
  0x53   :  { %5372 = vmatpush3.msra.mxu0 %v142_v30  ;;  %6166 = vmatpush3.msra.mxu1 %v7939_v61  ;;  %v138_v14 = vld [vmem:[#allocation2 + $0xf8] sm:$0xff]  ;;  %v137_v15 = vld [vmem:[#allocation2 + $0xf0] sm:$0xff]  ;;  %v7999_v18 = vld [vmem:[%s11234_s2] ss:$0 sm:$0xff] }
  0x54   :  { %5373 = vmatprep.subr.mxu0 %v157_v32  ;;  %6167 = vmatprep.subr.mxu1 %v7945_v63 }
  0x55   :  { %5374 = vmatpush3.msra.mxu0 %v141_v33  ;;  %6168 = vmatpush3.msra.mxu1 %v7945_v63 }
  0x56   :  { %5375 = vmatprep.subr.mxu0 %v156_v35  ;;  %6169 = vmatprep.subr.mxu1 %v7950_v1 }
  0x57   :  { %5376 = vmatpush3.msra.mxu0 %v140_v36  ;;  %6170 = vmatpush3.msra.mxu1 %v7950_v1 }
  0x58   :  { %5377 = vmatprep.subr.mxu0 %v155_v38  ;;  %6171 = vmatprep.subr.mxu1 %v7955_v3 }
  0x59   :  { %5378 = vmatpush3.msra.mxu0 %v139_v39  ;;  %6172 = vmatpush3.msra.mxu1 %v7955_v3 }
  0x5a   :  { %243 = vmatmul.mubr.f32.vlgmr.msra.gmra.mxu0 %v107_v41  ;;  %6217 = vmatprep.subr.mxu0 %v7886_v21 }
  0x5b   :  { %247 = vmatprep.mubr.f32.mxu0 %v110_v42  ;;  %6218 = vmatpush3.msra.mxu0 %v7886_v21 }
  0x5c   :  { %6219 = vmatprep.subr.mxu0 %v7888_v22  ;;  %6173 = vmatprep.subr.mxu1 %v7959_v5 }
  0x5d   :  { %6220 = vmatpush3.msra.mxu0 %v7888_v22  ;;  %6174 = vmatpush3.msra.mxu1 %v7959_v5 }
  0x5e   :  { %248 = vmatmul.mubr.f32.gmra.mxu0 %v109_v43  ;;  %6221 = vmatprep.subr.mxu0 %v7892_v25  ;;  %v11254_v43 = vmov 0.0  }
  0x5f   :  { %252 = vmatprep.mubr.f32.mxu0 %v112_v44  ;;  %6222 = vmatpush3.msra.mxu0 %v7892_v25 }
  0x60   :  { %6223 = vmatprep.subr.mxu0 %v7896_v28  ;;  %6175 = vmatprep.subr.mxu1 %v7962_v6 }
  0x61   :  { %6224 = vmatpush3.msra.mxu0 %v7896_v28  ;;  %6176 = vmatpush3.msra.mxu1 %v7962_v6 }
  0x62   :  { %253 = vmatmul.mubr.f32.gmra.mxu0 %v111_v45  ;;  %6225 = vmatprep.subr.mxu0 %v7900_v31  ;;  %v11252_v45 = vmov 1.0  }
  0x63   :  { %257 = vmatprep.mubr.f32.mxu0 %v114_v46  ;;  %6226 = vmatpush3.msra.mxu0 %v7900_v31 }
  0x64   :  { %6227 = vmatprep.subr.mxu0 %v7904_v34  ;;  %6177 = vmatprep.subr.mxu1 %v7971_v7 }
  0x65   :  { %6228 = vmatpush3.msra.mxu0 %v7904_v34  ;;  %6178 = vmatpush3.msra.mxu1 %v7971_v7 }
  0x66   :  { %258 = vmatmul.mubr.f32.gmra.mxu0 %v113_v47  ;;  %6229 = vmatprep.subr.mxu0 %v7908_v37 }
  0x67   :  { %262 = vmatprep.mubr.f32.mxu0 %v116_v48  ;;  %6230 = vmatpush3.msra.mxu0 %v7908_v37 }
  0x68   :  { %6231 = vmatprep.subr.mxu0 %v7912_v40  ;;  %6182 = vmatprep.subr.mxu1 %v7886_v21 }
  0x69   :  { %6232 = vmatpush3.msra.mxu0 %v7912_v40 }
  0x6a   :  { %263 = vmatmul.mubr.f32.gmra.mxu0 %v115_v49  ;;  %6233 = vmatprep.subr.mxu0 %v7934_v60 }
  0x6b   :  { %267 = vmatprep.mubr.f32.mxu0 %v118_v50  ;;  %6234 = vmatpush3.msra.mxu0 %v7934_v60 }
  0x6c   :  { %6235 = vmatprep.subr.mxu0 %v7939_v61 }
  0x6d   :  { %6236 = vmatpush3.msra.mxu0 %v7939_v61 }
  0x6e   :  { %268 = vmatmul.mubr.f32.gmra.mxu0 %v117_v51  ;;  %6237 = vmatprep.subr.mxu0 %v7945_v63 }
  0x6f   :  { %272 = vmatprep.mubr.f32.mxu0 %v120_v52  ;;  %6238 = vmatpush3.msra.mxu0 %v7945_v63 }
  0x70   :  { %6239 = vmatprep.subr.mxu0 %v7950_v1 }
  0x71   :  { %6240 = vmatpush3.msra.mxu0 %v7950_v1 }
  0x72   :  { %273 = vmatmul.mubr.f32.gmra.mxu0 %v119_v53  ;;  %6241 = vmatprep.subr.mxu0 %v7955_v3 }
  0x73   :  { %277 = vmatprep.mubr.f32.mxu0 %v122_v54  ;;  %6242 = vmatpush3.msra.mxu0 %v7955_v3 }
  0x74   :  { %6243 = vmatprep.subr.mxu0 %v7959_v5 }
  0x75   :  { %6244 = vmatpush3.msra.mxu0 %v7959_v5 }
  0x76   :  { %278 = vmatmul.mubr.f32.gmra.mxu0 %v121_v55  ;;  %6245 = vmatprep.subr.mxu0 %v7962_v6 }
  0x77   :  { %282 = vmatprep.mubr.f32.mxu0 %v124_v56  ;;  %6246 = vmatpush3.msra.mxu0 %v7962_v6 }
  0x78   :  { %6247 = vmatprep.subr.mxu0 %v7971_v7 }
  0x79   :  { %6248 = vmatpush3.msra.mxu0 %v7971_v7 }
  0x7a   :  { %283 = vmatmul.mubr.f32.gmra.mxu0 %v123_v57  ;;  %6287 = vmatprep.subr.mxu0 %v7886_v21 }
  0x7b   :  { %287 = vmatprep.mubr.f32.mxu0 %v126_v58 }
  0x7e   :  { %288 = vmatmul.mubr.f32.gmra.mxu0 %v125_v59 }
  0x7f   :  { %292 = vmatprep.mubr.f32.mxu0 %v128_v62 }
  0x82   :  { %293 = vmatmul.mubr.f32.gmra.mxu0 %v127_v0 }
  0x83   :  { %297 = vmatprep.mubr.f32.mxu0 %v130_v2 }
  0x86   :  { %298 = vmatmul.mubr.f32.gmra.mxu0 %v129_v4 }
  0x87   :  { %302 = vmatprep.mubr.f32.mxu0 %v132_v8 }
  0x8a   :  { %303 = vmatmul.mubr.f32.gmra.mxu0 %v131_v9 }
  0x8b   :  { %307 = vmatprep.mubr.f32.mxu0 %v134_v10 }
  0x8e   :  { %308 = vmatmul.mubr.f32.gmra.mxu0 %v133_v11 }
  0x8f   :  { %312 = vmatprep.mubr.f32.mxu0 %v136_v12 }
  0x92   :  { %313 = vmatmul.mubr.f32.gmra.mxu0 %v135_v13 }
  0x93   :  { %317 = vmatprep.mubr.f32.mxu0 %v138_v14 }
  0x96   :  { %318 = vmatmul.mubr.f32.gmra.mxu0 %v137_v15 }
 0x11a   :  { %v5379_v16 = vpop.f32.mrf.mxu0 }
 0x11c   :  { %v5380_v19 = vpop.f32.mrf.mxu0 }
 0x11d   :  { %v5381_v23 = vadd.f32 %v5380_v19, %v5379_v16 }
 0x11e   :  { %v5382_v26 = vpop.f32.mrf.mxu0 }
 0x11f   :  { %v8005_v27 = vadd.f32 %v5381_v23, %v7999_v18 }
 0x120   :  { %v5383_v30 = vpop.f32.mrf.mxu0 }
 0x121   :  { %v5384_v32 = vadd.f32 %v5383_v30, %v5382_v26  ;;  %v324_v33 = vadd.f32 %v323_v24, %v8005_v27 }
 0x122   :  { %v5385_v13 = vpop.f32.mrf.mxu0 }
 0x123   :  { %v8010_v35 = vadd.f32 %v5384_v32, %v7999_v18  ;;  %v327_v36 = vsub.f32 %v324_v33, %v326_v29 }
 0x124   :  { %v5386_v26 = vpop.f32.mrf.mxu0 }
 0x125   :  { %v329_v38 = vsub.f32 %v327_v36, %v8001_v20  ;;  %v445_v39 = vmul.f32 %v327_v36, %v7994_v17  ;;  %v325_v41 = vadd.f32 %v323_v24, %v8010_v35 }
 0x127   :  { %vm331_vm0 = vcmp.gt.f32.partialorder %v329_v38, 0.0  ;;  %v328_v42 = vsub.f32 %v325_v41, %v326_v29  ;;  %v447_v46 = vadd.f32 %v445_v39, %v8005_v27  ;;  %v5388_v39 = vpop.f32.mrf.mxu0 }
 0x128   :  { %v5044_v44 = vsel %vm331_vm0, 1.0, %v11254_v43  ;;  %6179 = vmatprep.mubr.msk.f32.mxu1 %vm331_vm0, %v11252_v45 }
 0x129   :  { %v449_v47 = vmul.f32 %v5044_v44, %v8001_v20  ;;  %v330_v48 = vsub.f32 %v328_v42, %v8001_v20  ;;  %v446_v49 = vmul.f32 %v328_v42, %v7994_v17  ;;  %v5387_v44 = vadd.f32 %v5386_v26, %v5385_v13 }
 0x12b   :  { %v451_v50 = vsub.f32 %v447_v46, %v449_v47  ;;  %vm332_vm1 = vcmp.gt.f32.partialorder %v330_v48, 0.0  ;;  %v448_v53 = vadd.f32 %v446_v49, %v8010_v35  ;;  %v5389_v48 = vpop.f32.mrf.mxu0 }
 0x12c   :  { %v5045_v51 = vsel %vm332_vm1, 1.0, %v11254_v43  ;;  %6180 = vmatmul.mubr.msk.f32.vlgmr.msra.gmra.mxu1 %vm332_vm1, %v11252_v45 }
 0x12d   :  { %v556_v52 = vmul.f32 %v451_v50, %v7994_v17  ;;  %v450_v54 = vmul.f32 %v5045_v51, %v8001_v20  ;;  %6183 = vmatpush3.msra.mxu1 %v7886_v21  ;;  %v453_v55 = vsub.f32 %v451_v50, %v8001_v20 }
 0x12e   :  { %6184 = vmatprep.subr.mxu1 %v7888_v22 }
 0x12f   :  { %v452_v56 = vsub.f32 %v448_v53, %v450_v54  ;;  %6185 = vmatpush3.msra.mxu1 %v7888_v22  ;;  %vm455_vm2 = vcmp.gt.f32.partialorder %v453_v55, 0.0  ;;  %v558_v0 = vadd.f32 %v556_v52, %v8005_v27  ;;  %v8102_v53 = vadd.f32 %v5387_v44, %v7999_v18 }
 0x130   :  { %6186 = vmatprep.subr.mxu1 %v7892_v25  ;;  %v5050_v57 = vsel %vm455_vm2, 1.0, %v11254_v43  ;;  %6214 = vmatprep.mubr.msk.f32.mxu1 %vm455_vm2, %v11252_v45  ;;  %v5390_v54 = vadd.f32 %v5389_v48, %v5388_v39 }
 0x131   :  { %v454_v58 = vsub.f32 %v452_v56, %v8001_v20  ;;  %v557_v59 = vmul.f32 %v452_v56, %v7994_v17  ;;  %6187 = vmatpush3.msra.mxu1 %v7892_v25  ;;  %v560_v62 = vmul.f32 %v5050_v57, %v8001_v20 }
 0x132   :  { %6188 = vmatprep.subr.mxu1 %v7896_v28 }
 0x133   :  { %vm8039_vm3 = vcmp.gt.f32.partialorder %v454_v58, 0.0  ;;  %6189 = vmatpush3.msra.mxu1 %v7896_v28  ;;  %v562_v4 = vsub.f32 %v558_v0, %v560_v62  ;;  %v559_v9 = vadd.f32 %v557_v59, %v8010_v35  ;;  %v8120_v62 = vadd.f32 %v5390_v54, %v7999_v18 }
 0x134   :  { %v5051_v8 = vsel %vm8039_vm3, 1.0, %v11254_v43  ;;  %6190 = vmatprep.subr.mxu1 %v7900_v31 }
 0x135   :  { %v561_v10 = vmul.f32 %v5051_v8, %v8001_v20  ;;  %6191 = vmatpush3.msra.mxu1 %v7900_v31  ;;  %v564_v11 = vsub.f32 %v562_v4, %v8001_v20  ;;  %v667_v12 = vmul.f32 %v562_v4, %v7994_v17 }
 0x136   :  { %6192 = vmatprep.subr.mxu1 %v7904_v34 }
 0x137   :  { %6193 = vmatpush3.msra.mxu1 %v7904_v34  ;;  %vm566_vm4 = vcmp.gt.f32.partialorder %v564_v11, 0.0  ;;  %v563_v14 = vsub.f32 %v559_v9, %v561_v10  ;;  %v669_v16 = vadd.f32 %v667_v12, %v8005_v27 }
 0x138   :  { %6194 = vmatprep.subr.mxu1 %v7908_v37  ;;  %v5056_v15 = vsel %vm566_vm4, 1.0, %v11254_v43  ;;  %6249 = vmatprep.mubr.msk.f32.mxu0 %vm566_vm4, %v11252_v45 }
 0x139   :  { %6195 = vmatpush3.msra.mxu1 %v7908_v37  ;;  %v671_v19 = vmul.f32 %v5056_v15, %v8001_v20  ;;  %v565_v23 = vsub.f32 %v563_v14, %v8001_v20  ;;  %v668_v24 = vmul.f32 %v563_v14, %v7994_v17 }
 0x13a   :  { %6196 = vmatprep.subr.mxu1 %v7912_v40 }
 0x13b   :  { %v673_v29 = vsub.f32 %v669_v16, %v671_v19  ;;  %6197 = vmatpush3.msra.mxu1 %v7912_v40  ;;  %vm567_vm5 = vcmp.gt.f32.partialorder %v565_v23, 0.0  ;;  %v670_v32 = vadd.f32 %v668_v24, %v8010_v35 }
 0x13c   :  { %6198 = vmatprep.subr.mxu1 %v7934_v60  ;;  %v5057_v30 = vsel %vm567_vm5, 1.0, %v11254_v43  ;;  %6250 = vmatmul.mubr.msk.f32.vlgmr.msra.gmra.mxu0 %vm567_vm5, %v11252_v45 }
 0x13d   :  { %v675_v33 = vsub.f32 %v673_v29, %v8001_v20  ;;  %v778_v36 = vmul.f32 %v673_v29, %v7994_v17  ;;  %6199 = vmatpush3.msra.mxu1 %v7934_v60  ;;  %v672_v38 = vmul.f32 %v5057_v30, %v8001_v20  ;;  %6288 = vmatpush3.msra.mxu0 %v7886_v21 }
 0x13e   :  { %6200 = vmatprep.subr.mxu1 %v7939_v61  ;;  %6289 = vmatprep.subr.mxu0 %v7888_v22 }
 0x13f   :  { %v674_v41 = vsub.f32 %v670_v32, %v672_v38  ;;  %6201 = vmatpush3.msra.mxu1 %v7939_v61  ;;  %6290 = vmatpush3.msra.mxu0 %v7888_v22  ;;  %vm8078_vm6 = vcmp.gt.f32.partialorder %v675_v33, 0.0  ;;  %v780_v47 = vadd.f32 %v778_v36, %v8005_v27 }
 0x140   :  { %6202 = vmatprep.subr.mxu1 %v7945_v63  ;;  %6291 = vmatprep.subr.mxu0 %v7892_v25  ;;  %v5062_v46 = vsel %vm8078_vm6, 1.0, %v11254_v43 }
 0x141   :  { %6203 = vmatpush3.msra.mxu1 %v7945_v63  ;;  %6292 = vmatpush3.msra.mxu0 %v7892_v25  ;;  %v782_v49 = vmul.f32 %v5062_v46, %v8001_v20  ;;  %v676_v50 = vsub.f32 %v674_v41, %v8001_v20  ;;  %v779_v51 = vmul.f32 %v674_v41, %v7994_v17 }
 0x142   :  { %6204 = vmatprep.subr.mxu1 %v7950_v1  ;;  %6293 = vmatprep.subr.mxu0 %v7896_v28 }
 0x143   :  { %6205 = vmatpush3.msra.mxu1 %v7950_v1  ;;  %6294 = vmatpush3.msra.mxu0 %v7896_v28  ;;  %v784_v27 = vsub.f32 %v780_v47, %v782_v49  ;;  %vm8097_vm7 = vcmp.gt.f32.partialorder %v676_v50, 0.0  ;;  %v781_v56 = vadd.f32 %v779_v51, %v8010_v35 }
 0x144   :  { %6206 = vmatprep.subr.mxu1 %v7955_v3  ;;  %6295 = vmatprep.subr.mxu0 %v7900_v31  ;;  %v5063_v55 = vsel %vm8097_vm7, 1.0, %v11254_v43 }
 0x145   :  { %6207 = vmatpush3.msra.mxu1 %v7955_v3  ;;  %6296 = vmatpush3.msra.mxu0 %v7900_v31  ;;  %v786_v57 = vsub.f32 %v784_v27, %v8001_v20  ;;  %v899_v58 = vmul.f32 %v784_v27, %v7994_v17  ;;  %v783_v59 = vmul.f32 %v5063_v55, %v8001_v20 }
 0x146   :  { %6208 = vmatprep.subr.mxu1 %v7959_v5  ;;  %6297 = vmatprep.subr.mxu0 %v7904_v34 }
 0x147   :  { %6209 = vmatpush3.msra.mxu1 %v7959_v5  ;;  %6298 = vmatpush3.msra.mxu0 %v7904_v34  ;;  %vm788_vm8 = vcmp.gt.f32.partialorder %v786_v57, 0.0  ;;  %v785_v35 = vsub.f32 %v781_v56, %v783_v59  ;;  %v901_v4 = vadd.f32 %v899_v58, %v8102_v53 }
 0x148   :  { %6210 = vmatprep.subr.mxu1 %v7962_v6  ;;  %6299 = vmatprep.subr.mxu0 %v7908_v37  ;;  %v5068_v0 = vsel %vm788_vm8, 1.0, %v11254_v43 }
 0x149   :  { %6211 = vmatpush3.msra.mxu1 %v7962_v6  ;;  %6300 = vmatpush3.msra.mxu0 %v7908_v37  ;;  %v903_v8 = vmul.f32 %v5068_v0, %v8001_v20  ;;  %v787_v9 = vsub.f32 %v785_v35, %v8001_v20  ;;  %v900_v10 = vmul.f32 %v785_v35, %v7994_v17  ;;  %v5391_v35 = vpop.f32.mrf.mxu0 }
 0x14a   :  { %6319 = vmatprep.mubr.msk.f32.mxu0 %vm788_vm8, %v11252_v45  ;;  %6212 = vmatprep.subr.mxu1 %v7971_v7 }
 0x14b   :  { %v905_v11 = vsub.f32 %v901_v4, %v903_v8  ;;  %6301 = vmatprep.subr.mxu0 %v7912_v40  ;;  %6213 = vmatpush3.msra.mxu1 %v7971_v7  ;;  %vm8135_vm9 = vcmp.gt.f32.partialorder %v787_v9, 0.0  ;;  %v902_v14 = vadd.f32 %v900_v10, %v8120_v62 }
 0x14c   :  { %6302 = vmatpush3.msra.mxu0 %v7912_v40  ;;  %6215 = vmatmul.mubr.msk.f32.vlgmr.msra.gmra.mxu1 %vm8039_vm3, %v11252_v45  ;;  %v5069_v13 = vsel %vm8135_vm9, 1.0, %v11254_v43 }
 0x14d   :  { %v907_v15 = vsub.f32 %v905_v11, %v8001_v20  ;;  %v1026_v16 = vmul.f32 %v905_v11, %v7994_v17  ;;  %6252 = vmatprep.subr.mxu1 %v7886_v21  ;;  %6303 = vmatprep.subr.mxu0 %v7934_v60  ;;  %v904_v19 = vmul.f32 %v5069_v13, %v8001_v20  ;;  %v5392_v11 = vpop.f32.mrf.mxu0 }
 0x14e   :  { %6253 = vmatpush3.msra.mxu1 %v7886_v21  ;;  %6284 = vmatprep.mubr.msk.f32.mxu1 %vm8078_vm6, %v11252_v45 }
 0x14f   :  { %6304 = vmatpush3.msra.mxu0 %v7934_v60  ;;  %6254 = vmatprep.subr.mxu1 %v7888_v22  ;;  %v906_v2 = vsub.f32 %v902_v14, %v904_v19  ;;  %vm8158_vm10 = vcmp.gt.f32.partialorder %v907_v15, 0.0  ;;  %v1028_v26 = vadd.f32 %v1026_v16, %v8102_v53 }
 0x150   :  { %6305 = vmatprep.subr.mxu0 %v7939_v61  ;;  %6255 = vmatpush3.msra.mxu1 %v7888_v22  ;;  %v5076_v24 = vsel %vm8158_vm10, 1.0, %v11254_v43 }
 0x151   :  { %6306 = vmatpush3.msra.mxu0 %v7939_v61  ;;  %6256 = vmatprep.subr.mxu1 %v7892_v25  ;;  %v908_v29 = vsub.f32 %v906_v2, %v8001_v20  ;;  %v1027_v30 = vmul.f32 %v906_v2, %v7994_v17  ;;  %v1030_v32 = vmul.f32 %v5076_v24, %v8001_v20  ;;  %v5394_v24 = vpop.f32.mrf.mxu0 }
 0x152   :  { %6307 = vmatprep.subr.mxu0 %v7945_v63  ;;  %6257 = vmatpush3.msra.mxu1 %v7892_v25 }
 0x153   :  { %6308 = vmatpush3.msra.mxu0 %v7945_v63  ;;  %6258 = vmatprep.subr.mxu1 %v7896_v28  ;;  %v1032_v33 = vsub.f32 %v1028_v26, %v1030_v32  ;;  %vm8177_vm11 = vcmp.gt.f32.partialorder %v908_v29, 0.0  ;;  %v1029_v39 = vadd.f32 %v1027_v30, %v8120_v62 }
 0x154   :  { %6309 = vmatprep.subr.mxu0 %v7950_v1  ;;  %6259 = vmatpush3.msra.mxu1 %v7896_v28  ;;  %v5077_v38 = vsel %vm8177_vm11, 1.0, %v11254_v43 }
 0x155   :  { %6310 = vmatpush3.msra.mxu0 %v7950_v1  ;;  %6260 = vmatprep.subr.mxu1 %v7900_v31  ;;  %v1034_v41 = vsub.f32 %v1032_v33, %v8001_v20  ;;  %v1137_v42 = vmul.f32 %v1032_v33, %v7994_v17  ;;  %v1031_v44 = vmul.f32 %v5077_v38, %v8001_v20 }
 0x156   :  { %6311 = vmatprep.subr.mxu0 %v7955_v3  ;;  %6261 = vmatpush3.msra.mxu1 %v7900_v31  ;;  %v5393_v38 = vadd.f32 %v5392_v11, %v5391_v35 }
 0x157   :  { %6312 = vmatpush3.msra.mxu0 %v7955_v3  ;;  %6262 = vmatprep.subr.mxu1 %v7904_v34  ;;  %vm8196_vm12 = vcmp.gt.f32.partialorder %v1034_v41, 0.0  ;;  %v1033_v47 = vsub.f32 %v1029_v39, %v1031_v44  ;;  %v1139_v49 = vadd.f32 %v1137_v42, %v8102_v53  ;;  %v5395_v42 = vpop.f32.mrf.mxu0 }
 0x158   :  { %6313 = vmatprep.subr.mxu0 %v7959_v5  ;;  %6263 = vmatpush3.msra.mxu1 %v7904_v34  ;;  %v5082_v48 = vsel %vm8196_vm12, 1.0, %v11254_v43 }
 0x159   :  { %6314 = vmatpush3.msra.mxu0 %v7959_v5  ;;  %6264 = vmatprep.subr.mxu1 %v7908_v37  ;;  %v1141_v50 = vmul.f32 %v5082_v48, %v8001_v20  ;;  %v1035_v51 = vsub.f32 %v1033_v47, %v8001_v20  ;;  %v1138_v27 = vmul.f32 %v1033_v47, %v7994_v17  ;;  %v8627_v48 = vld [vmem:[#allocation8 + $0x68] sm:$0xff] }
 0x15a   :  { %6315 = vmatprep.subr.mxu0 %v7962_v6  ;;  %6265 = vmatpush3.msra.mxu1 %v7908_v37 }
 0x15b   :  { %6316 = vmatpush3.msra.mxu0 %v7962_v6  ;;  %6266 = vmatprep.subr.mxu1 %v7912_v40  ;;  %v1143_v54 = vsub.f32 %v1139_v49, %v1141_v50  ;;  %vm8215_vm13 = vcmp.gt.f32.partialorder %v1035_v51, 0.0  ;;  %v1140_v57 = vadd.f32 %v1138_v27, %v8120_v62  ;;  %v8302_v49 = vadd.f32 %v5393_v38, %v7999_v18 }
 0x15c   :  { %6317 = vmatprep.subr.mxu0 %v7971_v7  ;;  %6267 = vmatpush3.msra.mxu1 %v7912_v40  ;;  %v5083_v56 = vsel %vm8215_vm13, 1.0, %v11254_v43  ;;  %v5396_v50 = vadd.f32 %v5395_v42, %v5394_v24 }
 0x15d   :  { %6318 = vmatpush3.msra.mxu0 %v7971_v7  ;;  %6268 = vmatprep.subr.mxu1 %v7934_v60  ;;  %v1145_v58 = vsub.f32 %v1143_v54, %v8001_v20  ;;  %v1248_v59 = vmul.f32 %v1143_v54, %v7994_v17  ;;  %v1142_v0 = vmul.f32 %v5083_v56, %v8001_v20 }
 0x15e   :  { %6320 = vmatmul.mubr.msk.f32.vlgmr.msra.gmra.mxu0 %vm8135_vm9, %v11252_v45  ;;  %6357 = vmatprep.subr.mxu0 %v7886_v21 }
 0x15f   :  { %6269 = vmatpush3.msra.mxu1 %v7934_v60  ;;  %6358 = vmatpush3.msra.mxu0 %v7886_v21  ;;  %v1144_v4 = vsub.f32 %v1140_v57, %v1142_v0  ;;  %vm8236_vm14 = vcmp.gt.f32.partialorder %v1145_v58, 0.0  ;;  %v1250_v10 = vadd.f32 %v1248_v59, %v8102_v53  ;;  %v8328_v59 = vadd.f32 %v5396_v50, %v7999_v18 }
 0x160   :  { %6389 = vmatprep.mubr.msk.f32.mxu0 %vm8196_vm12, %v11252_v45  ;;  %6270 = vmatprep.subr.mxu1 %v7939_v61  ;;  %v5088_v9 = vsel %vm8236_vm14, 1.0, %v11254_v43  ;;  %v11398_v50 = vmov 0 }
 0x161   :  { %6359 = vmatprep.subr.mxu0 %v7888_v22  ;;  %6271 = vmatpush3.msra.mxu1 %v7939_v61  ;;  %v1146_v12 = vsub.f32 %v1144_v4, %v8001_v20  ;;  %v1249_v13 = vmul.f32 %v1144_v4, %v7994_v17  ;;  %v1252_v14 = vmul.f32 %v5088_v9, %v8001_v20 }
 0x162   :  { %6360 = vmatpush3.msra.mxu0 %v7888_v22  ;;  %6272 = vmatprep.subr.mxu1 %v7945_v63 }
 0x163   :  { %6361 = vmatprep.subr.mxu0 %v7892_v25  ;;  %6273 = vmatpush3.msra.mxu1 %v7945_v63  ;;  %v1254_v15 = vsub.f32 %v1250_v10, %v1252_v14  ;;  %vm8257_vm15 = vcmp.gt.f32.partialorder %v1146_v12, 0.0  ;;  %v1251_v2 = vadd.f32 %v1249_v13, %v8120_v62 }
 0x164   :  { %6362 = vmatpush3.msra.mxu0 %v7892_v25  ;;  %6274 = vmatprep.subr.mxu1 %v7950_v1  ;;  %v5089_v19 = vsel %vm8257_vm15, 1.0, %v11254_v43 }
 0x165   :  { %6363 = vmatprep.subr.mxu0 %v7896_v28  ;;  %6275 = vmatpush3.msra.mxu1 %v7950_v1  ;;  %v1256_v26 = vsub.f32 %v1254_v15, %v8001_v20  ;;  %v1359_v29 = vmul.f32 %v1254_v15, %v7994_v17  ;;  %v1253_v30 = vmul.f32 %v5089_v19, %v8001_v20 }
 0x166   :  { %6364 = vmatpush3.msra.mxu0 %v7896_v28  ;;  %6276 = vmatprep.subr.mxu1 %v7955_v3 }
 0x167   :  { %6365 = vmatprep.subr.mxu0 %v7900_v31  ;;  %6277 = vmatpush3.msra.mxu1 %v7955_v3  ;;  %vm8276_vm0 = vcmp.gt.f32.partialorder %v1256_v26, 0.0  ;;  %v1255_v33 = vsub.f32 %v1251_v2, %v1253_v30  ;;  %v1361_v41 = vadd.f32 %v1359_v29, %v8102_v53 }
 0x168   :  { %6366 = vmatpush3.msra.mxu0 %v7900_v31  ;;  %6278 = vmatprep.subr.mxu1 %v7959_v5  ;;  %v5094_v39 = vsel %vm8276_vm0, 1.0, %v11254_v43 }
 0x169   :  { %6367 = vmatprep.subr.mxu0 %v7904_v34  ;;  %6279 = vmatpush3.msra.mxu1 %v7959_v5  ;;  %v1363_v44 = vmul.f32 %v5094_v39, %v8001_v20  ;;  %v1257_v46 = vsub.f32 %v1255_v33, %v8001_v20  ;;  %v1360_v47 = vmul.f32 %v1255_v33, %v7994_v17 }
 0x16a   :  { %6368 = vmatpush3.msra.mxu0 %v7904_v34  ;;  %6280 = vmatprep.subr.mxu1 %v7962_v6 }
 0x16b   :  { %6369 = vmatprep.subr.mxu0 %v7908_v37  ;;  %6281 = vmatpush3.msra.mxu1 %v7962_v6  ;;  %v1365_v53 = vsub.f32 %v1361_v41, %v1363_v44  ;;  %vm8295_vm1 = vcmp.gt.f32.partialorder %v1257_v46, 0.0  ;;  %v1362_v27 = vadd.f32 %v1360_v47, %v8120_v62  ;;  %v8407_v41 = vld [vmem:[#allocation8 + $0x78] sm:$0xff]  ;;  %v8423_v47 = vld [vmem:[#allocation8 + $0x70] sm:$0xff] }
 0x16c   :  { %6370 = vmatpush3.msra.mxu0 %v7908_v37  ;;  %6282 = vmatprep.subr.mxu1 %v7971_v7  ;;  %v5095_v51 = vsel %vm8295_vm1, 1.0, %v11254_v43 }
 0x16d   :  { %6371 = vmatprep.subr.mxu0 %v7912_v40  ;;  %6283 = vmatpush3.msra.mxu1 %v7971_v7  ;;  %v1367_v54 = vsub.f32 %v1365_v53, %v8001_v20  ;;  %v1480_v56 = vmul.f32 %v1365_v53, %v7994_v17  ;;  %v1364_v57 = vmul.f32 %v5095_v51, %v8001_v20 }
 0x16e   :  { %6372 = vmatpush3.msra.mxu0 %v7912_v40  ;;  %6285 = vmatmul.mubr.msk.f32.vlgmr.msra.gmra.mxu1 %vm8097_vm7, %v11252_v45 }
 0x16f   :  { %6322 = vmatprep.subr.mxu1 %v7886_v21  ;;  %6373 = vmatprep.subr.mxu0 %v7934_v60  ;;  %v1366_v62 = vsub.f32 %v1362_v27, %v1364_v57  ;;  %vm8319_vm2 = vcmp.gt.f32.partialorder %v1367_v54, 0.0  ;;  %v1482_v35 = vadd.f32 %v1480_v56, %v8302_v49  ;;  %v8437_v27 = vld [vmem:[#allocation8 + $0x68] sm:$0xff]  ;;  %v5397_v54 = vpop.f32.mrf.mxu0 }
 0x170   :  { %6323 = vmatpush3.msra.mxu1 %v7886_v21  ;;  %6354 = vmatprep.mubr.msk.f32.mxu1 %vm8158_vm10, %v11252_v45  ;;  %v5100_v52 = vsel %vm8319_vm2, 1.0, %v11254_v43 }
 0x171   :  { %6374 = vmatpush3.msra.mxu0 %v7934_v60  ;;  %6324 = vmatprep.subr.mxu1 %v7888_v22  ;;  %v1368_v0 = vsub.f32 %v1366_v62, %v8001_v20  ;;  %v1481_v21 = vmul.f32 %v1366_v62, %v7994_v17  ;;  %v1484_v23 = vmul.f32 %v5100_v52, %v8001_v20  ;;  %v8446_v52 = vld [vmem:[#allocation8 + $0x60] sm:$0xff] }
 0x172   :  { %6375 = vmatprep.subr.mxu0 %v7939_v61  ;;  %6325 = vmatpush3.msra.mxu1 %v7888_v22 }
 0x173   :  { %6376 = vmatpush3.msra.mxu0 %v7939_v61  ;;  %6326 = vmatprep.subr.mxu1 %v7892_v25  ;;  %v1486_v4 = vsub.f32 %v1482_v35, %v1484_v23  ;;  %vm8343_vm3 = vcmp.gt.f32.partialorder %v1368_v0, 0.0  ;;  %v1483_v11 = vadd.f32 %v1481_v21, %v8328_v59 }
 0x174   :  { %6377 = vmatprep.subr.mxu0 %v7945_v63  ;;  %6327 = vmatpush3.msra.mxu1 %v7892_v25  ;;  %v5101_v10 = vsel %vm8343_vm3, 1.0, %v11254_v43 }
 0x175   :  { %6378 = vmatpush3.msra.mxu0 %v7945_v63  ;;  %6328 = vmatprep.subr.mxu1 %v7896_v28  ;;  %v1488_v22 = vsub.f32 %v1486_v4, %v8001_v20  ;;  %v1607_v12 = vmul.f32 %v1486_v4, %v7994_v17  ;;  %v1485_v13 = vmul.f32 %v5101_v10, %v8001_v20  ;;  %v8460_v4 = vld [vmem:[#allocation8 + $0x58] sm:$0xff]  ;;  %v5398_v10 = vpop.f32.mrf.mxu0 }
 0x176   :  { %6379 = vmatprep.subr.mxu0 %v7950_v1  ;;  %6329 = vmatpush3.msra.mxu1 %v7896_v28 }
 0x177   :  { %6380 = vmatpush3.msra.mxu0 %v7950_v1  ;;  %6330 = vmatprep.subr.mxu1 %v7900_v31  ;;  %vm8362_vm4 = vcmp.gt.f32.partialorder %v1488_v22, 0.0  ;;  %v1487_v14 = vsub.f32 %v1483_v11, %v1485_v13  ;;  %v1609_v19 = vadd.f32 %v1607_v12, %v8302_v49  ;;  %v8469_v13 = vld [vmem:[#allocation8 + $0x50] sm:$0xff] }
 0x178   :  { %6381 = vmatprep.subr.mxu0 %v7955_v3  ;;  %6331 = vmatpush3.msra.mxu1 %v7900_v31  ;;  %v5108_v15 = vsel %vm8362_vm4, 1.0, %v11254_v43 }
 0x179   :  { %6382 = vmatpush3.msra.mxu0 %v7955_v3  ;;  %6332 = vmatprep.subr.mxu1 %v7904_v34  ;;  %v1611_v28 = vmul.f32 %v5108_v15, %v8001_v20  ;;  %v1489_v2 = vsub.f32 %v1487_v14, %v8001_v20  ;;  %v1608_v24 = vmul.f32 %v1487_v14, %v7994_v17 }
 0x17a   :  { %6383 = vmatprep.subr.mxu0 %v7959_v5  ;;  %6333 = vmatpush3.msra.mxu1 %v7904_v34 }
 0x17b   :  { %6384 = vmatpush3.msra.mxu0 %v7959_v5  ;;  %6334 = vmatprep.subr.mxu1 %v7908_v37  ;;  %v1613_v31 = vsub.f32 %v1609_v19, %v1611_v28  ;;  %vm8381_vm5 = vcmp.gt.f32.partialorder %v1489_v2, 0.0  ;;  %v1610_v30 = vadd.f32 %v1608_v24, %v8328_v59  ;;  %v8483_v2 = vld [vmem:[#allocation8 + $0x48] sm:$0xff]  ;;  %v5400_v24 = vpop.f32.mrf.mxu0 }
 0x17c   :  { %6385 = vmatprep.subr.mxu0 %v7962_v6  ;;  %6335 = vmatpush3.msra.mxu1 %v7908_v37  ;;  %v5109_v29 = vsel %vm8381_vm5, 1.0, %v11254_v43 }
 0x17d   :  { %6386 = vmatpush3.msra.mxu0 %v7962_v6  ;;  %6336 = vmatprep.subr.mxu1 %v7912_v40  ;;  %v1615_v34 = vsub.f32 %v1613_v31, %v8001_v20  ;;  %v1718_v33 = vmul.f32 %v1613_v31, %v7994_v17  ;;  %v1612_v38 = vmul.f32 %v5109_v29, %v8001_v20 }
 0x17e   :  { %6387 = vmatprep.subr.mxu0 %v7971_v7  ;;  %6337 = vmatpush3.msra.mxu1 %v7912_v40 }
 0x17f   :  { %6388 = vmatpush3.msra.mxu0 %v7971_v7  ;;  %6338 = vmatprep.subr.mxu1 %v7934_v60  ;;  %v1614_v37 = vsub.f32 %v1610_v30, %v1612_v38  ;;  %vm8400_vm6 = vcmp.gt.f32.partialorder %v1615_v34, 0.0  ;;  %v1720_v42 = vadd.f32 %v1718_v33, %v8302_v49  ;;  %v8492_v34 = vld [vmem:[#allocation8 + $0x40] sm:$0xff]  ;;  %v5399_v38 = vadd.f32 %v5398_v10, %v5397_v54 }
 0x180   :  { %6390 = vmatmul.mubr.msk.f32.vlgmr.msra.gmra.mxu0 %vm8215_vm13, %v11252_v45  ;;  %6427 = vmatprep.subr.mxu0 %v8407_v41  ;;  %v5114_v40 = vsel %vm8400_vm6, 1.0, %v11254_v43 }
 0x181   :  { %6339 = vmatpush3.msra.mxu1 %v7934_v60  ;;  %6428 = vmatpush3.msra.mxu0 %v8407_v41  ;;  %v1616_v44 = vsub.f32 %v1614_v37, %v8001_v20  ;;  %v1719_v46 = vmul.f32 %v1614_v37, %v7994_v17  ;;  %v1722_v55 = vmul.f32 %v5114_v40, %v8001_v20 }
 0x182   :  { %6459 = vmatprep.mubr.msk.f32.mxu0 %vm8276_vm0, %v11252_v45  ;;  %6340 = vmatprep.subr.mxu1 %v7939_v61 }
 0x183   :  { %6429 = vmatprep.subr.mxu0 %v8423_v47  ;;  %6341 = vmatpush3.msra.mxu1 %v7939_v61  ;;  %v1724_v53 = vsub.f32 %v1720_v42, %v1722_v55  ;;  %vm8427_vm7 = vcmp.gt.f32.partialorder %v1616_v44, 0.0  ;;  %v1721_v51 = vadd.f32 %v1719_v46, %v8328_v59  ;;  %v8526_v55 = vadd.f32 %v5399_v38, %v7999_v18 }
 0x184   :  { %6430 = vmatpush3.msra.mxu0 %v8423_v47  ;;  %6342 = vmatprep.subr.mxu1 %v7945_v63  ;;  %v5115_v32 = vsel %vm8427_vm7, 1.0, %v11254_v43 }
 0x185   :  { %6431 = vmatprep.subr.mxu0 %v8437_v27  ;;  %6343 = vmatpush3.msra.mxu1 %v7945_v63  ;;  %v1726_v56 = vsub.f32 %v1724_v53, %v8001_v20  ;;  %v1829_v57 = vmul.f32 %v1724_v53, %v7994_v17  ;;  %v1723_v62 = vmul.f32 %v5115_v32, %v8001_v20 }
 0x186   :  { %6432 = vmatpush3.msra.mxu0 %v8437_v27  ;;  %6344 = vmatprep.subr.mxu1 %v7950_v1 }
 0x187   :  { %6433 = vmatprep.subr.mxu0 %v8446_v52  ;;  %6345 = vmatpush3.msra.mxu1 %v7950_v1  ;;  %vm8450_vm8 = vcmp.gt.f32.partialorder %v1726_v56, 0.0  ;;  %v1725_v0 = vsub.f32 %v1721_v51, %v1723_v62  ;;  %v1831_v23 = vadd.f32 %v1829_v57, %v8302_v49 }
 0x188   :  { %6434 = vmatpush3.msra.mxu0 %v8446_v52  ;;  %6346 = vmatprep.subr.mxu1 %v7955_v3  ;;  %v5120_v21 = vsel %vm8450_vm8, 1.0, %v11254_v43 }
 0x189   :  { %6435 = vmatprep.subr.mxu0 %v8460_v4  ;;  %6347 = vmatpush3.msra.mxu1 %v7955_v3  ;;  %v1833_v11 = vmul.f32 %v5120_v21, %v8001_v20  ;;  %v1727_v22 = vsub.f32 %v1725_v0, %v8001_v20  ;;  %v1830_v12 = vmul.f32 %v1725_v0, %v7994_v17 }
 0x18a   :  { %6436 = vmatpush3.msra.mxu0 %v8460_v4  ;;  %6348 = vmatprep.subr.mxu1 %v7959_v5 }
 0x18b   :  { %6437 = vmatprep.subr.mxu0 %v8469_v13  ;;  %6349 = vmatpush3.msra.mxu1 %v7959_v5  ;;  %v1835_v14 = vsub.f32 %v1831_v23, %v1833_v11  ;;  %vm8473_vm9 = vcmp.gt.f32.partialorder %v1727_v22, 0.0  ;;  %v1832_v28 = vadd.f32 %v1830_v12, %v8328_v59  ;;  %v8575_v11 = vld [vmem:[#allocation8 + $0x10] sm:$0xff] }
 0x18c   :  { %6438 = vmatpush3.msra.mxu0 %v8469_v13  ;;  %6350 = vmatprep.subr.mxu1 %v7962_v6  ;;  %v5121_v19 = vsel %vm8473_vm9, 1.0, %v11254_v43 }
 0x18d   :  { %6439 = vmatprep.subr.mxu0 %v8483_v2  ;;  %6351 = vmatpush3.msra.mxu1 %v7962_v6  ;;  %v1837_v31 = vsub.f32 %v1835_v14, %v8001_v20  ;;  %v1940_v29 = vmul.f32 %v1835_v14, %v7994_v17  ;;  %v1834_v30 = vmul.f32 %v5121_v19, %v8001_v20  ;;  %v8582_v14 = vld [vmem:[#allocation8 + $0x8] sm:$0xff]  ;;  %v8588_v19 = vld [vmem:[#allocation8 + $0x78] sm:$0xff] }
 0x18e   :  { %6440 = vmatpush3.msra.mxu0 %v8483_v2  ;;  %6352 = vmatprep.subr.mxu1 %v7971_v7 }
 0x18f   :  { %6441 = vmatprep.subr.mxu0 %v8492_v34  ;;  %6353 = vmatpush3.msra.mxu1 %v7971_v7  ;;  %v1836_v33 = vsub.f32 %v1832_v28, %v1834_v30  ;;  %vm8496_vm10 = vcmp.gt.f32.partialorder %v1837_v31, 0.0  ;;  %v1942_v40 = vadd.f32 %v1940_v29, %v8302_v49  ;;  %v5401_v7 = vpop.f32.mrf.mxu0  ;;  %v8594_v31 = vld [vmem:[#allocation8] sm:$0xff] }
 0x190   :  { %6442 = vmatpush3.msra.mxu0 %v8492_v34  ;;  %6355 = vmatmul.mubr.msk.f32.vlgmr.msra.gmra.mxu1 %vm8177_vm11, %v11252_v45  ;;  %v5126_v37 = vsel %vm8496_vm10, 1.0, %v11254_v43  ;;  %v5402_v53 = vadd.f32 %v5401_v7, %v5400_v24  ;;  %v8613_v7 = vld [vmem:[#allocation8 + $0x70] sm:$0xff] }
 0x191   :  { %6392 = vmatprep.subr.mxu1 %v8407_v41  ;;  %6443 = vmatprep.subr.mxu0 %v7934_v60  ;;  %v1838_v42 = vsub.f32 %v1836_v33, %v8001_v20  ;;  %v1941_v44 = vmul.f32 %v1836_v33, %v7994_v17  ;;  %v1944_v46 = vmul.f32 %v5126_v37, %v8001_v20  ;;  %v8603_v33 = vld [vmem:[#allocation8 + $0x38] sm:$0xff] }
 0x192   :  { %6393 = vmatpush3.msra.mxu1 %v8407_v41  ;;  %6424 = vmatprep.mubr.msk.f32.mxu1 %vm8236_vm14, %v11252_v45  ;;  %v8548_v56 = vadd.f32 %v5402_v53, %v7999_v18  ;;  %v8561_v18 = vld [vmem:[#allocation8 + $0x18] sm:$0xff] }
 0x193   :  { %6444 = vmatpush3.msra.mxu0 %v7934_v60  ;;  %6394 = vmatprep.subr.mxu1 %v8423_v47  ;;  %v1946_v36 = vsub.f32 %v1942_v40, %v1944_v46  ;;  %vm8519_vm11 = vcmp.gt.f32.partialorder %v1838_v42, 0.0  ;;  %v1943_v60 = vadd.f32 %v1941_v44, %v8328_v59  ;;  %v11351_v44 = vmov 0  ;;  %v8624_v46 = vld [vmem:[#allocation8 + $0x30] sm:$0xff] }
 0x194   :  { %6445 = vmatprep.subr.mxu0 %v7939_v61  ;;  %6395 = vmatpush3.msra.mxu1 %v8423_v47  ;;  %v5127_v8 = vsel %vm8519_vm11, 1.0, %v11254_v43 }
 0x195   :  { %6446 = vmatpush3.msra.mxu0 %v7939_v61  ;;  %6396 = vmatprep.subr.mxu1 %v8437_v27  ;;  %v1948_v32 = vsub.f32 %v1946_v36, %v8001_v20  ;;  %v2061_v51 = vmul.f32 %v1946_v36, %v7994_v17  ;;  %v1945_v54 = vmul.f32 %v5127_v8, %v8001_v20 }
 0x196   :  { %6447 = vmatprep.subr.mxu0 %v7945_v63  ;;  %6397 = vmatpush3.msra.mxu1 %v8437_v27 }
 0x197   :  { %6448 = vmatpush3.msra.mxu0 %v7945_v63  ;;  %6398 = vmatprep.subr.mxu1 %v8446_v52  ;;  %vm8541_vm12 = vcmp.gt.f32.partialorder %v1948_v32, 0.0  ;;  %v1947_v61 = vsub.f32 %v1943_v60, %v1945_v54  ;;  %v2063_v63 = vadd.f32 %v2061_v51, %v8526_v55  ;;  %v8639_v32 = vld [vmem:[#allocation8 + $0x28] sm:$0xff]  ;;  %v8642_v51 = vld [vmem:[#allocation8 + $0x60] sm:$0xff] }
 0x198   :  { %6449 = vmatprep.subr.mxu0 %v7950_v1  ;;  %6399 = vmatpush3.msra.mxu1 %v8446_v52  ;;  %v5132_v57 = vsel %vm8541_vm12, 1.0, %v11254_v43 }
 0x199   :  { %6450 = vmatpush3.msra.mxu0 %v7950_v1  ;;  %6400 = vmatprep.subr.mxu1 %v8460_v4  ;;  %v2065_v62 = vmul.f32 %v5132_v57, %v8001_v20  ;;  %v1949_v0 = vsub.f32 %v1947_v61, %v8001_v20  ;;  %v2062_v21 = vmul.f32 %v1947_v61, %v7994_v17  ;;  %v8651_v57 = vld [vmem:[#allocation8 + $0x20] sm:$0xff] }
 0x19a   :  { %6451 = vmatprep.subr.mxu0 %v7955_v3  ;;  %6401 = vmatpush3.msra.mxu1 %v8460_v4 }
 0x19b   :  { %6452 = vmatpush3.msra.mxu0 %v8561_v18  ;;  %6402 = vmatprep.subr.mxu1 %v8469_v13  ;;  %v2067_v23 = vsub.f32 %v2063_v63, %v2065_v62  ;;  %vm8565_vm13 = vcmp.gt.f32.partialorder %v1949_v0, 0.0  ;;  %v2064_v10 = vadd.f32 %v2062_v21, %v8548_v56  ;;  %v8654_v63 = vld [vmem:[#allocation8 + $0x58] sm:$0xff] }
 0x19c   :  { %6453 = vmatprep.subr.mxu0 %v7959_v5  ;;  %6403 = vmatpush3.msra.mxu1 %v8469_v13  ;;  %v5133_v3 = vsel %vm8565_vm13, 1.0, %v11254_v43 }
 0x19d   :  { %6454 = vmatpush3.msra.mxu0 %v8575_v11  ;;  %6404 = vmatprep.subr.mxu1 %v8483_v2  ;;  %v2069_v22 = vsub.f32 %v2067_v23, %v8001_v20  ;;  %v2188_v12 = vmul.f32 %v2067_v23, %v7994_v17  ;;  %v2066_v5 = vmul.f32 %v5133_v3, %v8001_v20 }
 0x19e   :  { %6455 = vmatprep.subr.mxu0 %v8582_v14  ;;  %6405 = vmatpush3.msra.mxu1 %v8483_v2 }
 0x19f   :  { %6456 = vmatpush3.msra.mxu0 %v8582_v14  ;;  %6406 = vmatprep.subr.mxu1 %v8492_v34  ;;  %v2068_v28 = vsub.f32 %v2064_v10, %v2066_v5  ;;  %vm8590_vm14 = vcmp.gt.f32.partialorder %v2069_v22, 0.0  ;;  %v2190_v30 = vadd.f32 %v2188_v12, %v8526_v55  ;;  %v8667_v10 = vld [vmem:[#allocation8 + $0x50] sm:$0xff]  ;;  %v8677_v5 = vld [vmem:[#allocation8 + $0x48] sm:$0xff] }
 0x1a0   :  { %6457 = vmatprep.subr.mxu0 %v8594_v31  ;;  %6407 = vmatpush3.msra.mxu1 %v8492_v34  ;;  %v5140_v29 = vsel %vm8590_vm14, 1.0, %v11254_v43 }
 0x1a1   :  { %6458 = vmatpush3.msra.mxu0 %v8594_v31  ;;  %6408 = vmatprep.subr.mxu1 %v8603_v33  ;;  %v2070_v38 = vsub.f32 %v2068_v28, %v8001_v20  ;;  %v2189_v37 = vmul.f32 %v2068_v28, %v7994_v17  ;;  %v2192_v40 = vmul.f32 %v5140_v29, %v8001_v20 }
 0x1a2   :  { %6460 = vmatmul.mubr.msk.f32.vlgmr.msra.gmra.mxu0 %vm8295_vm1, %v11252_v45  ;;  %6497 = vmatprep.subr.mxu0 %v8588_v19 }
 0x1a3   :  { %6409 = vmatpush3.msra.mxu1 %v8603_v33  ;;  %6498 = vmatpush3.msra.mxu0 %v8588_v19  ;;  %v2194_v42 = vsub.f32 %v2190_v30, %v2192_v40  ;;  %vm8617_vm0 = vcmp.gt.f32.partialorder %v2070_v38, 0.0  ;;  %v2191_v53 = vadd.f32 %v2189_v37, %v8548_v56  ;;  %v5403_v30 = vpop.f32.mrf.mxu0 }
 0x1a4   :  { %v11352_v44 = vsel %vm8617_vm0, 4294967295, %v11351_v44  ;;  %6529 = vmatprep.mubr.msk.f32.mxu0 %vm8362_vm4, %v11252_v45  ;;  %6410 = vmatprep.subr.mxu1 %v8624_v46  ;;  %v5141_v36 = vsel %vm8617_vm0, 1.0, %v11254_v43 }
 0x1a5   :  { %6499 = vmatprep.subr.mxu0 %v8613_v7  ;;  %6411 = vmatpush3.msra.mxu1 %v8624_v46  ;;  %v2196_v8 = vsub.f32 %v2194_v42, %v8001_v20  ;;  %v2299_v25 = vmul.f32 %v2194_v42, %v7994_v17  ;;  %v2193_v60 = vmul.f32 %v5141_v36, %v8001_v20  ;;  %v8690_v42 = vld [vmem:[#allocation8 + $0x40] sm:$0xff] }
 0x1a6   :  { %6500 = vmatpush3.msra.mxu0 %v8613_v7  ;;  %6412 = vmatprep.subr.mxu1 %v8639_v32 }
 0x1a7   :  { %6501 = vmatprep.subr.mxu0 %v8627_v48  ;;  %6413 = vmatpush3.msra.mxu1 %v8639_v32  ;;  %vm8646_vm1 = vcmp.gt.f32.partialorder %v2196_v8, 0.0  ;;  %v2195_v61 = vsub.f32 %v2191_v53, %v2193_v60  ;;  %v2301_v0 = vadd.f32 %v2299_v25, %v8526_v55  ;;  %v11357_v53 = vmov 0  ;;  %v8700_v8 = vld [vmem:[#allocation8 + $0x38] sm:$0xff] }
 0x1a8   :  { %6502 = vmatpush3.msra.mxu0 %v8627_v48  ;;  %6414 = vmatprep.subr.mxu1 %v8651_v57  ;;  %v5146_v62 = vsel %vm8646_vm1, 1.0, %v11254_v43 }
 0x1a9   :  { %6503 = vmatprep.subr.mxu0 %v8642_v51  ;;  %6415 = vmatpush3.msra.mxu1 %v8651_v57  ;;  %v2303_v21 = vmul.f32 %v5146_v62, %v8001_v20  ;;  %v2197_v23 = vsub.f32 %v2195_v61, %v8001_v20  ;;  %v2300_v3 = vmul.f32 %v2195_v61, %v7994_v17  ;;  %v5404_v61 = vpop.f32.mrf.mxu0 }
 0x1aa   :  { %6504 = vmatpush3.msra.mxu0 %v8642_v51  ;;  %6416 = vmatprep.subr.mxu1 %v8561_v18 }
 0x1ab   :  { %6505 = vmatprep.subr.mxu0 %v8654_v63  ;;  %6417 = vmatpush3.msra.mxu1 %v8561_v18  ;;  %v2305_v22 = vsub.f32 %v2301_v0, %v2303_v21  ;;  %vm8671_vm4 = vcmp.gt.f32.partialorder %v2197_v23, 0.0  ;;  %v2302_v29 = vadd.f32 %v2300_v3, %v8548_v56  ;;  %v8717_v23 = vld [vmem:[#allocation8 + $0x30] sm:$0xff] }
 0x1ac   :  { %6506 = vmatpush3.msra.mxu0 %v8654_v63  ;;  %6418 = vmatprep.subr.mxu1 %v8575_v11  ;;  %v5147_v28 = vsel %vm8671_vm4, 1.0, %v11254_v43 }
 0x1ad   :  { %6507 = vmatprep.subr.mxu0 %v8667_v10  ;;  %6419 = vmatpush3.msra.mxu1 %v8575_v11  ;;  %v2307_v38 = vsub.f32 %v2305_v22, %v8001_v20  ;;  %v2410_v37 = vmul.f32 %v2305_v22, %v7994_v17  ;;  %v2304_v40 = vmul.f32 %v5147_v28, %v8001_v20  ;;  %v11359_v22 = vmov 0 }
 0x1ae   :  { %6508 = vmatpush3.msra.mxu0 %v8667_v10  ;;  %6420 = vmatprep.subr.mxu1 %v8582_v14 }
 0x1af   :  { %6509 = vmatprep.subr.mxu0 %v8677_v5  ;;  %6421 = vmatpush3.msra.mxu1 %v8582_v14  ;;  %v2306_v36 = vsub.f32 %v2302_v29, %v2304_v40  ;;  %vm8694_vm0 = vcmp.gt.f32.partialorder %v2307_v38, 0.0  ;;  %v2412_v60 = vadd.f32 %v2410_v37, %v8526_v55  ;;  %v8733_v29 = vld [vmem:[#allocation8 + $0x28] sm:$0xff]  ;;  %v5406_v38 = vpop.f32.mrf.mxu0  ;;  %v8742_v40 = vld [vmem:[#allocation8 + $0x20] sm:$0xff] }
 0x1b0   :  { %v11358_v53 = vsel %vm8694_vm0, 4294967295, %v11357_v53  ;;  %6510 = vmatpush3.msra.mxu0 %v8677_v5  ;;  %6422 = vmatprep.subr.mxu1 %v8594_v31  ;;  %v5152_v25 = vsel %vm8694_vm0, 1.0, %v11254_v43 }
 0x1b1   :  { %6511 = vmatprep.subr.mxu0 %v8690_v42  ;;  %6423 = vmatpush3.msra.mxu1 %v8594_v31  ;;  %v2308_v62 = vsub.f32 %v2306_v36, %v8001_v20  ;;  %v2411_v0 = vmul.f32 %v2306_v36, %v7994_v17  ;;  %v2414_v21 = vmul.f32 %v5152_v25, %v8001_v20 }
 0x1b2   :  { %6512 = vmatpush3.msra.mxu0 %v8690_v42  ;;  %6425 = vmatmul.mubr.msk.f32.vlgmr.msra.gmra.mxu1 %vm8257_vm15, %v11252_v45 }
 0x1b3   :  { %6462 = vmatprep.subr.mxu1 %v8407_v41  ;;  %6513 = vmatprep.subr.mxu0 %v8700_v8  ;;  %v2416_v3 = vsub.f32 %v2412_v60, %v2414_v21  ;;  %vm8719_vm0 = vcmp.gt.f32.partialorder %v2308_v62, 0.0  ;;  %v2413_v28 = vadd.f32 %v2411_v0, %v8548_v56  ;;  %v5405_v60 = vadd.f32 %v5404_v61, %v5403_v30  ;;  %v8756_v0 = vld [vmem:[#allocation8 + $0x18] sm:$0xff]  ;;  %v5407_v21 = vpop.f32.mrf.mxu0 }
 0x1b4   :  { %v11360_v22 = vsel %vm8719_vm0, 4294967295, %v11359_v22  ;;  %6463 = vmatpush3.msra.mxu1 %v8407_v41  ;;  %6494 = vmatprep.mubr.msk.f32.mxu1 %vm8319_vm2, %v11252_v45  ;;  %v5153_v16 = vsel %vm8719_vm0, 1.0, %v11254_v43 }
 0x1b5   :  { %6514 = vmatpush3.msra.mxu0 %v8700_v8  ;;  %6464 = vmatprep.subr.mxu1 %v8423_v47  ;;  %v2418_v37 = vsub.f32 %v2416_v3, %v8001_v20  ;;  %v2521_v41 = vmul.f32 %v2416_v3, %v7994_v17  ;;  %v2415_v58 = vmul.f32 %v5153_v16, %v8001_v20  ;;  %v5409_v9 = vpop.f32.mrf.mxu0 }
 0x1b6   :  { %6515 = vmatprep.subr.mxu0 %v8717_v23  ;;  %6465 = vmatpush3.msra.mxu1 %v8423_v47 }
 0x1b7   :  { %6516 = vmatpush3.msra.mxu0 %v8717_v23  ;;  %6466 = vmatprep.subr.mxu1 %v8437_v27  ;;  %vm8744_vm15 = vcmp.gt.f32.partialorder %v2418_v37, 0.0  ;;  %v2417_v25 = vsub.f32 %v2413_v28, %v2415_v58  ;;  %v2523_v62 = vadd.f32 %v2521_v41, %v8526_v55  ;;  %v8765_v55 = vld [vmem:[#allocation8 + $0x10] sm:$0xff]  ;;  %v8776_v28 = vld [vmem:[%s11234_s2] ss:$0 sm:$0xff]  ;;  %v5408_v37 = vadd.f32 %v5407_v21, %v5406_v38 }
 0x1b8   :  { %6517 = vmatprep.subr.mxu0 %v8733_v29  ;;  %6467 = vmatpush3.msra.mxu1 %v8437_v27  ;;  %v5158_v47 = vsel %vm8744_vm15, 1.0, %v11254_v43 }
 0x1b9   :  { %6518 = vmatpush3.msra.mxu0 %v8733_v29  ;;  %6468 = vmatprep.subr.mxu1 %v8446_v52  ;;  %v2525_v3 = vmul.f32 %v5158_v47, %v8001_v20  ;;  %v2419_v16 = vsub.f32 %v2417_v25, %v8001_v20  ;;  %v2522_v27 = vmul.f32 %v2417_v25, %v7994_v17 }
 0x1ba   :  { %6519 = vmatprep.subr.mxu0 %v8742_v40  ;;  %6469 = vmatpush3.msra.mxu1 %v8446_v52  ;;  %v8779_v52 = vadd.f32 %v8776_v28, %v5405_v60  ;;  %v8805_v21 = vadd.f32 %v8776_v28, %v5408_v37  ;;  %v11367_v37 = vmov 0 }
 0x1bb   :  { %6520 = vmatpush3.msra.mxu0 %v8742_v40  ;;  %6470 = vmatprep.subr.mxu1 %v8460_v4  ;;  %v2527_v30 = vsub.f32 %v2523_v62, %v2525_v3  ;;  %vm8767_vm2 = vcmp.gt.f32.partialorder %v2419_v16, 0.0  ;;  %v2524_v58 = vadd.f32 %v2522_v27, %v8548_v56  ;;  %v8796_v56 = vld [vmem:[#allocation8] sm:$0xff]  ;;  %v11365_v62 = vmov 0 }
 0x1bc   :  { %6521 = vmatprep.subr.mxu0 %v8756_v0  ;;  %6471 = vmatpush3.msra.mxu1 %v8460_v4  ;;  %v5159_v41 = vsel %vm8767_vm2, 1.0, %v11254_v43  ;;  %v8787_v4 = vld [vmem:[#allocation8 + $0x8] sm:$0xff] }
 0x1bd   :  { %6522 = vmatpush3.msra.mxu0 %v8756_v0  ;;  %6472 = vmatprep.subr.mxu1 %v8469_v13  ;;  %v2529_v25 = vsub.f32 %v2527_v30, %v8001_v20  ;;  %v2642_v47 = vmul.f32 %v2527_v30, %v7994_v17  ;;  %v2526_v60 = vmul.f32 %v5159_v41, %v8001_v20 }
 0x1be   :  { %6523 = vmatprep.subr.mxu0 %v8765_v55  ;;  %6473 = vmatpush3.msra.mxu1 %v8469_v13 }
 0x1bf   :  { %6524 = vmatpush3.msra.mxu0 %v8765_v55  ;;  %6474 = vmatprep.subr.mxu1 %v8483_v2  ;;  %v2528_v38 = vsub.f32 %v2524_v58, %v2526_v60  ;;  %vm8798_vm0 = vcmp.gt.f32.partialorder %v2529_v25, 0.0  ;;  %v2644_v3 = vadd.f32 %v2642_v47, %v8779_v52 }
 0x1c0   :  { %v11366_v62 = vsel %vm8798_vm0, 4294967295, %v11365_v62  ;;  %6525 = vmatprep.subr.mxu0 %v8787_v4  ;;  %6475 = vmatpush3.msra.mxu1 %v8483_v2  ;;  %v5164_v13 = vsel %vm8798_vm0, 1.0, %v11254_v43 }
 0x1c1   :  { %6526 = vmatpush3.msra.mxu0 %v8787_v4  ;;  %6476 = vmatprep.subr.mxu1 %v8492_v34  ;;  %v2530_v16 = vsub.f32 %v2528_v38, %v8001_v20  ;;  %v2643_v27 = vmul.f32 %v2528_v38, %v7994_v17  ;;  %v2646_v30 = vmul.f32 %v5164_v13, %v8001_v20 }
 0x1c2   :  { %6527 = vmatprep.subr.mxu0 %v8796_v56  ;;  %6477 = vmatpush3.msra.mxu1 %v8492_v34 }
 0x1c3   :  { %6528 = vmatpush3.msra.mxu0 %v8796_v56  ;;  %6478 = vmatprep.subr.mxu1 %v8603_v33  ;;  %v2648_v2 = vsub.f32 %v2644_v3, %v2646_v30  ;;  %vm8820_vm0 = vcmp.gt.f32.partialorder %v2530_v16, 0.0  ;;  %v2645_v34 = vadd.f32 %v2643_v27, %v8805_v21 }
 0x1c4   :  { %v11368_v37 = vsel %vm8820_vm0, 4294967295, %v11367_v37  ;;  %6530 = vmatmul.mubr.msk.f32.vlgmr.msra.gmra.mxu0 %vm8381_vm5, %v11252_v45  ;;  %6567 = vmatprep.subr.mxu0 %v8588_v19  ;;  %v5165_v41 = vsel %vm8820_vm0, 1.0, %v11254_v43 }
 0x1c5   :  { %6479 = vmatpush3.msra.mxu1 %v8603_v33  ;;  %6568 = vmatpush3.msra.mxu0 %v8588_v19  ;;  %v2650_v58 = vsub.f32 %v2648_v2, %v8001_v20  ;;  %v2769_v25 = vmul.f32 %v2648_v2, %v7994_v17  ;;  %v2647_v47 = vmul.f32 %v5165_v41, %v8001_v20 }
 0x1c6   :  { %6599 = vmatprep.mubr.msk.f32.mxu0 %vm8450_vm8, %v11252_v45  ;;  %6480 = vmatprep.subr.mxu1 %v8624_v46 }
 0x1c7   :  { %6569 = vmatprep.subr.mxu0 %v8613_v7  ;;  %6481 = vmatpush3.msra.mxu1 %v8624_v46  ;;  %vm8843_vm5 = vcmp.gt.f32.partialorder %v2650_v58, 0.0  ;;  %v2649_v33 = vsub.f32 %v2645_v34, %v2647_v47  ;;  %v2771_v60 = vadd.f32 %v2769_v25, %v8779_v52  ;;  %v11373_v34 = vmov 0 }
 0x1c8   :  { %6570 = vmatpush3.msra.mxu0 %v8613_v7  ;;  %6482 = vmatprep.subr.mxu1 %v8639_v32  ;;  %v5172_v35 = vsel %vm8843_vm5, 1.0, %v11254_v43 }
 0x1c9   :  { %6571 = vmatprep.subr.mxu0 %v8627_v48  ;;  %6483 = vmatpush3.msra.mxu1 %v8639_v32  ;;  %v2773_v46 = vmul.f32 %v5172_v35, %v8001_v20  ;;  %v2651_v38 = vsub.f32 %v2649_v33, %v8001_v20  ;;  %v2770_v13 = vmul.f32 %v2649_v33, %v7994_v17  ;;  %v11375_v35 = vmov 0 }
 0x1ca   :  { %6572 = vmatpush3.msra.mxu0 %v8627_v48  ;;  %6484 = vmatprep.subr.mxu1 %v8651_v57 }
 0x1cb   :  { %6573 = vmatprep.subr.mxu0 %v8642_v51  ;;  %6485 = vmatpush3.msra.mxu1 %v8651_v57  ;;  %v2775_v3 = vsub.f32 %v2771_v60, %v2773_v46  ;;  %vm8862_vm8 = vcmp.gt.f32.partialorder %v2651_v38, 0.0  ;;  %v2772_v27 = vadd.f32 %v2770_v13, %v8805_v21 }
 0x1cc   :  { %6574 = vmatpush3.msra.mxu0 %v8642_v51  ;;  %6486 = vmatprep.subr.mxu1 %v8561_v18  ;;  %v5173_v32 = vsel %vm8862_vm8, 1.0, %v11254_v43 }
 0x1cd   :  { %6575 = vmatprep.subr.mxu0 %v8654_v63  ;;  %6487 = vmatpush3.msra.mxu1 %v8561_v18  ;;  %v2777_v57 = vsub.f32 %v2775_v3, %v8001_v20  ;;  %v2880_v30 = vmul.f32 %v2775_v3, %v7994_v17  ;;  %v2774_v2 = vmul.f32 %v5173_v32, %v8001_v20 }
 0x1ce   :  { %6576 = vmatpush3.msra.mxu0 %v8654_v63  ;;  %6488 = vmatprep.subr.mxu1 %v8575_v11 }
 0x1cf   :  { %6577 = vmatprep.subr.mxu0 %v8667_v10  ;;  %6489 = vmatpush3.msra.mxu1 %v8575_v11  ;;  %v2776_v41 = vsub.f32 %v2772_v27, %v2774_v2  ;;  %vm8881_vm0 = vcmp.gt.f32.partialorder %v2777_v57, 0.0  ;;  %v2882_v58 = vadd.f32 %v2880_v30, %v8779_v52  ;;  %v5410_v2 = vpop.f32.mrf.mxu0 }
 0x1d0   :  { %v11374_v34 = vsel %vm8881_vm0, 4294967295, %v11373_v34  ;;  %6578 = vmatpush3.msra.mxu0 %v8667_v10  ;;  %6490 = vmatprep.subr.mxu1 %v8582_v14  ;;  %v5178_v18 = vsel %vm8881_vm0, 1.0, %v11254_v43 }
 0x1d1   :  { %6579 = vmatprep.subr.mxu0 %v8677_v5  ;;  %6491 = vmatpush3.msra.mxu1 %v8582_v14  ;;  %v2778_v11 = vsub.f32 %v2776_v41, %v8001_v20  ;;  %v2881_v25 = vmul.f32 %v2776_v41, %v7994_v17  ;;  %v2884_v47 = vmul.f32 %v5178_v18, %v8001_v20 }
 0x1d2   :  { %6580 = vmatpush3.msra.mxu0 %v8677_v5  ;;  %6492 = vmatprep.subr.mxu1 %v8594_v31 }
 0x1d3   :  { %6581 = vmatprep.subr.mxu0 %v8690_v42  ;;  %6493 = vmatpush3.msra.mxu1 %v8594_v31  ;;  %v2886_v33 = vsub.f32 %v2882_v58, %v2884_v47  ;;  %vm8900_vm0 = vcmp.gt.f32.partialorder %v2778_v11, 0.0  ;;  %v2883_v60 = vadd.f32 %v2881_v25, %v8805_v21 }
 0x1d4   :  { %v11376_v35 = vsel %vm8900_vm0, 4294967295, %v11375_v35  ;;  %6582 = vmatpush3.msra.mxu0 %v8690_v42  ;;  %6495 = vmatmul.mubr.msk.f32.vlgmr.msra.gmra.mxu1 %vm8343_vm3, %v11252_v45  ;;  %v5179_v14 = vsel %vm8900_vm0, 1.0, %v11254_v43 }
 0x1d5   :  { %6532 = vmatprep.subr.mxu1 %v8588_v19  ;;  %6583 = vmatprep.subr.mxu0 %v8700_v8  ;;  %v2888_v31 = vsub.f32 %v2886_v33, %v8001_v20  ;;  %v2991_v46 = vmul.f32 %v2886_v33, %v7994_v17  ;;  %v2885_v38 = vmul.f32 %v5179_v14, %v8001_v20  ;;  %v5412_v14 = vpop.f32.mrf.mxu0 }
 0x1d6   :  { %6533 = vmatpush3.msra.mxu1 %v8588_v19  ;;  %6564 = vmatprep.mubr.msk.f32.mxu1 %vm8400_vm6, %v11252_v45 }
 0x1d7   :  { %6584 = vmatpush3.msra.mxu0 %v8700_v8  ;;  %6534 = vmatprep.subr.mxu1 %v8613_v7  ;;  %vm8923_vm3 = vcmp.gt.f32.partialorder %v2888_v31, 0.0  ;;  %v2887_v3 = vsub.f32 %v2883_v60, %v2885_v38  ;;  %v2993_v39 = vadd.f32 %v2991_v46, %v8779_v52  ;;  %v11381_v31 = vmov 0 }
 0x1d8   :  { %6585 = vmatprep.subr.mxu0 %v8717_v23  ;;  %6535 = vmatpush3.msra.mxu1 %v8613_v7  ;;  %v5184_v32 = vsel %vm8923_vm3, 1.0, %v11254_v43  ;;  %v5411_v46 = vadd.f32 %v5410_v2, %v5409_v9  ;;  %v5413_v9 = vpop.f32.mrf.mxu0 }
 0x1d9   :  { %6586 = vmatpush3.msra.mxu0 %v8717_v23  ;;  %6536 = vmatprep.subr.mxu1 %v8627_v48  ;;  %v2995_v27 = vmul.f32 %v5184_v32, %v8001_v20  ;;  %v2889_v57 = vsub.f32 %v2887_v3, %v8001_v20  ;;  %v2992_v30 = vmul.f32 %v2887_v3, %v7994_v17 }
 0x1da   :  { %6587 = vmatprep.subr.mxu0 %v8733_v29  ;;  %6537 = vmatpush3.msra.mxu1 %v8627_v48 }
 0x1db   :  { %6588 = vmatpush3.msra.mxu0 %v8733_v29  ;;  %6538 = vmatprep.subr.mxu1 %v8642_v51  ;;  %v2997_v41 = vsub.f32 %v2993_v39, %v2995_v27  ;;  %vm8942_vm6 = vcmp.gt.f32.partialorder %v2889_v57, 0.0  ;;  %v2994_v11 = vadd.f32 %v2992_v30, %v8805_v21  ;;  %v11384_v57 = vmov 0 }
 0x1dc   :  { %6589 = vmatprep.subr.mxu0 %v8742_v40  ;;  %6539 = vmatpush3.msra.mxu1 %v8642_v51  ;;  %v5185_v58 = vsel %vm8942_vm6, 1.0, %v11254_v43  ;;  %v8987_v30 = vadd.f32 %v8776_v28, %v5411_v46 }
 0x1dd   :  { %6590 = vmatpush3.msra.mxu0 %v8742_v40  ;;  %6540 = vmatprep.subr.mxu1 %v8654_v63  ;;  %v2999_v25 = vsub.f32 %v2997_v41, %v8001_v20  ;;  %v3102_v47 = vmul.f32 %v2997_v41, %v7994_v17  ;;  %v2996_v33 = vmul.f32 %v5185_v58, %v8001_v20 }
 0x1de   :  { %6591 = vmatprep.subr.mxu0 %v8756_v0  ;;  %6541 = vmatpush3.msra.mxu1 %v8654_v63 }
 0x1df   :  { %6592 = vmatpush3.msra.mxu0 %v8756_v0  ;;  %6542 = vmatprep.subr.mxu1 %v8667_v10  ;;  %v2998_v60 = vsub.f32 %v2994_v11, %v2996_v33  ;;  %vm8961_vm0 = vcmp.gt.f32.partialorder %v2999_v25, 0.0  ;;  %v3104_v3 = vadd.f32 %v3102_v47, %v8779_v52  ;;  %v5414_v47 = vadd.f32 %v5413_v9, %v5412_v14 }
 0x1e0   :  { %v11382_v31 = vsel %vm8961_vm0, 4294967295, %v11381_v31  ;;  %6593 = vmatprep.subr.mxu0 %v8765_v55  ;;  %6543 = vmatpush3.msra.mxu1 %v8667_v10  ;;  %v5190_v38 = vsel %vm8961_vm0, 1.0, %v11254_v43 }
 0x1e1   :  { %11383 = vst [vmem:[#allocation22_spill] sm:$0xff] %v11382_v31  ;;  %6594 = vmatpush3.msra.mxu0 %v8765_v55  ;;  %6544 = vmatprep.subr.mxu1 %v8677_v5  ;;  %v3000_v32 = vsub.f32 %v2998_v60, %v8001_v20  ;;  %v3103_v39 = vmul.f32 %v2998_v60, %v7994_v17 }
 0x1e2   :  { %v3106_v27 = vmul.f32 %v5190_v38, %v8001_v20  ;;  %6595 = vmatprep.subr.mxu0 %v8787_v4  ;;  %6545 = vmatpush3.msra.mxu1 %v8677_v5  ;;  %v9023_v59 = vadd.f32 %v8776_v28, %v5414_v47 }
 0x1e3   :  { %6596 = vmatpush3.msra.mxu0 %v8787_v4  ;;  %6546 = vmatprep.subr.mxu1 %v8690_v42  ;;  %vm8980_vm0 = vcmp.gt.f32.partialorder %v3000_v32, 0.0  ;;  %v3105_v41 = vadd.f32 %v3103_v39, %v8805_v21  ;;  %v11389_v32 = vmov 0 }
 0x1e4   :  { %v3108_v52 = vsub.f32 %v3104_v3, %v3106_v27  ;;  %v11385_v57 = vsel %vm8980_vm0, 4294967295, %v11384_v57  ;;  %6597 = vmatprep.subr.mxu0 %v8796_v56  ;;  %6547 = vmatpush3.msra.mxu1 %v8690_v42  ;;  %v5191_v2 = vsel %vm8980_vm0, 1.0, %v11254_v43 }
 0x1e5   :  { %11386 = vst [vmem:[#allocation23_spill] sm:$0xff] %v11385_v57  ;;  %6598 = vmatpush3.msra.mxu0 %v8796_v56  ;;  %6548 = vmatprep.subr.mxu1 %v8700_v8  ;;  %v3107_v25 = vmul.f32 %v5191_v2, %v8001_v20  ;;  %v11405_v57 = vmov 0 }
 0x1e6   :  { %v3110_v58 = vsub.f32 %v3108_v52, %v8001_v20  ;;  %v3223_v11 = vmul.f32 %v3108_v52, %v7994_v17  ;;  %6600 = vmatmul.mubr.msk.f32.vlgmr.msra.gmra.mxu0 %vm8473_vm9, %v11252_v45  ;;  %6637 = vmatprep.subr.mxu0 %v8588_v19 }
 0x1e7   :  { %6549 = vmatpush3.msra.mxu1 %v8700_v8  ;;  %6638 = vmatpush3.msra.mxu0 %v8588_v19  ;;  %v3109_v33 = vsub.f32 %v3105_v41, %v3107_v25  ;;  %v11392_v41 = vmov 0 }
 0x1e8   :  { %vm9004_vm0 = vcmp.gt.f32.partialorder %v3110_v58, 0.0  ;;  %6669 = vmatprep.mubr.msk.f32.mxu0 %vm8541_vm12, %v11252_v45  ;;  %6550 = vmatprep.subr.mxu1 %v8717_v23  ;;  %v3225_v14 = vadd.f32 %v3223_v11, %v8987_v30 }
 0x1e9   :  { %v5196_v15 = vsel %vm9004_vm0, 1.0, %v11254_v43  ;;  %6639 = vmatprep.subr.mxu0 %v8613_v7  ;;  %6551 = vmatpush3.msra.mxu1 %v8717_v23  ;;  %v3111_v46 = vsub.f32 %v3109_v33, %v8001_v20  ;;  %v3224_v38 = vmul.f32 %v3109_v33, %v7994_v17 }
 0x1ea   :  { %v3227_v60 = vmul.f32 %v5196_v15, %v8001_v20  ;;  %6640 = vmatpush3.msra.mxu0 %v8613_v7  ;;  %6552 = vmatprep.subr.mxu1 %v8733_v29 }
 0x1eb   :  { %6641 = vmatprep.subr.mxu0 %v8627_v48  ;;  %6553 = vmatpush3.msra.mxu1 %v8733_v29  ;;  %vm9028_vm9 = vcmp.gt.f32.partialorder %v3111_v46, 0.0  ;;  %v3226_v52 = vadd.f32 %v3224_v38, %v9023_v59  ;;  %v9076_v46 = vld [vmem:[%s11236_s4] ss:$0 sm:$0xff] }
 0x1ec   :  { %v3229_v3 = vsub.f32 %v3225_v14, %v3227_v60  ;;  %v11390_v32 = vsel %vm9028_vm9, 4294967295, %v11389_v32  ;;  %6642 = vmatpush3.msra.mxu0 %v8627_v48  ;;  %6554 = vmatprep.subr.mxu1 %v8742_v40  ;;  %v5197_v39 = vsel %vm9028_vm9, 1.0, %v11254_v43  ;;  %v6181_v47 = vpop.f32.mrf.mxu1  ;;  %v9071_v60 = vstv %s7978_s15 }
 0x1ed   :  { %11391 = vst [vmem:[#allocation24_spill] sm:$0xff] %v11390_v32  ;;  %6643 = vmatprep.subr.mxu0 %v8642_v51  ;;  %6555 = vmatpush3.msra.mxu1 %v8742_v40  ;;  %v3228_v2 = vmul.f32 %v5197_v39, %v8001_v20  ;;  %v11408_v32 = vmov 0 }
 0x1ee   :  { %v3231_v27 = vsub.f32 %v3229_v3, %v8001_v20  ;;  %v3350_v9 = vmul.f32 %v3229_v3, %v7994_v17  ;;  %6644 = vmatpush3.msra.mxu0 %v8642_v51  ;;  %6556 = vmatprep.subr.mxu1 %v8756_v0  ;;  %v11395_v3 = vmov 0 }
 0x1ef   :  { %6645 = vmatprep.subr.mxu0 %v8654_v63  ;;  %6557 = vmatpush3.msra.mxu1 %v8756_v0  ;;  %v3230_v58 = vsub.f32 %v3226_v52, %v3228_v2 }
 0x1f0   :  { %vm9047_vm12 = vcmp.gt.f32.partialorder %v3231_v27, 0.0  ;;  %6646 = vmatpush3.msra.mxu0 %v8654_v63  ;;  %6558 = vmatprep.subr.mxu1 %v8765_v55  ;;  %v3352_v25 = vadd.f32 %v3350_v9, %v8987_v30  ;;  %v419_v9 = vpop.f32.mrf.mxu1 }
 0x1f1   :  { %v11393_v41 = vsel %vm9047_vm12, 4294967295, %v11392_v41  ;;  %v5204_v11 = vsel %vm9047_vm12, 1.0, %v11254_v43  ;;  %6647 = vmatprep.subr.mxu0 %v8667_v10  ;;  %6559 = vmatpush3.msra.mxu1 %v8765_v55  ;;  %v3232_v33 = vsub.f32 %v3230_v58, %v8001_v20  ;;  %v3351_v15 = vmul.f32 %v3230_v58, %v7994_v17 }
 0x1f2   :  { %11394 = vst [vmem:[#allocation25_spill] sm:$0xff] %v11393_v41  ;;  %6648 = vmatpush3.msra.mxu0 %v8667_v10  ;;  %6560 = vmatprep.subr.mxu1 %v8787_v4  ;;  %v3354_v14 = vmul.f32 %v5204_v11, %v8001_v20  ;;  %v425_v11 = vadd.f32 %v6181_v47, %v9076_v46 }
 0x1f3   :  { %6649 = vmatprep.subr.mxu0 %v8677_v5  ;;  %6561 = vmatpush3.msra.mxu1 %v8787_v4  ;;  %vm9078_vm12 = vcmp.gt.f32.partialorder %v3232_v33, 0.0  ;;  %v3353_v27 = vadd.f32 %v3351_v15, %v9023_v59  ;;  %v9099_v33 = vpop.f32.mrf.mxu0  ;;  %v9102_v15 = vstv %s7983_s17  ;;  %v420_v47 = vadd.f32 %v9076_v46, %v419_v9 }
 0x1f4   :  { %6650 = vmatpush3.msra.mxu0 %v8677_v5  ;;  %6562 = vmatprep.subr.mxu1 %v8796_v56  ;;  %v3356_v38 = vsub.f32 %v3352_v25, %v3354_v14  ;;  %v11396_v3 = vsel %vm9078_vm12, 4294967295, %v11395_v3  ;;  %v5205_v39 = vsel %vm9078_vm12, 1.0, %v11254_v43  ;;  %v428_v25 = vmul.f32 0.0, %v9071_v60 }
 0x1f5   :  { %11397 = vst [vmem:[#allocation26_spill] sm:$0xff] %v11396_v3  ;;  %6651 = vmatprep.subr.mxu0 %v8690_v42  ;;  %6563 = vmatpush3.msra.mxu1 %v8796_v56  ;;  %v3355_v58 = vmul.f32 %v5205_v39, %v8001_v20  ;;  %v431_v9 = vmul.f32 0.0, %v9102_v15 }
 0x1f6   :  { %6652 = vmatpush3.msra.mxu0 %v8690_v42  ;;  %6565 = vmatmul.mubr.msk.f32.vlgmr.msra.gmra.mxu1 %vm8427_vm7, %v11252_v45  ;;  %v3358_v52 = vsub.f32 %v3356_v38, %v8001_v20  ;;  %v3461_v2 = vmul.f32 %v3356_v38, %v7994_v17 }
 0x1f7   :  { %6602 = vmatprep.subr.mxu1 %v8588_v19  ;;  %6653 = vmatprep.subr.mxu0 %v8700_v8  ;;  %v3357_v14 = vsub.f32 %v3353_v27, %v3355_v58  ;;  %v9124_v58 = vadd.f32 %v428_v25, %v425_v11  ;;  %v9138_v11 = vadd.f32 %v428_v25, %v420_v47 }
 0x1f8   :  { %6603 = vmatpush3.msra.mxu1 %v8588_v19  ;;  %6634 = vmatprep.mubr.msk.f32.mxu1 %vm8496_vm10, %v11252_v45  ;;  %vm9108_vm7 = vcmp.gt.f32.partialorder %v3358_v52, 0.0  ;;  %v3463_v39 = vadd.f32 %v3461_v2, %v8987_v30  ;;  %v9130_v45 = vstv %s9068_s25  ;;  %v5416_v2 = vpop.f32.mrf.mxu0 }
 0x1f9   :  { %v11399_v50 = vsel %vm9108_vm7, 4294967295, %v11398_v50  ;;  %6654 = vmatpush3.msra.mxu0 %v8700_v8  ;;  %6604 = vmatprep.subr.mxu1 %v8613_v7  ;;  %v5210_v38 = vsel %vm9108_vm7, 1.0, %v11254_v43  ;;  %v3359_v27 = vsub.f32 %v3357_v14, %v8001_v20  ;;  %v3462_v52 = vmul.f32 %v3357_v14, %v7994_v17 }
 0x1fa   :  { %11400 = vst [vmem:[#allocation27_spill] sm:$0xff] %v11399_v50  ;;  %6655 = vmatprep.subr.mxu0 %v8717_v23  ;;  %6605 = vmatpush3.msra.mxu1 %v8613_v7  ;;  %v3465_v6 = vmul.f32 %v5210_v38, %v8001_v20  ;;  %v11401_v43 = vmov 0  ;;  %v11404_v14 = vmov 0.0   ;;  %v433_v47 = vadd.f32 %v431_v9, %v9124_v58 }
 0x1fb   :  { %6656 = vmatpush3.msra.mxu0 %v8717_v23  ;;  %6606 = vmatprep.subr.mxu1 %v8627_v48  ;;  %vm9134_vm10 = vcmp.gt.f32.partialorder %v3359_v27, 0.0  ;;  %v3464_v41 = vadd.f32 %v3462_v52, %v9023_v59  ;;  %v434_v27 = vmul.f32 0.0, %v9130_v45 }
 0x1fc   :  { %6657 = vmatprep.subr.mxu0 %v8733_v29  ;;  %6607 = vmatpush3.msra.mxu1 %v8627_v48  ;;  %v3467_v38 = vsub.f32 %v3463_v39, %v3465_v6  ;;  %v11402_v43 = vsel %vm9134_vm10, 4294967295, %v11401_v43  ;;  %v5211_v3 = vsel %vm9134_vm10, 1.0, %v11404_v14 }
 0x1fd   :  { %11403 = vst [vmem:[#allocation28_spill] sm:$0xff] %v11402_v43  ;;  %6658 = vmatpush3.msra.mxu0 %v8733_v29  ;;  %6608 = vmatprep.subr.mxu1 %v8642_v51  ;;  %v3466_v25 = vmul.f32 %v5211_v3, %v8001_v20  ;;  %v5418_v43 = vpop.f32.mrf.mxu0  ;;  %v432_v3 = vadd.f32 %v431_v9, %v9138_v11 }
 0x1fe   :  { %6659 = vmatprep.subr.mxu0 %v8742_v40  ;;  %6609 = vmatpush3.msra.mxu1 %v8642_v51  ;;  %v3469_v39 = vsub.f32 %v3467_v38, %v8001_v20  ;;  %v3572_v6 = vmul.f32 %v3467_v38, %v7994_v17 }
 0x1ff   :  { %6660 = vmatpush3.msra.mxu0 %v8742_v40  ;;  %6610 = vmatprep.subr.mxu1 %v8654_v63  ;;  %v3468_v52 = vsub.f32 %v3464_v41, %v3466_v25  ;;  %v9173_v25 = vsub.f32 %v433_v47, %v434_v27  ;;  %v9183_v31 = vsub.f32 %v432_v3, %v434_v27 }
 0x200   :  { %6661 = vmatprep.subr.mxu0 %v8756_v0  ;;  %6611 = vmatpush3.msra.mxu1 %v8654_v63  ;;  %vm9157_vm12 = vcmp.gt.f32.partialorder %v3469_v39, 0.0  ;;  %v3574_v50 = vadd.f32 %v3572_v6, %v8987_v30 }
 0x201   :  { %v11406_v57 = vsel %vm9157_vm12, 4294967295, %v11405_v57  ;;  %6662 = vmatpush3.msra.mxu0 %v8756_v0  ;;  %6612 = vmatprep.subr.mxu1 %v8667_v10  ;;  %v5216_v38 = vsel %vm9157_vm12, 1.0, %v11404_v14  ;;  %v3470_v41 = vsub.f32 %v3468_v52, %v8001_v20  ;;  %v3573_v39 = vmul.f32 %v3468_v52, %v7994_v17 }
 0x202   :  { %11407 = vst [vmem:[#allocation29_spill] sm:$0xff] %v11406_v57  ;;  %6663 = vmatprep.subr.mxu0 %v8765_v55  ;;  %6613 = vmatpush3.msra.mxu1 %v8667_v10  ;;  %v3576_v9 = vmul.f32 %v5216_v38, %v8001_v20  ;;  %v5419_v57 = vpop.f32.mrf.mxu0  ;;  %v438_v3 = vsub.f32 %v9173_v25, %v9130_v45 }
 0x203   :  { %6664 = vmatpush3.msra.mxu0 %v8765_v55  ;;  %6614 = vmatprep.subr.mxu1 %v8677_v5  ;;  %vm9179_vm12 = vcmp.gt.f32.partialorder %v3470_v41, 0.0  ;;  %v3575_v52 = vadd.f32 %v3573_v39, %v9023_v59  ;;  %v5417_v41 = vadd.f32 %v5416_v2, %v9099_v33  ;;  %v437_v33 = vsub.f32 %v9183_v31, %v9130_v45 }
 0x204   :  { %6665 = vmatprep.subr.mxu0 %v8787_v4  ;;  %6615 = vmatpush3.msra.mxu1 %v8677_v5  ;;  %v3578_v6 = vsub.f32 %v3574_v50, %v3576_v9  ;;  %v11409_v32 = vsel %vm9179_vm12, 4294967295, %v11408_v32  ;;  %v5217_v47 = vsel %vm9179_vm12, 1.0, %v11404_v14  ;;  %v9201_v39 = vpop.f32.mrf.mxu0  ;;  %v11411_v9 = vmov 1.0  }
 0x205   :  { %11410 = vst [vmem:[#allocation30_spill] sm:$0xff] %v11409_v32  ;;  %6666 = vmatpush3.msra.mxu0 %v8787_v4  ;;  %6616 = vmatprep.subr.mxu1 %v8690_v42  ;;  %v3577_v27 = vmul.f32 %v5217_v47, %v8001_v20  ;;  %v9231_v32 = vadd.f32 %v8776_v28, %v5417_v41 }
 0x206   :  { %6667 = vmatprep.subr.mxu0 %v8796_v56  ;;  %6617 = vmatpush3.msra.mxu1 %v8690_v42  ;;  %v3580_v50 = vsub.f32 %v3578_v6, %v8001_v20  ;;  %v3683_v38 = vmul.f32 %v3578_v6, %v7994_v17  ;;  %v11412_v6 = vmov 0  ;;  %v9235_v54 = vpop.f32.mrf.mxu0 }
 0x207   :  { %6668 = vmatpush3.msra.mxu0 %v8796_v56  ;;  %6618 = vmatprep.subr.mxu1 %v8700_v8  ;;  %v3579_v47 = vsub.f32 %v3575_v52, %v3577_v27  ;;  %v9481_v12 = vadd.f32 %v9235_v54, %v9201_v39 }
 0x208   :  { %6670 = vmatmul.mubr.msk.f32.vlgmr.msra.gmra.mxu0 %vm8565_vm13, %v11411_v9  ;;  %6707 = vmatprep.subr.mxu0 %v8588_v19  ;;  %vm9207_vm12 = vcmp.gt.f32.partialorder %v3580_v50, 0.0  ;;  %v3685_v1 = vadd.f32 %v3683_v38, %v8987_v30  ;;  %vm9226_vm13 = vcmp.gt.f32.partialorder %v438_v3, 0.0  ;;  %v5420_v30 = vadd.f32 %v5419_v57, %v5418_v43  ;;  %v10402_v43 = vld [vmem:[#allocation8 + $0x28] sm:$0xff] }
 0x209   :  { %v11413_v6 = vsel %vm9207_vm12, 4294967295, %v11412_v6  ;;  %6619 = vmatpush3.msra.mxu1 %v8700_v8  ;;  %6708 = vmatpush3.msra.mxu0 %v8588_v19  ;;  %v5222_v2 = vsel %vm9207_vm12, 1.0, %v11404_v14  ;;  %v3581_v50 = vsub.f32 %v3579_v47, %v8001_v20  ;;  %v3684_v27 = vmul.f32 %v3579_v47, %v7994_v17 }
 0x20a   :  { %6739 = vmatprep.mubr.msk.f32.mxu0 %vm8646_vm1, %v11411_v9  ;;  %6620 = vmatprep.subr.mxu1 %v8717_v23  ;;  %v3687_v52 = vmul.f32 %v5222_v2, %v8001_v20  ;;  %v537_v3 = vmul.f32 %v9124_v58, %v9071_v60  ;;  %v536_v47 = vmul.f32 %v9138_v11, %v9071_v60  ;;  %vm9247_vm12 = vcmp.gt.f32.partialorder %v437_v33, 0.0 }
 0x20b   :  { %6709 = vmatprep.subr.mxu0 %v8613_v7  ;;  %6621 = vmatpush3.msra.mxu1 %v8717_v23  ;;  %vm9243_vm1 = vcmp.gt.f32.partialorder %v3581_v50, 0.0  ;;  %v3686_v11 = vadd.f32 %v3684_v27, %v9023_v59  ;;  %v5049_v2 = vsel %vm9226_vm13, 1.0, %v11404_v14  ;;  %v541_v27 = vmul.f32 %v9173_v25, %v9102_v15 }
 0x20c   :  { %6710 = vmatpush3.msra.mxu0 %v8613_v7  ;;  %6622 = vmatprep.subr.mxu1 %v8733_v29  ;;  %v6216_v38 = vpop.f32.mrf.mxu1  ;;  %v3689_v41 = vsub.f32 %v3685_v1, %v3687_v52  ;;  %v5223_v58 = vsel %vm9243_vm1, 1.0, %v11404_v14  ;;  %v5048_v19 = vsel %vm9247_vm12, 1.0, %v11404_v14  ;;  %v545_v25 = vmul.f32 %v5049_v2, %v9130_v45 }
 0x20d   :  { %6711 = vmatprep.subr.mxu0 %v8627_v48  ;;  %6623 = vmatpush3.msra.mxu1 %v8733_v29  ;;  %v533_v7 = vadd.f32 %v6216_v38, %v9076_v46  ;;  %v3688_v50 = vmul.f32 %v5223_v58, %v8001_v20  ;;  %v9276_v38 = vpop.f32.mrf.mxu0 }
 0x20e   :  { %6712 = vmatpush3.msra.mxu0 %v8627_v48  ;;  %6624 = vmatprep.subr.mxu1 %v8742_v40  ;;  %v527_v33 = vpop.f32.mrf.mxu1  ;;  %v3691_v1 = vsub.f32 %v3689_v41, %v8001_v20  ;;  %v3804_v52 = vmul.f32 %v3689_v41, %v7994_v17  ;;  %v540_v41 = vmul.f32 %v9183_v31, %v9102_v15 }
 0x20f   :  { %6713 = vmatprep.subr.mxu0 %v8642_v51  ;;  %6625 = vmatpush3.msra.mxu1 %v8742_v40  ;;  %v9268_v59 = vadd.f32 %v537_v3, %v533_v7  ;;  %v528_v48 = vadd.f32 %v9076_v46, %v527_v33  ;;  %v3690_v3 = vsub.f32 %v3686_v11, %v3688_v50  ;;  %v11420_v7 = vmov 0  ;;  %v9301_v50 = vpop.f32.mrf.mxu0 }
 0x210   :  { %6714 = vmatpush3.msra.mxu0 %v8642_v51  ;;  %6626 = vmatprep.subr.mxu1 %v8756_v0  ;;  %vm9282_vm13 = vcmp.gt.f32.partialorder %v3691_v1, 0.0  ;;  %v3806_v11 = vadd.f32 %v3804_v52, %v9231_v32  ;;  %v544_v33 = vmul.f32 %v5048_v19, %v9130_v45  ;;  %v9310_v52 = vadd.f32 %v8776_v28, %v5420_v30 }
 0x211   :  { %v11421_v7 = vsel %vm9282_vm13, 4294967295, %v11420_v7  ;;  %6715 = vmatprep.subr.mxu0 %v8654_v63  ;;  %6627 = vmatpush3.msra.mxu1 %v8756_v0  ;;  %v543_v57 = vadd.f32 %v541_v27, %v9268_v59  ;;  %v538_v58 = vadd.f32 %v536_v47, %v528_v48  ;;  %v5228_v51 = vsel %vm9282_vm13, 1.0, %v11404_v14 }
 0x212   :  { %11422 = vst [vmem:[#allocation31_spill] sm:$0xff] %v11421_v7  ;;  %6716 = vmatpush3.msra.mxu0 %v8654_v63  ;;  %6628 = vmatprep.subr.mxu1 %v8765_v55  ;;  %v3692_v31 = vsub.f32 %v3690_v3, %v8001_v20  ;;  %v3808_v2 = vmul.f32 %v5228_v51, %v8001_v20  ;;  %v11423_v27 = vmov 0 }
 0x213   :  { %6717 = vmatprep.subr.mxu0 %v8667_v10  ;;  %6629 = vmatpush3.msra.mxu1 %v8765_v55  ;;  %v547_v47 = vsub.f32 %v543_v57, %v545_v25  ;;  %v542_v1 = vadd.f32 %v540_v41, %v538_v58  ;;  %v3805_v19 = vmul.f32 %v3690_v3, %v7994_v17  ;;  %v6251_v25 = vpop.f32.mrf.mxu0  ;;  %v9334_v57 = vld [vmem:[#allocation8 + $0x78] sm:$0xff] }
 0x214   :  { %6718 = vmatpush3.msra.mxu0 %v8667_v10  ;;  %6630 = vmatprep.subr.mxu1 %v8787_v4  ;;  %v3810_v63 = vsub.f32 %v3806_v11, %v3808_v2  ;;  %vm9305_vm12 = vcmp.gt.f32.partialorder %v3692_v31, 0.0 }
 0x215   :  { %v11424_v27 = vsel %vm9305_vm12, 4294967295, %v11423_v27  ;;  %6719 = vmatprep.subr.mxu0 %v8677_v5  ;;  %6631 = vmatpush3.msra.mxu1 %v8787_v4  ;;  %v546_v48 = vsub.f32 %v542_v1, %v544_v33  ;;  %v549_v28 = vsub.f32 %v547_v47, %v9130_v45  ;;  %v5229_v41 = vsel %vm9305_vm12, 1.0, %v11404_v14  ;;  %v9358_v1 = vld [vmem:[#allocation8 + $0x70] sm:$0xff]  ;;  %v638_v24 = vpop.f32.mrf.mxu0 }
 0x216   :  { %11425 = vst [vmem:[#allocation32_spill] sm:$0xff] %v11424_v27  ;;  %6720 = vmatpush3.msra.mxu0 %v8677_v5  ;;  %6632 = vmatprep.subr.mxu1 %v8796_v56  ;;  %v3812_v10 = vsub.f32 %v3810_v63, %v8001_v20  ;;  %v11426_v5 = vmov 0  ;;  %v3931_v3 = vmul.f32 %v3810_v63, %v7994_v17 }
 0x217   :  { %6721 = vmatprep.subr.mxu0 %v8690_v42  ;;  %6633 = vmatpush3.msra.mxu1 %v8796_v56  ;;  %v548_v30 = vsub.f32 %v546_v48, %v9130_v45  ;;  %v3807_v51 = vadd.f32 %v3805_v19, %v9310_v52  ;;  %v3809_v11 = vmul.f32 %v5229_v41, %v8001_v20  ;;  %v9369_v41 = vld [vmem:[#allocation8 + $0x68] sm:$0xff] }
 0x218   :  { %6722 = vmatpush3.msra.mxu0 %v8690_v42  ;;  %6635 = vmatmul.mubr.msk.f32.vlgmr.msra.gmra.mxu1 %vm8519_vm11, %v11411_v9  ;;  %vm9329_vm13 = vcmp.gt.f32.partialorder %v3812_v10, 0.0  ;;  %v3933_v49 = vadd.f32 %v3931_v3, %v9231_v32  ;;  %vm9349_vm11 = vcmp.gt.f32.partialorder %v549_v28, 0.0  ;;  %v648_v63 = vmul.f32 %v9268_v59, %v9071_v60 }
 0x219   :  { %v11427_v5 = vsel %vm9329_vm13, 4294967295, %v11426_v5  ;;  %6672 = vmatprep.subr.mxu1 %v9334_v57  ;;  %6723 = vmatprep.subr.mxu0 %v8700_v8  ;;  %v5236_v42 = vsel %vm9329_vm13, 1.0, %v11404_v14  ;;  %vm9354_vm12 = vcmp.gt.f32.partialorder %v548_v30, 0.0  ;;  %v3811_v10 = vsub.f32 %v3807_v51, %v3809_v11 }
 0x21a   :  { %11428 = vst [vmem:[#allocation33_spill] sm:$0xff] %v11427_v5  ;;  %6673 = vmatpush3.msra.mxu1 %v9334_v57  ;;  %6704 = vmatprep.mubr.msk.f32.mxu1 %vm8590_vm14, %v11411_v9  ;;  %v3935_v31 = vmul.f32 %v5236_v42, %v8001_v20  ;;  %v652_v28 = vmul.f32 %v547_v47, %v9102_v15  ;;  %v5055_v59 = vsel %vm9349_vm11, 1.0, %v11404_v14  ;;  %v5054_v3 = vsel %vm9354_vm12, 1.0, %v11404_v14  ;;  %v9385_v42 = vld [vmem:[#allocation8 + $0x60] sm:$0xff] }
 0x21b   :  { %6724 = vmatpush3.msra.mxu0 %v8700_v8  ;;  %6674 = vmatprep.subr.mxu1 %v9358_v1  ;;  %v644_v8 = vadd.f32 %v6251_v25, %v9076_v46  ;;  %v647_v30 = vmul.f32 %v538_v58, %v9071_v60  ;;  %v639_v47 = vadd.f32 %v9076_v46, %v638_v24  ;;  %v9407_v24 = vld [vmem:[#allocation8 + $0x58] sm:$0xff] }
 0x21c   :  { %6725 = vmatprep.subr.mxu0 %v8717_v23  ;;  %6675 = vmatpush3.msra.mxu1 %v9358_v1  ;;  %v3937_v19 = vsub.f32 %v3933_v49, %v3935_v31  ;;  %v651_v25 = vmul.f32 %v546_v48, %v9102_v15  ;;  %v11433_v31 = vmov 0  ;;  %v3932_v48 = vmul.f32 %v3811_v10, %v7994_v17 }
 0x21d   :  { %6726 = vmatpush3.msra.mxu0 %v8717_v23  ;;  %6676 = vmatprep.subr.mxu1 %v9369_v41  ;;  %v3813_v23 = vsub.f32 %v3811_v10, %v8001_v20  ;;  %v9389_v49 = vadd.f32 %v648_v63, %v644_v8  ;;  %v656_v11 = vmul.f32 %v5055_v59, %v9130_v45  ;;  %v9423_v59 = vld [vmem:[#allocation8 + $0x50] sm:$0xff] }
 0x21e   :  { %6727 = vmatprep.subr.mxu0 %v8733_v29  ;;  %6677 = vmatpush3.msra.mxu1 %v9369_v41  ;;  %v3939_v58 = vsub.f32 %v3937_v19, %v8001_v20  ;;  %v4042_v51 = vmul.f32 %v3937_v19, %v7994_v17  ;;  %v9403_v2 = vadd.f32 %v647_v30, %v639_v47 }
 0x21f   :  { %6728 = vmatpush3.msra.mxu0 %v8733_v29  ;;  %6678 = vmatprep.subr.mxu1 %v9385_v42  ;;  %vm9393_vm14 = vcmp.gt.f32.partialorder %v3813_v23, 0.0  ;;  %v11436_v29 = vmov 0  ;;  %v655_v33 = vmul.f32 %v5054_v3, %v9130_v45  ;;  %v654_v19 = vadd.f32 %v652_v28, %v9389_v49 }
 0x220   :  { %6729 = vmatprep.subr.mxu0 %v8742_v40  ;;  %6679 = vmatpush3.msra.mxu1 %v9385_v42  ;;  %v11434_v31 = vsel %vm9393_vm14, 4294967295, %v11433_v31  ;;  %vm9398_vm12 = vcmp.gt.f32.partialorder %v3939_v58, 0.0  ;;  %v5237_v63 = vsel %vm9393_vm14, 1.0, %v11404_v14  ;;  %v3934_v10 = vadd.f32 %v3932_v48, %v9310_v52 }
 0x221   :  { %11435 = vst [vmem:[#allocation34_spill] sm:$0xff] %v11434_v31  ;;  %v11437_v29 = vsel %vm9398_vm12, 4294967295, %v11436_v29  ;;  %6730 = vmatpush3.msra.mxu0 %v8742_v40  ;;  %6680 = vmatprep.subr.mxu1 %v9407_v24  ;;  %v3936_v8 = vmul.f32 %v5237_v63, %v8001_v20  ;;  %v5242_v40 = vsel %vm9398_vm12, 1.0, %v11404_v14  ;;  %v653_v30 = vadd.f32 %v651_v25, %v9403_v2  ;;  %v9433_v25 = vld [vmem:[#allocation8 + $0x48] sm:$0xff] }
 0x222   :  { %11438 = vst [vmem:[#allocation35_spill] sm:$0xff] %v11437_v29  ;;  %6731 = vmatprep.subr.mxu0 %v8756_v0  ;;  %6681 = vmatpush3.msra.mxu1 %v9407_v24  ;;  %v4044_v28 = vadd.f32 %v4042_v51, %v9231_v32  ;;  %v4046_v3 = vmul.f32 %v5242_v40, %v8001_v20  ;;  %v11439_v63 = vmov 0  ;;  %v11452_v29 = vmov 0 }
 0x223   :  { %6732 = vmatpush3.msra.mxu0 %v8756_v0  ;;  %6682 = vmatprep.subr.mxu1 %v9423_v59  ;;  %v3938_v58 = vsub.f32 %v3934_v10, %v3936_v8  ;;  %v658_v23 = vsub.f32 %v654_v19, %v656_v11  ;;  %v9430_v47 = vsub.f32 %v653_v30, %v655_v33  ;;  %v9441_v11 = vld [vmem:[#allocation8 + $0x40] sm:$0xff]  ;;  %v9456_v10 = vld [vmem:[#allocation8 + $0x38] sm:$0xff]  ;;  %v11442_v8 = vmov 0 }
 0x224   :  { %6733 = vmatprep.subr.mxu0 %v8765_v55  ;;  %6683 = vmatpush3.msra.mxu1 %v9423_v59  ;;  %v4048_v0 = vsub.f32 %v4044_v28, %v4046_v3  ;;  %v758_v36 = vmul.f32 %v9403_v2, %v9071_v60 }
 0x225   :  { %6734 = vmatpush3.msra.mxu0 %v8765_v55  ;;  %6684 = vmatprep.subr.mxu1 %v9433_v25  ;;  %v3940_v51 = vsub.f32 %v3938_v58, %v8001_v20  ;;  %v4043_v48 = vmul.f32 %v3938_v58, %v7994_v17  ;;  %v660_v19 = vsub.f32 %v658_v23, %v9130_v45 }
 0x226   :  { %6735 = vmatprep.subr.mxu0 %v8787_v4  ;;  %6685 = vmatpush3.msra.mxu1 %v9433_v25  ;;  %v4050_v55 = vsub.f32 %v4048_v0, %v8001_v20  ;;  %v4153_v33 = vmul.f32 %v4048_v0, %v7994_v17  ;;  %v6321_v0 = vpop.f32.mrf.mxu0 }
 0x227   :  { %6736 = vmatpush3.msra.mxu0 %v8787_v4  ;;  %6686 = vmatprep.subr.mxu1 %v9441_v11  ;;  %vm9448_vm11 = vcmp.gt.f32.partialorder %v3940_v51, 0.0  ;;  %v659_v4 = vsub.f32 %v9430_v47, %v9130_v45  ;;  %v4045_v30 = vadd.f32 %v4043_v48, %v9310_v52  ;;  %v9486_v51 = vld [vmem:[#allocation8 + $0x30] sm:$0xff]  ;;  %v759_v48 = vmul.f32 %v9389_v49, %v9071_v60  ;;  %v9504_v49 = vld [vmem:[#allocation8 + $0x28] sm:$0xff] }
 0x228   :  { %6737 = vmatprep.subr.mxu0 %v8796_v56  ;;  %6687 = vmatpush3.msra.mxu1 %v9441_v11  ;;  %v11440_v63 = vsel %vm9448_vm11, 4294967295, %v11439_v63  ;;  %vm9459_vm12 = vcmp.gt.f32.partialorder %v4050_v55, 0.0  ;;  %v5243_v40 = vsel %vm9448_vm11, 1.0, %v11404_v14  ;;  %v4155_v3 = vadd.f32 %v4153_v33, %v9231_v32 }
 0x229   :  { %11441 = vst [vmem:[#allocation36_spill] sm:$0xff] %v11440_v63  ;;  %6738 = vmatpush3.msra.mxu0 %v8796_v56  ;;  %6688 = vmatprep.subr.mxu1 %v9456_v10  ;;  %v11443_v8 = vsel %vm9459_vm12, 4294967295, %v11442_v8  ;;  %v5248_v56 = vsel %vm9459_vm12, 1.0, %v11404_v14  ;;  %v4047_v28 = vmul.f32 %v5243_v40, %v8001_v20  ;;  %vm9495_vm11 = vcmp.gt.f32.partialorder %v659_v4, 0.0 }
 0x22a   :  { %11444 = vst [vmem:[#allocation37_spill] sm:$0xff] %v11443_v8  ;;  %6740 = vmatmul.mubr.msk.f32.vlgmr.msra.gmra.mxu0 %vm8671_vm4, %v11411_v9  ;;  %6777 = vmatprep.subr.mxu0 %v9334_v57  ;;  %v4157_v58 = vmul.f32 %v5248_v56, %v8001_v20  ;;  %vm9491_vm4 = vcmp.gt.f32.partialorder %v660_v19, 0.0  ;;  %v763_v4 = vmul.f32 %v658_v23, %v9102_v15  ;;  %v5060_v23 = vsel %vm9495_vm11, 1.0, %v11404_v14  ;;  %v9555_v8 = vld [vmem:[#allocation8 + $0x10] sm:$0xff] }
 0x22b   :  { %6689 = vmatpush3.msra.mxu1 %v9456_v10  ;;  %6778 = vmatpush3.msra.mxu0 %v9334_v57  ;;  %v4049_v55 = vsub.f32 %v4045_v30, %v4047_v28  ;;  %v866_v30 = vadd.f32 %v6321_v0, %v9076_v46 }
 0x22c   :  { %6809 = vmatprep.mubr.msk.f32.mxu0 %vm8744_vm15, %v11411_v9  ;;  %6690 = vmatprep.subr.mxu1 %v9486_v51  ;;  %v4159_v54 = vsub.f32 %v4155_v3, %v4157_v58  ;;  %v5061_v3 = vsel %vm9491_vm4, 1.0, %v11404_v14  ;;  %v9522_v58 = vld [vmem:[#allocation8 + $0x20] sm:$0xff] }
 0x22d   :  { %6779 = vmatprep.subr.mxu0 %v9358_v1  ;;  %6691 = vmatpush3.msra.mxu1 %v9486_v51  ;;  %v4051_v40 = vsub.f32 %v4049_v55, %v8001_v20  ;;  %v4154_v56 = vmul.f32 %v4049_v55, %v7994_v17  ;;  %v762_v55 = vmul.f32 %v9430_v47, %v9102_v15  ;;  %v9542_v47 = vld [vmem:[#allocation8 + $0x18] sm:$0xff] }
 0x22e   :  { %6780 = vmatpush3.msra.mxu0 %v9358_v1  ;;  %6692 = vmatprep.subr.mxu1 %v9504_v49  ;;  %v6286_v19 = vpop.f32.mrf.mxu1  ;;  %v4161_v28 = vsub.f32 %v4159_v54, %v8001_v20 }
 0x22f   :  { %6781 = vmatprep.subr.mxu0 %v9369_v41  ;;  %6693 = vmatpush3.msra.mxu1 %v9504_v49  ;;  %v755_v2 = vadd.f32 %v6286_v19, %v9076_v46  ;;  %vm9527_vm15 = vcmp.gt.f32.partialorder %v4051_v40, 0.0  ;;  %v11449_v19 = vmov 0  ;;  %v4264_v40 = vmul.f32 %v4159_v54, %v7994_v17 }
 0x230   :  { %6782 = vmatpush3.msra.mxu0 %v9369_v41  ;;  %6694 = vmatprep.subr.mxu1 %v9522_v58  ;;  %v749_v0 = vpop.f32.mrf.mxu1  ;;  %v11450_v19 = vsel %vm9527_vm15, 4294967295, %v11449_v19  ;;  %v5249_v63 = vsel %vm9527_vm15, 1.0, %v11404_v14  ;;  %vm9537_vm11 = vcmp.gt.f32.partialorder %v4161_v28, 0.0  ;;  %v767_v28 = vmul.f32 %v5061_v3, %v9130_v45  ;;  %v860_v3 = vpop.f32.mrf.mxu0 }
 0x231   :  { %11451 = vst [vmem:[#allocation38_spill] sm:$0xff] %v11450_v19  ;;  %6783 = vmatprep.subr.mxu0 %v9385_v42  ;;  %6695 = vmatpush3.msra.mxu1 %v9522_v58  ;;  %v761_v33 = vadd.f32 %v759_v48, %v755_v2  ;;  %v750_v39 = vadd.f32 %v9076_v46, %v749_v0  ;;  %v11453_v29 = vsel %vm9537_vm11, 4294967295, %v11452_v29  ;;  %v5254_v0 = vsel %vm9537_vm11, 1.0, %v11404_v14 }
 0x232   :  { %11454 = vst [vmem:[#allocation39_spill] sm:$0xff] %v11453_v29  ;;  %6784 = vmatpush3.msra.mxu0 %v9385_v42  ;;  %6696 = vmatprep.subr.mxu1 %v9542_v47  ;;  %v4156_v48 = vadd.f32 %v4154_v56, %v9310_v52  ;;  %v4158_v2 = vmul.f32 %v5249_v63, %v8001_v20  ;;  %vm11458_vm15 = vnez %v11352_v44 }
 0x233   :  { %6785 = vmatprep.subr.mxu0 %v9407_v24  ;;  %6697 = vmatpush3.msra.mxu1 %v9542_v47  ;;  %v765_v19 = vadd.f32 %v763_v4, %v761_v33  ;;  %v760_v27 = vadd.f32 %v758_v36, %v750_v39  ;;  %v870_v63 = vmul.f32 %v761_v33, %v9071_v60  ;;  %v9564_v39 = vld [vmem:[#allocation8 + $0x8] sm:$0xff] }
 0x234   :  { %6786 = vmatpush3.msra.mxu0 %v9407_v24  ;;  %6698 = vmatprep.subr.mxu1 %v9555_v8  ;;  %v4160_v54 = vsub.f32 %v4156_v48, %v4158_v2  ;;  %v4268_v56 = vmul.f32 %v5254_v0, %v8001_v20  ;;  %v766_v29 = vmul.f32 %v5060_v23, %v9130_v45 }
 0x235   :  { %6787 = vmatprep.subr.mxu0 %v9423_v59  ;;  %6699 = vmatpush3.msra.mxu1 %v9555_v8  ;;  %v769_v4 = vsub.f32 %v765_v19, %v767_v28  ;;  %v764_v36 = vadd.f32 %v762_v55, %v760_v27  ;;  %v869_v33 = vmul.f32 %v760_v27, %v9071_v60  ;;  %v9576_v28 = vld [vmem:[#allocation8] sm:$0xff] }
 0x236   :  { %6788 = vmatpush3.msra.mxu0 %v9423_v59  ;;  %6700 = vmatprep.subr.mxu1 %v9564_v39  ;;  %v4162_v48 = vsub.f32 %v4160_v54, %v8001_v20  ;;  %v4266_v2 = vadd.f32 %v4264_v40, %v9231_v32  ;;  %v861_v0 = vadd.f32 %v9076_v46, %v860_v3  ;;  %v11455_v40 = vmov 0 }
 0x237   :  { %6789 = vmatprep.subr.mxu0 %v9433_v25  ;;  %6701 = vmatpush3.msra.mxu1 %v9564_v39  ;;  %v771_v23 = vsub.f32 %v769_v4, %v9130_v45  ;;  %v874_v55 = vmul.f32 %v769_v4, %v9102_v15  ;;  %v768_v19 = vsub.f32 %v764_v36, %v766_v29 }
 0x238   :  { %6790 = vmatpush3.msra.mxu0 %v9433_v25  ;;  %6702 = vmatprep.subr.mxu1 %v9576_v28  ;;  %v9579_v27 = vadd.f32 %v870_v63, %v866_v30  ;;  %v4270_v32 = vsub.f32 %v4266_v2, %v4268_v56  ;;  %vm9581_vm4 = vcmp.gt.f32.partialorder %v4162_v48, 0.0  ;;  %v4265_v4 = vmul.f32 %v4160_v54, %v7994_v17  ;;  %v7598_v54 = vld [vmem:[%s11234_s2] ss:$0 sm:$0xff] }
 0x239   :  { %v11456_v40 = vsel %vm9581_vm4, 4294967295, %v11455_v40  ;;  %6791 = vmatprep.subr.mxu0 %v9441_v11  ;;  %6703 = vmatpush3.msra.mxu1 %v9576_v28  ;;  %vm773_vm11 = vcmp.gt.f32.partialorder %v771_v23, 0.0  ;;  %v770_v29 = vsub.f32 %v768_v19, %v9130_v45  ;;  %v873_v3 = vmul.f32 %v768_v19, %v9102_v15 }
 0x23a   :  { %11457 = vst [vmem:[#allocation40_spill] sm:$0xff] %v11456_v40  ;;  %6792 = vmatpush3.msra.mxu0 %v9441_v11  ;;  %v5067_v30 = vsel %vm773_vm11, 1.0, %v11404_v14  ;;  %6705 = vmatmul.mubr.msk.f32.vlgmr.msra.gmra.mxu1 %vm11458_vm15, %v11411_v9  ;;  %v9595_v63 = vadd.f32 %v869_v33, %v861_v0  ;;  %v4272_v56 = vsub.f32 %v4270_v32, %v8001_v20  ;;  %v5255_v44 = vsel %vm9581_vm4, 1.0, %v11404_v14  ;;  %v9755_v40 = vld [vmem:[#allocation8 + $0x58] sm:$0xff] }
 0x23b   :  { %v4385_v36 = vmul.f32 %v4270_v32, %v7994_v17  ;;  %v876_v48 = vadd.f32 %v874_v55, %v9579_v27  ;;  %v878_v2 = vmul.f32 %v5067_v30, %v9130_v45  ;;  %6742 = vmatprep.subr.mxu1 %v9334_v57  ;;  %6793 = vmatprep.subr.mxu0 %v9456_v10  ;;  %vm772_vm12 = vcmp.gt.f32.partialorder %v770_v29, 0.0 }
 0x23c   :  { %v9610_v33 = vadd.f32 %v7598_v54, %v9481_v12  ;;  %6743 = vmatpush3.msra.mxu1 %v9334_v57  ;;  %vm11459_vm15 = vnez %v11358_v53  ;;  %v5066_v23 = vsel %vm772_vm12, 1.0, %v11404_v14  ;;  %v875_v55 = vadd.f32 %v873_v3, %v9595_v63  ;;  %6794 = vmatpush3.msra.mxu0 %v9456_v10 }
 0x23d   :  { %6774 = vmatprep.mubr.msk.f32.mxu1 %vm11459_vm15, %v11411_v9  ;;  %vm9618_vm11 = vcmp.gt.f32.partialorder %v4272_v56, 0.0  ;;  %v11460_v19 = vmov 0  ;;  %v9622_v0 = vsub.f32 %v876_v48, %v878_v2  ;;  %v877_v12 = vmul.f32 %v5066_v23, %v9130_v45  ;;  %6744 = vmatprep.subr.mxu1 %v9358_v1 }
 0x23e   :  { %v11461_v19 = vsel %vm9618_vm11, 4294967295, %v11460_v19  ;;  %v5260_v53 = vsel %vm9618_vm11, 1.0, %v11404_v14  ;;  %v4269_v32 = vmul.f32 %v5255_v44, %v8001_v20  ;;  %6795 = vmatprep.subr.mxu0 %v9486_v51  ;;  %6745 = vmatpush3.msra.mxu1 %v9358_v1  ;;  %v4387_v29 = vadd.f32 %v4385_v36, %v9610_v33 }
 0x23f   :  { %11462 = vst [vmem:[#allocation41_spill] sm:$0xff] %v11461_v19  ;;  %v4389_v3 = vmul.f32 %v5260_v53, %v8001_v20  ;;  %v4267_v30 = vadd.f32 %v4265_v4, %v9310_v52  ;;  %v5426_v56 = vadd.f32 %v9301_v50, %v9276_v38  ;;  %v882_v48 = vsub.f32 %v9622_v0, %v9130_v45 }
 0x240   :  { %v9640_v2 = vsub.f32 %v875_v55, %v877_v12  ;;  %6796 = vmatpush3.msra.mxu0 %v9486_v51  ;;  %6746 = vmatprep.subr.mxu1 %v9369_v41 }
 0x241   :  { %6797 = vmatprep.subr.mxu0 %v9504_v49  ;;  %6747 = vmatpush3.msra.mxu1 %v9369_v41  ;;  %v4391_v36 = vsub.f32 %v4387_v29, %v4389_v3  ;;  %v4271_v44 = vsub.f32 %v4267_v30, %v4269_v32  ;;  %vm884_vm12 = vcmp.gt.f32.partialorder %v882_v48, 0.0  ;;  %v9654_v4 = vadd.f32 %v7598_v54, %v5426_v56 }
 0x242   :  { %v881_v52 = vsub.f32 %v9640_v2, %v9130_v45  ;;  %6798 = vmatpush3.msra.mxu0 %v9504_v49  ;;  %6748 = vmatprep.subr.mxu1 %v9385_v42  ;;  %v9661_v12 = vsel %vm884_vm12, 1.0, %v11404_v14  ;;  %v11463_v54 = vmov 0  ;;  %v11466_v32 = vmov 0 }
 0x243   :  { %6799 = vmatprep.subr.mxu0 %v9522_v58  ;;  %6749 = vmatpush3.msra.mxu1 %v9385_v42  ;;  %v4393_v38 = vsub.f32 %v4391_v36, %v8001_v20  ;;  %v4273_v50 = vsub.f32 %v4271_v44, %v8001_v20  ;;  %v4512_v23 = vmul.f32 %v4391_v36, %v7994_v17 }
 0x244   :  { %vm883_vm15 = vcmp.gt.f32.partialorder %v881_v52, 0.0  ;;  %6800 = vmatpush3.msra.mxu0 %v9522_v58  ;;  %6750 = vmatprep.subr.mxu1 %v9407_v24  ;;  %v4386_v55 = vmul.f32 %v4271_v44, %v7994_v17 }
 0x245   :  { %v9664_v53 = vsel %vm883_vm15, 1.0, %v11404_v14  ;;  %6801 = vmatprep.subr.mxu0 %v9542_v47  ;;  %6751 = vmatpush3.msra.mxu1 %v9407_v24  ;;  %vm9668_vm4 = vcmp.gt.f32.partialorder %v4273_v50, 0.0  ;;  %vm9672_vm11 = vcmp.gt.f32.partialorder %v4393_v38, 0.0  ;;  %v4514_v36 = vadd.f32 %v4512_v23, %v9610_v33  ;;  %v9698_v38 = vld [vmem:[#allocation8 + $0x78] sm:$0xff] }
 0x246   :  { %v11464_v54 = vsel %vm9668_vm4, 4294967295, %v11463_v54  ;;  %v11467_v32 = vsel %vm9672_vm11, 4294967295, %v11466_v32  ;;  %v5317_v29 = vpack.c.bf16 %v9661_v12, %v9664_v53  ;;  %6802 = vmatpush3.msra.mxu0 %v9542_v47  ;;  %6752 = vmatprep.subr.mxu1 %v9423_v59  ;;  %v5261_v3 = vsel %vm9668_vm4, 1.0, %v11404_v14 }
 0x247   :  { %11465 = vst [vmem:[#allocation42_spill] sm:$0xff] %v11464_v54  ;;  %11468 = vst [vmem:[#allocation43_spill] sm:$0xff] %v11467_v32  ;;  %6803 = vmatprep.subr.mxu0 %v9555_v8  ;;  %6753 = vmatpush3.msra.mxu1 %v9423_v59  ;;  %v4388_v30 = vadd.f32 %v4386_v55, %v9654_v4  ;;  %v4390_v56 = vmul.f32 %v5261_v3, %v8001_v20  ;;  %v5268_v48 = vsel %vm9672_vm11, 1.0, %v11404_v14 }
 0x248   :  { %5318 = vst [vmem:[#allocation10] sm:$0xff] %v5317_v29   ;;  %6804 = vmatpush3.msra.mxu0 %v9555_v8  ;;  %6754 = vmatprep.subr.mxu1 %v9433_v25  ;;  %v4516_v44 = vmul.f32 %v5268_v48, %v8001_v20  ;;  %v11472_v48 = vmov 0 }
 0x249   :  { %6805 = vmatprep.subr.mxu0 %v9564_v39  ;;  %6755 = vmatpush3.msra.mxu1 %v9433_v25  ;;  %v4392_v52 = vsub.f32 %v4388_v30, %v4390_v56  ;;  %v9712_v30 = vld [vmem:[#allocation8 + $0x70] sm:$0xff]  ;;  %v11469_v56 = vmov 0 }
 0x24a   :  { %6806 = vmatpush3.msra.mxu0 %v9564_v39  ;;  %6756 = vmatprep.subr.mxu1 %v9441_v11  ;;  %v4518_v50 = vsub.f32 %v4514_v36, %v4516_v44  ;;  %v9731_v36 = vld [vmem:[#allocation8 + $0x68] sm:$0xff] }
 0x24b   :  { %6807 = vmatprep.subr.mxu0 %v9576_v28  ;;  %6757 = vmatpush3.msra.mxu1 %v9441_v11  ;;  %v4394_v23 = vsub.f32 %v4392_v52, %v8001_v20  ;;  %v4513_v55 = vmul.f32 %v4392_v52, %v7994_v17 }
 0x24c   :  { %6808 = vmatpush3.msra.mxu0 %v9576_v28  ;;  %6758 = vmatprep.subr.mxu1 %v9456_v10  ;;  %v4520_v29 = vsub.f32 %v4518_v50, %v8001_v20  ;;  %v4623_v3 = vmul.f32 %v4518_v50, %v7994_v17 }
 0x24d   :  { %6810 = vmatmul.mubr.msk.f32.vlgmr.msra.gmra.mxu0 %vm8767_vm2, %v11411_v9  ;;  %6847 = vmatprep.subr.mxu0 %v9698_v38  ;;  %vm9714_vm12 = vcmp.gt.f32.partialorder %v4394_v23, 0.0  ;;  %v4515_v52 = vadd.f32 %v4513_v55, %v9654_v4  ;;  %v1007_v55 = vmul.f32 %v9579_v27, %v9071_v60  ;;  %v1011_v27 = vmul.f32 %v9622_v0, %v9102_v15  ;;  %v9769_v0 = vld [vmem:[#allocation8 + $0x50] sm:$0xff] }
 0x24e   :  { %v11470_v56 = vsel %vm9714_vm12, 4294967295, %v11469_v56  ;;  %6759 = vmatpush3.msra.mxu1 %v9456_v10  ;;  %6848 = vmatpush3.msra.mxu0 %v9698_v38  ;;  %vm9720_vm15 = vcmp.gt.f32.partialorder %v4520_v29, 0.0  ;;  %v5269_v61 = vsel %vm9714_vm12, 1.0, %v11404_v14  ;;  %v4625_v23 = vadd.f32 %v4623_v3, %v9610_v33  ;;  %v9744_v29 = vld [vmem:[#allocation8 + $0x60] sm:$0xff] }
 0x24f   :  { %11471 = vst [vmem:[#allocation44_spill] sm:$0xff] %v11470_v56  ;;  %v11473_v48 = vsel %vm9720_vm15, 4294967295, %v11472_v48  ;;  %6879 = vmatprep.mubr.msk.f32.mxu0 %vm8843_vm5, %v11411_v9  ;;  %6760 = vmatprep.subr.mxu1 %v9486_v51  ;;  %v5274_v44 = vsel %vm9720_vm15, 1.0, %v11404_v14  ;;  %v4517_v50 = vmul.f32 %v5269_v61, %v8001_v20  ;;  %v1006_v3 = vmul.f32 %v9595_v63, %v9071_v60 }
 0x250   :  { %11474 = vst [vmem:[#allocation45_spill] sm:$0xff] %v11473_v48  ;;  %6849 = vmatprep.subr.mxu0 %v9712_v30  ;;  %6761 = vmatpush3.msra.mxu1 %v9486_v51  ;;  %v4627_v26 = vmul.f32 %v5274_v44, %v8001_v20  ;;  %v6356_v56 = vpop.f32.mrf.mxu1 }
 0x251   :  { %6850 = vmatpush3.msra.mxu0 %v9712_v30  ;;  %6762 = vmatprep.subr.mxu1 %v9504_v49  ;;  %v4519_v32 = vsub.f32 %v4515_v52, %v4517_v50  ;;  %v1003_v61 = vadd.f32 %v6356_v56, %v9076_v46 }
 0x252   :  { %6851 = vmatprep.subr.mxu0 %v9731_v36  ;;  %6763 = vmatpush3.msra.mxu1 %v9504_v49  ;;  %v4629_v44 = vsub.f32 %v4625_v23, %v4627_v26  ;;  %v997_v52 = vpop.f32.mrf.mxu1  ;;  %v1010_v26 = vmul.f32 %v9640_v2, %v9102_v15  ;;  %v9789_v2 = vld [vmem:[#allocation8 + $0x48] sm:$0xff] }
 0x253   :  { %6852 = vmatpush3.msra.mxu0 %v9731_v36  ;;  %6764 = vmatprep.subr.mxu1 %v9522_v58  ;;  %v4521_v50 = vsub.f32 %v4519_v32, %v8001_v20  ;;  %v4624_v48 = vmul.f32 %v4519_v32, %v7994_v17  ;;  %v9763_v63 = vadd.f32 %v1007_v55, %v1003_v61  ;;  %v11475_v32 = vmov 0 }
 0x254   :  { %6853 = vmatprep.subr.mxu0 %v9744_v29  ;;  %6765 = vmatpush3.msra.mxu1 %v9522_v58  ;;  %v998_v56 = vadd.f32 %v9076_v46, %v997_v52  ;;  %v4631_v23 = vsub.f32 %v4629_v44, %v8001_v20  ;;  %v1015_v55 = vmul.f32 %v9661_v12, %v9130_v45 }
 0x255   :  { %6854 = vmatpush3.msra.mxu0 %v9744_v29  ;;  %6766 = vmatprep.subr.mxu1 %v9542_v47  ;;  %vm9773_vm2 = vcmp.gt.f32.partialorder %v4521_v50, 0.0  ;;  %v1013_v46 = vadd.f32 %v1011_v27, %v9763_v63  ;;  %v4734_v12 = vmul.f32 %v4629_v44, %v7994_v17  ;;  %v4626_v50 = vadd.f32 %v4624_v48, %v9654_v4  ;;  %v9808_v44 = vld [vmem:[#allocation8 + $0x40] sm:$0xff] }
 0x256   :  { %v11476_v32 = vsel %vm9773_vm2, 4294967295, %v11475_v32  ;;  %6855 = vmatprep.subr.mxu0 %v9755_v40  ;;  %6767 = vmatpush3.msra.mxu1 %v9542_v47  ;;  %v9782_v61 = vadd.f32 %v1006_v3, %v998_v56  ;;  %v5275_v52 = vsel %vm9773_vm2, 1.0, %v11404_v14  ;;  %vm9794_vm5 = vcmp.gt.f32.partialorder %v4631_v23, 0.0 }
 0x257   :  { %11477 = vst [vmem:[#allocation46_spill] sm:$0xff] %v11476_v32  ;;  %6856 = vmatpush3.msra.mxu0 %v9755_v40  ;;  %6768 = vmatprep.subr.mxu1 %v9555_v8  ;;  %v4628_v54 = vmul.f32 %v5275_v52, %v8001_v20  ;;  %v11478_v27 = vmov 0  ;;  %v1014_v3 = vmul.f32 %v9664_v53, %v9130_v45  ;;  %v5280_v48 = vsel %vm9794_vm5, 1.0, %v11404_v14 }
 0x258   :  { %v11479_v27 = vsel %vm9794_vm5, 4294967295, %v11478_v27  ;;  %6857 = vmatprep.subr.mxu0 %v9769_v0  ;;  %6769 = vmatpush3.msra.mxu1 %v9555_v8  ;;  %v1017_v56 = vsub.f32 %v1013_v46, %v1015_v55  ;;  %v1012_v32 = vadd.f32 %v1010_v26, %v9782_v61  ;;  %v4738_v53 = vmul.f32 %v5280_v48, %v8001_v20  ;;  %v9815_v26 = vld [vmem:[#allocation8 + $0x38] sm:$0xff]  ;;  %v9830_v48 = vld [vmem:[#allocation8 + $0x30] sm:$0xff] }
 0x259   :  { %11480 = vst [vmem:[#allocation47_spill] sm:$0xff] %v11479_v27  ;;  %6858 = vmatpush3.msra.mxu0 %v9769_v0  ;;  %6770 = vmatprep.subr.mxu1 %v9564_v39  ;;  %v4630_v23 = vsub.f32 %v4626_v50, %v4628_v54  ;;  %v4736_v52 = vadd.f32 %v4734_v12, %v9610_v33  ;;  %v6391_v50 = vpop.f32.mrf.mxu0  ;;  %vm11481_vm5 = vnez %v11360_v22  ;;  %v11482_v27 = vmov 0 }
 0x25a   :  { %6859 = vmatprep.subr.mxu0 %v9789_v2  ;;  %6771 = vmatpush3.msra.mxu1 %v9564_v39  ;;  %v1016_v55 = vsub.f32 %v1012_v32, %v1014_v3  ;;  %v1019_v54 = vsub.f32 %v1017_v56, %v9130_v45  ;;  %v1118_v31 = vmul.f32 %v9763_v63, %v9071_v60 }
 0x25b   :  { %6860 = vmatpush3.msra.mxu0 %v9789_v2  ;;  %6772 = vmatprep.subr.mxu1 %v9576_v28  ;;  %v4632_v46 = vsub.f32 %v4630_v23, %v8001_v20  ;;  %v4735_v32 = vmul.f32 %v4630_v23, %v7994_v17  ;;  %v4740_v3 = vsub.f32 %v4736_v52, %v4738_v53  ;;  %v9893_v52 = vld [vmem:[#allocation8 + $0x18] sm:$0xff] }
 0x25c   :  { %6861 = vmatprep.subr.mxu0 %v9808_v44  ;;  %6773 = vmatpush3.msra.mxu1 %v9576_v28  ;;  %v1018_v12 = vsub.f32 %v1016_v55, %v9130_v45  ;;  %vm9845_vm2 = vcmp.gt.f32.partialorder %v1019_v54, 0.0  ;;  %v1122_v5 = vmul.f32 %v1017_v56, %v9102_v15 }
 0x25d   :  { %6862 = vmatpush3.msra.mxu0 %v9808_v44  ;;  %6775 = vmatmul.mubr.msk.f32.vlgmr.msra.gmra.mxu1 %vm11481_vm5, %v11411_v9  ;;  %vm9832_vm12 = vcmp.gt.f32.partialorder %v4632_v46, 0.0  ;;  %vm11485_vm5 = vnez %v11366_v62  ;;  %v4742_v22 = vsub.f32 %v4740_v3, %v8001_v20  ;;  %v4845_v23 = vmul.f32 %v4740_v3, %v7994_v17  ;;  %v1108_v62 = vpop.f32.mrf.mxu0 }
 0x25e   :  { %6812 = vmatprep.subr.mxu1 %v9334_v57  ;;  %6863 = vmatprep.subr.mxu0 %v9815_v26  ;;  %v11483_v27 = vsel %vm9832_vm12, 4294967295, %v11482_v27  ;;  %v5281_v53 = vsel %vm9832_vm12, 1.0, %v11404_v14  ;;  %v11488_v46 = vmov 0  ;;  %v4737_v54 = vadd.f32 %v4735_v32, %v9654_v4  ;;  %v9875_v32 = vld [vmem:[#allocation8 + $0x20] sm:$0xff] }
 0x25f   :  { %11484 = vst [vmem:[#allocation48_spill] sm:$0xff] %v11483_v27  ;;  %6813 = vmatpush3.msra.mxu1 %v9334_v57  ;;  %6844 = vmatprep.mubr.msk.f32.mxu1 %vm11485_vm5, %v11411_v9  ;;  %v9851_v57 = vld [vmem:[#allocation8 + $0x28] sm:$0xff]  ;;  %vm9855_vm5 = vcmp.gt.f32.partialorder %v4742_v22, 0.0  ;;  %v4739_v3 = vmul.f32 %v5281_v53, %v8001_v20  ;;  %v9864_v27 = vld [vmem:[%s11236_s4] ss:$0 sm:$0xff]  ;;  %vm9869_vm12 = vcmp.gt.f32.partialorder %v1018_v12, 0.0  ;;  %v4847_v53 = vadd.f32 %v4845_v23, %v9610_v33 }
 0x260   :  { %6864 = vmatpush3.msra.mxu0 %v9815_v26  ;;  %6814 = vmatprep.subr.mxu1 %v9358_v1  ;;  %v11489_v46 = vsel %vm9855_vm5, 4294967295, %v11488_v46  ;;  %v1114_v19 = vadd.f32 %v9864_v27, %v6391_v50  ;;  %v5286_v22 = vsel %vm9855_vm5, 1.0, %v11404_v14  ;;  %v5081_v50 = vsel %vm9845_vm2, 1.0, %v11404_v14 }
 0x261   :  { %6865 = vmatprep.subr.mxu0 %v9830_v48  ;;  %6815 = vmatpush3.msra.mxu1 %v9358_v1  ;;  %11490 = vst [vmem:[#allocation49_spill] sm:$0xff] %v11489_v46  ;;  %v4849_v63 = vmul.f32 %v5286_v22, %v8001_v20  ;;  %v4741_v12 = vsub.f32 %v4737_v54, %v4739_v3  ;;  %v9906_v3 = vld [vmem:[#allocation8 + $0x10] sm:$0xff]  ;;  %v9928_v22 = vld [vmem:[#allocation8] sm:$0xff] }
 0x262   :  { %6866 = vmatpush3.msra.mxu0 %v9830_v48  ;;  %6816 = vmatprep.subr.mxu1 %v9369_v41  ;;  %v1109_v7 = vadd.f32 %v9864_v27, %v1108_v62  ;;  %v1117_v46 = vmul.f32 %v9782_v61, %v9071_v60  ;;  %v1120_v61 = vadd.f32 %v1118_v31, %v1114_v19 }
 0x263   :  { %6867 = vmatprep.subr.mxu0 %v9851_v57  ;;  %6817 = vmatpush3.msra.mxu1 %v9369_v41  ;;  %v5080_v41 = vsel %vm9869_vm12, 1.0, %v11404_v14  ;;  %v4743_v33 = vsub.f32 %v4741_v12, %v8001_v20  ;;  %v4846_v56 = vmul.f32 %v4741_v12, %v7994_v17  ;;  %v4851_v23 = vsub.f32 %v4847_v53, %v4849_v63 }
 0x264   :  { %6868 = vmatpush3.msra.mxu0 %v9851_v57  ;;  %6818 = vmatprep.subr.mxu1 %v9385_v42  ;;  %v1126_v62 = vmul.f32 %v5081_v50, %v9130_v45  ;;  %v1121_v54 = vmul.f32 %v1016_v55, %v9102_v15  ;;  %v1124_v17 = vadd.f32 %v1122_v5, %v1120_v61  ;;  %v9917_v55 = vld [vmem:[#allocation8 + $0x8] sm:$0xff] }
 0x265   :  { %6869 = vmatprep.subr.mxu0 %v9875_v32  ;;  %6819 = vmatpush3.msra.mxu1 %v9385_v42  ;;  %vm9910_vm12 = vcmp.gt.f32.partialorder %v4743_v33, 0.0  ;;  %4966 = vst [vmem:[#allocation11] sm:$0xff] %v4851_v23  ;;  %v1119_v31 = vadd.f32 %v1117_v46, %v1109_v7  ;;  %v1125_v19 = vmul.f32 %v5080_v41, %v9130_v45  ;;  %v10983_v42 = vld [vmem:[%s11236_s4] ss:$0 sm:$0xff] }
 0x266   :  { %6870 = vmatpush3.msra.mxu0 %v9875_v32  ;;  %6820 = vmatprep.subr.mxu1 %v9407_v24  ;;  %v5287_v1 = vsel %vm9910_vm12, 1.0, %v11404_v14  ;;  %v4848_v7 = vadd.f32 %v4846_v56, %v9654_v4  ;;  %v1128_v5 = vsub.f32 %v1124_v17, %v1126_v62  ;;  %v6461_v17 = vpop.f32.mrf.mxu0 }
 0x267   :  { %6871 = vmatprep.subr.mxu0 %v9893_v52  ;;  %6821 = vmatpush3.msra.mxu1 %v9407_v24  ;;  %v4850_v24 = vmul.f32 %v5287_v1, %v8001_v20  ;;  %v1123_v46 = vadd.f32 %v1121_v54, %v1119_v31  ;;  %v1228_v4 = vmul.f32 %v1119_v31, %v9071_v60 }
 0x268   :  { %6872 = vmatpush3.msra.mxu0 %v9893_v52  ;;  %6822 = vmatprep.subr.mxu1 %v9423_v59  ;;  %v1336_v31 = vadd.f32 %v9864_v27, %v6461_v17 }
 0x269   :  { %6873 = vmatprep.subr.mxu0 %v9906_v3  ;;  %6823 = vmatpush3.msra.mxu1 %v9423_v59  ;;  %v4852_v50 = vsub.f32 %v4848_v7, %v4850_v24  ;;  %v1127_v63 = vsub.f32 %v1123_v46, %v1125_v19  ;;  %v1130_v59 = vsub.f32 %v1128_v5, %v9130_v45 }
 0x26a   :  { %6874 = vmatpush3.msra.mxu0 %v9906_v3  ;;  %6824 = vmatprep.subr.mxu1 %v9433_v25 }
 0x26b   :  { %6875 = vmatprep.subr.mxu0 %v9917_v55  ;;  %6825 = vmatpush3.msra.mxu1 %v9433_v25  ;;  %4967 = vst [vmem:[#allocation11 + $0x8] sm:$0xff] %v4852_v50  ;;  %v1129_v25 = vsub.f32 %v1127_v63, %v9130_v45  ;;  %vm1132_vm2 = vcmp.gt.f32.partialorder %v1130_v59, 0.0  ;;  %v1232_v33 = vmul.f32 %v1127_v63, %v9102_v15 }
 0x26c   :  { %6876 = vmatpush3.msra.mxu0 %v9917_v55  ;;  %6826 = vmatprep.subr.mxu1 %v9441_v11 }
 0x26d   :  { %6877 = vmatprep.subr.mxu0 %v9928_v22  ;;  %6827 = vmatpush3.msra.mxu1 %v9441_v11  ;;  %v1229_v11 = vmul.f32 %v1120_v61, %v9071_v60 }
 0x26e   :  { %6878 = vmatpush3.msra.mxu0 %v9928_v22  ;;  %6828 = vmatprep.subr.mxu1 %v9456_v10 }
 0x26f   :  { %6880 = vmatmul.mubr.msk.f32.vlgmr.msra.gmra.mxu0 %vm8862_vm8, %v11411_v9  ;;  %6917 = vmatprep.subr.mxu0 %v9698_v38  ;;  %vm1131_vm8 = vcmp.gt.f32.partialorder %v1129_v25, 0.0 }
 0x270   :  { %6829 = vmatpush3.msra.mxu1 %v9456_v10  ;;  %6918 = vmatpush3.msra.mxu0 %v9698_v38  ;;  %v5087_v10 = vsel %vm1132_vm2, 1.0, %v11404_v14  ;;  %v5086_v41 = vsel %vm1131_vm8, 1.0, %v11404_v14  ;;  %vm11496_vm2 = vnez %v11374_v34 }
 0x271   :  { %6949 = vmatprep.mubr.msk.f32.mxu0 %vm8923_vm3, %v11411_v9  ;;  %6830 = vmatprep.subr.mxu1 %v9486_v51  ;;  %v1237_v56 = vmul.f32 %v5087_v10, %v9130_v45  ;;  %v1236_v61 = vmul.f32 %v5086_v41, %v9130_v45  ;;  %vm11495_vm3 = vnez %v11368_v37  ;;  %v1330_v37 = vpop.f32.mrf.mxu0 }
 0x272   :  { %6919 = vmatprep.subr.mxu0 %v9712_v30  ;;  %6831 = vmatpush3.msra.mxu1 %v9486_v51  ;;  %v6426_v16 = vpop.f32.mrf.mxu1  ;;  %v1331_v24 = vadd.f32 %v9864_v27, %v1330_v37 }
 0x273   :  { %6920 = vmatpush3.msra.mxu0 %v9712_v30  ;;  %6832 = vmatprep.subr.mxu1 %v9504_v49  ;;  %v1225_v13 = vadd.f32 %v9864_v27, %v6426_v16 }
 0x274   :  { %6921 = vmatprep.subr.mxu0 %v9731_v36  ;;  %6833 = vmatpush3.msra.mxu1 %v9504_v49  ;;  %v1219_v51 = vpop.f32.mrf.mxu1  ;;  %v1233_v49 = vmul.f32 %v1128_v5, %v9102_v15 }
 0x275   :  { %6922 = vmatpush3.msra.mxu0 %v9731_v36  ;;  %6834 = vmatprep.subr.mxu1 %v9522_v58  ;;  %v1231_v12 = vadd.f32 %v1229_v11, %v1225_v13  ;;  %v1220_v53 = vadd.f32 %v9864_v27, %v1219_v51 }
 0x276   :  { %6923 = vmatprep.subr.mxu0 %v9744_v29  ;;  %6835 = vmatpush3.msra.mxu1 %v9522_v58 }
 0x277   :  { %6924 = vmatpush3.msra.mxu0 %v9744_v29  ;;  %6836 = vmatprep.subr.mxu1 %v9542_v47  ;;  %v1235_v58 = vadd.f32 %v1233_v49, %v1231_v12  ;;  %v1230_v23 = vadd.f32 %v1228_v4, %v1220_v53 }
 0x278   :  { %6925 = vmatprep.subr.mxu0 %v9755_v40  ;;  %6837 = vmatpush3.msra.mxu1 %v9542_v47 }
 0x279   :  { %6926 = vmatpush3.msra.mxu0 %v9755_v40  ;;  %6838 = vmatprep.subr.mxu1 %v9555_v8  ;;  %v1239_v62 = vsub.f32 %v1235_v58, %v1237_v56  ;;  %v1234_v54 = vadd.f32 %v1232_v33, %v1230_v23  ;;  %v1339_v1 = vmul.f32 %v1230_v23, %v9071_v60 }
 0x27a   :  { %6927 = vmatprep.subr.mxu0 %v9769_v0  ;;  %6839 = vmatpush3.msra.mxu1 %v9555_v8 }
 0x27b   :  { %6928 = vmatpush3.msra.mxu0 %v9769_v0  ;;  %6840 = vmatprep.subr.mxu1 %v9564_v39  ;;  %v1238_v47 = vsub.f32 %v1234_v54, %v1236_v61  ;;  %v1241_v8 = vsub.f32 %v1239_v62, %v9130_v45  ;;  %v1344_v19 = vmul.f32 %v1239_v62, %v9102_v15 }
 0x27c   :  { %6929 = vmatprep.subr.mxu0 %v9789_v2  ;;  %6841 = vmatpush3.msra.mxu1 %v9564_v39  ;;  %v1341_v59 = vadd.f32 %v1339_v1, %v1331_v24 }
 0x27d   :  { %6930 = vmatpush3.msra.mxu0 %v9789_v2  ;;  %6842 = vmatprep.subr.mxu1 %v9576_v28  ;;  %v1240_v39 = vsub.f32 %v1238_v47, %v9130_v45  ;;  %vm1243_vm8 = vcmp.gt.f32.partialorder %v1241_v8, 0.0  ;;  %v1343_v50 = vmul.f32 %v1238_v47, %v9102_v15 }
 0x27e   :  { %6931 = vmatprep.subr.mxu0 %v9808_v44  ;;  %6843 = vmatpush3.msra.mxu1 %v9576_v28  ;;  %v1340_v28 = vmul.f32 %v1231_v12, %v9071_v60  ;;  %v5093_v34 = vsel %vm1243_vm8, 1.0, %v11404_v14  ;;  %v1450_v53 = vmul.f32 %v1341_v59, %v9071_v60  ;;  %vm11497_vm8 = vnez %v11376_v35 }
 0x27f   :  { %6932 = vmatpush3.msra.mxu0 %v9808_v44  ;;  %6845 = vmatmul.mubr.msk.f32.vlgmr.msra.gmra.mxu1 %vm11495_vm3, %v11411_v9  ;;  %vm1242_vm3 = vcmp.gt.f32.partialorder %v1240_v39, 0.0  ;;  %v1348_v46 = vmul.f32 %v5093_v34, %v9130_v45  ;;  %v1345_v13 = vadd.f32 %v1343_v50, %v1341_v59 }
 0x280   :  { %6882 = vmatprep.subr.mxu1 %v9698_v38  ;;  %6933 = vmatprep.subr.mxu0 %v9815_v26  ;;  %v5092_v7 = vsel %vm1242_vm3, 1.0, %v11404_v14  ;;  %v1342_v5 = vadd.f32 %v1340_v28, %v1336_v31 }
 0x281   :  { %6883 = vmatpush3.msra.mxu1 %v9698_v38  ;;  %6914 = vmatprep.mubr.msk.f32.mxu1 %vm11496_vm2, %v11411_v9  ;;  %v1347_v25 = vmul.f32 %v5092_v7, %v9130_v45 }
 0x282   :  { %6934 = vmatpush3.msra.mxu0 %v9815_v26  ;;  %6884 = vmatprep.subr.mxu1 %v9712_v30  ;;  %v1346_v63 = vadd.f32 %v1344_v19, %v1342_v5  ;;  %v1451_v4 = vmul.f32 %v1342_v5, %v9071_v60  ;;  %v11498_v19 = vld [vmem:[#allocation22_spill] sm:$0xff] }
 0x283   :  { %6935 = vmatprep.subr.mxu0 %v9830_v48  ;;  %6885 = vmatpush3.msra.mxu1 %v9712_v30  ;;  %v1349_v11 = vsub.f32 %v1345_v13, %v1347_v25 }
 0x284   :  { %6936 = vmatpush3.msra.mxu0 %v9830_v48  ;;  %6886 = vmatprep.subr.mxu1 %v9731_v36  ;;  %v1350_v16 = vsub.f32 %v1346_v63, %v1348_v46  ;;  %v6531_v34 = vpop.f32.mrf.mxu0 }
 0x285   :  { %6937 = vmatprep.subr.mxu0 %v9851_v57  ;;  %6887 = vmatpush3.msra.mxu1 %v9731_v36  ;;  %v1351_v51 = vsub.f32 %v1349_v11, %v9130_v45  ;;  %v1454_v23 = vmul.f32 %v1349_v11, %v9102_v15  ;;  %v1584_v5 = vadd.f32 %v9864_v27, %v6531_v34 }
 0x286   :  { %6938 = vmatpush3.msra.mxu0 %v9851_v57  ;;  %6888 = vmatprep.subr.mxu1 %v9744_v29  ;;  %v1352_v10 = vsub.f32 %v1350_v16, %v9130_v45  ;;  %v1455_v33 = vmul.f32 %v1350_v16, %v9102_v15  ;;  %v1578_v24 = vpop.f32.mrf.mxu0 }
 0x287   :  { %6939 = vmatprep.subr.mxu0 %v9875_v32  ;;  %6889 = vmatpush3.msra.mxu1 %v9744_v29  ;;  %v1579_v63 = vadd.f32 %v9864_v27, %v1578_v24  ;;  %v11502_v24 = vld [vmem:[#allocation23_spill] sm:$0xff] }
 0x288   :  { %6940 = vmatpush3.msra.mxu0 %v9875_v32  ;;  %6890 = vmatprep.subr.mxu1 %v9755_v40  ;;  %vm1354_vm2 = vcmp.gt.f32.partialorder %v1352_v10, 0.0 }
 0x289   :  { %6941 = vmatprep.subr.mxu0 %v9893_v52  ;;  %6891 = vmatpush3.msra.mxu1 %v9755_v40  ;;  %v5099_v12 = vsel %vm1354_vm2, 1.0, %v11404_v14  ;;  %vm11499_vm2 = vnez %v11498_v19 }
 0x28a   :  { %6942 = vmatpush3.msra.mxu0 %v9893_v52  ;;  %6892 = vmatprep.subr.mxu1 %v9769_v0  ;;  %v1459_v61 = vmul.f32 %v5099_v12, %v9130_v45 }
 0x28b   :  { %6943 = vmatprep.subr.mxu0 %v9906_v3  ;;  %6893 = vmatpush3.msra.mxu1 %v9769_v0 }
 0x28c   :  { %6944 = vmatpush3.msra.mxu0 %v9906_v3  ;;  %6894 = vmatprep.subr.mxu1 %v9789_v2 }
 0x28d   :  { %6945 = vmatprep.subr.mxu0 %v9917_v55  ;;  %6895 = vmatpush3.msra.mxu1 %v9789_v2 }
 0x28e   :  { %6946 = vmatpush3.msra.mxu0 %v9917_v55  ;;  %6896 = vmatprep.subr.mxu1 %v9808_v44 }
 0x28f   :  { %6947 = vmatprep.subr.mxu0 %v9928_v22  ;;  %6897 = vmatpush3.msra.mxu1 %v9808_v44 }
 0x290   :  { %6948 = vmatpush3.msra.mxu0 %v9928_v22  ;;  %6898 = vmatprep.subr.mxu1 %v9815_v26 }
 0x291   :  { %6950 = vmatmul.mubr.msk.f32.vlgmr.msra.gmra.mxu0 %vm8942_vm6, %v11411_v9  ;;  %6987 = vmatprep.subr.mxu0 %v9698_v38  ;;  %vm1353_vm6 = vcmp.gt.f32.partialorder %v1351_v51, 0.0 }
 0x292   :  { %6899 = vmatpush3.msra.mxu1 %v9815_v26  ;;  %6988 = vmatpush3.msra.mxu0 %v9698_v38  ;;  %v5098_v58 = vsel %vm1353_vm6, 1.0, %v11404_v14 }
 0x293   :  { %7019 = vmatprep.mubr.msk.f32.mxu0 %vm9004_vm0, %v11411_v9  ;;  %6900 = vmatprep.subr.mxu1 %v9830_v48  ;;  %v1458_v47 = vmul.f32 %v5098_v58, %v9130_v45 }
 0x294   :  { %6989 = vmatprep.subr.mxu0 %v9712_v30  ;;  %6901 = vmatpush3.msra.mxu1 %v9830_v48  ;;  %v6496_v18 = vpop.f32.mrf.mxu1 }
 0x295   :  { %6990 = vmatpush3.msra.mxu0 %v9712_v30  ;;  %6902 = vmatprep.subr.mxu1 %v9851_v57  ;;  %v1447_v21 = vadd.f32 %v9864_v27, %v6496_v18 }
 0x296   :  { %6991 = vmatprep.subr.mxu0 %v9731_v36  ;;  %6903 = vmatpush3.msra.mxu1 %v9851_v57  ;;  %v1441_v49 = vpop.f32.mrf.mxu1 }
 0x297   :  { %6992 = vmatpush3.msra.mxu0 %v9731_v36  ;;  %6904 = vmatprep.subr.mxu1 %v9875_v32  ;;  %v1453_v41 = vadd.f32 %v1451_v4, %v1447_v21  ;;  %v1442_v56 = vadd.f32 %v9864_v27, %v1441_v49 }
 0x298   :  { %6993 = vmatprep.subr.mxu0 %v9744_v29  ;;  %6905 = vmatpush3.msra.mxu1 %v9875_v32 }
 0x299   :  { %6994 = vmatpush3.msra.mxu0 %v9744_v29  ;;  %6906 = vmatprep.subr.mxu1 %v9893_v52  ;;  %v1457_v62 = vadd.f32 %v1455_v33, %v1453_v41  ;;  %v1452_v54 = vadd.f32 %v1450_v53, %v1442_v56  ;;  %v1588_v7 = vmul.f32 %v1453_v41, %v9071_v60 }
 0x29a   :  { %6995 = vmatprep.subr.mxu0 %v9755_v40  ;;  %6907 = vmatpush3.msra.mxu1 %v9893_v52 }
 0x29b   :  { %6996 = vmatpush3.msra.mxu0 %v9755_v40  ;;  %6908 = vmatprep.subr.mxu1 %v9906_v3  ;;  %v1461_v8 = vsub.f32 %v1457_v62, %v1459_v61  ;;  %v1456_v17 = vadd.f32 %v1454_v23, %v1452_v54  ;;  %v1587_v50 = vmul.f32 %v1452_v54, %v9071_v60 }
 0x29c   :  { %6997 = vmatprep.subr.mxu0 %v9769_v0  ;;  %6909 = vmatpush3.msra.mxu1 %v9906_v3  ;;  %v1590_v59 = vadd.f32 %v1588_v7, %v1584_v5 }
 0x29d   :  { %6998 = vmatpush3.msra.mxu0 %v9769_v0  ;;  %6910 = vmatprep.subr.mxu1 %v9917_v55  ;;  %v1463_v39 = vsub.f32 %v1461_v8, %v9130_v45  ;;  %v1460_v37 = vsub.f32 %v1456_v17, %v1458_v47  ;;  %v1592_v46 = vmul.f32 %v1461_v8, %v9102_v15 }
 0x29e   :  { %6999 = vmatprep.subr.mxu0 %v9789_v2  ;;  %6911 = vmatpush3.msra.mxu1 %v9917_v55  ;;  %v1589_v11 = vadd.f32 %v1587_v50, %v1579_v63  ;;  %v1699_v56 = vmul.f32 %v1590_v59, %v9071_v60 }
 0x29f   :  { %7000 = vmatpush3.msra.mxu0 %v9789_v2  ;;  %6912 = vmatprep.subr.mxu1 %v9928_v22  ;;  %vm1465_vm0 = vcmp.gt.f32.partialorder %v1463_v39, 0.0  ;;  %v1462_v28 = vsub.f32 %v1460_v37, %v9130_v45  ;;  %v1591_v16 = vmul.f32 %v1460_v37, %v9102_v15  ;;  %v1594_v13 = vadd.f32 %v1592_v46, %v1590_v59  ;;  %v11504_v46 = vld [vmem:[#allocation25_spill] sm:$0xff] }
 0x2a0   :  { %7001 = vmatprep.subr.mxu0 %v9808_v44  ;;  %6913 = vmatpush3.msra.mxu1 %v9928_v22  ;;  %v5105_v31 = vsel %vm1465_vm0, 1.0, %v11404_v14  ;;  %v1698_v61 = vmul.f32 %v1589_v11, %v9071_v60  ;;  %vm11505_vm0 = vnez %v11504_v46 }
 0x2a1   :  { %7002 = vmatpush3.msra.mxu0 %v9808_v44  ;;  %6915 = vmatmul.mubr.msk.f32.vlgmr.msra.gmra.mxu1 %vm11497_vm8, %v11411_v9  ;;  %vm1464_vm3 = vcmp.gt.f32.partialorder %v1462_v28, 0.0  ;;  %v1596_v25 = vmul.f32 %v5105_v31, %v9130_v45  ;;  %v1593_v18 = vadd.f32 %v1591_v16, %v1589_v11 }
 0x2a2   :  { %6952 = vmatprep.subr.mxu1 %v9698_v38  ;;  %7003 = vmatprep.subr.mxu0 %v9815_v26  ;;  %v5104_v1 = vsel %vm1464_vm3, 1.0, %v11404_v14 }
 0x2a3   :  { %6953 = vmatpush3.msra.mxu1 %v9698_v38  ;;  %6984 = vmatprep.mubr.msk.f32.mxu1 %vm11499_vm2, %v11411_v9  ;;  %v5320_v35 = vpack.c.bf16 %v5105_v31, %v5104_v1  ;;  %v1595_v10 = vmul.f32 %v5104_v1, %v9130_v45  ;;  %v1598_v51 = vsub.f32 %v1594_v13, %v1596_v25 }
 0x2a4   :  { %7004 = vmatpush3.msra.mxu0 %v9815_v26  ;;  %6954 = vmatprep.subr.mxu1 %v9712_v30  ;;  %vm11507_vm2 = vnez %v11413_v6 }
 0x2a5   :  { %7005 = vmatprep.subr.mxu0 %v9830_v48  ;;  %6955 = vmatpush3.msra.mxu1 %v9712_v30  ;;  %5340 = vst [vmem:[#allocation10 + $0x8] sm:$0xff] %v5320_v35   ;;  %v1597_v21 = vsub.f32 %v1593_v18, %v1595_v10  ;;  %v1600_v4 = vsub.f32 %v1598_v51, %v9130_v45 }
 0x2a6   :  { %7006 = vmatpush3.msra.mxu0 %v9830_v48  ;;  %6956 = vmatprep.subr.mxu1 %v9731_v36  ;;  %v1703_v54 = vmul.f32 %v1598_v51, %v9102_v15  ;;  %v6601_v5 = vpop.f32.mrf.mxu0 }
 0x2a7   :  { %7007 = vmatprep.subr.mxu0 %v9851_v57  ;;  %6957 = vmatpush3.msra.mxu1 %v9731_v36  ;;  %v1599_v49 = vsub.f32 %v1597_v21, %v9130_v45  ;;  %vm1602_vm6 = vcmp.gt.f32.partialorder %v1600_v4, 0.0  ;;  %v1702_v17 = vmul.f32 %v1597_v21, %v9102_v15  ;;  %v1806_v25 = vadd.f32 %v9864_v27, %v6601_v5 }
 0x2a8   :  { %7008 = vmatpush3.msra.mxu0 %v9851_v57  ;;  %6958 = vmatprep.subr.mxu1 %v9744_v29  ;;  %v5113_v58 = vsel %vm1602_vm6, 1.0, %v11404_v14  ;;  %v1800_v50 = vpop.f32.mrf.mxu0 }
 0x2a9   :  { %7009 = vmatprep.subr.mxu0 %v9875_v32  ;;  %6959 = vmatpush3.msra.mxu1 %v9744_v29  ;;  %v1707_v39 = vmul.f32 %v5113_v58, %v9130_v45  ;;  %v1801_v13 = vadd.f32 %v9864_v27, %v1800_v50 }
 0x2aa   :  { %7010 = vmatpush3.msra.mxu0 %v9875_v32  ;;  %6960 = vmatprep.subr.mxu1 %v9755_v40 }
 0x2ab   :  { %7011 = vmatprep.subr.mxu0 %v9893_v52  ;;  %6961 = vmatpush3.msra.mxu1 %v9755_v40 }
 0x2ac   :  { %7012 = vmatpush3.msra.mxu0 %v9893_v52  ;;  %6962 = vmatprep.subr.mxu1 %v9769_v0 }
 0x2ad   :  { %7013 = vmatprep.subr.mxu0 %v9906_v3  ;;  %6963 = vmatpush3.msra.mxu1 %v9769_v0 }
 0x2ae   :  { %7014 = vmatpush3.msra.mxu0 %v9906_v3  ;;  %6964 = vmatprep.subr.mxu1 %v9789_v2 }
 0x2af   :  { %7015 = vmatprep.subr.mxu0 %v9917_v55  ;;  %6965 = vmatpush3.msra.mxu1 %v9789_v2 }
 0x2b0   :  { %7016 = vmatpush3.msra.mxu0 %v9917_v55  ;;  %6966 = vmatprep.subr.mxu1 %v9808_v44 }
 0x2b1   :  { %7017 = vmatprep.subr.mxu0 %v9928_v22  ;;  %6967 = vmatpush3.msra.mxu1 %v9808_v44 }
 0x2b2   :  { %7018 = vmatpush3.msra.mxu0 %v9928_v22  ;;  %6968 = vmatprep.subr.mxu1 %v9815_v26 }
 0x2b3   :  { %7020 = vmatmul.mubr.msk.f32.vlgmr.msra.gmra.mxu0 %vm9028_vm9, %v11411_v9  ;;  %7057 = vmatprep.subr.mxu0 %v9698_v38  ;;  %vm1601_vm9 = vcmp.gt.f32.partialorder %v1599_v49, 0.0 }
 0x2b4   :  { %6969 = vmatpush3.msra.mxu1 %v9815_v26  ;;  %7058 = vmatpush3.msra.mxu0 %v9698_v38  ;;  %v5112_v8 = vsel %vm1601_vm9, 1.0, %v11404_v14 }
 0x2b5   :  { %7089 = vmatprep.mubr.msk.f32.mxu0 %vm9108_vm7, %v11411_v9  ;;  %6970 = vmatprep.subr.mxu1 %v9830_v48  ;;  %v1706_v34 = vmul.f32 %v5112_v8, %v9130_v45  ;;  %vm11503_vm7 = vnez %v11502_v24 }
 0x2b6   :  { %7059 = vmatprep.subr.mxu0 %v9712_v30  ;;  %6971 = vmatpush3.msra.mxu1 %v9830_v48  ;;  %v6566_v41 = vpop.f32.mrf.mxu1 }
 0x2b7   :  { %7060 = vmatpush3.msra.mxu0 %v9712_v30  ;;  %6972 = vmatprep.subr.mxu1 %v9851_v57  ;;  %v1695_v33 = vadd.f32 %v9864_v27, %v6566_v41 }
 0x2b8   :  { %7061 = vmatprep.subr.mxu0 %v9731_v36  ;;  %6973 = vmatpush3.msra.mxu1 %v9851_v57  ;;  %v1689_v23 = vpop.f32.mrf.mxu1 }
 0x2b9   :  { %7062 = vmatpush3.msra.mxu0 %v9731_v36  ;;  %6974 = vmatprep.subr.mxu1 %v9875_v32  ;;  %v1701_v62 = vadd.f32 %v1699_v56, %v1695_v33  ;;  %v1690_v47 = vadd.f32 %v9864_v27, %v1689_v23  ;;  %v10242_v56 = vld [vmem:[#allocation8 + $0x78] sm:$0xff]  ;;  %v10252_v23 = vld [vmem:[#allocation8 + $0x70] sm:$0xff] }
 0x2ba   :  { %7063 = vmatprep.subr.mxu0 %v9744_v29  ;;  %6975 = vmatpush3.msra.mxu1 %v9875_v32 }
 0x2bb   :  { %7064 = vmatpush3.msra.mxu0 %v9744_v29  ;;  %6976 = vmatprep.subr.mxu1 %v9893_v52  ;;  %v1705_v37 = vadd.f32 %v1703_v54, %v1701_v62  ;;  %v1700_v28 = vadd.f32 %v1698_v61, %v1690_v47  ;;  %v1810_v63 = vmul.f32 %v1701_v62, %v9071_v60  ;;  %v10266_v47 = vld [vmem:[#allocation8 + $0x68] sm:$0xff]  ;;  %v10375_v62 = vld [vmem:[#allocation8 + $0x78] sm:$0xff] }
 0x2bc   :  { %7065 = vmatprep.subr.mxu0 %v9755_v40  ;;  %6977 = vmatpush3.msra.mxu1 %v9893_v52 }
 0x2bd   :  { %7066 = vmatpush3.msra.mxu0 %v9755_v40  ;;  %6978 = vmatprep.subr.mxu1 %v9906_v3  ;;  %v1709_v31 = vsub.f32 %v1705_v37, %v1707_v39  ;;  %v1704_v19 = vadd.f32 %v1702_v17, %v1700_v28  ;;  %v1809_v59 = vmul.f32 %v1700_v28, %v9071_v60 }
 0x2be   :  { %7067 = vmatprep.subr.mxu0 %v9769_v0  ;;  %6979 = vmatpush3.msra.mxu1 %v9906_v3  ;;  %v1812_v10 = vadd.f32 %v1810_v63, %v1806_v25 }
 0x2bf   :  { %7068 = vmatpush3.msra.mxu0 %v9769_v0  ;;  %6980 = vmatprep.subr.mxu1 %v9917_v55  ;;  %v1708_v1 = vsub.f32 %v1704_v19, %v1706_v34  ;;  %v1711_v35 = vsub.f32 %v1709_v31, %v9130_v45  ;;  %v1814_v16 = vmul.f32 %v1709_v31, %v9102_v15  ;;  %v10279_v19 = vld [vmem:[#allocation8 + $0x60] sm:$0xff] }
 0x2c0   :  { %7069 = vmatprep.subr.mxu0 %v9789_v2  ;;  %6981 = vmatpush3.msra.mxu1 %v9917_v55  ;;  %v1811_v18 = vadd.f32 %v1809_v59, %v1801_v13  ;;  %v1921_v54 = vmul.f32 %v1812_v10, %v9071_v60  ;;  %v10296_v59 = vld [vmem:[#allocation8 + $0x50] sm:$0xff] }
 0x2c1   :  { %7070 = vmatpush3.msra.mxu0 %v9789_v2  ;;  %6982 = vmatprep.subr.mxu1 %v9928_v22  ;;  %v1710_v7 = vsub.f32 %v1708_v1, %v9130_v45  ;;  %vm1713_vm8 = vcmp.gt.f32.partialorder %v1711_v35, 0.0  ;;  %v1813_v11 = vmul.f32 %v1708_v1, %v9102_v15  ;;  %v1816_v4 = vadd.f32 %v1814_v16, %v1812_v10 }
 0x2c2   :  { %7071 = vmatprep.subr.mxu0 %v9808_v44  ;;  %6983 = vmatpush3.msra.mxu1 %v9928_v22  ;;  %v1920_v39 = vmul.f32 %v1811_v18, %v9071_v60 }
 0x2c3   :  { %7072 = vmatpush3.msra.mxu0 %v9808_v44  ;;  %6985 = vmatmul.mubr.msk.f32.vlgmr.msra.gmra.mxu1 %vm11503_vm7, %v11411_v9  ;;  %vm1712_vm3 = vcmp.gt.f32.partialorder %v1710_v7, 0.0  ;;  %v1815_v12 = vadd.f32 %v1813_v11, %v1811_v18  ;;  %v10287_v7 = vld [vmem:[#allocation8 + $0x58] sm:$0xff] }
 0x2c4   :  { %7022 = vmatprep.subr.mxu1 %v9698_v38  ;;  %7073 = vmatprep.subr.mxu0 %v9815_v26 }
 0x2c5   :  { %7023 = vmatpush3.msra.mxu1 %v9698_v38  ;;  %7054 = vmatprep.mubr.msk.f32.mxu1 %vm11505_vm0, %v11411_v9  ;;  %v5119_v38 = vsel %vm1713_vm8, 1.0, %v11404_v14 }
 0x2c6   :  { %7074 = vmatpush3.msra.mxu0 %v9815_v26  ;;  %7024 = vmatprep.subr.mxu1 %v9712_v30  ;;  %v1818_v51 = vmul.f32 %v5119_v38, %v9130_v45 }
 0x2c7   :  { %7075 = vmatprep.subr.mxu0 %v9830_v48  ;;  %7025 = vmatpush3.msra.mxu1 %v9712_v30  ;;  %v5118_v30 = vsel %vm1712_vm3, 1.0, %v11404_v14 }
 0x2c8   :  { %7076 = vmatpush3.msra.mxu0 %v9830_v48  ;;  %7026 = vmatprep.subr.mxu1 %v9731_v36  ;;  %v1817_v21 = vmul.f32 %v5118_v30, %v9130_v45  ;;  %v1820_v49 = vsub.f32 %v1816_v4, %v1818_v51  ;;  %v6671_v37 = vpop.f32.mrf.mxu0 }
 0x2c9   :  { %7077 = vmatprep.subr.mxu0 %v9851_v57  ;;  %7027 = vmatpush3.msra.mxu1 %v9731_v36  ;;  %v2028_v38 = vadd.f32 %v9864_v27, %v6671_v37 }
 0x2ca   :  { %7078 = vmatpush3.msra.mxu0 %v9851_v57  ;;  %7028 = vmatprep.subr.mxu1 %v9744_v29  ;;  %v1819_v53 = vsub.f32 %v1815_v12, %v1817_v21  ;;  %v1822_v41 = vsub.f32 %v1820_v49, %v9130_v45  ;;  %v1925_v28 = vmul.f32 %v1820_v49, %v9102_v15  ;;  %v2022_v46 = vpop.f32.mrf.mxu0 }
 0x2cb   :  { %7079 = vmatprep.subr.mxu0 %v9875_v32  ;;  %7029 = vmatpush3.msra.mxu1 %v9744_v29  ;;  %v2023_v13 = vadd.f32 %v9864_v27, %v2022_v46  ;;  %v10434_v46 = vld [vmem:[#allocation8 + $0x50] sm:$0xff] }
 0x2cc   :  { %7080 = vmatpush3.msra.mxu0 %v9875_v32  ;;  %7030 = vmatprep.subr.mxu1 %v9755_v40  ;;  %v1821_v58 = vsub.f32 %v1819_v53, %v9130_v45  ;;  %v1924_v1 = vmul.f32 %v1819_v53, %v9102_v15 }
 0x2cd   :  { %7081 = vmatprep.subr.mxu0 %v9893_v52  ;;  %7031 = vmatpush3.msra.mxu1 %v9755_v40 }
 0x2ce   :  { %7082 = vmatpush3.msra.mxu0 %v9893_v52  ;;  %7032 = vmatprep.subr.mxu1 %v9769_v0  ;;  %vm10258_vm6 = vcmp.gt.f32.partialorder %v1821_v58, 0.0 }
 0x2cf   :  { %7083 = vmatprep.subr.mxu0 %v9906_v3  ;;  %7033 = vmatpush3.msra.mxu1 %v9769_v0  ;;  %v5124_v34 = vsel %vm10258_vm6, 1.0, %v11404_v14 }
 0x2d0   :  { %7084 = vmatpush3.msra.mxu0 %v9906_v3  ;;  %7034 = vmatprep.subr.mxu1 %v9789_v2  ;;  %v1928_v5 = vmul.f32 %v5124_v34, %v9130_v45  ;;  %v10421_v34 = vld [vmem:[#allocation8 + $0x58] sm:$0xff] }
 0x2d1   :  { %7085 = vmatprep.subr.mxu0 %v9917_v55  ;;  %7035 = vmatpush3.msra.mxu1 %v9789_v2 }
 0x2d2   :  { %7086 = vmatpush3.msra.mxu0 %v9917_v55  ;;  %7036 = vmatprep.subr.mxu1 %v9808_v44 }
 0x2d3   :  { %7087 = vmatprep.subr.mxu0 %v9928_v22  ;;  %7037 = vmatpush3.msra.mxu1 %v9808_v44 }
 0x2d4   :  { %7088 = vmatpush3.msra.mxu0 %v9928_v22  ;;  %7038 = vmatprep.subr.mxu1 %v9815_v26 }
 0x2d5   :  { %7090 = vmatmul.mubr.msk.f32.vlgmr.msra.gmra.mxu0 %vm9134_vm10, %v11411_v9  ;;  %7127 = vmatprep.subr.mxu0 %v10242_v56  ;;  %vm1824_vm10 = vcmp.gt.f32.partialorder %v1822_v41, 0.0 }
 0x2d6   :  { %7039 = vmatpush3.msra.mxu1 %v9815_v26  ;;  %7128 = vmatpush3.msra.mxu0 %v10242_v56  ;;  %v5125_v8 = vsel %vm1824_vm10, 1.0, %v11404_v14 }
 0x2d7   :  { %7159 = vmatprep.mubr.msk.f32.mxu0 %vm11507_vm2, %v11411_v9  ;;  %7040 = vmatprep.subr.mxu1 %v9830_v48  ;;  %v1929_v35 = vmul.f32 %v5125_v8, %v9130_v45  ;;  %v10405_v8 = vld [vmem:[#allocation8 + $0x60] sm:$0xff] }
 0x2d8   :  { %7129 = vmatprep.subr.mxu0 %v10252_v23  ;;  %7041 = vmatpush3.msra.mxu1 %v9830_v48  ;;  %v6636_v61 = vpop.f32.mrf.mxu1 }
 0x2d9   :  { %7130 = vmatpush3.msra.mxu0 %v10252_v23  ;;  %7042 = vmatprep.subr.mxu1 %v9851_v57  ;;  %v1917_v6 = vadd.f32 %v9864_v27, %v6636_v61 }
 0x2da   :  { %7131 = vmatprep.subr.mxu0 %v9731_v36  ;;  %7043 = vmatpush3.msra.mxu1 %v9851_v57  ;;  %v1911_v17 = vpop.f32.mrf.mxu1 }
 0x2db   :  { %7132 = vmatpush3.msra.mxu0 %v10266_v47  ;;  %7044 = vmatprep.subr.mxu1 %v9875_v32  ;;  %v1923_v36 = vadd.f32 %v1921_v54, %v1917_v6  ;;  %v1912_v31 = vadd.f32 %v9864_v27, %v1911_v17  ;;  %v11510_v27 = vld [vmem:[#allocation26_spill] sm:$0xff]  ;;  %v10397_v54 = vld [vmem:[#allocation8 + $0x68] sm:$0xff] }
 0x2dc   :  { %7133 = vmatprep.subr.mxu0 %v9744_v29  ;;  %7045 = vmatpush3.msra.mxu1 %v9875_v32  ;;  %vm11511_vm7 = vnez %v11510_v27  ;;  %v10463_v27 = vld [vmem:[#allocation8 + $0x38] sm:$0xff] }
 0x2dd   :  { %7134 = vmatpush3.msra.mxu0 %v10279_v19  ;;  %7046 = vmatprep.subr.mxu1 %v9893_v52  ;;  %v1927_v29 = vadd.f32 %v1925_v28, %v1923_v36  ;;  %v1922_v24 = vadd.f32 %v1920_v39, %v1912_v31  ;;  %v2032_v50 = vmul.f32 %v1923_v36, %v9071_v60  ;;  %v10412_v39 = vld [vmem:[%s11236_s4] ss:$0 sm:$0xff]  ;;  %s7812_s4 = smov [#allocation11]  }
 0x2de   :  { %7135 = vmatprep.subr.mxu0 %v9755_v40  ;;  %7047 = vmatpush3.msra.mxu1 %v9893_v52  ;;  %v10418_v28 = vld [vmem:[#allocation8 + $0x20] sm:$0xff]  ;;  %s4989_s11 = sshll.u32 %s7812_s4, 4  ;;  %s4990_s11 = int_to_ptr.vmem [resolvable:$true] %s4989_s11 }
 0x2df   :  { %7136 = vmatpush3.msra.mxu0 %v10287_v7  ;;  %7048 = vmatprep.subr.mxu1 %v9906_v3  ;;  %v1931_v40 = vsub.f32 %v1927_v29, %v1929_v35  ;;  %v1926_v63 = vadd.f32 %v1924_v1, %v1922_v24  ;;  %v2031_v25 = vmul.f32 %v1922_v24, %v9071_v60  ;;  %s7708_s14 = scalar_lea.vmem %s4990_s11, 256  ;;  %p7713_p7 = scmp.lt.s32.totalorder %s4990_s11, %s4990_s11 }
 0x2e0   :  { %7137 = vmatprep.subr.mxu0 %v9769_v0  ;;  %7049 = vmatpush3.msra.mxu1 %v9906_v3  ;;  %v10312_v51 = vadd.f32 %v2032_v50, %v2028_v38  ;;  %p7709_p6 = scmp.ne.s32.totalorder %s4990_s11, %s7708_s14  ;;  %p7714_p8 = scmp.lt.s32.totalorder %s7708_s14, %s7708_s14 }
 0x2e1   :  { %7138 = vmatpush3.msra.mxu0 %v10296_v59  ;;  %7050 = vmatprep.subr.mxu1 %v9917_v55  ;;  %v1933_v0 = vsub.f32 %v1931_v40, %v9130_v45  ;;  %v2036_v16 = vmul.f32 %v1931_v40, %v9102_v15  ;;  %v1930_v30 = vsub.f32 %v1926_v63, %v1928_v5  ;;  %v10431_v5 = vld [vmem:[#allocation8 + $0x18] sm:$0xff] }
 0x2e2   :  { %7139 = vmatprep.subr.mxu0 %v9789_v2  ;;  %7051 = vmatpush3.msra.mxu1 %v9917_v55  ;;  %v10323_v4 = vadd.f32 %v2031_v25, %v2023_v13  ;;  %v2169_v36 = vmul.f32 %v10312_v51, %v9071_v60  ;;  %v10442_v25 = vld [vmem:[#allocation8 + $0x10] sm:$0xff]  ;;  %p7715_p9 = por %p7714_p8, %p7713_p7 }
 0x2e3   :  { %7140 = vmatpush3.msra.mxu0 %v9789_v2  ;;  %7052 = vmatprep.subr.mxu1 %v9928_v22  ;;  %vm1935_vm9 = vcmp.gt.f32.partialorder %v1933_v0, 0.0  ;;  %v1932_v11 = vsub.f32 %v1930_v30, %v9130_v45  ;;  %v2035_v10 = vmul.f32 %v1930_v30, %v9102_v15  ;;  %v2038_v2 = vadd.f32 %v2036_v16, %v10312_v51  ;;  %v10445_v0 = vld [vmem:[#allocation8 + $0x48] sm:$0xff] }
 0x2e4   :  { %7141 = vmatprep.subr.mxu0 %v9808_v44  ;;  %7053 = vmatpush3.msra.mxu1 %v9928_v22  ;;  %v5131_v18 = vsel %vm1935_vm9, 1.0, %v11404_v14  ;;  %v2168_v1 = vmul.f32 %v10323_v4, %v9071_v60  ;;  %p7716_p10 = pnand %p7715_p9, %p7709_p6 }
 0x2e5   :  { %7142 = vmatpush3.msra.mxu0 %v9808_v44  ;;  %7055 = vmatmul.mubr.msk.f32.vlgmr.msra.gmra.mxu1 %vm11511_vm7, %v11411_v9  ;;  %vm1934_vm0 = vcmp.gt.f32.partialorder %v1932_v11, 0.0  ;;  %v2040_v21 = vmul.f32 %v5131_v18, %v9130_v45  ;;  %v11512_v44 = vld [vmem:[#allocation29_spill] sm:$0xff]  ;;  %v2037_v53 = vadd.f32 %v2035_v10, %v10323_v4  ;;  %v10455_v10 = vld [vmem:[#allocation8 + $0x40] sm:$0xff] }
 0x2e6   :  { %7092 = vmatprep.subr.mxu1 %v10242_v56  ;;  %7143 = vmatprep.subr.mxu0 %v9815_v26  ;;  %vm11513_vm8 = vnez %v11512_v44  ;;  %v5130_v12 = vsel %vm1934_vm0, 1.0, %v11404_v14  ;;  %v10452_v11 = vld [vmem:[#allocation8 + $0x8] sm:$0xff]  ;;  %v10460_v18 = vld [vmem:[#allocation8] sm:$0xff] }
 0x2e7   :  { %7093 = vmatpush3.msra.mxu1 %v10242_v56  ;;  %7124 = vmatprep.mubr.msk.f32.mxu1 %vm11513_vm8, %v11411_v9  ;;  %v10332_v49 = vsub.f32 %v2038_v2, %v2040_v21  ;;  %v2039_v41 = vmul.f32 %v5130_v12, %v9130_v45  ;;  %v11515_v21 = vld [vmem:[#allocation30_spill] sm:$0xff] }
 0x2e8   :  { %7144 = vmatpush3.msra.mxu0 %v9815_v26  ;;  %7094 = vmatprep.subr.mxu1 %v10252_v23  ;;  %v10475_v12 = vld [vmem:[#allocation8 + $0x30] sm:$0xff] }
 0x2e9   :  { %7145 = vmatprep.subr.mxu0 %v9830_v48  ;;  %7095 = vmatpush3.msra.mxu1 %v10252_v23  ;;  %v2044_v33 = vsub.f32 %v10332_v49, %v9130_v45  ;;  %v10342_v26 = vsub.f32 %v2037_v53, %v2039_v41  ;;  %v2173_v35 = vmul.f32 %v10332_v49, %v9102_v15  ;;  %v11517_v49 = vld [vmem:[#allocation31_spill] sm:$0xff]  ;;  %v10483_v53 = vld [vmem:[#allocation8 + $0x28] sm:$0xff] }
 0x2ea   :  { %7146 = vmatpush3.msra.mxu0 %v9830_v48  ;;  %7096 = vmatprep.subr.mxu1 %v10266_v47  ;;  %v6741_v4 = vpop.f32.mrf.mxu0 }
 0x2eb   :  { %7147 = vmatprep.subr.mxu0 %v9851_v57  ;;  %7097 = vmatpush3.msra.mxu1 %v10266_v47  ;;  %vm2046_vm3 = vcmp.gt.f32.partialorder %v2044_v33, 0.0  ;;  %v2043_v58 = vsub.f32 %v10342_v26, %v9130_v45  ;;  %v2172_v40 = vmul.f32 %v10342_v26, %v9102_v15 }
 0x2ec   :  { %7148 = vmatpush3.msra.mxu0 %v9851_v57  ;;  %7098 = vmatprep.subr.mxu1 %v10279_v19  ;;  %v5137_v48 = vsel %vm2046_vm3, 1.0, %v11404_v14  ;;  %v2270_v41 = vpop.f32.mrf.mxu0 }
 0x2ed   :  { %7149 = vmatprep.subr.mxu0 %v9875_v32  ;;  %7099 = vmatpush3.msra.mxu1 %v10279_v19  ;;  %vm2045_vm2 = vcmp.gt.f32.partialorder %v2043_v58, 0.0  ;;  %v2177_v63 = vmul.f32 %v5137_v48, %v9130_v45  ;;  %v2276_v58 = vadd.f32 %v10412_v39, %v6741_v4 }
 0x2ee   :  { %7150 = vmatpush3.msra.mxu0 %v9875_v32  ;;  %7100 = vmatprep.subr.mxu1 %v10287_v7  ;;  %v10358_v57 = vsel %vm2045_vm2, 1.0, %v11404_v14  ;;  %v10366_v32 = vld [vmem:[#allocation8 + $0x48] sm:$0xff] }
 0x2ef   :  { %7151 = vmatprep.subr.mxu0 %v9893_v52  ;;  %7101 = vmatpush3.msra.mxu1 %v10287_v7  ;;  %v5323_v61 = vpack.c.bf16 %v5137_v48, %v10358_v57  ;;  %v2176_v13 = vmul.f32 %v10358_v57, %v9130_v45  ;;  %v10500_v57 = vld [vmem:[#allocation8 + $0x18] sm:$0xff] }
 0x2f0   :  { %7152 = vmatpush3.msra.mxu0 %v9893_v52  ;;  %7102 = vmatprep.subr.mxu1 %v10296_v59  ;;  %v10372_v52 = vld [vmem:[#allocation8 + $0x40] sm:$0xff] }
 0x2f1   :  { %7153 = vmatprep.subr.mxu0 %v9906_v3  ;;  %7103 = vmatpush3.msra.mxu1 %v10296_v59  ;;  %5341 = vst [vmem:[#allocation10 + $0x10] sm:$0xff] %v5323_v61   ;;  %v2271_v61 = vadd.f32 %v10412_v39, %v2270_v41 }
 0x2f2   :  { %7154 = vmatpush3.msra.mxu0 %v9906_v3  ;;  %7104 = vmatprep.subr.mxu1 %v10366_v32  ;;  %v10380_v3 = vld [vmem:[#allocation8 + $0x38] sm:$0xff] }
 0x2f3   :  { %7155 = vmatprep.subr.mxu0 %v9917_v55  ;;  %7105 = vmatpush3.msra.mxu1 %v10366_v32 }
 0x2f4   :  { %7156 = vmatpush3.msra.mxu0 %v9917_v55  ;;  %7106 = vmatprep.subr.mxu1 %v10372_v52  ;;  %v10387_v55 = vld [vmem:[#allocation8 + $0x70] sm:$0xff] }
 0x2f5   :  { %7157 = vmatprep.subr.mxu0 %v9928_v22  ;;  %7107 = vmatpush3.msra.mxu1 %v10372_v52 }
 0x2f6   :  { %7158 = vmatpush3.msra.mxu0 %v9928_v22  ;;  %7108 = vmatprep.subr.mxu1 %v10380_v3  ;;  %v10394_v22 = vld [vmem:[#allocation8 + $0x30] sm:$0xff] }
 0x2f7   :  { %7160 = vmatmul.mubr.msk.f32.vlgmr.msra.gmra.mxu0 %vm9243_vm1, %v11411_v9  ;;  %7197 = vmatprep.subr.mxu0 %v10375_v62  ;;  %vm11516_vm1 = vnez %v11515_v21 }
 0x2f8   :  { %7109 = vmatpush3.msra.mxu1 %v10380_v3  ;;  %7198 = vmatpush3.msra.mxu0 %v10375_v62 }
 0x2f9   :  { %7229 = vmatprep.mubr.msk.f32.mxu0 %vm9329_vm13, %v11411_v9  ;;  %7110 = vmatprep.subr.mxu1 %v10394_v22  ;;  %vm11518_vm13 = vnez %v11517_v49 }
 0x2fa   :  { %7199 = vmatprep.subr.mxu0 %v10387_v55  ;;  %7111 = vmatpush3.msra.mxu1 %v10394_v22  ;;  %v6706_v17 = vpop.f32.mrf.mxu1 }
 0x2fb   :  { %7200 = vmatpush3.msra.mxu0 %v10387_v55  ;;  %7112 = vmatprep.subr.mxu1 %v10402_v43  ;;  %v2165_v37 = vadd.f32 %v10412_v39, %v6706_v17  ;;  %v10509_v17 = vld [vmem:[#allocation8 + $0x10] sm:$0xff] }
 0x2fc   :  { %7201 = vmatprep.subr.mxu0 %v10397_v54  ;;  %7113 = vmatpush3.msra.mxu1 %v10402_v43  ;;  %v2159_v31 = vpop.f32.mrf.mxu1 }
 0x2fd   :  { %7202 = vmatpush3.msra.mxu0 %v10397_v54  ;;  %7114 = vmatprep.subr.mxu1 %v10418_v28  ;;  %v2171_v29 = vadd.f32 %v2169_v36, %v2165_v37  ;;  %v2160_v24 = vadd.f32 %v10412_v39, %v2159_v31 }
 0x2fe   :  { %7203 = vmatprep.subr.mxu0 %v10405_v8  ;;  %7115 = vmatpush3.msra.mxu1 %v10418_v28 }
 0x2ff   :  { %7204 = vmatpush3.msra.mxu0 %v10405_v8  ;;  %7116 = vmatprep.subr.mxu1 %v10431_v5  ;;  %v2175_v50 = vadd.f32 %v2173_v35, %v2171_v29  ;;  %v2170_v38 = vadd.f32 %v2168_v1, %v2160_v24  ;;  %v2280_v33 = vmul.f32 %v2171_v29, %v9071_v60  ;;  %v10523_v35 = vld [vmem:[#allocation8] sm:$0xff] }
 0x300   :  { %7205 = vmatprep.subr.mxu0 %v10421_v34  ;;  %7117 = vmatpush3.msra.mxu1 %v10431_v5 }
 0x301   :  { %7206 = vmatpush3.msra.mxu0 %v10421_v34  ;;  %7118 = vmatprep.subr.mxu1 %v10442_v25  ;;  %v2179_v16 = vsub.f32 %v2175_v50, %v2177_v63  ;;  %v2174_v30 = vadd.f32 %v2172_v40, %v2170_v38  ;;  %v2279_v48 = vmul.f32 %v2170_v38, %v9071_v60 }
 0x302   :  { %7207 = vmatprep.subr.mxu0 %v10434_v46  ;;  %7119 = vmatpush3.msra.mxu1 %v10442_v25  ;;  %v2282_v37 = vadd.f32 %v2280_v33, %v2276_v58 }
 0x303   :  { %7208 = vmatpush3.msra.mxu0 %v10434_v46  ;;  %7120 = vmatprep.subr.mxu1 %v10452_v11  ;;  %v2178_v51 = vsub.f32 %v2174_v30, %v2176_v13  ;;  %v2181_v2 = vsub.f32 %v2179_v16, %v9130_v45  ;;  %v2281_v1 = vadd.f32 %v2279_v48, %v2271_v61 }
 0x304   :  { %7209 = vmatprep.subr.mxu0 %v10445_v0  ;;  %7121 = vmatpush3.msra.mxu1 %v10452_v11  ;;  %v2391_v38 = vmul.f32 %v2282_v37, %v9071_v60 }
 0x305   :  { %7210 = vmatpush3.msra.mxu0 %v10445_v0  ;;  %7122 = vmatprep.subr.mxu1 %v10460_v18  ;;  %v2180_v44 = vsub.f32 %v2178_v51, %v9130_v45  ;;  %vm2183_vm10 = vcmp.gt.f32.partialorder %v2181_v2, 0.0  ;;  %v2390_v30 = vmul.f32 %v2281_v1, %v9071_v60 }
 0x306   :  { %7211 = vmatprep.subr.mxu0 %v10455_v10  ;;  %7123 = vmatpush3.msra.mxu1 %v10460_v18  ;;  %v5145_v26 = vsel %vm2183_vm10, 1.0, %v11404_v14 }
 0x307   :  { %7212 = vmatpush3.msra.mxu0 %v10455_v10  ;;  %7125 = vmatmul.mubr.msk.f32.vlgmr.msra.gmra.mxu1 %vm11516_vm1, %v11411_v9  ;;  %vm2182_vm6 = vcmp.gt.f32.partialorder %v2180_v44, 0.0  ;;  %v2288_v36 = vmul.f32 %v5145_v26, %v9130_v45  ;;  %v11522_v26 = vld [vmem:[#allocation32_spill] sm:$0xff] }
 0x308   :  { %7162 = vmatprep.subr.mxu1 %v10242_v56  ;;  %7213 = vmatprep.subr.mxu0 %v10463_v27  ;;  %v5144_v6 = vsel %vm2182_vm6, 1.0, %v11404_v14  ;;  %vm11523_vm0 = vnez %v11522_v26 }
 0x309   :  { %7163 = vmatpush3.msra.mxu1 %v10242_v56  ;;  %7194 = vmatprep.mubr.msk.f32.mxu1 %vm11518_vm13, %v11411_v9  ;;  %v10490_v56 = vld [vmem:[#allocation8 + $0x20] sm:$0xff]  ;;  %v2287_v29 = vmul.f32 %v5144_v6, %v9130_v45 }
 0x30a   :  { %7214 = vmatpush3.msra.mxu0 %v10463_v27  ;;  %7164 = vmatprep.subr.mxu1 %v10252_v23 }
 0x30b   :  { %7215 = vmatprep.subr.mxu0 %v10475_v12  ;;  %7165 = vmatpush3.msra.mxu1 %v10252_v23  ;;  %v2284_v23 = vmul.f32 %v2179_v16, %v9102_v15 }
 0x30c   :  { %7216 = vmatpush3.msra.mxu0 %v10475_v12  ;;  %7166 = vmatprep.subr.mxu1 %v10266_v47 }
 0x30d   :  { %7217 = vmatprep.subr.mxu0 %v10483_v53  ;;  %7167 = vmatpush3.msra.mxu1 %v10266_v47  ;;  %v2283_v47 = vmul.f32 %v2178_v51, %v9102_v15  ;;  %v2286_v31 = vadd.f32 %v2284_v23, %v2282_v37  ;;  %v6811_v58 = vpop.f32.mrf.mxu0  ;;  %v11524_v23 = vld [vmem:[#allocation35_spill] sm:$0xff] }
 0x30e   :  { %7218 = vmatpush3.msra.mxu0 %v10483_v53  ;;  %7168 = vmatprep.subr.mxu1 %v10279_v19  ;;  %vm11525_vm8 = vnez %v11524_v23  ;;  %v2498_v6 = vadd.f32 %v10412_v39, %v6811_v58 }
 0x30f   :  { %7219 = vmatprep.subr.mxu0 %v10490_v56  ;;  %7169 = vmatpush3.msra.mxu1 %v10279_v19  ;;  %v10516_v19 = vld [vmem:[#allocation8 + $0x8] sm:$0xff]  ;;  %v2285_v24 = vadd.f32 %v2283_v47, %v2281_v1 }
 0x310   :  { %7220 = vmatpush3.msra.mxu0 %v10490_v56  ;;  %7170 = vmatprep.subr.mxu1 %v10287_v7 }
 0x311   :  { %7221 = vmatprep.subr.mxu0 %v10500_v57  ;;  %7171 = vmatpush3.msra.mxu1 %v10287_v7  ;;  %v2290_v7 = vsub.f32 %v2286_v31, %v2288_v36  ;;  %v2289_v40 = vsub.f32 %v2285_v24, %v2287_v29 }
 0x312   :  { %7222 = vmatpush3.msra.mxu0 %v10500_v57  ;;  %7172 = vmatprep.subr.mxu1 %v10296_v59 }
 0x313   :  { %7223 = vmatprep.subr.mxu0 %v10509_v17  ;;  %7173 = vmatpush3.msra.mxu1 %v10296_v59  ;;  %v2292_v59 = vsub.f32 %v2290_v7, %v9130_v45  ;;  %v2394_v21 = vmul.f32 %v2289_v40, %v9102_v15 }
 0x314   :  { %7224 = vmatpush3.msra.mxu0 %v10509_v17  ;;  %7174 = vmatprep.subr.mxu1 %v10366_v32 }
 0x315   :  { %7225 = vmatprep.subr.mxu0 %v10516_v19  ;;  %7175 = vmatpush3.msra.mxu1 %v10366_v32  ;;  %v2291_v32 = vsub.f32 %v2289_v40, %v9130_v45  ;;  %vm2294_vm7 = vcmp.gt.f32.partialorder %v2292_v59, 0.0 }
 0x316   :  { %7226 = vmatpush3.msra.mxu0 %v10516_v19  ;;  %7176 = vmatprep.subr.mxu1 %v10372_v52 }
 0x317   :  { %7227 = vmatprep.subr.mxu0 %v10523_v35  ;;  %7177 = vmatpush3.msra.mxu1 %v10372_v52  ;;  %v11520_v52 = vld [vmem:[#allocation37_spill] sm:$0xff] }
 0x318   :  { %7228 = vmatpush3.msra.mxu0 %v10523_v35  ;;  %7178 = vmatprep.subr.mxu1 %v10380_v3  ;;  %vm11521_vm9 = vnez %v11520_v52 }
 0x319   :  { %7230 = vmatmul.mubr.msk.f32.vlgmr.msra.gmra.mxu0 %vm9393_vm14, %v11411_v9  ;;  %7267 = vmatprep.subr.mxu0 %v10375_v62  ;;  %vm2293_vm14 = vcmp.gt.f32.partialorder %v2291_v32, 0.0 }
 0x31a   :  { %7179 = vmatpush3.msra.mxu1 %v10380_v3  ;;  %7268 = vmatpush3.msra.mxu0 %v10375_v62  ;;  %v5150_v2 = vsel %vm2293_vm14, 1.0, %v11404_v14 }
 0x31b   :  { %7299 = vmatprep.mubr.msk.f32.mxu0 %vm11521_vm9, %v11411_v9  ;;  %7180 = vmatprep.subr.mxu1 %v10394_v22  ;;  %v2398_v33 = vmul.f32 %v5150_v2, %v9130_v45 }
 0x31c   :  { %7269 = vmatprep.subr.mxu0 %v10387_v55  ;;  %7181 = vmatpush3.msra.mxu1 %v10394_v22  ;;  %v5151_v22 = vsel %vm2294_vm7, 1.0, %v11404_v14 }
 0x31d   :  { %7270 = vmatpush3.msra.mxu0 %v10387_v55  ;;  %7182 = vmatprep.subr.mxu1 %v10402_v43  ;;  %v6776_v3 = vpop.f32.mrf.mxu1 }
 0x31e   :  { %7271 = vmatprep.subr.mxu0 %v10397_v54  ;;  %7183 = vmatpush3.msra.mxu1 %v10402_v43  ;;  %v2387_v63 = vadd.f32 %v10412_v39, %v6776_v3  ;;  %v2395_v43 = vmul.f32 %v2290_v7, %v9102_v15 }
 0x31f   :  { %7272 = vmatpush3.msra.mxu0 %v10397_v54  ;;  %7184 = vmatprep.subr.mxu1 %v10418_v28  ;;  %v2381_v16 = vpop.f32.mrf.mxu1 }
 0x320   :  { %7273 = vmatprep.subr.mxu0 %v10405_v8  ;;  %7185 = vmatpush3.msra.mxu1 %v10418_v28  ;;  %v2393_v13 = vadd.f32 %v2391_v38, %v2387_v63  ;;  %v2382_v51 = vadd.f32 %v10412_v39, %v2381_v16  ;;  %v2399_v28 = vmul.f32 %v5151_v22, %v9130_v45  ;;  %v11526_v63 = vld [vmem:[#allocation38_spill] sm:$0xff]  ;;  %v11528_v22 = vld [vmem:[#allocation41_spill] sm:$0xff] }
 0x321   :  { %7274 = vmatpush3.msra.mxu0 %v10405_v8  ;;  %7186 = vmatprep.subr.mxu1 %v10431_v5  ;;  %vm11527_vm1 = vnez %v11526_v63  ;;  %vm11529_vm13 = vnez %v11528_v22 }
 0x322   :  { %7275 = vmatprep.subr.mxu0 %v10421_v34  ;;  %7187 = vmatpush3.msra.mxu1 %v10431_v5  ;;  %v2397_v4 = vadd.f32 %v2395_v43, %v2393_v13  ;;  %v2392_v44 = vadd.f32 %v2390_v30, %v2382_v51  ;;  %v2502_v48 = vmul.f32 %v2393_v13, %v9071_v60 }
 0x323   :  { %7276 = vmatpush3.msra.mxu0 %v10421_v34  ;;  %7188 = vmatprep.subr.mxu1 %v10442_v25 }
 0x324   :  { %7277 = vmatprep.subr.mxu0 %v10434_v46  ;;  %7189 = vmatpush3.msra.mxu1 %v10442_v25  ;;  %v2401_v49 = vsub.f32 %v2397_v4, %v2399_v28  ;;  %v2396_v41 = vadd.f32 %v2394_v21, %v2392_v44  ;;  %v2501_v37 = vmul.f32 %v2392_v44, %v9071_v60 }
 0x325   :  { %7278 = vmatpush3.msra.mxu0 %v10434_v46  ;;  %7190 = vmatprep.subr.mxu1 %v10452_v11  ;;  %v2504_v29 = vadd.f32 %v2502_v48, %v2498_v6  ;;  %v11530_v48 = vld [vmem:[#allocation36_spill] sm:$0xff] }
 0x326   :  { %7279 = vmatprep.subr.mxu0 %v10445_v0  ;;  %7191 = vmatpush3.msra.mxu1 %v10452_v11  ;;  %v2400_v5 = vsub.f32 %v2396_v41, %v2398_v33  ;;  %v2403_v25 = vsub.f32 %v2401_v49, %v9130_v45  ;;  %v2506_v47 = vmul.f32 %v2401_v49, %v9102_v15 }
 0x327   :  { %7280 = vmatpush3.msra.mxu0 %v10445_v0  ;;  %7192 = vmatprep.subr.mxu1 %v10460_v18  ;;  %v2613_v13 = vmul.f32 %v2504_v29, %v9071_v60  ;;  %vm11531_vm7 = vnez %v11530_v48 }
 0x328   :  { %7281 = vmatprep.subr.mxu0 %v10455_v10  ;;  %7193 = vmatpush3.msra.mxu1 %v10460_v18  ;;  %v2402_v11 = vsub.f32 %v2400_v5, %v9130_v45  ;;  %vm2405_vm3 = vcmp.gt.f32.partialorder %v2403_v25, 0.0  ;;  %v2492_v18 = vpop.f32.mrf.mxu0  ;;  %v2505_v1 = vmul.f32 %v2400_v5, %v9102_v15  ;;  %v2508_v24 = vadd.f32 %v2506_v47, %v2504_v29  ;;  %v11532_v47 = vld [vmem:[#allocation39_spill] sm:$0xff] }
 0x329   :  { %7282 = vmatpush3.msra.mxu0 %v10455_v10  ;;  %7195 = vmatmul.mubr.msk.f32.vlgmr.msra.gmra.mxu1 %vm11523_vm0, %v11411_v9  ;;  %v5157_v61 = vsel %vm2405_vm3, 1.0, %v11404_v14  ;;  %v2493_v36 = vadd.f32 %v10412_v39, %v2492_v18  ;;  %vm11533_vm0 = vnez %v11532_v47 }
 0x32a   :  { %7232 = vmatprep.subr.mxu1 %v10375_v62  ;;  %7283 = vmatprep.subr.mxu0 %v10463_v27  ;;  %vm2404_vm2 = vcmp.gt.f32.partialorder %v2402_v11, 0.0  ;;  %v2510_v7 = vmul.f32 %v5157_v61, %v9130_v45 }
 0x32b   :  { %7233 = vmatpush3.msra.mxu1 %v10375_v62  ;;  %7264 = vmatprep.mubr.msk.f32.mxu1 %vm11525_vm8, %v11411_v9  ;;  %v5156_v31 = vsel %vm2404_vm2, 1.0, %v11404_v14  ;;  %v2503_v40 = vadd.f32 %v2501_v37, %v2493_v36 }
 0x32c   :  { %7284 = vmatpush3.msra.mxu0 %v10463_v27  ;;  %7234 = vmatprep.subr.mxu1 %v10387_v55  ;;  %v2509_v59 = vmul.f32 %v5156_v31, %v9130_v45  ;;  %v2512_v50 = vsub.f32 %v2508_v24, %v2510_v7 }
 0x32d   :  { %7285 = vmatprep.subr.mxu0 %v10475_v12  ;;  %7235 = vmatpush3.msra.mxu1 %v10387_v55  ;;  %v2507_v32 = vadd.f32 %v2505_v1, %v2503_v40  ;;  %v2612_v2 = vmul.f32 %v2503_v40, %v9071_v60 }
 0x32e   :  { %7286 = vmatpush3.msra.mxu0 %v10475_v12  ;;  %7236 = vmatprep.subr.mxu1 %v10397_v54  ;;  %v2514_v3 = vsub.f32 %v2512_v50, %v9130_v45  ;;  %v2617_v4 = vmul.f32 %v2512_v50, %v9102_v15 }
 0x32f   :  { %7287 = vmatprep.subr.mxu0 %v10483_v53  ;;  %7237 = vmatpush3.msra.mxu1 %v10397_v54  ;;  %v2511_v52 = vsub.f32 %v2507_v32, %v2509_v59  ;;  %v6881_v61 = vpop.f32.mrf.mxu0 }
 0x330   :  { %7288 = vmatpush3.msra.mxu0 %v10483_v53  ;;  %7238 = vmatprep.subr.mxu1 %v10405_v8  ;;  %vm2516_vm10 = vcmp.gt.f32.partialorder %v2514_v3, 0.0  ;;  %v2746_v29 = vadd.f32 %v10412_v39, %v6881_v61 }
 0x331   :  { %7289 = vmatprep.subr.mxu0 %v10490_v56  ;;  %7239 = vmatpush3.msra.mxu1 %v10405_v8  ;;  %v2513_v38 = vsub.f32 %v2511_v52, %v9130_v45  ;;  %v5163_v43 = vsel %vm2516_vm10, 1.0, %v11404_v14  ;;  %v2616_v49 = vmul.f32 %v2511_v52, %v9102_v15  ;;  %v2740_v31 = vpop.f32.mrf.mxu0 }
 0x332   :  { %7290 = vmatpush3.msra.mxu0 %v10490_v56  ;;  %7240 = vmatprep.subr.mxu1 %v10421_v34  ;;  %v2621_v33 = vmul.f32 %v5163_v43, %v9130_v45  ;;  %v2741_v40 = vadd.f32 %v10412_v39, %v2740_v31 }
 0x333   :  { %7291 = vmatprep.subr.mxu0 %v10500_v57  ;;  %7241 = vmatpush3.msra.mxu1 %v10421_v34  ;;  %vm2515_vm6 = vcmp.gt.f32.partialorder %v2513_v38, 0.0 }
 0x334   :  { %7292 = vmatpush3.msra.mxu0 %v10500_v57  ;;  %7242 = vmatprep.subr.mxu1 %v10434_v46  ;;  %v5162_v44 = vsel %vm2515_vm6, 1.0, %v11404_v14 }
 0x335   :  { %7293 = vmatprep.subr.mxu0 %v10509_v17  ;;  %7243 = vmatpush3.msra.mxu1 %v10434_v46  ;;  %v2620_v58 = vmul.f32 %v5162_v44, %v9130_v45 }
 0x336   :  { %7294 = vmatpush3.msra.mxu0 %v10509_v17  ;;  %7244 = vmatprep.subr.mxu1 %v10445_v0 }
 0x337   :  { %7295 = vmatprep.subr.mxu0 %v10516_v19  ;;  %7245 = vmatpush3.msra.mxu1 %v10445_v0 }
 0x338   :  { %7296 = vmatpush3.msra.mxu0 %v10516_v19  ;;  %7246 = vmatprep.subr.mxu1 %v10455_v10 }
 0x339   :  { %7297 = vmatprep.subr.mxu0 %v10523_v35  ;;  %7247 = vmatpush3.msra.mxu1 %v10455_v10 }
 0x33a   :  { %7298 = vmatpush3.msra.mxu0 %v10523_v35  ;;  %7248 = vmatprep.subr.mxu1 %v10463_v27 }
 0x33b   :  { %7300 = vmatmul.mubr.msk.f32.vlgmr.msra.gmra.mxu0 %vm11527_vm1, %v11411_v9  ;;  %7337 = vmatprep.subr.mxu0 %v10375_v62 }
 0x33c   :  { %7249 = vmatpush3.msra.mxu1 %v10463_v27  ;;  %7338 = vmatpush3.msra.mxu0 %v10375_v62 }
 0x33d   :  { %7369 = vmatprep.mubr.msk.f32.mxu0 %vm11529_vm13, %v11411_v9  ;;  %7250 = vmatprep.subr.mxu1 %v10475_v12 }
 0x33e   :  { %7339 = vmatprep.subr.mxu0 %v10387_v55  ;;  %7251 = vmatpush3.msra.mxu1 %v10475_v12 }
 0x33f   :  { %7340 = vmatpush3.msra.mxu0 %v10387_v55  ;;  %7252 = vmatprep.subr.mxu1 %v10483_v53  ;;  %v6846_v16 = vpop.f32.mrf.mxu1 }
 0x340   :  { %7341 = vmatprep.subr.mxu0 %v10397_v54  ;;  %7253 = vmatpush3.msra.mxu1 %v10483_v53  ;;  %v2609_v30 = vadd.f32 %v10412_v39, %v6846_v16 }
 0x341   :  { %7342 = vmatpush3.msra.mxu0 %v10397_v54  ;;  %7254 = vmatprep.subr.mxu1 %v10490_v56  ;;  %v2603_v51 = vpop.f32.mrf.mxu1 }
 0x342   :  { %7343 = vmatprep.subr.mxu0 %v10405_v8  ;;  %7255 = vmatpush3.msra.mxu1 %v10490_v56  ;;  %v2615_v21 = vadd.f32 %v2613_v13, %v2609_v30  ;;  %v2604_v28 = vadd.f32 %v10412_v39, %v2603_v51 }
 0x343   :  { %7344 = vmatpush3.msra.mxu0 %v10405_v8  ;;  %7256 = vmatprep.subr.mxu1 %v10500_v57 }
 0x344   :  { %7345 = vmatprep.subr.mxu0 %v10421_v34  ;;  %7257 = vmatpush3.msra.mxu1 %v10500_v57  ;;  %v2619_v41 = vadd.f32 %v2617_v4, %v2615_v21  ;;  %v2614_v5 = vadd.f32 %v2612_v2, %v2604_v28  ;;  %v2750_v1 = vmul.f32 %v2615_v21, %v9071_v60 }
 0x345   :  { %7346 = vmatpush3.msra.mxu0 %v10421_v34  ;;  %7258 = vmatprep.subr.mxu1 %v10509_v17 }
 0x346   :  { %7347 = vmatprep.subr.mxu0 %v10434_v46  ;;  %7259 = vmatpush3.msra.mxu1 %v10509_v17  ;;  %v2623_v25 = vsub.f32 %v2619_v41, %v2621_v33  ;;  %v2618_v26 = vadd.f32 %v2616_v49, %v2614_v5  ;;  %v2749_v24 = vmul.f32 %v2614_v5, %v9071_v60 }
 0x347   :  { %7348 = vmatpush3.msra.mxu0 %v10434_v46  ;;  %7260 = vmatprep.subr.mxu1 %v10516_v19  ;;  %v2752_v50 = vadd.f32 %v2750_v1, %v2746_v29 }
 0x348   :  { %7349 = vmatprep.subr.mxu0 %v10445_v0  ;;  %7261 = vmatpush3.msra.mxu1 %v10516_v19  ;;  %v2625_v11 = vsub.f32 %v2623_v25, %v9130_v45  ;;  %v2622_v23 = vsub.f32 %v2618_v26, %v2620_v58  ;;  %v2754_v7 = vmul.f32 %v2623_v25, %v9102_v15 }
 0x349   :  { %7350 = vmatpush3.msra.mxu0 %v10445_v0  ;;  %7262 = vmatprep.subr.mxu1 %v10523_v35  ;;  %v2751_v3 = vadd.f32 %v2749_v24, %v2741_v40  ;;  %v2861_v4 = vmul.f32 %v2752_v50, %v9071_v60 }
 0x34a   :  { %7351 = vmatprep.subr.mxu0 %v10455_v10  ;;  %7263 = vmatpush3.msra.mxu1 %v10523_v35  ;;  %vm2627_vm9 = vcmp.gt.f32.partialorder %v2625_v11, 0.0  ;;  %v2624_v18 = vsub.f32 %v2622_v23, %v9130_v45  ;;  %v2753_v59 = vmul.f32 %v2622_v23, %v9102_v15  ;;  %v2756_v52 = vadd.f32 %v2754_v7, %v2752_v50 }
 0x34b   :  { %7352 = vmatpush3.msra.mxu0 %v10455_v10  ;;  %7265 = vmatmul.mubr.msk.f32.vlgmr.msra.gmra.mxu1 %vm11531_vm7, %v11411_v9  ;;  %v5169_v6 = vsel %vm2627_vm9, 1.0, %v11404_v14  ;;  %v2860_v49 = vmul.f32 %v2751_v3, %v9071_v60 }
 0x34c   :  { %7302 = vmatprep.subr.mxu1 %v10375_v62  ;;  %7353 = vmatprep.subr.mxu0 %v10463_v27  ;;  %vm2626_vm14 = vcmp.gt.f32.partialorder %v2624_v18, 0.0  ;;  %v2758_v32 = vmul.f32 %v5169_v6, %v9130_v45  ;;  %v2755_v22 = vadd.f32 %v2753_v59, %v2751_v3 }
 0x34d   :  { %7303 = vmatpush3.msra.mxu1 %v10375_v62  ;;  %7334 = vmatprep.mubr.msk.f32.mxu1 %vm11533_vm0, %v11411_v9  ;;  %v5168_v37 = vsel %vm2626_vm14, 1.0, %v11404_v14 }
 0x34e   :  { %7354 = vmatpush3.msra.mxu0 %v10463_v27  ;;  %v5326_v36 = vpack.c.bf16 %v5169_v6, %v5168_v37  ;;  %7304 = vmatprep.subr.mxu1 %v10387_v55  ;;  %v2757_v63 = vmul.f32 %v5168_v37, %v9130_v45  ;;  %v2760_v38 = vsub.f32 %v2756_v52, %v2758_v32  ;;  %v11536_v37 = vld [vmem:[#allocation40_spill] sm:$0xff] }
 0x34f   :  { %7355 = vmatprep.subr.mxu0 %v10475_v12  ;;  %7305 = vmatpush3.msra.mxu1 %v10387_v55 }
 0x350   :  { %5342 = vst [vmem:[#allocation10 + $0x18] sm:$0xff] %v5326_v36   ;;  %7356 = vmatpush3.msra.mxu0 %v10475_v12  ;;  %7306 = vmatprep.subr.mxu1 %v10397_v54  ;;  %v2759_v16 = vsub.f32 %v2755_v22, %v2757_v63  ;;  %v2762_v30 = vsub.f32 %v2760_v38, %v9130_v45 }
 0x351   :  { %7357 = vmatprep.subr.mxu0 %v10483_v53  ;;  %7307 = vmatpush3.msra.mxu1 %v10397_v54  ;;  %v2865_v33 = vmul.f32 %v2760_v38, %v9102_v15  ;;  %v6951_v31 = vpop.f32.mrf.mxu0 }
 0x352   :  { %7358 = vmatpush3.msra.mxu0 %v10483_v53  ;;  %7308 = vmatprep.subr.mxu1 %v10405_v8  ;;  %v2761_v43 = vsub.f32 %v2759_v16, %v9130_v45  ;;  %vm2764_vm8 = vcmp.gt.f32.partialorder %v2762_v30, 0.0  ;;  %v2864_v26 = vmul.f32 %v2759_v16, %v9102_v15  ;;  %v2968_v59 = vadd.f32 %v10412_v39, %v6951_v31 }
 0x353   :  { %7359 = vmatprep.subr.mxu0 %v10490_v56  ;;  %7309 = vmatpush3.msra.mxu1 %v10405_v8  ;;  %v5177_v28 = vsel %vm2764_vm8, 1.0, %v11404_v14  ;;  %v2962_v29 = vpop.f32.mrf.mxu0 }
 0x354   :  { %7360 = vmatpush3.msra.mxu0 %v10490_v56  ;;  %7310 = vmatprep.subr.mxu1 %v10421_v34  ;;  %v2869_v11 = vmul.f32 %v5177_v28, %v9130_v45  ;;  %v2963_v52 = vadd.f32 %v10412_v39, %v2962_v29  ;;  %v10952_v28 = vld [vmem:[#allocation8 + $0x48] sm:$0xff] }
 0x355   :  { %7361 = vmatprep.subr.mxu0 %v10500_v57  ;;  %7311 = vmatpush3.msra.mxu1 %v10421_v34 }
 0x356   :  { %7362 = vmatpush3.msra.mxu0 %v10500_v57  ;;  %7312 = vmatprep.subr.mxu1 %v10434_v46 }
 0x357   :  { %7363 = vmatprep.subr.mxu0 %v10509_v17  ;;  %7313 = vmatpush3.msra.mxu1 %v10434_v46 }
 0x358   :  { %7364 = vmatpush3.msra.mxu0 %v10509_v17  ;;  %7314 = vmatprep.subr.mxu1 %v10445_v0 }
 0x359   :  { %7365 = vmatprep.subr.mxu0 %v10516_v19  ;;  %7315 = vmatpush3.msra.mxu1 %v10445_v0 }
 0x35a   :  { %7366 = vmatpush3.msra.mxu0 %v10516_v19  ;;  %7316 = vmatprep.subr.mxu1 %v10455_v10 }
 0x35b   :  { %7367 = vmatprep.subr.mxu0 %v10523_v35  ;;  %7317 = vmatpush3.msra.mxu1 %v10455_v10 }
 0x35c   :  { %7368 = vmatpush3.msra.mxu0 %v10523_v35  ;;  %7318 = vmatprep.subr.mxu1 %v10463_v27 }
 0x35d   :  { %7370 = vmatmul.mubr.msk.f32.vlgmr.msra.gmra.mxu0 %vm9668_vm4, %v11411_v9  ;;  %7407 = vmatprep.subr.mxu0 %v10375_v62  ;;  %vm2763_vm4 = vcmp.gt.f32.partialorder %v2761_v43, 0.0 }
 0x35e   :  { %7319 = vmatpush3.msra.mxu1 %v10463_v27  ;;  %7408 = vmatpush3.msra.mxu0 %v10375_v62  ;;  %v5176_v25 = vsel %vm2763_vm4, 1.0, %v11404_v14 }
 0x35f   :  { %7439 = vmatprep.mubr.msk.f32.mxu0 %vm9720_vm15, %v11411_v9  ;;  %7320 = vmatprep.subr.mxu1 %v10475_v12  ;;  %v2868_v61 = vmul.f32 %v5176_v25, %v9130_v45  ;;  %vm11537_vm15 = vnez %v11536_v37 }
 0x360   :  { %7409 = vmatprep.subr.mxu0 %v10387_v55  ;;  %7321 = vmatpush3.msra.mxu1 %v10475_v12 }
 0x361   :  { %7410 = vmatpush3.msra.mxu0 %v10387_v55  ;;  %7322 = vmatprep.subr.mxu1 %v10483_v53  ;;  %v6916_v2 = vpop.f32.mrf.mxu1 }
 0x362   :  { %7411 = vmatprep.subr.mxu0 %v10397_v54  ;;  %7323 = vmatpush3.msra.mxu1 %v10483_v53  ;;  %v2857_v21 = vadd.f32 %v10412_v39, %v6916_v2 }
 0x363   :  { %7412 = vmatpush3.msra.mxu0 %v10397_v54  ;;  %7324 = vmatprep.subr.mxu1 %v10490_v56  ;;  %v2851_v44 = vpop.f32.mrf.mxu1 }
 0x364   :  { %7413 = vmatprep.subr.mxu0 %v10405_v8  ;;  %7325 = vmatpush3.msra.mxu1 %v10490_v56  ;;  %v2863_v41 = vadd.f32 %v2861_v4, %v2857_v21  ;;  %v2852_v5 = vadd.f32 %v10412_v39, %v2851_v44  ;;  %v11539_v21 = vld [vmem:[#allocation46_spill] sm:$0xff] }
 0x365   :  { %7414 = vmatpush3.msra.mxu0 %v10405_v8  ;;  %7326 = vmatprep.subr.mxu1 %v10500_v57 }
 0x366   :  { %7415 = vmatprep.subr.mxu0 %v10421_v34  ;;  %7327 = vmatpush3.msra.mxu1 %v10500_v57  ;;  %v2867_v58 = vadd.f32 %v2865_v33, %v2863_v41  ;;  %v2862_v23 = vadd.f32 %v2860_v49, %v2852_v5  ;;  %v2972_v7 = vmul.f32 %v2863_v41, %v9071_v60 }
 0x367   :  { %7416 = vmatpush3.msra.mxu0 %v10421_v34  ;;  %7328 = vmatprep.subr.mxu1 %v10509_v17 }
 0x368   :  { %7417 = vmatprep.subr.mxu0 %v10434_v46  ;;  %7329 = vmatpush3.msra.mxu1 %v10509_v17  ;;  %v2871_v18 = vsub.f32 %v2867_v58, %v2869_v11  ;;  %v2866_v48 = vadd.f32 %v2864_v26, %v2862_v23  ;;  %v2971_v40 = vmul.f32 %v2862_v23, %v9071_v60 }
 0x369   :  { %7418 = vmatpush3.msra.mxu0 %v10434_v46  ;;  %7330 = vmatprep.subr.mxu1 %v10516_v19  ;;  %v2974_v63 = vadd.f32 %v2972_v7, %v2968_v59 }
 0x36a   :  { %7419 = vmatprep.subr.mxu0 %v10445_v0  ;;  %7331 = vmatpush3.msra.mxu1 %v10516_v19  ;;  %v2870_v6 = vsub.f32 %v2866_v48, %v2868_v61  ;;  %v2873_v47 = vsub.f32 %v2871_v18, %v9130_v45  ;;  %v2976_v50 = vmul.f32 %v2871_v18, %v9102_v15 }
 0x36b   :  { %7420 = vmatpush3.msra.mxu0 %v10445_v0  ;;  %7332 = vmatprep.subr.mxu1 %v10523_v35  ;;  %v2973_v22 = vadd.f32 %v2971_v40, %v2963_v52  ;;  %v3083_v49 = vmul.f32 %v2974_v63, %v9071_v60 }
 0x36c   :  { %7421 = vmatprep.subr.mxu0 %v10455_v10  ;;  %7333 = vmatpush3.msra.mxu1 %v10523_v35  ;;  %v2872_v36 = vsub.f32 %v2870_v6, %v9130_v45  ;;  %vm2875_vm3 = vcmp.gt.f32.partialorder %v2873_v47, 0.0  ;;  %v2975_v3 = vmul.f32 %v2870_v6, %v9102_v15  ;;  %v2978_v30 = vadd.f32 %v2976_v50, %v2974_v63  ;;  %v10910_v63 = vld [vmem:[#allocation8 + $0x70] sm:$0xff] }
 0x36d   :  { %7422 = vmatpush3.msra.mxu0 %v10455_v10  ;;  %7335 = vmatmul.mubr.msk.f32.vlgmr.msra.gmra.mxu1 %vm11537_vm15, %v11411_v9  ;;  %v5183_v24 = vsel %vm2875_vm3, 1.0, %v11404_v14 }
 0x36e   :  { %7372 = vmatprep.subr.mxu1 %v10375_v62  ;;  %7423 = vmatprep.subr.mxu0 %v10463_v27  ;;  %vm2874_vm2 = vcmp.gt.f32.partialorder %v2872_v36, 0.0  ;;  %v2980_v38 = vmul.f32 %v5183_v24, %v9130_v45  ;;  %v2977_v13 = vadd.f32 %v2975_v3, %v2973_v22 }
 0x36f   :  { %7373 = vmatpush3.msra.mxu1 %v10375_v62  ;;  %7404 = vmatprep.mubr.msk.f32.mxu1 %vm9672_vm11, %v11411_v9  ;;  %v5182_v32 = vsel %vm2874_vm2, 1.0, %v11404_v14  ;;  %vm11540_vm11 = vnez %v11539_v21  ;;  %v10946_v21 = vld [vmem:[#allocation8 + $0x50] sm:$0xff] }
 0x370   :  { %7424 = vmatpush3.msra.mxu0 %v10463_v27  ;;  %7374 = vmatprep.subr.mxu1 %v10387_v55  ;;  %v2979_v16 = vmul.f32 %v5182_v32, %v9130_v45  ;;  %v2982_v43 = vsub.f32 %v2978_v30, %v2980_v38  ;;  %v10920_v30 = vld [vmem:[#allocation8 + $0x68] sm:$0xff] }
 0x371   :  { %7425 = vmatprep.subr.mxu0 %v10475_v12  ;;  %7375 = vmatpush3.msra.mxu1 %v10387_v55 }
 0x372   :  { %7426 = vmatpush3.msra.mxu0 %v10475_v12  ;;  %7376 = vmatprep.subr.mxu1 %v10397_v54  ;;  %v2981_v51 = vsub.f32 %v2977_v13, %v2979_v16  ;;  %v2984_v2 = vsub.f32 %v2982_v43, %v9130_v45  ;;  %v3087_v26 = vmul.f32 %v2982_v43, %v9102_v15  ;;  %v10930_v43 = vld [vmem:[#allocation8 + $0x60] sm:$0xff] }
 0x373   :  { %7427 = vmatprep.subr.mxu0 %v10483_v53  ;;  %7377 = vmatpush3.msra.mxu1 %v10397_v54  ;;  %v7021_v5 = vpop.f32.mrf.mxu0 }
 0x374   :  { %7428 = vmatpush3.msra.mxu0 %v10483_v53  ;;  %7378 = vmatprep.subr.mxu1 %v10405_v8  ;;  %v2983_v4 = vsub.f32 %v2981_v51, %v9130_v45  ;;  %vm2986_vm1 = vcmp.gt.f32.partialorder %v2984_v2, 0.0  ;;  %v3190_v36 = vadd.f32 %v10412_v39, %v7021_v5 }
 0x375   :  { %7429 = vmatprep.subr.mxu0 %v10490_v56  ;;  %7379 = vmatpush3.msra.mxu1 %v10405_v8  ;;  %v5189_v41 = vsel %vm2986_vm1, 1.0, %v11404_v14  ;;  %v3184_v6 = vpop.f32.mrf.mxu0 }
 0x376   :  { %7430 = vmatpush3.msra.mxu0 %v10490_v56  ;;  %7380 = vmatprep.subr.mxu1 %v10421_v34  ;;  %vm2985_vm13 = vcmp.gt.f32.partialorder %v2983_v4, 0.0  ;;  %v3091_v18 = vmul.f32 %v5189_v41, %v9130_v45  ;;  %v3185_v7 = vadd.f32 %v10412_v39, %v3184_v6  ;;  %v10975_v41 = vld [vmem:[#allocation8 + $0x28] sm:$0xff] }
 0x377   :  { %7431 = vmatprep.subr.mxu0 %v10500_v57  ;;  %7381 = vmatpush3.msra.mxu1 %v10421_v34  ;;  %v5188_v58 = vsel %vm2985_vm13, 1.0, %v11404_v14 }
 0x378   :  { %7432 = vmatpush3.msra.mxu0 %v10500_v57  ;;  %7382 = vmatprep.subr.mxu1 %v10434_v46  ;;  %v3090_v61 = vmul.f32 %v5188_v58, %v9130_v45 }
 0x379   :  { %7433 = vmatprep.subr.mxu0 %v10509_v17  ;;  %7383 = vmatpush3.msra.mxu1 %v10434_v46 }
 0x37a   :  { %7434 = vmatpush3.msra.mxu0 %v10509_v17  ;;  %7384 = vmatprep.subr.mxu1 %v10445_v0 }
 0x37b   :  { %7435 = vmatprep.subr.mxu0 %v10516_v19  ;;  %7385 = vmatpush3.msra.mxu1 %v10445_v0 }
 0x37c   :  { %7436 = vmatpush3.msra.mxu0 %v10516_v19  ;;  %7386 = vmatprep.subr.mxu1 %v10455_v10 }
 0x37d   :  { %7437 = vmatprep.subr.mxu0 %v10523_v35  ;;  %7387 = vmatpush3.msra.mxu1 %v10455_v10 }
 0x37e   :  { %7438 = vmatpush3.msra.mxu0 %v10523_v35  ;;  %7388 = vmatprep.subr.mxu1 %v10463_v27 }
 0x37f   :  { %7440 = vmatmul.mubr.msk.f32.vlgmr.msra.gmra.mxu0 %vm11540_vm11, %v11411_v9  ;;  %7477 = vmatprep.subr.mxu0 %v10375_v62 }
 0x380   :  { %7389 = vmatpush3.msra.mxu1 %v10463_v27  ;;  %7478 = vmatpush3.msra.mxu0 %v10375_v62 }
 0x381   :  { %7509 = vmatprep.mubr.msk.f32.mxu0 %vm9855_vm5, %v11411_v9  ;;  %7390 = vmatprep.subr.mxu1 %v10475_v12 }
 0x382   :  { %7479 = vmatprep.subr.mxu0 %v10387_v55  ;;  %7391 = vmatpush3.msra.mxu1 %v10475_v12 }
 0x383   :  { %7480 = vmatpush3.msra.mxu0 %v10387_v55  ;;  %7392 = vmatprep.subr.mxu1 %v10483_v53  ;;  %v6986_v44 = vpop.f32.mrf.mxu1  ;;  %v3082_v55 = vmul.f32 %v2973_v22, %v9071_v60 }
 0x384   :  { %7481 = vmatprep.subr.mxu0 %v10397_v54  ;;  %7393 = vmatpush3.msra.mxu1 %v10483_v53  ;;  %v3079_v62 = vadd.f32 %v10412_v39, %v6986_v44  ;;  %v10958_v44 = vld [vmem:[#allocation8 + $0x40] sm:$0xff] }
 0x385   :  { %7482 = vmatpush3.msra.mxu0 %v10397_v54  ;;  %7394 = vmatprep.subr.mxu1 %v10490_v56  ;;  %v3073_v33 = vpop.f32.mrf.mxu1  ;;  %v3086_v54 = vmul.f32 %v2981_v51, %v9102_v15  ;;  %v10938_v51 = vld [vmem:[#allocation8 + $0x58] sm:$0xff] }
 0x386   :  { %7483 = vmatprep.subr.mxu0 %v10405_v8  ;;  %7395 = vmatpush3.msra.mxu1 %v10490_v56  ;;  %v3085_v25 = vadd.f32 %v3083_v49, %v3079_v62  ;;  %v3074_v11 = vadd.f32 %v10412_v39, %v3073_v33  ;;  %v11542_v39 = vld [vmem:[#allocation44_spill] sm:$0xff]  ;;  %v10964_v62 = vld [vmem:[#allocation8 + $0x38] sm:$0xff]  ;;  %v10971_v49 = vld [vmem:[#allocation8 + $0x30] sm:$0xff] }
 0x387   :  { %7484 = vmatpush3.msra.mxu0 %v10405_v8  ;;  %7396 = vmatprep.subr.mxu1 %v10500_v57  ;;  %vm11543_vm10 = vnez %v11542_v39 }
 0x388   :  { %7485 = vmatprep.subr.mxu0 %v10421_v34  ;;  %7397 = vmatpush3.msra.mxu1 %v10500_v57  ;;  %v3089_v23 = vadd.f32 %v3087_v26, %v3085_v25  ;;  %v3084_v48 = vadd.f32 %v3082_v55, %v3074_v11  ;;  %v3194_v47 = vmul.f32 %v3085_v25, %v9071_v60  ;;  %v10988_v25 = vld [vmem:[#allocation8 + $0x20] sm:$0xff] }
 0x389   :  { %7486 = vmatpush3.msra.mxu0 %v10421_v34  ;;  %7398 = vmatprep.subr.mxu1 %v10509_v17 }
 0x38a   :  { %7487 = vmatprep.subr.mxu0 %v10434_v46  ;;  %7399 = vmatpush3.msra.mxu1 %v10509_v17  ;;  %v3093_v8 = vsub.f32 %v3089_v23, %v3091_v18  ;;  %v3088_v37 = vadd.f32 %v3086_v54, %v3084_v48  ;;  %v3193_v34 = vmul.f32 %v3084_v48, %v9071_v60 }
 0x38b   :  { %7488 = vmatpush3.msra.mxu0 %v10434_v46  ;;  %7400 = vmatprep.subr.mxu1 %v10516_v19  ;;  %v10889_v40 = vadd.f32 %v3194_v47, %v3190_v36 }
 0x38c   :  { %7489 = vmatprep.subr.mxu0 %v10445_v0  ;;  %7401 = vmatpush3.msra.mxu1 %v10516_v19  ;;  %v3095_v31 = vsub.f32 %v3093_v8, %v9130_v45  ;;  %v3198_v1 = vmul.f32 %v3093_v8, %v9102_v15  ;;  %v3092_v29 = vsub.f32 %v3088_v37, %v3090_v61  ;;  %v7630_v8 = vld [vmem:[#allocation11] sm:$0xff] }
 0x38d   :  { %7490 = vmatpush3.msra.mxu0 %v10445_v0  ;;  %7402 = vmatprep.subr.mxu1 %v10523_v35  ;;  %v10896_v0 = vld [vmem:[#allocation8 + $0x78] sm:$0xff]  ;;  %v10902_v52 = vadd.f32 %v3193_v34, %v3185_v7  ;;  %v3331_v5 = vmul.f32 %v10889_v40, %v9071_v60  ;;  %v4853_v47 = vsub.f32 %v7630_v8, %v8001_v20 }
 0x38e   :  { %7491 = vmatprep.subr.mxu0 %v10455_v10  ;;  %7403 = vmatpush3.msra.mxu1 %v10523_v35  ;;  %vm3097_vm5 = vcmp.gt.f32.partialorder %v3095_v31, 0.0  ;;  %v3094_v46 = vsub.f32 %v3092_v29, %v9130_v45  ;;  %v3197_v24 = vmul.f32 %v3092_v29, %v9102_v15  ;;  %v3200_v50 = vadd.f32 %v3198_v1, %v10889_v40 }
 0x38f   :  { %7492 = vmatpush3.msra.mxu0 %v10455_v10  ;;  %v5195_v59 = vsel %vm3097_vm5, 1.0, %v11404_v14  ;;  %7405 = vmatmul.mubr.msk.f32.vlgmr.msra.gmra.mxu1 %vm11543_vm10, %v11411_v9  ;;  %v11544_v10 = vld [vmem:[#allocation47_spill] sm:$0xff]  ;;  %v3330_v54 = vmul.f32 %v10902_v52, %v9071_v60  ;;  %vm4855_vm0 = vcmp.gt.f32.partialorder %v4853_v47, 0.0 }
 0x390   :  { %7442 = vmatprep.subr.mxu1 %v10896_v0  ;;  %7493 = vmatprep.subr.mxu0 %v10463_v27  ;;  %vm3096_vm6 = vcmp.gt.f32.partialorder %v3094_v46, 0.0  ;;  %v3202_v32 = vmul.f32 %v5195_v59, %v9130_v45  ;;  %vm11545_vm9 = vnez %v11544_v10  ;;  %v3199_v22 = vadd.f32 %v3197_v24, %v10902_v52 }
 0x391   :  { %7443 = vmatpush3.msra.mxu1 %v10896_v0  ;;  %7474 = vmatprep.mubr.msk.f32.mxu1 %vm11545_vm9, %v11411_v9  ;;  %v5194_v3 = vsel %vm3096_vm6, 1.0, %v11404_v14 }
 0x392   :  { %7494 = vmatpush3.msra.mxu0 %v10463_v27  ;;  %7444 = vmatprep.subr.mxu1 %v10910_v63  ;;  %v10913_v38 = vsub.f32 %v3200_v50, %v3202_v32  ;;  %v3201_v16 = vmul.f32 %v5194_v3, %v9130_v45 }
 0x393   :  { %7495 = vmatprep.subr.mxu0 %v10475_v12  ;;  %7445 = vmatpush3.msra.mxu1 %v10910_v63 }
 0x394   :  { %7496 = vmatpush3.msra.mxu0 %v10475_v12  ;;  %7446 = vmatprep.subr.mxu1 %v10920_v30  ;;  %v3206_v27 = vsub.f32 %v10913_v38, %v9130_v45  ;;  %v10925_v13 = vsub.f32 %v3199_v22, %v3201_v16 }
 0x395   :  { %7497 = vmatprep.subr.mxu0 %v10483_v53  ;;  %7447 = vmatpush3.msra.mxu1 %v10920_v30  ;;  %v7091_v31 = vpop.f32.mrf.mxu0 }
 0x396   :  { %7498 = vmatpush3.msra.mxu0 %v10483_v53  ;;  %7448 = vmatprep.subr.mxu1 %v10930_v43  ;;  %vm3208_vm7 = vcmp.gt.f32.partialorder %v3206_v27, 0.0  ;;  %v3205_v12 = vsub.f32 %v10925_v13, %v9130_v45  ;;  %v3334_v61 = vmul.f32 %v10925_v13, %v9102_v15  ;;  %v3438_v7 = vadd.f32 %v10983_v42, %v7091_v31  ;;  %v7631_v27 = vld [vmem:[#allocation8 + $0x18] sm:$0xff] }
 0x397   :  { %7499 = vmatprep.subr.mxu0 %v10490_v56  ;;  %7449 = vmatpush3.msra.mxu1 %v10930_v43  ;;  %v5201_v53 = vsel %vm3208_vm7, 1.0, %v11404_v14  ;;  %v3432_v1 = vpop.f32.mrf.mxu0 }
 0x398   :  { %7500 = vmatpush3.msra.mxu0 %v10490_v56  ;;  %7450 = vmatprep.subr.mxu1 %v10938_v51  ;;  %vm3207_vm14 = vcmp.gt.f32.partialorder %v3205_v12, 0.0  ;;  %v3339_v18 = vmul.f32 %v5201_v53, %v9130_v45  ;;  %v3433_v59 = vadd.f32 %v10983_v42, %v3432_v1 }
 0x399   :  { %7501 = vmatprep.subr.mxu0 %v10500_v57  ;;  %7451 = vmatpush3.msra.mxu1 %v10938_v51  ;;  %v5200_v2 = vsel %vm3207_vm14, 1.0, %v11404_v14 }
 0x39a   :  { %7502 = vmatpush3.msra.mxu0 %v10500_v57  ;;  %7452 = vmatprep.subr.mxu1 %v10946_v21  ;;  %v5329_v4 = vpack.c.bf16 %v5201_v53, %v5200_v2  ;;  %v7632_v53 = vld [vmem:[#allocation8 + $0x10] sm:$0xff] }
 0x39b   :  { %7503 = vmatprep.subr.mxu0 %v10509_v17  ;;  %7453 = vmatpush3.msra.mxu1 %v10946_v21 }
 0x39c   :  { %7504 = vmatpush3.msra.mxu0 %v10509_v17  ;;  %7454 = vmatprep.subr.mxu1 %v10952_v28  ;;  %5343 = vst [vmem:[#allocation10 + $0x20] sm:$0xff] %v5329_v4  }
 0x39d   :  { %7505 = vmatprep.subr.mxu0 %v10516_v19  ;;  %7455 = vmatpush3.msra.mxu1 %v10952_v28 }
 0x39e   :  { %7506 = vmatpush3.msra.mxu0 %v10516_v19  ;;  %7456 = vmatprep.subr.mxu1 %v10958_v44 }
 0x39f   :  { %7507 = vmatprep.subr.mxu0 %v10523_v35  ;;  %7457 = vmatpush3.msra.mxu1 %v10958_v44 }
 0x3a0   :  { %7508 = vmatpush3.msra.mxu0 %v10523_v35  ;;  %7458 = vmatprep.subr.mxu1 %v10964_v62 }
 0x3a1   :  { %7510 = vmatmul.mubr.msk.f32.vlgmr.msra.gmra.mxu0 %vm9910_vm12, %v11411_v9  ;;  %7459 = vmatpush3.msra.mxu1 %v10964_v62 }
 0x3a2   :  { %7460 = vmatprep.subr.mxu1 %v10971_v49 }
 0x3a3   :  { %7461 = vmatpush3.msra.mxu1 %v10971_v49 }
 0x3a4   :  { %7462 = vmatprep.subr.mxu1 %v10975_v41 }
 0x3a5   :  { %7463 = vmatpush3.msra.mxu1 %v10975_v41  ;;  %v7056_v33 = vpop.f32.mrf.mxu1 }
 0x3a6   :  { %7464 = vmatprep.subr.mxu1 %v10490_v56  ;;  %v3327_v55 = vadd.f32 %v10983_v42, %v7056_v33  ;;  %v3335_v56 = vmul.f32 %v10913_v38, %v9102_v15 }
 0x3a7   :  { %7465 = vmatpush3.msra.mxu1 %v10988_v25  ;;  %v3321_v26 = vpop.f32.mrf.mxu1 }
 0x3a8   :  { %7466 = vmatprep.subr.mxu1 %v10500_v57  ;;  %v3333_v58 = vadd.f32 %v3331_v5, %v3327_v55  ;;  %v3322_v11 = vadd.f32 %v10983_v42, %v3321_v26  ;;  %v7635_v26 = vld [vmem:[#allocation8] sm:$0xff] }
 0x3a9   :  { %7467 = vmatpush3.msra.mxu1 %v10500_v57  ;;  %v3338_v57 = vmul.f32 %v5200_v2, %v9130_v45 }
 0x3aa   :  { %7468 = vmatprep.subr.mxu1 %v10509_v17  ;;  %v3337_v23 = vadd.f32 %v3335_v56, %v3333_v58  ;;  %v3332_v48 = vadd.f32 %v3330_v54, %v3322_v11 }
 0x3ab   :  { %7469 = vmatpush3.msra.mxu1 %v10509_v17  ;;  %v11546_v17 = vld [vmem:[#allocation48_spill] sm:$0xff] }
 0x3ac   :  { %7470 = vmatprep.subr.mxu1 %v10516_v19  ;;  %v3341_v6 = vsub.f32 %v3337_v23, %v3339_v18  ;;  %v3336_v37 = vadd.f32 %v3334_v61, %v3332_v48  ;;  %vm11547_vm12 = vnez %v11546_v17  ;;  %v3441_v24 = vmul.f32 %v3332_v48, %v9071_v60 }
 0x3ad   :  { %7471 = vmatpush3.msra.mxu1 %v10516_v19 }
 0x3ae   :  { %7472 = vmatprep.subr.mxu1 %v10523_v35  ;;  %v3340_v36 = vsub.f32 %v3336_v37, %v3338_v57  ;;  %v3343_v34 = vsub.f32 %v3341_v6, %v9130_v45  ;;  %v3446_v46 = vmul.f32 %v3341_v6, %v9102_v15  ;;  %v3443_v52 = vadd.f32 %v3441_v24, %v3433_v59 }
 0x3af   :  { %7473 = vmatpush3.msra.mxu1 %v10523_v35  ;;  %v3442_v35 = vmul.f32 %v3333_v58, %v9071_v60 }
 0x3b0   :  { %7475 = vmatmul.mubr.msk.f32.vlgmr.msra.gmra.mxu1 %vm11547_vm12, %v11411_v9  ;;  %7512 = vmatprep.subr.mxu1 %v10896_v0  ;;  %v3342_v19 = vsub.f32 %v3340_v36, %v9130_v45  ;;  %vm3345_vm8 = vcmp.gt.f32.partialorder %v3343_v34, 0.0  ;;  %v3445_v39 = vmul.f32 %v3340_v36, %v9102_v15 }
 0x3b1   :  { %7513 = vmatpush3.msra.mxu1 %v10896_v0  ;;  %7544 = vmatprep.mubr.msk.f32.mxu1 %vm4855_vm0, %v11411_v9  ;;  %v5209_v29 = vsel %vm3345_vm8, 1.0, %v11404_v14  ;;  %v3444_v0 = vadd.f32 %v3442_v35, %v3438_v7 }
 0x3b2   :  { %7514 = vmatprep.subr.mxu1 %v10910_v63  ;;  %vm3344_vm4 = vcmp.gt.f32.partialorder %v3342_v19, 0.0  ;;  %v3450_v50 = vmul.f32 %v5209_v29, %v9130_v45 }
 0x3b3   :  { %7515 = vmatpush3.msra.mxu1 %v10910_v63  ;;  %v5208_v40 = vsel %vm3344_vm4, 1.0, %v11404_v14  ;;  %v3448_v32 = vadd.f32 %v3446_v46, %v3444_v0  ;;  %v3447_v63 = vadd.f32 %v3445_v39, %v3443_v52 }
 0x3b4   :  { %7516 = vmatprep.subr.mxu1 %v10920_v30  ;;  %v3449_v10 = vmul.f32 %v5208_v40, %v9130_v45 }
 0x3b5   :  { %7517 = vmatpush3.msra.mxu1 %v10920_v30  ;;  %v3452_v3 = vsub.f32 %v3448_v32, %v3450_v50 }
 0x3b6   :  { %7518 = vmatprep.subr.mxu1 %v10930_v43  ;;  %v3451_v38 = vsub.f32 %v3447_v63, %v3449_v10 }
 0x3b7   :  { %7519 = vmatpush3.msra.mxu1 %v10930_v43  ;;  %v3454_v22 = vsub.f32 %v3452_v3, %v9130_v45  ;;  %v3553_v43 = vmul.f32 %v3444_v0, %v9071_v60  ;;  %v7161_v18 = vpop.f32.mrf.mxu0 }
 0x3b8   :  { %7520 = vmatprep.subr.mxu1 %v10938_v51  ;;  %v3453_v16 = vsub.f32 %v3451_v38, %v9130_v45  ;;  %v3660_v8 = vadd.f32 %v10983_v42, %v7161_v18 }
 0x3b9   :  { %7521 = vmatpush3.msra.mxu1 %v10938_v51  ;;  %vm3456_vm15 = vcmp.gt.f32.partialorder %v3454_v22, 0.0  ;;  %v3654_v61 = vpop.f32.mrf.mxu0 }
 0x3ba   :  { %7522 = vmatprep.subr.mxu1 %v10946_v21  ;;  %vm3455_vm3 = vcmp.gt.f32.partialorder %v3453_v16, 0.0  ;;  %v5215_v12 = vsel %vm3456_vm15, 1.0, %v11404_v14  ;;  %v3655_v57 = vadd.f32 %v10983_v42, %v3654_v61 }
 0x3bb   :  { %7523 = vmatpush3.msra.mxu1 %v10946_v21  ;;  %v3557_v21 = vmul.f32 %v3452_v3, %v9102_v15  ;;  %v3561_v55 = vmul.f32 %v5215_v12, %v9130_v45 }
 0x3bc   :  { %7524 = vmatprep.subr.mxu1 %v10952_v28 }
 0x3bd   :  { %7525 = vmatpush3.msra.mxu1 %v10952_v28  ;;  %v3552_v28 = vmul.f32 %v3443_v52, %v9071_v60 }
 0x3be   :  { %7526 = vmatprep.subr.mxu1 %v10958_v44 }
 0x3bf   :  { %7527 = vmatpush3.msra.mxu1 %v10958_v44  ;;  %v7633_v44 = vld [vmem:[#allocation11 + $0x8] sm:$0xff] }
 0x3c0   :  { %7528 = vmatprep.subr.mxu1 %v10964_v62 }
 0x3c1   :  { %7529 = vmatpush3.msra.mxu1 %v10964_v62  ;;  %v4854_v62 = vsub.f32 %v7633_v44, %v8001_v20 }
 0x3c2   :  { %7530 = vmatprep.subr.mxu1 %v10971_v49 }
 0x3c3   :  { %7531 = vmatpush3.msra.mxu1 %v10971_v49  ;;  %v5214_v49 = vsel %vm3455_vm3, 1.0, %v11404_v14  ;;  %vm4856_vm2 = vcmp.gt.f32.partialorder %v4854_v62, 0.0 }
 0x3c4   :  { %7532 = vmatprep.subr.mxu1 %v10975_v41  ;;  %v3560_v11 = vmul.f32 %v5214_v49, %v9130_v45 }
 0x3c5   :  { %7533 = vmatpush3.msra.mxu1 %v10975_v41  ;;  %v7634_v41 = vld [vmem:[#allocation8 + $0x8] sm:$0xff] }
 0x3c6   :  { %7534 = vmatprep.subr.mxu1 %v10988_v25 }
 0x3c7   :  { %7535 = vmatpush3.msra.mxu1 %v10988_v25  ;;  %v7126_v30 = vpop.f32.mrf.mxu1  ;;  %v3556_v25 = vmul.f32 %v3451_v38, %v9102_v15 }
 0x3c8   :  { %7536 = vmatprep.subr.mxu1 %v7631_v27  ;;  %v3549_v13 = vadd.f32 %v10983_v42, %v7126_v30 }
 0x3c9   :  { %7537 = vmatpush3.msra.mxu1 %v7631_v27  ;;  %v3543_v51 = vpop.f32.mrf.mxu1 }
 0x3ca   :  { %7538 = vmatprep.subr.mxu1 %v7632_v53  ;;  %v3555_v2 = vadd.f32 %v3553_v43, %v3549_v13  ;;  %v3544_v4 = vadd.f32 %v10983_v42, %v3543_v51 }
 0x3cb   :  { %7539 = vmatpush3.msra.mxu1 %v7632_v53 }
 0x3cc   :  { %7540 = vmatprep.subr.mxu1 %v7634_v41  ;;  %v3559_v33 = vadd.f32 %v3557_v21, %v3555_v2  ;;  %v3554_v5 = vadd.f32 %v3552_v28, %v3544_v4  ;;  %v3664_v48 = vmul.f32 %v3555_v2, %v9071_v60 }
 0x3cd   :  { %7541 = vmatpush3.msra.mxu1 %v7634_v41 }
 0x3ce   :  { %7542 = vmatprep.subr.mxu1 %v7635_v26  ;;  %v3563_v58 = vsub.f32 %v3559_v33, %v3561_v55  ;;  %v3558_v56 = vadd.f32 %v3556_v25, %v3554_v5  ;;  %v3663_v37 = vmul.f32 %v3554_v5, %v9071_v60  ;;  %v3666_v34 = vadd.f32 %v3664_v48, %v3660_v8 }
 0x3cf   :  { %7543 = vmatpush3.msra.mxu1 %v7635_v26 }
 0x3d0   :  { %7545 = vmatmul.mubr.msk.f32.vlgmr.msra.gmra.mxu1 %vm4856_vm2, %v11411_v9  ;;  %v3562_v20 = vsub.f32 %v3558_v56, %v3560_v11  ;;  %v3565_v54 = vsub.f32 %v3563_v58, %v9130_v45  ;;  %v3668_v47 = vmul.f32 %v3563_v58, %v9102_v15  ;;  %v3665_v31 = vadd.f32 %v3663_v37, %v3655_v57 }
 0x3d1   :  { %v3775_v39 = vmul.f32 %v3666_v34, %v9071_v60 }
 0x3d2   :  { %v3564_v23 = vsub.f32 %v3562_v20, %v9130_v45  ;;  %vm3567_vm11 = vcmp.gt.f32.partialorder %v3565_v54, 0.0  ;;  %v3667_v36 = vmul.f32 %v3562_v20, %v9102_v15  ;;  %v3670_v19 = vadd.f32 %v3668_v47, %v3666_v34 }
 0x3d3   :  { %v5221_v6 = vsel %vm3567_vm11, 1.0, %v11404_v14  ;;  %v3774_v3 = vmul.f32 %v3665_v31, %v9071_v60 }
 0x3d4   :  { %vm3566_vm1 = vcmp.gt.f32.partialorder %v3564_v23, 0.0  ;;  %v3672_v17 = vmul.f32 %v5221_v6, %v9130_v45  ;;  %v3669_v29 = vadd.f32 %v3667_v36, %v3665_v31 }
 0x3d5   :  { %v5220_v9 = vsel %vm3566_vm1, 1.0, %v11404_v14 }
 0x3d6   :  { %v3671_v35 = vmul.f32 %v5220_v9, %v9130_v45  ;;  %v3674_v1 = vsub.f32 %v3670_v19, %v3672_v17 }
 0x3d8   :  { %v3673_v7 = vsub.f32 %v3669_v29, %v3671_v35  ;;  %v3676_v46 = vsub.f32 %v3674_v1, %v9130_v45  ;;  %v3779_v52 = vmul.f32 %v3674_v1, %v9102_v15 }
 0x3d9   :  { %v7231_v2 = vpop.f32.mrf.mxu0 }
 0x3da   :  { %v3675_v24 = vsub.f32 %v3673_v7, %v9130_v45  ;;  %vm3678_vm13 = vcmp.gt.f32.partialorder %v3676_v46, 0.0  ;;  %v3778_v30 = vmul.f32 %v3673_v7, %v9102_v15  ;;  %v3908_v49 = vadd.f32 %v10983_v42, %v7231_v2 }
 0x3db   :  { %v5227_v0 = vsel %vm3678_vm13, 1.0, %v11404_v14  ;;  %v3902_v62 = vpop.f32.mrf.mxu0 }
 0x3dc   :  { %vm3677_vm5 = vcmp.gt.f32.partialorder %v3675_v24, 0.0  ;;  %v3783_v22 = vmul.f32 %v5227_v0, %v9130_v45  ;;  %v3903_v55 = vadd.f32 %v10983_v42, %v3902_v62 }
 0x3dd   :  { %v5226_v63 = vsel %vm3677_vm5, 1.0, %v11404_v14 }
 0x3de   :  { %v3782_v43 = vmul.f32 %v5226_v63, %v9130_v45 }
 0x3e9   :  { %v7196_v40 = vpop.f32.mrf.mxu1 }
 0x3ea   :  { %v3771_v59 = vadd.f32 %v10983_v42, %v7196_v40 }
 0x3eb   :  { %v3765_v50 = vpop.f32.mrf.mxu1 }
 0x3ec   :  { %v3777_v32 = vadd.f32 %v3775_v39, %v3771_v59  ;;  %v3766_v10 = vadd.f32 %v10983_v42, %v3765_v50 }
 0x3ee   :  { %v3781_v38 = vadd.f32 %v3779_v52, %v3777_v32  ;;  %v3776_v16 = vadd.f32 %v3774_v3, %v3766_v10  ;;  %v3912_v44 = vmul.f32 %v3777_v32, %v9071_v60 }
 0x3f0   :  { %v3785_v27 = vsub.f32 %v3781_v38, %v3783_v22  ;;  %v3780_v13 = vadd.f32 %v3778_v30, %v3776_v16  ;;  %v3911_v33 = vmul.f32 %v3776_v16, %v9071_v60  ;;  %v3914_v25 = vadd.f32 %v3912_v44, %v3908_v49 }
 0x3f2   :  { %v3787_v12 = vsub.f32 %v3785_v27, %v9130_v45  ;;  %v3784_v51 = vsub.f32 %v3780_v13, %v3782_v43  ;;  %v3916_v41 = vmul.f32 %v3785_v27, %v9102_v15  ;;  %v3913_v56 = vadd.f32 %v3911_v33, %v3903_v55 }
 0x3f3   :  { %v4023_v8 = vmul.f32 %v3914_v25, %v9071_v60 }
 0x3f4   :  { %vm3789_vm10 = vcmp.gt.f32.partialorder %v3787_v12, 0.0  ;;  %v3786_v53 = vsub.f32 %v3784_v51, %v9130_v45  ;;  %v3915_v5 = vmul.f32 %v3784_v51, %v9102_v15  ;;  %v3918_v58 = vadd.f32 %v3916_v41, %v3914_v25 }
 0x3f5   :  { %v5233_v21 = vsel %vm3789_vm10, 1.0, %v11404_v14  ;;  %v4022_v34 = vmul.f32 %v3913_v56, %v9071_v60 }
 0x3f6   :  { %vm3788_vm6 = vcmp.gt.f32.partialorder %v3786_v53, 0.0  ;;  %v3920_v26 = vmul.f32 %v5233_v21, %v9130_v45  ;;  %v3917_v54 = vadd.f32 %v3915_v5, %v3913_v56 }
 0x3f7   :  { %v5232_v4 = vsel %vm3788_vm6, 1.0, %v11404_v14 }
 0x3f8   :  { %v5332_v28 = vpack.c.bf16 %v5233_v21, %v5232_v4  ;;  %v3919_v11 = vmul.f32 %v5232_v4, %v9130_v45  ;;  %v3922_v20 = vsub.f32 %v3918_v58, %v3920_v26 }
 0x3fa   :  { %5344 = vst [vmem:[#allocation10 + $0x28] sm:$0xff] %v5332_v28   ;;  %v3921_v23 = vsub.f32 %v3917_v54, %v3919_v11  ;;  %v3924_v18 = vsub.f32 %v3922_v20, %v9130_v45  ;;  %v4027_v57 = vmul.f32 %v3922_v20, %v9102_v15 }
 0x3fb   :  { %v7301_v39 = vpop.f32.mrf.mxu0 }
 0x3fc   :  { %v3923_v48 = vsub.f32 %v3921_v23, %v9130_v45  ;;  %vm3926_vm9 = vcmp.gt.f32.partialorder %v3924_v18, 0.0  ;;  %v4026_v1 = vmul.f32 %v3921_v23, %v9102_v15  ;;  %v4130_v52 = vadd.f32 %v10983_v42, %v7301_v39 }
 0x3fd   :  { %v5241_v47 = vsel %vm3926_vm9, 1.0, %v11404_v14  ;;  %v4124_v50 = vpop.f32.mrf.mxu0 }
 0x3fe   :  { %vm3925_vm7 = vcmp.gt.f32.partialorder %v3923_v48, 0.0  ;;  %v4031_v31 = vmul.f32 %v5241_v47, %v9130_v45  ;;  %v4125_v38 = vadd.f32 %v10983_v42, %v4124_v50 }
 0x3ff   :  { %v5240_v17 = vsel %vm3925_vm7, 1.0, %v11404_v14 }
 0x400   :  { %v4030_v46 = vmul.f32 %v5240_v17, %v9130_v45 }
 0x40b   :  { %v7266_v61 = vpop.f32.mrf.mxu1 }
 0x40c   :  { %v4019_v6 = vadd.f32 %v10983_v42, %v7266_v61 }
 0x40d   :  { %v4013_v37 = vpop.f32.mrf.mxu1 }
 0x40e   :  { %v4025_v9 = vadd.f32 %v4023_v8, %v4019_v6  ;;  %v4014_v36 = vadd.f32 %v10983_v42, %v4013_v37 }
 0x410   :  { %v4029_v19 = vadd.f32 %v4027_v57, %v4025_v9  ;;  %v4024_v35 = vadd.f32 %v4022_v34, %v4014_v36  ;;  %v4134_v0 = vmul.f32 %v4025_v9, %v9071_v60 }
 0x412   :  { %v4033_v29 = vsub.f32 %v4029_v19, %v4031_v31  ;;  %v4028_v7 = vadd.f32 %v4026_v1, %v4024_v35  ;;  %v4133_v3 = vmul.f32 %v4024_v35, %v9071_v60  ;;  %v4136_v16 = vadd.f32 %v4134_v0, %v4130_v52 }
 0x414   :  { %v4032_v24 = vsub.f32 %v4028_v7, %v4030_v46  ;;  %v4035_v40 = vsub.f32 %v4033_v29, %v9130_v45  ;;  %v4138_v10 = vmul.f32 %v4033_v29, %v9102_v15  ;;  %v4135_v13 = vadd.f32 %v4133_v3, %v4125_v38 }
 0x416   :  { %v4034_v59 = vsub.f32 %v4032_v24, %v9130_v45  ;;  %vm4037_vm14 = vcmp.gt.f32.partialorder %v4035_v40, 0.0  ;;  %v4137_v22 = vmul.f32 %v4032_v24, %v9102_v15  ;;  %v4140_v27 = vadd.f32 %v4138_v10, %v4136_v16 }
 0x417   :  { %v5247_v32 = vsel %vm4037_vm14, 1.0, %v11404_v14 }
 0x418   :  { %vm4036_vm12 = vcmp.gt.f32.partialorder %v4034_v59, 0.0  ;;  %v4142_v30 = vmul.f32 %v5247_v32, %v9130_v45 }
 0x419   :  { %v5246_v63 = vsel %vm4036_vm12, 1.0, %v11404_v14 }
 0x41a   :  { %v4141_v43 = vmul.f32 %v5246_v63, %v9130_v45 }
 0x41b   :  { %7719 = shalt.err (!%p7716_p10)
}
 0x41c   :  { %4995 = dma.vmem_to_hbm [thread:$0]  %s4990_s11, 256, %s11239_s7, [#allocation12], %s7801_s12, %s7801_s12, %s7802_s13   ;;  %v4144_v12 = vsub.f32 %v4140_v27, %v4142_v30  ;;  %v4139_v51 = vadd.f32 %v4137_v22, %v4135_v13  ;;  %v4245_v44 = vmul.f32 %v4136_v16, %v9071_v60  ;;  %v4244_v25 = vmul.f32 %v4135_v13, %v9071_v60 }
 0x41d   :  { %v7371_v41 = vpop.f32.mrf.mxu0  ;;  %s7813_s7 = smov [#allocation13]   ;;  %s7814_s18 = smov [#allocation14]  }
 0x41e   :  { %v4143_v53 = vsub.f32 %v4139_v51, %v4141_v43  ;;  %v4146_v2 = vsub.f32 %v4144_v12, %v9130_v45  ;;  %v4249_v55 = vmul.f32 %v4144_v12, %v9102_v15  ;;  %v4352_v6 = vadd.f32 %v10983_v42, %v7371_v41  ;;  %s5001_s17 = sshll.u32 %s7813_s7, 4  ;;  %s5013_s19 = sshll.u32 %s7814_s18, 4  ;;  %s5002_s17 = int_to_ptr.vmem [resolvable:$true] %s5001_s17  ;;  %s5014_s19 = int_to_ptr.vmem [resolvable:$true] %s5013_s19 }
 0x41f   :  { %v4346_v54 = vpop.f32.mrf.mxu0  ;;  %s7728_s20 = scalar_lea.vmem %s5002_s17, 256  ;;  %p7733_p12 = scmp.lt.s32.totalorder %s5002_s17, %s5002_s17 }
 0x420   :  { %v4145_v21 = vsub.f32 %v4143_v53, %v9130_v45  ;;  %vm4148_vm0 = vcmp.gt.f32.partialorder %v4146_v2, 0.0  ;;  %v4248_v20 = vmul.f32 %v4143_v53, %v9102_v15  ;;  %v4347_v57 = vadd.f32 %v10983_v42, %v4346_v54  ;;  %p7729_p11 = scmp.ne.s32.totalorder %s5002_s17, %s7728_s20  ;;  %p7734_p13 = scmp.lt.s32.totalorder %s7728_s20, %s7728_s20 }
 0x421   :  { %v5253_v62 = vsel %vm4148_vm0, 1.0, %v11404_v14 }
 0x422   :  { %vm4147_vm8 = vcmp.gt.f32.partialorder %v4145_v21, 0.0  ;;  %v4253_v56 = vmul.f32 %v5253_v62, %v9130_v45  ;;  %p7735_p0 = por %p7734_p13, %p7733_p12 }
 0x423   :  { %v5252_v26 = vsel %vm4147_vm8, 1.0, %v11404_v14 }
 0x424   :  { %v4252_v61 = vmul.f32 %v5252_v26, %v9130_v45  ;;  %p7736_p1 = pnand %p7735_p0, %p7729_p11 }
 0x42d   :  { %v7336_v4 = vpop.f32.mrf.mxu1 }
 0x42e   :  { %v4241_v28 = vadd.f32 %v10983_v42, %v7336_v4 }
 0x42f   :  { %v4235_v49 = vpop.f32.mrf.mxu1 }
 0x430   :  { %v4247_v33 = vadd.f32 %v4245_v44, %v4241_v28  ;;  %v4236_v5 = vadd.f32 %v10983_v42, %v4235_v49 }
 0x432   :  { %v4251_v58 = vadd.f32 %v4249_v55, %v4247_v33  ;;  %v4246_v11 = vadd.f32 %v4244_v25, %v4236_v5  ;;  %v4356_v18 = vmul.f32 %v4247_v33, %v9071_v60 }
 0x434   :  { %v4255_v23 = vsub.f32 %v4251_v58, %v4253_v56  ;;  %v4250_v48 = vadd.f32 %v4248_v20, %v4246_v11  ;;  %v4355_v9 = vmul.f32 %v4246_v11, %v9071_v60  ;;  %v4358_v17 = vadd.f32 %v4356_v18, %v4352_v6 }
 0x436   :  { %v4257_v8 = vsub.f32 %v4255_v23, %v9130_v45  ;;  %v4360_v47 = vmul.f32 %v4255_v23, %v9102_v15  ;;  %v4254_v37 = vsub.f32 %v4250_v48, %v4252_v61  ;;  %v4357_v1 = vadd.f32 %v4355_v9, %v4347_v57 }
 0x437   :  { %v4493_v3 = vmul.f32 %v4358_v17, %v9071_v60 }
 0x438   :  { %vm4259_vm4 = vcmp.gt.f32.partialorder %v4257_v8, 0.0  ;;  %v4256_v36 = vsub.f32 %v4254_v37, %v9130_v45  ;;  %v4359_v34 = vmul.f32 %v4254_v37, %v9102_v15  ;;  %v4362_v31 = vadd.f32 %v4360_v47, %v4358_v17 }
 0x439   :  { %v5259_v19 = vsel %vm4259_vm4, 1.0, %v11404_v14  ;;  %v4492_v30 = vmul.f32 %v4357_v1, %v9071_v60 }
 0x43a   :  { %vm4258_vm15 = vcmp.gt.f32.partialorder %v4256_v36, 0.0  ;;  %v4364_v35 = vmul.f32 %v5259_v19, %v9130_v45  ;;  %v4361_v46 = vadd.f32 %v4359_v34, %v4357_v1 }
 0x43b   :  { %v5258_v29 = vsel %vm4258_vm15, 1.0, %v11404_v14 }
 0x43c   :  { %v4366_v7 = vsub.f32 %v4362_v31, %v4364_v35  ;;  %v4363_v24 = vmul.f32 %v5258_v29, %v9130_v45 }
 0x43e   :  { %v4368_v40 = vsub.f32 %v4366_v7, %v9130_v45  ;;  %v4365_v59 = vsub.f32 %v4361_v46, %v4363_v24  ;;  %v4497_v22 = vmul.f32 %v4366_v7, %v9102_v15 }
 0x43f   :  { %v7441_v44 = vpop.f32.mrf.mxu0 }
 0x440   :  { %vm4370_vm3 = vcmp.gt.f32.partialorder %v4368_v40, 0.0  ;;  %v4367_v39 = vsub.f32 %v4365_v59, %v9130_v45  ;;  %v4496_v12 = vmul.f32 %v4365_v59, %v9102_v15  ;;  %v4600_v33 = vadd.f32 %v10983_v42, %v7441_v44 }
 0x441   :  { %v5265_v0 = vsel %vm4370_vm3, 1.0, %v11404_v14  ;;  %v4594_v49 = vpop.f32.mrf.mxu0 }
 0x442   :  { %vm4369_vm2 = vcmp.gt.f32.partialorder %v4367_v39, 0.0  ;;  %v4501_v13 = vmul.f32 %v5265_v0, %v9130_v45  ;;  %v4595_v26 = vadd.f32 %v10983_v42, %v4594_v49 }
 0x443   :  { %v5264_v50 = vsel %vm4369_vm2, 1.0, %v11404_v14 }
 0x444   :  { %v5335_v32 = vpack.c.bf16 %v5265_v0, %v5264_v50  ;;  %v4500_v2 = vmul.f32 %v5264_v50, %v9130_v45 }
 0x446   :  { %5345 = vst [vmem:[#allocation10 + $0x30] sm:$0xff] %v5335_v32  }
 0x44f   :  { %v7406_v52 = vpop.f32.mrf.mxu1 }
 0x450   :  { %v4489_v10 = vadd.f32 %v10983_v42, %v7406_v52 }
 0x451   :  { %v4483_v63 = vpop.f32.mrf.mxu1 }
 0x452   :  { %v4495_v38 = vadd.f32 %v4493_v3, %v4489_v10  ;;  %v4484_v16 = vadd.f32 %v10983_v42, %v4483_v63 }
 0x454   :  { %v4499_v27 = vadd.f32 %v4497_v22, %v4495_v38  ;;  %v4494_v43 = vadd.f32 %v4492_v30, %v4484_v16  ;;  %v4604_v62 = vmul.f32 %v4495_v38, %v9071_v60 }
 0x456   :  { %v4503_v51 = vsub.f32 %v4499_v27, %v4501_v13  ;;  %v4498_v53 = vadd.f32 %v4496_v12, %v4494_v43  ;;  %v4603_v5 = vmul.f32 %v4494_v43, %v9071_v60  ;;  %v4606_v56 = vadd.f32 %v4604_v62, %v4600_v33 }
 0x458   :  { %v4502_v21 = vsub.f32 %v4498_v53, %v4500_v2  ;;  %v4505_v4 = vsub.f32 %v4503_v51, %v9130_v45  ;;  %v4608_v55 = vmul.f32 %v4503_v51, %v9102_v15  ;;  %v4605_v54 = vadd.f32 %v4603_v5, %v4595_v26 }
 0x459   :  { %v4715_v9 = vmul.f32 %v4606_v56, %v9071_v60 }
 0x45a   :  { %v4504_v28 = vsub.f32 %v4502_v21, %v9130_v45  ;;  %vm4507_vm11 = vcmp.gt.f32.partialorder %v4505_v4, 0.0  ;;  %v4607_v58 = vmul.f32 %v4502_v21, %v9102_v15  ;;  %v4610_v20 = vadd.f32 %v4608_v55, %v4606_v56 }
 0x45b   :  { %v5273_v41 = vsel %vm4507_vm11, 1.0, %v11404_v14  ;;  %v4714_v31 = vmul.f32 %v4605_v54, %v9071_v60 }
 0x45c   :  { %vm4506_vm1 = vcmp.gt.f32.partialorder %v4504_v28, 0.0  ;;  %v4612_v11 = vmul.f32 %v5273_v41, %v9130_v45  ;;  %v4609_v48 = vadd.f32 %v4607_v58, %v4605_v54 }
 0x45d   :  { %v5272_v25 = vsel %vm4506_vm1, 1.0, %v11404_v14 }
 0x45e   :  { %v4611_v23 = vmul.f32 %v5272_v25, %v9130_v45  ;;  %v4614_v18 = vsub.f32 %v4610_v20, %v4612_v11 }
 0x460   :  { %v4613_v61 = vsub.f32 %v4609_v48, %v4611_v23  ;;  %v4616_v6 = vsub.f32 %v4614_v18, %v9130_v45  ;;  %v4719_v17 = vmul.f32 %v4614_v18, %v9102_v15 }
 0x461   :  { %v7511_v32 = vpop.f32.mrf.mxu0 }
 0x462   :  { %v4615_v8 = vsub.f32 %v4613_v61, %v9130_v45  ;;  %vm4618_vm13 = vcmp.gt.f32.partialorder %v4616_v6, 0.0  ;;  %v4718_v46 = vmul.f32 %v4613_v61, %v9102_v15  ;;  %v4822_v63 = vadd.f32 %v10983_v42, %v7511_v32 }
 0x463   :  { %v5279_v57 = vsel %vm4618_vm13, 1.0, %v11404_v14  ;;  %v4816_v10 = vpop.f32.mrf.mxu0 }
 0x464   :  { %vm4617_vm5 = vcmp.gt.f32.partialorder %v4615_v8, 0.0  ;;  %v4723_v29 = vmul.f32 %v5279_v57, %v9130_v45  ;;  %v4817_v30 = vadd.f32 %v10983_v42, %v4816_v10 }
 0x465   :  { %v5278_v35 = vsel %vm4617_vm5, 1.0, %v11404_v14 }
 0x466   :  { %v4722_v59 = vmul.f32 %v5278_v35, %v9130_v45 }
 0x470   :  { %v7476_v47 = vpop.f32.mrf.mxu1 }
 0x471   :  { %v4711_v37 = vadd.f32 %v10983_v42, %v7476_v47 }
 0x472   :  { %v4705_v36 = vpop.f32.mrf.mxu1 }
 0x473   :  { %v4717_v34 = vadd.f32 %v4715_v9, %v4711_v37  ;;  %v4706_v19 = vadd.f32 %v10983_v42, %v4705_v36 }
 0x475   :  { %v4721_v1 = vadd.f32 %v4719_v17, %v4717_v34  ;;  %v4716_v7 = vadd.f32 %v4714_v31, %v4706_v19  ;;  %v4826_v52 = vmul.f32 %v4717_v34, %v9071_v60 }
 0x477   :  { %v4725_v24 = vsub.f32 %v4721_v1, %v4723_v29  ;;  %v4720_v40 = vadd.f32 %v4718_v46, %v4716_v7  ;;  %v4825_v22 = vmul.f32 %v4716_v7, %v9071_v60  ;;  %v4828_v13 = vadd.f32 %v4826_v52, %v4822_v63 }
 0x479   :  { %v4727_v39 = vsub.f32 %v4725_v24, %v9130_v45  ;;  %v4724_v0 = vsub.f32 %v4720_v40, %v4722_v59  ;;  %v4830_v38 = vmul.f32 %v4725_v24, %v9102_v15  ;;  %v4827_v51 = vadd.f32 %v4825_v22, %v4817_v30 }
 0x47a   :  { %v4937_v41 = vmul.f32 %v4828_v13, %v9071_v60 }
 0x47b   :  { %v4726_v50 = vsub.f32 %v4724_v0, %v9130_v45  ;;  %vm4729_vm10 = vcmp.gt.f32.partialorder %v4727_v39, 0.0  ;;  %v4829_v27 = vmul.f32 %v4724_v0, %v9102_v15  ;;  %v4832_v12 = vadd.f32 %v4830_v38, %v4828_v13 }
 0x47c   :  { %v5285_v3 = vsel %vm4729_vm10, 1.0, %v11404_v14  ;;  %v4936_v58 = vmul.f32 %v4827_v51, %v9071_v60 }
 0x47d   :  { %vm4728_vm6 = vcmp.gt.f32.partialorder %v4726_v50, 0.0  ;;  %v4834_v43 = vmul.f32 %v5285_v3, %v9130_v45  ;;  %v4831_v21 = vadd.f32 %v4829_v27, %v4827_v51 }
 0x47e   :  { %v5284_v16 = vsel %vm4728_vm6, 1.0, %v11404_v14 }
 0x47f   :  { %v4833_v53 = vmul.f32 %v5284_v16, %v9130_v45  ;;  %v4836_v2 = vsub.f32 %v4832_v12, %v4834_v43 }
 0x481   :  { %v4835_v4 = vsub.f32 %v4831_v21, %v4833_v53  ;;  %v4838_v28 = vsub.f32 %v4836_v2, %v9130_v45  ;;  %v4941_v25 = vmul.f32 %v4836_v2, %v9102_v15 }
 0x483   :  { %v4837_v44 = vsub.f32 %v4835_v4, %v9130_v45  ;;  %vm4840_vm9 = vcmp.gt.f32.partialorder %v4838_v28, 0.0  ;;  %v4940_v23 = vmul.f32 %v4835_v4, %v9102_v15 }
 0x484   :  { %v5291_v33 = vsel %vm4840_vm9, 1.0, %v11404_v14 }
 0x485   :  { %vm4839_vm7 = vcmp.gt.f32.partialorder %v4837_v44, 0.0  ;;  %v4945_v20 = vmul.f32 %v5291_v33, %v9130_v45 }
 0x486   :  { %v5290_v56 = vsel %vm4839_vm7, 1.0, %v11404_v14 }
 0x487   :  { %v4944_v61 = vmul.f32 %v5290_v56, %v9130_v45 }
 0x490   :  { %v7546_v62 = vpop.f32.mrf.mxu1 }
 0x491   :  { %v4933_v49 = vadd.f32 %v10983_v42, %v7546_v62 }
 0x492   :  { %v4927_v55 = vpop.f32.mrf.mxu1 }
 0x493   :  { %v4939_v5 = vadd.f32 %v4937_v41, %v4933_v49  ;;  %v4928_v26 = vadd.f32 %v10983_v42, %v4927_v55 }
 0x495   :  { %v4943_v11 = vadd.f32 %v4941_v25, %v4939_v5  ;;  %4969 = vst [vmem:[#allocation13 + $0x8] sm:$0xff] %v4939_v5  ;;  %v4938_v54 = vadd.f32 %v4936_v58, %v4928_v26 }
 0x497   :  { %v4947_v18 = vsub.f32 %v4943_v11, %v4945_v20  ;;  %v4942_v48 = vadd.f32 %v4940_v23, %v4938_v54  ;;  %4968 = vst [vmem:[#allocation13] sm:$0xff] %v4938_v54 }
 0x498   :  { %7739 = shalt.err (!%p7736_p1)
}
 0x499   :  { %5007 = dma.vmem_to_hbm [thread:$0]  %s5002_s17, 256, %s11240_s8, [#allocation12], %s7801_s12, %s7801_s12, %s7802_s13   ;;  %v4949_v60 = vsub.f32 %v4947_v18, %v9130_v45  ;;  %4971 = vst [vmem:[#allocation14 + $0x8] sm:$0xff] %v4947_v18  ;;  %v4946_v15 = vsub.f32 %v4942_v48, %v4944_v61 }
 0x49a   :  { %s7815_s23 = smov [#allocation10]   ;;  %s7748_s1 = scalar_lea.vmem %s5014_s19, 256 }
 0x49b   :  { %vm4951_vm14 = vcmp.gt.f32.partialorder %v4949_v60, 0.0  ;;  %v4948_v42 = vsub.f32 %v4946_v15, %v9130_v45  ;;  %4970 = vst [vmem:[#allocation14] sm:$0xff] %v4946_v15  ;;  %s4977_s24 = sshll.u32 %s7815_s23, 4  ;;  %p7749_p2 = scmp.ne.s32.totalorder %s5014_s19, %s7748_s1  ;;  %s4978_s24 = int_to_ptr.vmem [resolvable:$true] %s4977_s24 }
 0x49c   :  { %p7753_p3 = scmp.lt.s32.totalorder %s5014_s19, %s5014_s19  ;;  %p7754_p4 = scmp.lt.s32.totalorder %s7748_s1, %s7748_s1 }
 0x49e   :  { %p7755_p5 = por %p7754_p4, %p7753_p3 }
 0x4a0   :  { %p7756_p6 = pnand %p7755_p5, %p7749_p2 }
 0x4a2   :  { %7759 = shalt.err (!%p7756_p6)
}
 0x4a3   :  { %5019 = dma.vmem_to_hbm [thread:$0]  %s5014_s19, 256, %s11241_s9, [#allocation15], %s7801_s12, %s7801_s12, %s7802_s13   ;;  %vm4950_vm12 = vcmp.gt.f32.partialorder %v4948_v42, 0.0  ;;  %v5297_v45 = vsel %vm4951_vm14, 1.0, %v11404_v14 }
 0x4a4   :  { %v5296_v6 = vsel %vm4950_vm12, 1.0, %v11404_v14  ;;  %s7768_s26 = scalar_lea.vmem %s4978_s24, 1024  ;;  %p7773_p8 = scmp.lt.s32.totalorder %s4978_s24, %s4978_s24 }
 0x4a5   :  { %v5338_v8 = vpack.c.bf16 %v5297_v45, %v5296_v6  ;;  %p7769_p7 = scmp.ne.s32.totalorder %s4978_s24, %s7768_s26  ;;  %p7774_p9 = scmp.lt.s32.totalorder %s7768_s26, %s7768_s26 }
 0x4a7   :  { %5346 = vst [vmem:[#allocation10 + $0x38] sm:$0xff] %v5338_v8   ;;  %p7775_p10 = por %p7774_p9, %p7773_p8 }
 0x4a9   :  { %p7776_p11 = pnand %p7775_p10, %p7769_p7 }
 0x4ab   :  { %7779 = shalt.err (!%p7776_p11)
}
 0x4ac   :  { %s7816_s27 = smov 64   ;;  %s7817_s28 = smov 4  }
 0x4ad   :  { %4983 = dma.vmem_to_hbm [thread:$0]  %s4978_s24, 1024, %s11238_s6, [#allocation4], %s7816_s27, %s7816_s27, %s7817_s28  }
 0x4ae   :  { %7794 = dma.done.wait [#allocation4], 1024  }
 0x4af   :  { %7795 = vsyncadd [#allocation4], 4294966272 }
 0x4b0   :  { %7796 = dma.done.wait [#allocation12], 512  }
 0x4b1   :  { %7797 = vsyncadd [#allocation12], 4294966784 }
 0x4b2   :  { %7798 = dma.done.wait [#allocation15], 256  }
 0x4b3   :  { %7799 = vsyncadd [#allocation15], 4294967040 }
 0x4b4   :  { %5032 = vsyncpa [#allocation3], 1 }
 0x4b5   :  { %5033 = vsyncpa [#allocation7], 1 }
 0x4b6   :  { %5034 = vsyncpa [#allocation4], 1 }
 0x4b7   :  { %5035 = vsyncpa [#allocation12], 1 }
 0x4b8   :  { %5036 = vsyncpa [#allocation15], 1 }
 0x4b9   :  { %5037 = vsyncpa [#allocation5], 1 }

</bundles_post_ra>
